<compile_context>
chip_gen: v7x
topology: tpu7x:2x2x1
jax: 0.10.0
libtpu: 0.0.40
codegen_flags: <defaults>
</compile_context>

<pallas_src>
import functools

import jax
import jax.numpy as jnp
from jax.experimental import pallas as pl
from jax.experimental.pallas import tpu as pltpu


def _round_up(x, m):
    return (x + m - 1) // m * m


def _pick_tile(padded_dim, candidates):
    for c in candidates:
        if padded_dim % c == 0:
            return c
    return candidates[-1]


# Fits v7x's 64 MiB physical VMEM with double-buffering headroom; also fine on
# v5e / v6e (128 MiB).
_VMEM_LIMIT = 48 * 1024 * 1024


# --------------------------- tiled matmul kernel ---------------------------

def _make_matmul_kernel(activation):
    def kernel(a_ref, b_ref, bias_ref, o_ref, acc_ref):
        @pl.when(pl.program_id(2) == 0)
        def _():
            acc_ref[...] = jnp.zeros_like(acc_ref)

        acc_ref[...] += jnp.dot(a_ref[...], b_ref[...],
                                preferred_element_type=jnp.float32)

        @pl.when(pl.program_id(2) == pl.num_programs(2) - 1)
        def _():
            y = acc_ref[...] + bias_ref[...]
            if activation == "tanh":
                y = jnp.tanh(y)
            o_ref[...] = y

    return kernel


def _pallas_matmul_bias(a, b, bias, activation=None):
    """a: (M, K) f32, b: (K, N) f32, bias: (N,) f32 -> (M, N) f32.

    MXU inputs are cast to bf16 (full-rate on v5e/v6e/v7x); accumulation and
    epilogue stay f32. Tiled (M//tm, N//tn, K//tk) grid with a VMEM f32
    accumulator, pl.when init/finalize on the K axis and parallel M/N axes.
    """
    M, K = a.shape
    _, N = b.shape
    Mp, Kp, Np = _round_up(M, 128), _round_up(K, 128), _round_up(N, 128)
    tm = _pick_tile(Mp, (256, 128))
    tn = _pick_tile(Np, (256, 128))
    tk = _pick_tile(Kp, (512, 384, 256, 128))

    a_p = jnp.pad(a.astype(jnp.bfloat16), ((0, Mp - M), (0, Kp - K)))
    b_p = jnp.pad(b.astype(jnp.bfloat16), ((0, Kp - K), (0, Np - N)))
    bias_p = jnp.pad(bias.astype(jnp.float32), (0, Np - N)).reshape(1, Np)

    grid = (Mp // tm, Np // tn, Kp // tk)
    cost = pl.CostEstimate(
        flops=2 * Mp * Np * Kp,
        transcendentals=Mp * Np if activation == "tanh" else 0,
        bytes_accessed=Mp * Kp * 2 + Kp * Np * 2 + Np * 4 + Mp * Np * 4,
    )
    out = pl.pallas_call(
        _make_matmul_kernel(activation),
        out_shape=jax.ShapeDtypeStruct((Mp, Np), jnp.float32),
        grid_spec=pltpu.PrefetchScalarGridSpec(
            num_scalar_prefetch=0,
            grid=grid,
            in_specs=[
                pl.BlockSpec((tm, tk), lambda i, j, k: (i, k)),
                pl.BlockSpec((tk, tn), lambda i, j, k: (k, j)),
                pl.BlockSpec((1, tn), lambda i, j, k: (0, j)),
            ],
            out_specs=pl.BlockSpec((tm, tn), lambda i, j, k: (i, j)),
            scratch_shapes=[pltpu.VMEM((tm, tn), jnp.float32)],
        ),
        compiler_params=pltpu.CompilerParams(
            dimension_semantics=("parallel", "parallel", "arbitrary"),
            vmem_limit_bytes=_VMEM_LIMIT,
        ),
        cost_estimate=cost,
    )(a_p, b_p, bias_p)
    return out[:M, :N]


# ----------------- fused instance-norm / relu / residual -------------------

def _make_in_kernel(do_relu, has_residual, eps=1e-5):
    def kernel(*refs):
        if has_residual:
            x_ref, r_ref, o_ref = refs
        else:
            x_ref, o_ref = refs
            r_ref = None
        x = x_ref[...]                                   # (1, HW, C) f32
        mean = jnp.mean(x, axis=1, keepdims=True)
        centered = x - mean
        var = jnp.mean(centered * centered, axis=1, keepdims=True)  # two-pass
        y = centered * jax.lax.rsqrt(var + eps)
        if do_relu:
            y = jnp.maximum(y, 0.0)
        if has_residual:
            y = y + r_ref[...]
        o_ref[...] = y

    return kernel


def _pallas_instance_norm(x, do_relu, residual=None):
    """x: (N, H, W, C) f32 NHWC. InstanceNorm2d(affine=False) + optional ReLU
    + optional residual add, fused in a single pass, no padded copies."""
    N, H, W, C = x.shape
    HW = H * W
    inputs = [x.reshape(N, HW, C)]
    specs = [pl.BlockSpec((1, HW, C), lambda n: (n, 0, 0))]
    if residual is not None:
        inputs.append(residual.reshape(N, HW, C))
        specs.append(pl.BlockSpec((1, HW, C), lambda n: (n, 0, 0)))
    out = pl.pallas_call(
        _make_in_kernel(do_relu, residual is not None),
        out_shape=jax.ShapeDtypeStruct((N, HW, C), jnp.float32),
        grid=(N,),
        in_specs=specs,
        out_specs=pl.BlockSpec((1, HW, C), lambda n: (n, 0, 0)),
        compiler_params=pltpu.CompilerParams(
            dimension_semantics=("parallel",),
            vmem_limit_bytes=_VMEM_LIMIT,
        ),
    )(*inputs)
    return out.reshape(N, H, W, C)


# ------------------------------- conv glue ---------------------------------

def conv2d_nhwc(x, w, b, stride=1, padding=0, pad_mode="constant",
                activation=None):
    """PyTorch-semantics Conv2d on NHWC activations.

    x: (N, H, W, Cin), w: (Cout, Cin, K, K) [PyTorch layout], b: (Cout,).
    Returns (N, Ho, Wo, Cout). Bias (and optional tanh) fused in the matmul.
    """
    Cout, Cin, K, _ = w.shape
    if padding > 0:
        x = jnp.pad(
            x, ((0, 0), (padding, padding), (padding, padding), (0, 0)),
            mode=pad_mode,
        )
    N, Hp, Wp, C = x.shape
    Ho = (Hp - K) // stride + 1
    Wo = (Wp - K) // stride + 1
    cols = []
    for ky in range(K):
        for kx in range(K):
            cols.append(
                x[:, ky:ky + stride * Ho:stride, kx:kx + stride * Wo:stride, :]
            )
    patches = jnp.stack(cols, axis=3).reshape(N * Ho * Wo, K * K * C)
    w2 = w.transpose(2, 3, 1, 0).reshape(K * K * Cin, Cout)
    y = _pallas_matmul_bias(patches, w2, b, activation=activation)
    return y.reshape(N, Ho, Wo, Cout)


def conv_transpose2d_nhwc(x, w, b):
    """PyTorch ConvTranspose2d(K=3, stride=2, padding=1, output_padding=1),
    NHWC, phase-decomposed (sub-pixel): one matmul over 2x2 input taps produces
    all four output phases; no zero-dilated input through the MXU.

    x: (N, H, W, Cin), w: (Cin, Cout, 3, 3), b: (Cout,) -> (N, 2H, 2W, Cout).
    """
    N, H, W, Cin = x.shape
    Cout = w.shape[1]
    # zero pad bottom/right by one so the (+1) taps read zeros at the boundary
    xp = jnp.pad(x, ((0, 0), (0, 1), (0, 1), (0, 0)))
    taps = [xp[:, dy:dy + H, dx:dx + W, :] for dy in (0, 1) for dx in (0, 1)]
    patches = jnp.stack(taps, axis=3).reshape(N * H * W, 4 * Cin)

    # Map input taps (dy, dx) -> output phases (py, px) of the transposed conv:
    #   out[2m+py, 2p+px] = sum_taps x[m+dy, p+dx] * w[:, :, ky, kx]
    wb = jnp.zeros((2, 2, Cin, 2, 2, Cout), jnp.float32)
    wb = wb.at[0, 0, :, 0, 0, :].set(w[:, :, 1, 1])          # phase (even,even)
    wb = wb.at[0, 0, :, 0, 1, :].set(w[:, :, 1, 2])          # phase (even,odd)
    wb = wb.at[0, 1, :, 0, 1, :].set(w[:, :, 1, 0])
    wb = wb.at[0, 0, :, 1, 0, :].set(w[:, :, 2, 1])          # phase (odd,even)
    wb = wb.at[1, 0, :, 1, 0, :].set(w[:, :, 0, 1])
    wb = wb.at[0, 0, :, 1, 1, :].set(w[:, :, 2, 2])          # phase (odd,odd)
    wb = wb.at[0, 1, :, 1, 1, :].set(w[:, :, 2, 0])
    wb = wb.at[1, 0, :, 1, 1, :].set(w[:, :, 0, 2])
    wb = wb.at[1, 1, :, 1, 1, :].set(w[:, :, 0, 0])
    w2 = wb.reshape(4 * Cin, 4 * Cout)
    bias4 = jnp.tile(b, 4)                                   # (phase, co) order

    y = _pallas_matmul_bias(patches, w2, bias4)              # (N*H*W, 4*Cout)
    y = y.reshape(N, H, W, 2, 2, Cout)
    y = y.transpose(0, 1, 3, 2, 4, 5).reshape(N, 2 * H, 2 * W, Cout)
    return y


# ------------------------------ model setup --------------------------------

def init_params(key, in_channels, out_channels, res_blocks):
    params = {}
    scale = 0.05
    n_keys = 16 + 4 * res_blocks
    keys = iter(jax.random.split(key, n_keys))

    def w(shape):
        return jax.random.normal(next(keys), shape, jnp.float32) * scale

    def bvec(n):
        return jax.random.normal(next(keys), (n,), jnp.float32) * scale

    # initial reflection-pad(3) + conv7
    params["c_in_w"] = w((64, in_channels, 7, 7))
    params["c_in_b"] = bvec(64)
    # downsampling: 64 -> 128 -> 256
    cin = 64
    for i in range(2):
        cout = cin * 2
        params[f"down{i}_w"] = w((cout, cin, 3, 3))
        params[f"down{i}_b"] = bvec(cout)
        cin = cout
    # residual blocks at 256 channels
    for i in range(res_blocks):
        params[f"res{i}_w1"] = w((cin, cin, 3, 3))
        params[f"res{i}_b1"] = bvec(cin)
        params[f"res{i}_w2"] = w((cin, cin, 3, 3))
        params[f"res{i}_b2"] = bvec(cin)
    # upsampling: 256 -> 128 -> 64 (ConvTranspose weight layout: (Cin, Cout, K, K))
    for i in range(2):
        cout = cin // 2
        params[f"up{i}_w"] = w((cin, cout, 3, 3))
        params[f"up{i}_b"] = bvec(cout)
        cin = cout
    # output reflection-pad(3) + conv7 + tanh
    params["c_out_w"] = w((out_channels, 64, 7, 7))
    params["c_out_b"] = bvec(out_channels)
    return params


def generator_forward(params, x_nchw, res_blocks):
    # single layout change at the boundary: NCHW -> NHWC
    h = x_nchw.transpose(0, 2, 3, 1)
    # initial block: reflection-pad(3) + conv7 + IN + ReLU
    h = conv2d_nhwc(h, params["c_in_w"], params["c_in_b"],
                    stride=1, padding=3, pad_mode="reflect")
    h = _pallas_instance_norm(h, do_relu=True)
    # downsampling
    for i in range(2):
        h = conv2d_nhwc(h, params[f"down{i}_w"], params[f"down{i}_b"],
                        stride=2, padding=1, pad_mode="constant")
        h = _pallas_instance_norm(h, do_relu=True)
    # residual blocks (second IN fused with the residual add)
    for i in range(res_blocks):
        skip = h
        h = conv2d_nhwc(h, params[f"res{i}_w1"], params[f"res{i}_b1"],
                        stride=1, padding=1, pad_mode="reflect")
        h = _pallas_instance_norm(h, do_relu=True)
        h = conv2d_nhwc(h, params[f"res{i}_w2"], params[f"res{i}_b2"],
                        stride=1, padding=1, pad_mode="reflect")
        h = _pallas_instance_norm(h, do_relu=False, residual=skip)
    # upsampling
    for i in range(2):
        h = conv_transpose2d_nhwc(h, params[f"up{i}_w"], params[f"up{i}_b"])
        h = _pallas_instance_norm(h, do_relu=True)
    # output block: reflection-pad(3) + conv7 + tanh (tanh fused in matmul)
    h = conv2d_nhwc(h, params["c_out_w"], params["c_out_b"],
                    stride=1, padding=3, pad_mode="reflect", activation="tanh")
    return h.transpose(0, 3, 1, 2)  # back to NCHW


if __name__ == "__main__":
    # args: in_channels=3, out_channels=3, res_blocks=2
    in_channels, out_channels, res_blocks = 3, 3, 2
    batch, spatial = 2, 16

    key = jax.random.PRNGKey(0)
    k_params, k_x = jax.random.split(key)
    params = init_params(k_params, in_channels, out_channels, res_blocks)
    x = jax.random.normal(k_x, (batch, in_channels, spatial, spatial),
                          jnp.float32)

    fwd = jax.jit(generator_forward, static_argnums=2)
    y = fwd(params, x, res_blocks)
    y = jax.block_until_ready(y)

    assert y.shape == (batch, out_channels, spatial, spatial), y.shape
    assert bool(jnp.all(jnp.isfinite(y)))
    assert float(jnp.max(jnp.abs(y))) <= 1.0 + 1e-6  # tanh range
    print("KERNEL_OK")
</pallas_src>

<mosaic_0001>
module attributes {stable_mosaic.version = 11 : i64} {
  func.func @kernel(%arg0: i32, %arg1: memref<1x256x64xf32, #tpu.memory_space<vmem>>, %arg2: memref<1x256x64xf32, #tpu.memory_space<vmem>>) attributes {dimension_semantics = [#tpu.dimension_semantics<parallel>], iteration_bounds = array<i64: 2>, scalar_prefetch = 0 : i64, scratch_operands = 0 : i64, tpu.core_type = #tpu.core_type<tc>, window_params = [{transform_indices = @transform_0, window_bounds = array<i64: 1, 256, 64>}, {transform_indices = @transform_1, window_bounds = array<i64: 1, 256, 64>}]} {
    %c0 = arith.constant 0 : index
    %c0_0 = arith.constant 0 : index
    %c0_1 = arith.constant 0 : index
    %0 = vector.load %arg1[%c0, %c0_0, %c0_1] : memref<1x256x64xf32, #tpu.memory_space<vmem>>, vector<1x256x64xf32>
    %cst = arith.constant dense<0.000000e+00> : vector<1x64xf32>
    %1 = vector.multi_reduction <add>, %0, %cst [1] : vector<1x256x64xf32> to vector<1x64xf32>
    %2 = vector.shape_cast %1 : vector<1x64xf32> to vector<1x1x64xf32>
    %cst_2 = arith.constant 2.560000e+02 : f32
    %3 = vector.broadcast %cst_2 : f32 to vector<1x1x64xf32>
    %4 = arith.divf %2, %3 : vector<1x1x64xf32>
    %5 = vector.broadcast %4 : vector<1x1x64xf32> to vector<1x256x64xf32>
    %6 = arith.subf %0, %5 : vector<1x256x64xf32>
    %7 = arith.mulf %6, %6 : vector<1x256x64xf32>
    %cst_3 = arith.constant dense<0.000000e+00> : vector<1x64xf32>
    %8 = vector.multi_reduction <add>, %7, %cst_3 [1] : vector<1x256x64xf32> to vector<1x64xf32>
    %9 = vector.shape_cast %8 : vector<1x64xf32> to vector<1x1x64xf32>
    %cst_4 = arith.constant 2.560000e+02 : f32
    %10 = vector.broadcast %cst_4 : f32 to vector<1x1x64xf32>
    %11 = arith.divf %9, %10 : vector<1x1x64xf32>
    %cst_5 = arith.constant 9.99999974E-6 : f32
    %12 = vector.broadcast %cst_5 : f32 to vector<1x1x64xf32>
    %13 = arith.addf %11, %12 : vector<1x1x64xf32>
    %14 = math.rsqrt %13 : vector<1x1x64xf32>
    %15 = vector.broadcast %14 : vector<1x1x64xf32> to vector<1x256x64xf32>
    %16 = arith.mulf %6, %15 : vector<1x256x64xf32>
    %cst_6 = arith.constant 0.000000e+00 : f32
    %17 = vector.broadcast %cst_6 : f32 to vector<1x256x64xf32>
    %18 = arith.maximumf %16, %17 : vector<1x256x64xf32>
    %c0_7 = arith.constant 0 : index
    %c0_8 = arith.constant 0 : index
    %c0_9 = arith.constant 0 : index
    %19 = vector.load %arg2[%c0_7, %c0_8, %c0_9] : memref<1x256x64xf32, #tpu.memory_space<vmem>>, vector<1x256x64xf32>
    tpu.vector_store %arg2[%c0_7, %c0_8, %c0_9], %18 {strides = array<i32>} : memref<1x256x64xf32, #tpu.memory_space<vmem>>, vector<1x256x64xf32>,
    return
  }
  func.func @transform_0(%arg0: i32) -> (i32, i32, i32) {
    %c0_i32 = arith.constant 0 : i32
    %c0_i32_0 = arith.constant 0 : i32
    %c0_i32_1 = arith.constant 0 : i32
    return %arg0, %c0_i32, %c0_i32_0 : i32, i32, i32
  }
  func.func @transform_1(%arg0: i32) -> (i32, i32, i32) {
    %c0_i32 = arith.constant 0 : i32
    %c0_i32_0 = arith.constant 0 : i32
    %c0_i32_1 = arith.constant 0 : i32
    return %arg0, %c0_i32, %c0_i32_0 : i32, i32, i32
  }
}

module attributes {stable_mosaic.version = 11 : i64} {
  func.func @kernel(%arg0: i32, %arg1: i32, %arg2: i32, %arg3: memref<256x256xbf16, #tpu.memory_space<vmem>>, %arg4: memref<256x128xbf16, #tpu.memory_space<vmem>>, %arg5: memref<1x128xf32, #tpu.memory_space<vmem>>, %arg6: memref<256x128xf32, #tpu.memory_space<vmem>>, %arg7: memref<256x128xf32, #tpu.memory_space<vmem>>) attributes {dimension_semantics = [#tpu.dimension_semantics<parallel>, #tpu.dimension_semantics<parallel>, #tpu.dimension_semantics<arbitrary>], iteration_bounds = array<i64: 2, 1, 1>, scalar_prefetch = 0 : i64, scratch_operands = 1 : i64, tpu.core_type = #tpu.core_type<tc>, window_params = [{transform_indices = @transform_0, window_bounds = array<i64: 256, 256>}, {transform_indices = @transform_1, window_bounds = array<i64: 256, 128>}, {transform_indices = @transform_2, window_bounds = array<i64: 1, 128>}, {transform_indices = @transform_3, window_bounds = array<i64: 256, 128>}]} {
    %c0_i32 = arith.constant 0 : i32
    %0 = arith.cmpi eq, %arg2, %c0_i32 : i32
    %1 = arith.extui %0 : i1 to i32
    %c0_i32_0 = arith.constant 0 : i32
    %2 = arith.cmpi ne, %1, %c0_i32_0 : i32
    scf.if %2 {
      %cst_10 = arith.constant 0.000000e+00 : f32
      %12 = vector.broadcast %cst_10 : f32 to vector<256x128xf32>
      %c0_11 = arith.constant 0 : index
      %c0_12 = arith.constant 0 : index
      %13 = vector.load %arg7[%c0_11, %c0_12] : memref<256x128xf32, #tpu.memory_space<vmem>>, vector<256x128xf32>
      tpu.vector_store %arg7[%c0_11, %c0_12], %12 {strides = array<i32>} : memref<256x128xf32, #tpu.memory_space<vmem>>, vector<256x128xf32>,
    } else {
    }
    %c0 = arith.constant 0 : index
    %c0_1 = arith.constant 0 : index
    %3 = vector.load %arg7[%c0, %c0_1] : memref<256x128xf32, #tpu.memory_space<vmem>>, vector<256x128xf32>
    %c0_2 = arith.constant 0 : index
    %c0_3 = arith.constant 0 : index
    %4 = vector.load %arg3[%c0_2, %c0_3] : memref<256x256xbf16, #tpu.memory_space<vmem>>, vector<256x256xbf16>
    %c0_4 = arith.constant 0 : index
    %c0_5 = arith.constant 0 : index
    %5 = vector.load %arg4[%c0_4, %c0_5] : memref<256x128xbf16, #tpu.memory_space<vmem>>, vector<256x128xbf16>
    %cst = arith.constant dense<0.000000e+00> : vector<256x128xf32>
    %6 = tpu.matmul %4, %5, %cst {dimension_numbers = #tpu.dot_dimension_numbers<[1], [0], [0], [1], [0, 0, 1, 1], [], []>} : vector<256x256xbf16>, vector<256x128xbf16>, vector<256x128xf32> -> vector<256x128xf32>
    %7 = arith.addf %3, %6 : vector<256x128xf32>
    %c0_6 = arith.constant 0 : index
    %c0_7 = arith.constant 0 : index
    %8 = vector.load %arg7[%c0_6, %c0_7] : memref<256x128xf32, #tpu.memory_space<vmem>>, vector<256x128xf32>
    tpu.vector_store %arg7[%c0_6, %c0_7], %7 {strides = array<i32>} : memref<256x128xf32, #tpu.memory_space<vmem>>, vector<256x128xf32>,
    %c0_i32_8 = arith.constant 0 : i32
    %9 = arith.cmpi eq, %arg2, %c0_i32_8 : i32
    %10 = arith.extui %9 : i1 to i32
    %c0_i32_9 = arith.constant 0 : i32
    %11 = arith.cmpi ne, %10, %c0_i32_9 : i32
    scf.if %11 {
      %c0_10 = arith.constant 0 : index
      %c0_11 = arith.constant 0 : index
      %12 = vector.load %arg7[%c0_10, %c0_11] : memref<256x128xf32, #tpu.memory_space<vmem>>, vector<256x128xf32>
      %c0_12 = arith.constant 0 : index
      %c0_13 = arith.constant 0 : index
      %13 = vector.load %arg5[%c0_12, %c0_13] : memref<1x128xf32, #tpu.memory_space<vmem>>, vector<1x128xf32>
      %14 = vector.broadcast %13 : vector<1x128xf32> to vector<256x128xf32>
      %15 = arith.addf %12, %14 : vector<256x128xf32>
      %c0_14 = arith.constant 0 : index
      %c0_15 = arith.constant 0 : index
      %16 = vector.load %arg6[%c0_14, %c0_15] : memref<256x128xf32, #tpu.memory_space<vmem>>, vector<256x128xf32>
      tpu.vector_store %arg6[%c0_14, %c0_15], %15 {strides = array<i32>} : memref<256x128xf32, #tpu.memory_space<vmem>>, vector<256x128xf32>,
    } else {
    }
    return
  }
  func.func @transform_0(%arg0: i32, %arg1: i32, %arg2: i32) -> (i32, i32) {
    %c0_i32 = arith.constant 0 : i32
    return %arg0, %arg2 : i32, i32
  }
  func.func @transform_1(%arg0: i32, %arg1: i32, %arg2: i32) -> (i32, i32) {
    %c0_i32 = arith.constant 0 : i32
    return %arg2, %arg1 : i32, i32
  }
  func.func @transform_2(%arg0: i32, %arg1: i32, %arg2: i32) -> (i32, i32) {
    %c0_i32 = arith.constant 0 : i32
    %c0_i32_0 = arith.constant 0 : i32
    return %c0_i32, %arg1 : i32, i32
  }
  func.func @transform_3(%arg0: i32, %arg1: i32, %arg2: i32) -> (i32, i32) {
    %c0_i32 = arith.constant 0 : i32
    return %arg0, %arg1 : i32, i32
  }
}

module attributes {stable_mosaic.version = 11 : i64} {
  func.func @kernel(%arg0: i32, %arg1: i32, %arg2: i32, %arg3: memref<128x128xbf16, #tpu.memory_space<vmem>>, %arg4: memref<128x128xbf16, #tpu.memory_space<vmem>>, %arg5: memref<1x128xf32, #tpu.memory_space<vmem>>, %arg6: memref<128x128xf32, #tpu.memory_space<vmem>>, %arg7: memref<128x128xf32, #tpu.memory_space<vmem>>) attributes {dimension_semantics = [#tpu.dimension_semantics<parallel>, #tpu.dimension_semantics<parallel>, #tpu.dimension_semantics<arbitrary>], iteration_bounds = array<i64: 1, 1, 5>, scalar_prefetch = 0 : i64, scratch_operands = 1 : i64, tpu.core_type = #tpu.core_type<tc>, window_params = [{transform_indices = @transform_0, window_bounds = array<i64: 128, 128>}, {transform_indices = @transform_1, window_bounds = array<i64: 128, 128>}, {transform_indices = @transform_2, window_bounds = array<i64: 1, 128>}, {transform_indices = @transform_3, window_bounds = array<i64: 128, 128>}]} {
    %c0_i32 = arith.constant 0 : i32
    %0 = arith.cmpi eq, %arg2, %c0_i32 : i32
    %1 = arith.extui %0 : i1 to i32
    %c0_i32_0 = arith.constant 0 : i32
    %2 = arith.cmpi ne, %1, %c0_i32_0 : i32
    scf.if %2 {
      %cst_9 = arith.constant 0.000000e+00 : f32
      %12 = vector.broadcast %cst_9 : f32 to vector<128x128xf32>
      %c0_10 = arith.constant 0 : index
      %c0_11 = arith.constant 0 : index
      %13 = vector.load %arg7[%c0_10, %c0_11] : memref<128x128xf32, #tpu.memory_space<vmem>>, vector<128x128xf32>
      tpu.vector_store %arg7[%c0_10, %c0_11], %12 {strides = array<i32>} : memref<128x128xf32, #tpu.memory_space<vmem>>, vector<128x128xf32>,
    } else {
    }
    %c0 = arith.constant 0 : index
    %c0_1 = arith.constant 0 : index
    %3 = vector.load %arg7[%c0, %c0_1] : memref<128x128xf32, #tpu.memory_space<vmem>>, vector<128x128xf32>
    %c0_2 = arith.constant 0 : index
    %c0_3 = arith.constant 0 : index
    %4 = vector.load %arg3[%c0_2, %c0_3] : memref<128x128xbf16, #tpu.memory_space<vmem>>, vector<128x128xbf16>
    %c0_4 = arith.constant 0 : index
    %c0_5 = arith.constant 0 : index
    %5 = vector.load %arg4[%c0_4, %c0_5] : memref<128x128xbf16, #tpu.memory_space<vmem>>, vector<128x128xbf16>
    %cst = arith.constant dense<0.000000e+00> : vector<128x128xf32>
    %6 = tpu.matmul %4, %5, %cst {dimension_numbers = #tpu.dot_dimension_numbers<[1], [0], [0], [1], [0, 0, 1, 1], [], []>} : vector<128x128xbf16>, vector<128x128xbf16>, vector<128x128xf32> -> vector<128x128xf32>
    %7 = arith.addf %3, %6 : vector<128x128xf32>
    %c0_6 = arith.constant 0 : index
    %c0_7 = arith.constant 0 : index
    %8 = vector.load %arg7[%c0_6, %c0_7] : memref<128x128xf32, #tpu.memory_space<vmem>>, vector<128x128xf32>
    tpu.vector_store %arg7[%c0_6, %c0_7], %7 {strides = array<i32>} : memref<128x128xf32, #tpu.memory_space<vmem>>, vector<128x128xf32>,
    %c4_i32 = arith.constant 4 : i32
    %9 = arith.cmpi eq, %arg2, %c4_i32 : i32
    %10 = arith.extui %9 : i1 to i32
    %c0_i32_8 = arith.constant 0 : i32
    %11 = arith.cmpi ne, %10, %c0_i32_8 : i32
    scf.if %11 {
      %c0_9 = arith.constant 0 : index
      %c0_10 = arith.constant 0 : index
      %12 = vector.load %arg7[%c0_9, %c0_10] : memref<128x128xf32, #tpu.memory_space<vmem>>, vector<128x128xf32>
      %c0_11 = arith.constant 0 : index
      %c0_12 = arith.constant 0 : index
      %13 = vector.load %arg5[%c0_11, %c0_12] : memref<1x128xf32, #tpu.memory_space<vmem>>, vector<1x128xf32>
      %14 = vector.broadcast %13 : vector<1x128xf32> to vector<128x128xf32>
      %15 = arith.addf %12, %14 : vector<128x128xf32>
      %c0_13 = arith.constant 0 : index
      %c0_14 = arith.constant 0 : index
      %16 = vector.load %arg6[%c0_13, %c0_14] : memref<128x128xf32, #tpu.memory_space<vmem>>, vector<128x128xf32>
      tpu.vector_store %arg6[%c0_13, %c0_14], %15 {strides = array<i32>} : memref<128x128xf32, #tpu.memory_space<vmem>>, vector<128x128xf32>,
    } else {
    }
    return
  }
  func.func @transform_0(%arg0: i32, %arg1: i32, %arg2: i32) -> (i32, i32) {
    %c0_i32 = arith.constant 0 : i32
    return %arg0, %arg2 : i32, i32
  }
  func.func @transform_1(%arg0: i32, %arg1: i32, %arg2: i32) -> (i32, i32) {
    %c0_i32 = arith.constant 0 : i32
    return %arg2, %arg1 : i32, i32
  }
  func.func @transform_2(%arg0: i32, %arg1: i32, %arg2: i32) -> (i32, i32) {
    %c0_i32 = arith.constant 0 : i32
    %c0_i32_0 = arith.constant 0 : i32
    return %c0_i32, %arg1 : i32, i32
  }
  func.func @transform_3(%arg0: i32, %arg1: i32, %arg2: i32) -> (i32, i32) {
    %c0_i32 = arith.constant 0 : i32
    return %arg0, %arg1 : i32, i32
  }
}

module attributes {stable_mosaic.version = 11 : i64} {
  func.func @kernel(%arg0: i32, %arg1: memref<1x64x128xf32, #tpu.memory_space<vmem>>, %arg2: memref<1x64x128xf32, #tpu.memory_space<vmem>>) attributes {dimension_semantics = [#tpu.dimension_semantics<parallel>], iteration_bounds = array<i64: 2>, scalar_prefetch = 0 : i64, scratch_operands = 0 : i64, tpu.core_type = #tpu.core_type<tc>, window_params = [{transform_indices = @transform_0, window_bounds = array<i64: 1, 64, 128>}, {transform_indices = @transform_1, window_bounds = array<i64: 1, 64, 128>}]} {
    %c0 = arith.constant 0 : index
    %c0_0 = arith.constant 0 : index
    %c0_1 = arith.constant 0 : index
    %0 = vector.load %arg1[%c0, %c0_0, %c0_1] : memref<1x64x128xf32, #tpu.memory_space<vmem>>, vector<1x64x128xf32>
    %cst = arith.constant dense<0.000000e+00> : vector<1x128xf32>
    %1 = vector.multi_reduction <add>, %0, %cst [1] : vector<1x64x128xf32> to vector<1x128xf32>
    %2 = vector.shape_cast %1 : vector<1x128xf32> to vector<1x1x128xf32>
    %cst_2 = arith.constant 6.400000e+01 : f32
    %3 = vector.broadcast %cst_2 : f32 to vector<1x1x128xf32>
    %4 = arith.divf %2, %3 : vector<1x1x128xf32>
    %5 = vector.broadcast %4 : vector<1x1x128xf32> to vector<1x64x128xf32>
    %6 = arith.subf %0, %5 : vector<1x64x128xf32>
    %7 = arith.mulf %6, %6 : vector<1x64x128xf32>
    %cst_3 = arith.constant dense<0.000000e+00> : vector<1x128xf32>
    %8 = vector.multi_reduction <add>, %7, %cst_3 [1] : vector<1x64x128xf32> to vector<1x128xf32>
    %9 = vector.shape_cast %8 : vector<1x128xf32> to vector<1x1x128xf32>
    %cst_4 = arith.constant 6.400000e+01 : f32
    %10 = vector.broadcast %cst_4 : f32 to vector<1x1x128xf32>
    %11 = arith.divf %9, %10 : vector<1x1x128xf32>
    %cst_5 = arith.constant 9.99999974E-6 : f32
    %12 = vector.broadcast %cst_5 : f32 to vector<1x1x128xf32>
    %13 = arith.addf %11, %12 : vector<1x1x128xf32>
    %14 = math.rsqrt %13 : vector<1x1x128xf32>
    %15 = vector.broadcast %14 : vector<1x1x128xf32> to vector<1x64x128xf32>
    %16 = arith.mulf %6, %15 : vector<1x64x128xf32>
    %cst_6 = arith.constant 0.000000e+00 : f32
    %17 = vector.broadcast %cst_6 : f32 to vector<1x64x128xf32>
    %18 = arith.maximumf %16, %17 : vector<1x64x128xf32>
    %c0_7 = arith.constant 0 : index
    %c0_8 = arith.constant 0 : index
    %c0_9 = arith.constant 0 : index
    %19 = vector.load %arg2[%c0_7, %c0_8, %c0_9] : memref<1x64x128xf32, #tpu.memory_space<vmem>>, vector<1x64x128xf32>
    tpu.vector_store %arg2[%c0_7, %c0_8, %c0_9], %18 {strides = array<i32>} : memref<1x64x128xf32, #tpu.memory_space<vmem>>, vector<1x64x128xf32>,
    return
  }
  func.func @transform_0(%arg0: i32) -> (i32, i32, i32) {
    %c0_i32 = arith.constant 0 : i32
    %c0_i32_0 = arith.constant 0 : i32
    %c0_i32_1 = arith.constant 0 : i32
    return %arg0, %c0_i32, %c0_i32_0 : i32, i32, i32
  }
  func.func @transform_1(%arg0: i32) -> (i32, i32, i32) {
    %c0_i32 = arith.constant 0 : i32
    %c0_i32_0 = arith.constant 0 : i32
    %c0_i32_1 = arith.constant 0 : i32
    return %arg0, %c0_i32, %c0_i32_0 : i32, i32, i32
  }
}

module attributes {stable_mosaic.version = 11 : i64} {
  func.func @kernel(%arg0: i32, %arg1: i32, %arg2: i32, %arg3: memref<128x384xbf16, #tpu.memory_space<vmem>>, %arg4: memref<384x256xbf16, #tpu.memory_space<vmem>>, %arg5: memref<1x256xf32, #tpu.memory_space<vmem>>, %arg6: memref<128x256xf32, #tpu.memory_space<vmem>>, %arg7: memref<128x256xf32, #tpu.memory_space<vmem>>) attributes {dimension_semantics = [#tpu.dimension_semantics<parallel>, #tpu.dimension_semantics<parallel>, #tpu.dimension_semantics<arbitrary>], iteration_bounds = array<i64: 1, 1, 3>, scalar_prefetch = 0 : i64, scratch_operands = 1 : i64, tpu.core_type = #tpu.core_type<tc>, window_params = [{transform_indices = @transform_0, window_bounds = array<i64: 128, 384>}, {transform_indices = @transform_1, window_bounds = array<i64: 384, 256>}, {transform_indices = @transform_2, window_bounds = array<i64: 1, 256>}, {transform_indices = @transform_3, window_bounds = array<i64: 128, 256>}]} {
    %c0_i32 = arith.constant 0 : i32
    %0 = arith.cmpi eq, %arg2, %c0_i32 : i32
    %1 = arith.extui %0 : i1 to i32
    %c0_i32_0 = arith.constant 0 : i32
    %2 = arith.cmpi ne, %1, %c0_i32_0 : i32
    scf.if %2 {
      %cst_9 = arith.constant 0.000000e+00 : f32
      %12 = vector.broadcast %cst_9 : f32 to vector<128x256xf32>
      %c0_10 = arith.constant 0 : index
      %c0_11 = arith.constant 0 : index
      %13 = vector.load %arg7[%c0_10, %c0_11] : memref<128x256xf32, #tpu.memory_space<vmem>>, vector<128x256xf32>
      tpu.vector_store %arg7[%c0_10, %c0_11], %12 {strides = array<i32>} : memref<128x256xf32, #tpu.memory_space<vmem>>, vector<128x256xf32>,
    } else {
    }
    %c0 = arith.constant 0 : index
    %c0_1 = arith.constant 0 : index
    %3 = vector.load %arg7[%c0, %c0_1] : memref<128x256xf32, #tpu.memory_space<vmem>>, vector<128x256xf32>
    %c0_2 = arith.constant 0 : index
    %c0_3 = arith.constant 0 : index
    %4 = vector.load %arg3[%c0_2, %c0_3] : memref<128x384xbf16, #tpu.memory_space<vmem>>, vector<128x384xbf16>
    %c0_4 = arith.constant 0 : index
    %c0_5 = arith.constant 0 : index
    %5 = vector.load %arg4[%c0_4, %c0_5] : memref<384x256xbf16, #tpu.memory_space<vmem>>, vector<384x256xbf16>
    %cst = arith.constant dense<0.000000e+00> : vector<128x256xf32>
    %6 = tpu.matmul %4, %5, %cst {dimension_numbers = #tpu.dot_dimension_numbers<[1], [0], [0], [1], [0, 0, 1, 1], [], []>} : vector<128x384xbf16>, vector<384x256xbf16>, vector<128x256xf32> -> vector<128x256xf32>
    %7 = arith.addf %3, %6 : vector<128x256xf32>
    %c0_6 = arith.constant 0 : index
    %c0_7 = arith.constant 0 : index
    %8 = vector.load %arg7[%c0_6, %c0_7] : memref<128x256xf32, #tpu.memory_space<vmem>>, vector<128x256xf32>
    tpu.vector_store %arg7[%c0_6, %c0_7], %7 {strides = array<i32>} : memref<128x256xf32, #tpu.memory_space<vmem>>, vector<128x256xf32>,
    %c2_i32 = arith.constant 2 : i32
    %9 = arith.cmpi eq, %arg2, %c2_i32 : i32
    %10 = arith.extui %9 : i1 to i32
    %c0_i32_8 = arith.constant 0 : i32
    %11 = arith.cmpi ne, %10, %c0_i32_8 : i32
    scf.if %11 {
      %c0_9 = arith.constant 0 : index
      %c0_10 = arith.constant 0 : index
      %12 = vector.load %arg7[%c0_9, %c0_10] : memref<128x256xf32, #tpu.memory_space<vmem>>, vector<128x256xf32>
      %c0_11 = arith.constant 0 : index
      %c0_12 = arith.constant 0 : index
      %13 = vector.load %arg5[%c0_11, %c0_12] : memref<1x256xf32, #tpu.memory_space<vmem>>, vector<1x256xf32>
      %14 = vector.broadcast %13 : vector<1x256xf32> to vector<128x256xf32>
      %15 = arith.addf %12, %14 : vector<128x256xf32>
      %c0_13 = arith.constant 0 : index
      %c0_14 = arith.constant 0 : index
      %16 = vector.load %arg6[%c0_13, %c0_14] : memref<128x256xf32, #tpu.memory_space<vmem>>, vector<128x256xf32>
      tpu.vector_store %arg6[%c0_13, %c0_14], %15 {strides = array<i32>} : memref<128x256xf32, #tpu.memory_space<vmem>>, vector<128x256xf32>,
    } else {
    }
    return
  }
  func.func @transform_0(%arg0: i32, %arg1: i32, %arg2: i32) -> (i32, i32) {
    %c0_i32 = arith.constant 0 : i32
    return %arg0, %arg2 : i32, i32
  }
  func.func @transform_1(%arg0: i32, %arg1: i32, %arg2: i32) -> (i32, i32) {
    %c0_i32 = arith.constant 0 : i32
    return %arg2, %arg1 : i32, i32
  }
  func.func @transform_2(%arg0: i32, %arg1: i32, %arg2: i32) -> (i32, i32) {
    %c0_i32 = arith.constant 0 : i32
    %c0_i32_0 = arith.constant 0 : i32
    return %c0_i32, %arg1 : i32, i32
  }
  func.func @transform_3(%arg0: i32, %arg1: i32, %arg2: i32) -> (i32, i32) {
    %c0_i32 = arith.constant 0 : i32
    return %arg0, %arg1 : i32, i32
  }
}

module attributes {stable_mosaic.version = 11 : i64} {
  func.func @kernel(%arg0: i32, %arg1: memref<1x16x256xf32, #tpu.memory_space<vmem>>, %arg2: memref<1x16x256xf32, #tpu.memory_space<vmem>>) attributes {dimension_semantics = [#tpu.dimension_semantics<parallel>], iteration_bounds = array<i64: 2>, scalar_prefetch = 0 : i64, scratch_operands = 0 : i64, tpu.core_type = #tpu.core_type<tc>, window_params = [{transform_indices = @transform_0, window_bounds = array<i64: 1, 16, 256>}, {transform_indices = @transform_1, window_bounds = array<i64: 1, 16, 256>}]} {
    %c0 = arith.constant 0 : index
    %c0_0 = arith.constant 0 : index
    %c0_1 = arith.constant 0 : index
    %0 = vector.load %arg1[%c0, %c0_0, %c0_1] : memref<1x16x256xf32, #tpu.memory_space<vmem>>, vector<1x16x256xf32>
    %cst = arith.constant dense<0.000000e+00> : vector<1x256xf32>
    %1 = vector.multi_reduction <add>, %0, %cst [1] : vector<1x16x256xf32> to vector<1x256xf32>
    %2 = vector.shape_cast %1 : vector<1x256xf32> to vector<1x1x256xf32>
    %cst_2 = arith.constant 1.600000e+01 : f32
    %3 = vector.broadcast %cst_2 : f32 to vector<1x1x256xf32>
    %4 = arith.divf %2, %3 : vector<1x1x256xf32>
    %5 = vector.broadcast %4 : vector<1x1x256xf32> to vector<1x16x256xf32>
    %6 = arith.subf %0, %5 : vector<1x16x256xf32>
    %7 = arith.mulf %6, %6 : vector<1x16x256xf32>
    %cst_3 = arith.constant dense<0.000000e+00> : vector<1x256xf32>
    %8 = vector.multi_reduction <add>, %7, %cst_3 [1] : vector<1x16x256xf32> to vector<1x256xf32>
    %9 = vector.shape_cast %8 : vector<1x256xf32> to vector<1x1x256xf32>
    %cst_4 = arith.constant 1.600000e+01 : f32
    %10 = vector.broadcast %cst_4 : f32 to vector<1x1x256xf32>
    %11 = arith.divf %9, %10 : vector<1x1x256xf32>
    %cst_5 = arith.constant 9.99999974E-6 : f32
    %12 = vector.broadcast %cst_5 : f32 to vector<1x1x256xf32>
    %13 = arith.addf %11, %12 : vector<1x1x256xf32>
    %14 = math.rsqrt %13 : vector<1x1x256xf32>
    %15 = vector.broadcast %14 : vector<1x1x256xf32> to vector<1x16x256xf32>
    %16 = arith.mulf %6, %15 : vector<1x16x256xf32>
    %cst_6 = arith.constant 0.000000e+00 : f32
    %17 = vector.broadcast %cst_6 : f32 to vector<1x16x256xf32>
    %18 = arith.maximumf %16, %17 : vector<1x16x256xf32>
    %c0_7 = arith.constant 0 : index
    %c0_8 = arith.constant 0 : index
    %c0_9 = arith.constant 0 : index
    %19 = vector.load %arg2[%c0_7, %c0_8, %c0_9] : memref<1x16x256xf32, #tpu.memory_space<vmem>>, vector<1x16x256xf32>
    tpu.vector_store %arg2[%c0_7, %c0_8, %c0_9], %18 {strides = array<i32>} : memref<1x16x256xf32, #tpu.memory_space<vmem>>, vector<1x16x256xf32>,
    return
  }
  func.func @transform_0(%arg0: i32) -> (i32, i32, i32) {
    %c0_i32 = arith.constant 0 : i32
    %c0_i32_0 = arith.constant 0 : i32
    %c0_i32_1 = arith.constant 0 : i32
    return %arg0, %c0_i32, %c0_i32_0 : i32, i32, i32
  }
  func.func @transform_1(%arg0: i32) -> (i32, i32, i32) {
    %c0_i32 = arith.constant 0 : i32
    %c0_i32_0 = arith.constant 0 : i32
    %c0_i32_1 = arith.constant 0 : i32
    return %arg0, %c0_i32, %c0_i32_0 : i32, i32, i32
  }
}

module attributes {stable_mosaic.version = 11 : i64} {
  func.func @kernel(%arg0: i32, %arg1: i32, %arg2: i32, %arg3: memref<128x384xbf16, #tpu.memory_space<vmem>>, %arg4: memref<384x256xbf16, #tpu.memory_space<vmem>>, %arg5: memref<1x256xf32, #tpu.memory_space<vmem>>, %arg6: memref<128x256xf32, #tpu.memory_space<vmem>>, %arg7: memref<128x256xf32, #tpu.memory_space<vmem>>) attributes {dimension_semantics = [#tpu.dimension_semantics<parallel>, #tpu.dimension_semantics<parallel>, #tpu.dimension_semantics<arbitrary>], iteration_bounds = array<i64: 1, 1, 6>, scalar_prefetch = 0 : i64, scratch_operands = 1 : i64, tpu.core_type = #tpu.core_type<tc>, window_params = [{transform_indices = @transform_0, window_bounds = array<i64: 128, 384>}, {transform_indices = @transform_1, window_bounds = array<i64: 384, 256>}, {transform_indices = @transform_2, window_bounds = array<i64: 1, 256>}, {transform_indices = @transform_3, window_bounds = array<i64: 128, 256>}]} {
    %c0_i32 = arith.constant 0 : i32
    %0 = arith.cmpi eq, %arg2, %c0_i32 : i32
    %1 = arith.extui %0 : i1 to i32
    %c0_i32_0 = arith.constant 0 : i32
    %2 = arith.cmpi ne, %1, %c0_i32_0 : i32
    scf.if %2 {
      %cst_9 = arith.constant 0.000000e+00 : f32
      %12 = vector.broadcast %cst_9 : f32 to vector<128x256xf32>
      %c0_10 = arith.constant 0 : index
      %c0_11 = arith.constant 0 : index
      %13 = vector.load %arg7[%c0_10, %c0_11] : memref<128x256xf32, #tpu.memory_space<vmem>>, vector<128x256xf32>
      tpu.vector_store %arg7[%c0_10, %c0_11], %12 {strides = array<i32>} : memref<128x256xf32, #tpu.memory_space<vmem>>, vector<128x256xf32>,
    } else {
    }
    %c0 = arith.constant 0 : index
    %c0_1 = arith.constant 0 : index
    %3 = vector.load %arg7[%c0, %c0_1] : memref<128x256xf32, #tpu.memory_space<vmem>>, vector<128x256xf32>
    %c0_2 = arith.constant 0 : index
    %c0_3 = arith.constant 0 : index
    %4 = vector.load %arg3[%c0_2, %c0_3] : memref<128x384xbf16, #tpu.memory_space<vmem>>, vector<128x384xbf16>
    %c0_4 = arith.constant 0 : index
    %c0_5 = arith.constant 0 : index
    %5 = vector.load %arg4[%c0_4, %c0_5] : memref<384x256xbf16, #tpu.memory_space<vmem>>, vector<384x256xbf16>
    %cst = arith.constant dense<0.000000e+00> : vector<128x256xf32>
    %6 = tpu.matmul %4, %5, %cst {dimension_numbers = #tpu.dot_dimension_numbers<[1], [0], [0], [1], [0, 0, 1, 1], [], []>} : vector<128x384xbf16>, vector<384x256xbf16>, vector<128x256xf32> -> vector<128x256xf32>
    %7 = arith.addf %3, %6 : vector<128x256xf32>
    %c0_6 = arith.constant 0 : index
    %c0_7 = arith.constant 0 : index
    %8 = vector.load %arg7[%c0_6, %c0_7] : memref<128x256xf32, #tpu.memory_space<vmem>>, vector<128x256xf32>
    tpu.vector_store %arg7[%c0_6, %c0_7], %7 {strides = array<i32>} : memref<128x256xf32, #tpu.memory_space<vmem>>, vector<128x256xf32>,
    %c5_i32 = arith.constant 5 : i32
    %9 = arith.cmpi eq, %arg2, %c5_i32 : i32
    %10 = arith.extui %9 : i1 to i32
    %c0_i32_8 = arith.constant 0 : i32
    %11 = arith.cmpi ne, %10, %c0_i32_8 : i32
    scf.if %11 {
      %c0_9 = arith.constant 0 : index
      %c0_10 = arith.constant 0 : index
      %12 = vector.load %arg7[%c0_9, %c0_10] : memref<128x256xf32, #tpu.memory_space<vmem>>, vector<128x256xf32>
      %c0_11 = arith.constant 0 : index
      %c0_12 = arith.constant 0 : index
      %13 = vector.load %arg5[%c0_11, %c0_12] : memref<1x256xf32, #tpu.memory_space<vmem>>, vector<1x256xf32>
      %14 = vector.broadcast %13 : vector<1x256xf32> to vector<128x256xf32>
      %15 = arith.addf %12, %14 : vector<128x256xf32>
      %c0_13 = arith.constant 0 : index
      %c0_14 = arith.constant 0 : index
      %16 = vector.load %arg6[%c0_13, %c0_14] : memref<128x256xf32, #tpu.memory_space<vmem>>, vector<128x256xf32>
      tpu.vector_store %arg6[%c0_13, %c0_14], %15 {strides = array<i32>} : memref<128x256xf32, #tpu.memory_space<vmem>>, vector<128x256xf32>,
    } else {
    }
    return
  }
  func.func @transform_0(%arg0: i32, %arg1: i32, %arg2: i32) -> (i32, i32) {
    %c0_i32 = arith.constant 0 : i32
    return %arg0, %arg2 : i32, i32
  }
  func.func @transform_1(%arg0: i32, %arg1: i32, %arg2: i32) -> (i32, i32) {
    %c0_i32 = arith.constant 0 : i32
    return %arg2, %arg1 : i32, i32
  }
  func.func @transform_2(%arg0: i32, %arg1: i32, %arg2: i32) -> (i32, i32) {
    %c0_i32 = arith.constant 0 : i32
    %c0_i32_0 = arith.constant 0 : i32
    return %c0_i32, %arg1 : i32, i32
  }
  func.func @transform_3(%arg0: i32, %arg1: i32, %arg2: i32) -> (i32, i32) {
    %c0_i32 = arith.constant 0 : i32
    return %arg0, %arg1 : i32, i32
  }
}

module attributes {stable_mosaic.version = 11 : i64} {
  func.func @kernel(%arg0: i32, %arg1: memref<1x16x256xf32, #tpu.memory_space<vmem>>, %arg2: memref<1x16x256xf32, #tpu.memory_space<vmem>>, %arg3: memref<1x16x256xf32, #tpu.memory_space<vmem>>) attributes {dimension_semantics = [#tpu.dimension_semantics<parallel>], iteration_bounds = array<i64: 2>, scalar_prefetch = 0 : i64, scratch_operands = 0 : i64, tpu.core_type = #tpu.core_type<tc>, window_params = [{transform_indices = @transform_0, window_bounds = array<i64: 1, 16, 256>}, {transform_indices = @transform_1, window_bounds = array<i64: 1, 16, 256>}, {transform_indices = @transform_2, window_bounds = array<i64: 1, 16, 256>}]} {
    %c0 = arith.constant 0 : index
    %c0_0 = arith.constant 0 : index
    %c0_1 = arith.constant 0 : index
    %0 = vector.load %arg1[%c0, %c0_0, %c0_1] : memref<1x16x256xf32, #tpu.memory_space<vmem>>, vector<1x16x256xf32>
    %cst = arith.constant dense<0.000000e+00> : vector<1x256xf32>
    %1 = vector.multi_reduction <add>, %0, %cst [1] : vector<1x16x256xf32> to vector<1x256xf32>
    %2 = vector.shape_cast %1 : vector<1x256xf32> to vector<1x1x256xf32>
    %cst_2 = arith.constant 1.600000e+01 : f32
    %3 = vector.broadcast %cst_2 : f32 to vector<1x1x256xf32>
    %4 = arith.divf %2, %3 : vector<1x1x256xf32>
    %5 = vector.broadcast %4 : vector<1x1x256xf32> to vector<1x16x256xf32>
    %6 = arith.subf %0, %5 : vector<1x16x256xf32>
    %7 = arith.mulf %6, %6 : vector<1x16x256xf32>
    %cst_3 = arith.constant dense<0.000000e+00> : vector<1x256xf32>
    %8 = vector.multi_reduction <add>, %7, %cst_3 [1] : vector<1x16x256xf32> to vector<1x256xf32>
    %9 = vector.shape_cast %8 : vector<1x256xf32> to vector<1x1x256xf32>
    %cst_4 = arith.constant 1.600000e+01 : f32
    %10 = vector.broadcast %cst_4 : f32 to vector<1x1x256xf32>
    %11 = arith.divf %9, %10 : vector<1x1x256xf32>
    %cst_5 = arith.constant 9.99999974E-6 : f32
    %12 = vector.broadcast %cst_5 : f32 to vector<1x1x256xf32>
    %13 = arith.addf %11, %12 : vector<1x1x256xf32>
    %14 = math.rsqrt %13 : vector<1x1x256xf32>
    %15 = vector.broadcast %14 : vector<1x1x256xf32> to vector<1x16x256xf32>
    %16 = arith.mulf %6, %15 : vector<1x16x256xf32>
    %c0_6 = arith.constant 0 : index
    %c0_7 = arith.constant 0 : index
    %c0_8 = arith.constant 0 : index
    %17 = vector.load %arg2[%c0_6, %c0_7, %c0_8] : memref<1x16x256xf32, #tpu.memory_space<vmem>>, vector<1x16x256xf32>
    %18 = arith.addf %16, %17 : vector<1x16x256xf32>
    %c0_9 = arith.constant 0 : index
    %c0_10 = arith.constant 0 : index
    %c0_11 = arith.constant 0 : index
    %19 = vector.load %arg3[%c0_9, %c0_10, %c0_11] : memref<1x16x256xf32, #tpu.memory_space<vmem>>, vector<1x16x256xf32>
    tpu.vector_store %arg3[%c0_9, %c0_10, %c0_11], %18 {strides = array<i32>} : memref<1x16x256xf32, #tpu.memory_space<vmem>>, vector<1x16x256xf32>,
    return
  }
  func.func @transform_0(%arg0: i32) -> (i32, i32, i32) {
    %c0_i32 = arith.constant 0 : i32
    %c0_i32_0 = arith.constant 0 : i32
    %c0_i32_1 = arith.constant 0 : i32
    return %arg0, %c0_i32, %c0_i32_0 : i32, i32, i32
  }
  func.func @transform_1(%arg0: i32) -> (i32, i32, i32) {
    %c0_i32 = arith.constant 0 : i32
    %c0_i32_0 = arith.constant 0 : i32
    %c0_i32_1 = arith.constant 0 : i32
    return %arg0, %c0_i32, %c0_i32_0 : i32, i32, i32
  }
  func.func @transform_2(%arg0: i32) -> (i32, i32, i32) {
    %c0_i32 = arith.constant 0 : i32
    %c0_i32_0 = arith.constant 0 : i32
    %c0_i32_1 = arith.constant 0 : i32
    return %arg0, %c0_i32, %c0_i32_0 : i32, i32, i32
  }
}

module attributes {stable_mosaic.version = 11 : i64} {
  func.func @kernel(%arg0: i32, %arg1: i32, %arg2: i32, %arg3: memref<128x512xbf16, #tpu.memory_space<vmem>>, %arg4: memref<512x256xbf16, #tpu.memory_space<vmem>>, %arg5: memref<1x256xf32, #tpu.memory_space<vmem>>, %arg6: memref<128x256xf32, #tpu.memory_space<vmem>>, %arg7: memref<128x256xf32, #tpu.memory_space<vmem>>) attributes {dimension_semantics = [#tpu.dimension_semantics<parallel>, #tpu.dimension_semantics<parallel>, #tpu.dimension_semantics<arbitrary>], iteration_bounds = array<i64: 1, 2, 2>, scalar_prefetch = 0 : i64, scratch_operands = 1 : i64, tpu.core_type = #tpu.core_type<tc>, window_params = [{transform_indices = @transform_0, window_bounds = array<i64: 128, 512>}, {transform_indices = @transform_1, window_bounds = array<i64: 512, 256>}, {transform_indices = @transform_2, window_bounds = array<i64: 1, 256>}, {transform_indices = @transform_3, window_bounds = array<i64: 128, 256>}]} {
    %c0_i32 = arith.constant 0 : i32
    %0 = arith.cmpi eq, %arg2, %c0_i32 : i32
    %1 = arith.extui %0 : i1 to i32
    %c0_i32_0 = arith.constant 0 : i32
    %2 = arith.cmpi ne, %1, %c0_i32_0 : i32
    scf.if %2 {
      %cst_9 = arith.constant 0.000000e+00 : f32
      %12 = vector.broadcast %cst_9 : f32 to vector<128x256xf32>
      %c0_10 = arith.constant 0 : index
      %c0_11 = arith.constant 0 : index
      %13 = vector.load %arg7[%c0_10, %c0_11] : memref<128x256xf32, #tpu.memory_space<vmem>>, vector<128x256xf32>
      tpu.vector_store %arg7[%c0_10, %c0_11], %12 {strides = array<i32>} : memref<128x256xf32, #tpu.memory_space<vmem>>, vector<128x256xf32>,
    } else {
    }
    %c0 = arith.constant 0 : index
    %c0_1 = arith.constant 0 : index
    %3 = vector.load %arg7[%c0, %c0_1] : memref<128x256xf32, #tpu.memory_space<vmem>>, vector<128x256xf32>
    %c0_2 = arith.constant 0 : index
    %c0_3 = arith.constant 0 : index
    %4 = vector.load %arg3[%c0_2, %c0_3] : memref<128x512xbf16, #tpu.memory_space<vmem>>, vector<128x512xbf16>
    %c0_4 = arith.constant 0 : index
    %c0_5 = arith.constant 0 : index
    %5 = vector.load %arg4[%c0_4, %c0_5] : memref<512x256xbf16, #tpu.memory_space<vmem>>, vector<512x256xbf16>
    %cst = arith.constant dense<0.000000e+00> : vector<128x256xf32>
    %6 = tpu.matmul %4, %5, %cst {dimension_numbers = #tpu.dot_dimension_numbers<[1], [0], [0], [1], [0, 0, 1, 1], [], []>} : vector<128x512xbf16>, vector<512x256xbf16>, vector<128x256xf32> -> vector<128x256xf32>
    %7 = arith.addf %3, %6 : vector<128x256xf32>
    %c0_6 = arith.constant 0 : index
    %c0_7 = arith.constant 0 : index
    %8 = vector.load %arg7[%c0_6, %c0_7] : memref<128x256xf32, #tpu.memory_space<vmem>>, vector<128x256xf32>
    tpu.vector_store %arg7[%c0_6, %c0_7], %7 {strides = array<i32>} : memref<128x256xf32, #tpu.memory_space<vmem>>, vector<128x256xf32>,
    %c1_i32 = arith.constant 1 : i32
    %9 = arith.cmpi eq, %arg2, %c1_i32 : i32
    %10 = arith.extui %9 : i1 to i32
    %c0_i32_8 = arith.constant 0 : i32
    %11 = arith.cmpi ne, %10, %c0_i32_8 : i32
    scf.if %11 {
      %c0_9 = arith.constant 0 : index
      %c0_10 = arith.constant 0 : index
      %12 = vector.load %arg7[%c0_9, %c0_10] : memref<128x256xf32, #tpu.memory_space<vmem>>, vector<128x256xf32>
      %c0_11 = arith.constant 0 : index
      %c0_12 = arith.constant 0 : index
      %13 = vector.load %arg5[%c0_11, %c0_12] : memref<1x256xf32, #tpu.memory_space<vmem>>, vector<1x256xf32>
      %14 = vector.broadcast %13 : vector<1x256xf32> to vector<128x256xf32>
      %15 = arith.addf %12, %14 : vector<128x256xf32>
      %c0_13 = arith.constant 0 : index
      %c0_14 = arith.constant 0 : index
      %16 = vector.load %arg6[%c0_13, %c0_14] : memref<128x256xf32, #tpu.memory_space<vmem>>, vector<128x256xf32>
      tpu.vector_store %arg6[%c0_13, %c0_14], %15 {strides = array<i32>} : memref<128x256xf32, #tpu.memory_space<vmem>>, vector<128x256xf32>,
    } else {
    }
    return
  }
  func.func @transform_0(%arg0: i32, %arg1: i32, %arg2: i32) -> (i32, i32) {
    %c0_i32 = arith.constant 0 : i32
    return %arg0, %arg2 : i32, i32
  }
  func.func @transform_1(%arg0: i32, %arg1: i32, %arg2: i32) -> (i32, i32) {
    %c0_i32 = arith.constant 0 : i32
    return %arg2, %arg1 : i32, i32
  }
  func.func @transform_2(%arg0: i32, %arg1: i32, %arg2: i32) -> (i32, i32) {
    %c0_i32 = arith.constant 0 : i32
    %c0_i32_0 = arith.constant 0 : i32
    return %c0_i32, %arg1 : i32, i32
  }
  func.func @transform_3(%arg0: i32, %arg1: i32, %arg2: i32) -> (i32, i32) {
    %c0_i32 = arith.constant 0 : i32
    return %arg0, %arg1 : i32, i32
  }
}

module attributes {stable_mosaic.version = 11 : i64} {
  func.func @kernel(%arg0: i32, %arg1: i32, %arg2: i32, %arg3: memref<128x512xbf16, #tpu.memory_space<vmem>>, %arg4: memref<512x256xbf16, #tpu.memory_space<vmem>>, %arg5: memref<1x256xf32, #tpu.memory_space<vmem>>, %arg6: memref<128x256xf32, #tpu.memory_space<vmem>>, %arg7: memref<128x256xf32, #tpu.memory_space<vmem>>) attributes {dimension_semantics = [#tpu.dimension_semantics<parallel>, #tpu.dimension_semantics<parallel>, #tpu.dimension_semantics<arbitrary>], iteration_bounds = array<i64: 1, 1, 1>, scalar_prefetch = 0 : i64, scratch_operands = 1 : i64, tpu.core_type = #tpu.core_type<tc>, window_params = [{transform_indices = @transform_0, window_bounds = array<i64: 128, 512>}, {transform_indices = @transform_1, window_bounds = array<i64: 512, 256>}, {transform_indices = @transform_2, window_bounds = array<i64: 1, 256>}, {transform_indices = @transform_3, window_bounds = array<i64: 128, 256>}]} {
    %c0_i32 = arith.constant 0 : i32
    %0 = arith.cmpi eq, %arg2, %c0_i32 : i32
    %1 = arith.extui %0 : i1 to i32
    %c0_i32_0 = arith.constant 0 : i32
    %2 = arith.cmpi ne, %1, %c0_i32_0 : i32
    scf.if %2 {
      %cst_10 = arith.constant 0.000000e+00 : f32
      %12 = vector.broadcast %cst_10 : f32 to vector<128x256xf32>
      %c0_11 = arith.constant 0 : index
      %c0_12 = arith.constant 0 : index
      %13 = vector.load %arg7[%c0_11, %c0_12] : memref<128x256xf32, #tpu.memory_space<vmem>>, vector<128x256xf32>
      tpu.vector_store %arg7[%c0_11, %c0_12], %12 {strides = array<i32>} : memref<128x256xf32, #tpu.memory_space<vmem>>, vector<128x256xf32>,
    } else {
    }
    %c0 = arith.constant 0 : index
    %c0_1 = arith.constant 0 : index
    %3 = vector.load %arg7[%c0, %c0_1] : memref<128x256xf32, #tpu.memory_space<vmem>>, vector<128x256xf32>
    %c0_2 = arith.constant 0 : index
    %c0_3 = arith.constant 0 : index
    %4 = vector.load %arg3[%c0_2, %c0_3] : memref<128x512xbf16, #tpu.memory_space<vmem>>, vector<128x512xbf16>
    %c0_4 = arith.constant 0 : index
    %c0_5 = arith.constant 0 : index
    %5 = vector.load %arg4[%c0_4, %c0_5] : memref<512x256xbf16, #tpu.memory_space<vmem>>, vector<512x256xbf16>
    %cst = arith.constant dense<0.000000e+00> : vector<128x256xf32>
    %6 = tpu.matmul %4, %5, %cst {dimension_numbers = #tpu.dot_dimension_numbers<[1], [0], [0], [1], [0, 0, 1, 1], [], []>} : vector<128x512xbf16>, vector<512x256xbf16>, vector<128x256xf32> -> vector<128x256xf32>
    %7 = arith.addf %3, %6 : vector<128x256xf32>
    %c0_6 = arith.constant 0 : index
    %c0_7 = arith.constant 0 : index
    %8 = vector.load %arg7[%c0_6, %c0_7] : memref<128x256xf32, #tpu.memory_space<vmem>>, vector<128x256xf32>
    tpu.vector_store %arg7[%c0_6, %c0_7], %7 {strides = array<i32>} : memref<128x256xf32, #tpu.memory_space<vmem>>, vector<128x256xf32>,
    %c0_i32_8 = arith.constant 0 : i32
    %9 = arith.cmpi eq, %arg2, %c0_i32_8 : i32
    %10 = arith.extui %9 : i1 to i32
    %c0_i32_9 = arith.constant 0 : i32
    %11 = arith.cmpi ne, %10, %c0_i32_9 : i32
    scf.if %11 {
      %c0_10 = arith.constant 0 : index
      %c0_11 = arith.constant 0 : index
      %12 = vector.load %arg7[%c0_10, %c0_11] : memref<128x256xf32, #tpu.memory_space<vmem>>, vector<128x256xf32>
      %c0_12 = arith.constant 0 : index
      %c0_13 = arith.constant 0 : index
      %13 = vector.load %arg5[%c0_12, %c0_13] : memref<1x256xf32, #tpu.memory_space<vmem>>, vector<1x256xf32>
      %14 = vector.broadcast %13 : vector<1x256xf32> to vector<128x256xf32>
      %15 = arith.addf %12, %14 : vector<128x256xf32>
      %c0_14 = arith.constant 0 : index
      %c0_15 = arith.constant 0 : index
      %16 = vector.load %arg6[%c0_14, %c0_15] : memref<128x256xf32, #tpu.memory_space<vmem>>, vector<128x256xf32>
      tpu.vector_store %arg6[%c0_14, %c0_15], %15 {strides = array<i32>} : memref<128x256xf32, #tpu.memory_space<vmem>>, vector<128x256xf32>,
    } else {
    }
    return
  }
  func.func @transform_0(%arg0: i32, %arg1: i32, %arg2: i32) -> (i32, i32) {
    %c0_i32 = arith.constant 0 : i32
    return %arg0, %arg2 : i32, i32
  }
  func.func @transform_1(%arg0: i32, %arg1: i32, %arg2: i32) -> (i32, i32) {
    %c0_i32 = arith.constant 0 : i32
    return %arg2, %arg1 : i32, i32
  }
  func.func @transform_2(%arg0: i32, %arg1: i32, %arg2: i32) -> (i32, i32) {
    %c0_i32 = arith.constant 0 : i32
    %c0_i32_0 = arith.constant 0 : i32
    return %c0_i32, %arg1 : i32, i32
  }
  func.func @transform_3(%arg0: i32, %arg1: i32, %arg2: i32) -> (i32, i32) {
    %c0_i32 = arith.constant 0 : i32
    return %arg0, %arg1 : i32, i32
  }
}

module attributes {stable_mosaic.version = 11 : i64} {
  func.func @kernel(%arg0: i32, %arg1: i32, %arg2: i32, %arg3: memref<256x128xbf16, #tpu.memory_space<vmem>>, %arg4: memref<128x128xbf16, #tpu.memory_space<vmem>>, %arg5: memref<1x128xf32, #tpu.memory_space<vmem>>, %arg6: memref<256x128xf32, #tpu.memory_space<vmem>>, %arg7: memref<256x128xf32, #tpu.memory_space<vmem>>) attributes {dimension_semantics = [#tpu.dimension_semantics<parallel>, #tpu.dimension_semantics<parallel>, #tpu.dimension_semantics<arbitrary>], iteration_bounds = array<i64: 2, 1, 25>, scalar_prefetch = 0 : i64, scratch_operands = 1 : i64, tpu.core_type = #tpu.core_type<tc>, window_params = [{transform_indices = @transform_0, window_bounds = array<i64: 256, 128>}, {transform_indices = @transform_1, window_bounds = array<i64: 128, 128>}, {transform_indices = @transform_2, window_bounds = array<i64: 1, 128>}, {transform_indices = @transform_3, window_bounds = array<i64: 256, 128>}]} {
    %c0_i32 = arith.constant 0 : i32
    %0 = arith.cmpi eq, %arg2, %c0_i32 : i32
    %1 = arith.extui %0 : i1 to i32
    %c0_i32_0 = arith.constant 0 : i32
    %2 = arith.cmpi ne, %1, %c0_i32_0 : i32
    scf.if %2 {
      %cst_9 = arith.constant 0.000000e+00 : f32
      %12 = vector.broadcast %cst_9 : f32 to vector<256x128xf32>
      %c0_10 = arith.constant 0 : index
      %c0_11 = arith.constant 0 : index
      %13 = vector.load %arg7[%c0_10, %c0_11] : memref<256x128xf32, #tpu.memory_space<vmem>>, vector<256x128xf32>
      tpu.vector_store %arg7[%c0_10, %c0_11], %12 {strides = array<i32>} : memref<256x128xf32, #tpu.memory_space<vmem>>, vector<256x128xf32>,
    } else {
    }
    %c0 = arith.constant 0 : index
    %c0_1 = arith.constant 0 : index
    %3 = vector.load %arg7[%c0, %c0_1] : memref<256x128xf32, #tpu.memory_space<vmem>>, vector<256x128xf32>
    %c0_2 = arith.constant 0 : index
    %c0_3 = arith.constant 0 : index
    %4 = vector.load %arg3[%c0_2, %c0_3] : memref<256x128xbf16, #tpu.memory_space<vmem>>, vector<256x128xbf16>
    %c0_4 = arith.constant 0 : index
    %c0_5 = arith.constant 0 : index
    %5 = vector.load %arg4[%c0_4, %c0_5] : memref<128x128xbf16, #tpu.memory_space<vmem>>, vector<128x128xbf16>
    %cst = arith.constant dense<0.000000e+00> : vector<256x128xf32>
    %6 = tpu.matmul %4, %5, %cst {dimension_numbers = #tpu.dot_dimension_numbers<[1], [0], [0], [1], [0, 0, 1, 1], [], []>} : vector<256x128xbf16>, vector<128x128xbf16>, vector<256x128xf32> -> vector<256x128xf32>
    %7 = arith.addf %3, %6 : vector<256x128xf32>
    %c0_6 = arith.constant 0 : index
    %c0_7 = arith.constant 0 : index
    %8 = vector.load %arg7[%c0_6, %c0_7] : memref<256x128xf32, #tpu.memory_space<vmem>>, vector<256x128xf32>
    tpu.vector_store %arg7[%c0_6, %c0_7], %7 {strides = array<i32>} : memref<256x128xf32, #tpu.memory_space<vmem>>, vector<256x128xf32>,
    %c24_i32 = arith.constant 24 : i32
    %9 = arith.cmpi eq, %arg2, %c24_i32 : i32
    %10 = arith.extui %9 : i1 to i32
    %c0_i32_8 = arith.constant 0 : i32
    %11 = arith.cmpi ne, %10, %c0_i32_8 : i32
    scf.if %11 {
      %c0_9 = arith.constant 0 : index
      %c0_10 = arith.constant 0 : index
      %12 = vector.load %arg7[%c0_9, %c0_10] : memref<256x128xf32, #tpu.memory_space<vmem>>, vector<256x128xf32>
      %c0_11 = arith.constant 0 : index
      %c0_12 = arith.constant 0 : index
      %13 = vector.load %arg5[%c0_11, %c0_12] : memref<1x128xf32, #tpu.memory_space<vmem>>, vector<1x128xf32>
      %14 = vector.broadcast %13 : vector<1x128xf32> to vector<256x128xf32>
      %15 = arith.addf %12, %14 : vector<256x128xf32>
      %16 = math.tanh %15 : vector<256x128xf32>
      %c0_13 = arith.constant 0 : index
      %c0_14 = arith.constant 0 : index
      %17 = vector.load %arg6[%c0_13, %c0_14] : memref<256x128xf32, #tpu.memory_space<vmem>>, vector<256x128xf32>
      tpu.vector_store %arg6[%c0_13, %c0_14], %16 {strides = array<i32>} : memref<256x128xf32, #tpu.memory_space<vmem>>, vector<256x128xf32>,
    } else {
    }
    return
  }
  func.func @transform_0(%arg0: i32, %arg1: i32, %arg2: i32) -> (i32, i32) {
    %c0_i32 = arith.constant 0 : i32
    return %arg0, %arg2 : i32, i32
  }
  func.func @transform_1(%arg0: i32, %arg1: i32, %arg2: i32) -> (i32, i32) {
    %c0_i32 = arith.constant 0 : i32
    return %arg2, %arg1 : i32, i32
  }
  func.func @transform_2(%arg0: i32, %arg1: i32, %arg2: i32) -> (i32, i32) {
    %c0_i32 = arith.constant 0 : i32
    %c0_i32_0 = arith.constant 0 : i32
    return %c0_i32, %arg1 : i32, i32
  }
  func.func @transform_3(%arg0: i32, %arg1: i32, %arg2: i32) -> (i32, i32) {
    %c0_i32 = arith.constant 0 : i32
    return %arg0, %arg1 : i32, i32
  }
}

</mosaic_0001>

<bundles_post_ra>
// kernel: generator_forward.20
= control target key start
LH: loop header
LB: loop body
LE: loop exit
PB: predicated region body
PF: predicated region fallthrough
CT: control target
= control target key end

     0   :  { %s549_s6 = smov 0   ;;  %s1093_s0 = inlined_call_operand.vmem [shape: f32[2,256,64], index: 0, kind: input, shape index: {}]   ;;  %s1094_s1 = inlined_call_operand.vmem [shape: f32[2,256,64], index: 1, kind: output, shape index: {}]  }
   0x1 LB: > { %s508_s7 = sadd.s32 4294967295, %s537_s6   ;;  %p512_p0 = scmp.ge.s32.totalorder %s537_s6, 1  ;;  %s537_s6 = sphi %s549_s6, %s11_s6  }
   0x2   : > { %p87_p1 = scmp.lt.s32.totalorder %s537_s6, 3 }
   0x4   : > { %p88_p2 = pnand %p512_p0, %p87_p1 }
   0x5   : > { %p107_p3 = scmp.lt.s32.totalorder (!%p88_p2), %s508_s7, 1  ;;  %vm149_vm0 = vcmask (!%p88_p2), 523264  }
   0x6   : > { %91 = sbr.rel (%p88_p2) target bundleno = 209 (0xd1), region = 24 }
   0xd   : > { %s1096_s7 = smov (!%p107_p3, %s508_s7), 1 }
   0xe   : > { %s519_s8 = sshll.u32 %s1096_s7, 8 }
   0xf   : > { %s565_s11 = scalar_lea.vmem %s1093_s0, %s519_s8  ;;  %s968_s14 = scalar_lea.vmem %s1094_s1, %s519_s8 }
  0x10   : > { %v568_v0 = vld [vmem:[%s565_s11] sm:$0xff]  ;;  %v571_v1 = vld [vmem:[%s565_s11 + $0x8] sm:$0xff]  ;;  %v574_v2 = vld [vmem:[%s565_s11 + $0x10] sm:$0xff] }
  0x11   : > { %v577_v3 = vld [vmem:[%s565_s11 + $0x18] sm:$0xff]  ;;  %v150_v4 = vsel %vm149_vm0, %v568_v0, 0.0  ;;  %v151_v5 = vsel %vm149_vm0, %v571_v1, 0.0  ;;  %v153_v6 = vsel %vm149_vm0, %v574_v2, 0.0  ;;  %v586_v7 = vld [vmem:[%s565_s11 + $0x20] sm:$0xff]  ;;  %v591_v10 = vld [vmem:[%s565_s11 + $0x28] sm:$0xff] }
  0x12   : > { %v152_v8 = vadd.f32 %v151_v5, %v150_v4  ;;  %v155_v9 = vsel %vm149_vm0, %v577_v3, 0.0  ;;  %v157_v12 = vsel %vm149_vm0, %v586_v7, 0.0  ;;  %v596_v13 = vld [vmem:[%s565_s11 + $0x30] sm:$0xff]  ;;  %v159_v15 = vsel %vm149_vm0, %v591_v10, 0.0  ;;  %v601_v16 = vld [vmem:[%s565_s11 + $0x38] sm:$0xff]  ;;  %v606_v19 = vld [vmem:[%s565_s11 + $0x40] sm:$0xff] }
  0x13   : > { %v161_v18 = vsel %vm149_vm0, %v596_v13, 0.0  ;;  %v163_v21 = vsel %vm149_vm0, %v601_v16, 0.0  ;;  %v611_v22 = vld [vmem:[%s565_s11 + $0x48] sm:$0xff]  ;;  %v165_v24 = vsel %vm149_vm0, %v606_v19, 0.0  ;;  %v616_v25 = vld [vmem:[%s565_s11 + $0x50] sm:$0xff]  ;;  %v621_v28 = vld [vmem:[%s565_s11 + $0x58] sm:$0xff] }
  0x14   : > { %v154_v11 = vadd.f32 %v153_v6, %v152_v8  ;;  %v167_v27 = vsel %vm149_vm0, %v611_v22, 0.0  ;;  %v169_v30 = vsel %vm149_vm0, %v616_v25, 0.0  ;;  %v626_v31 = vld [vmem:[%s565_s11 + $0x60] sm:$0xff]  ;;  %v171_v33 = vsel %vm149_vm0, %v621_v28, 0.0  ;;  %v631_v34 = vld [vmem:[%s565_s11 + $0x68] sm:$0xff]  ;;  %v636_v37 = vld [vmem:[%s565_s11 + $0x70] sm:$0xff] }
  0x15   : > { %v173_v36 = vsel %vm149_vm0, %v626_v31, 0.0  ;;  %v175_v39 = vsel %vm149_vm0, %v631_v34, 0.0  ;;  %v641_v40 = vld [vmem:[%s565_s11 + $0x78] sm:$0xff]  ;;  %v177_v42 = vsel %vm149_vm0, %v636_v37, 0.0  ;;  %v646_v43 = vld [vmem:[%s565_s11 + $0x80] sm:$0xff]  ;;  %v651_v46 = vld [vmem:[%s565_s11 + $0x88] sm:$0xff] }
  0x16   : > { %v156_v14 = vadd.f32 %v155_v9, %v154_v11  ;;  %v179_v45 = vsel %vm149_vm0, %v641_v40, 0.0  ;;  %v181_v48 = vsel %vm149_vm0, %v646_v43, 0.0  ;;  %v656_v49 = vld [vmem:[%s565_s11 + $0x90] sm:$0xff]  ;;  %v183_v51 = vsel %vm149_vm0, %v651_v46, 0.0  ;;  %v661_v52 = vld [vmem:[%s565_s11 + $0x98] sm:$0xff]  ;;  %v666_v55 = vld [vmem:[%s565_s11 + $0xa0] sm:$0xff] }
  0x17   : > { %v185_v54 = vsel %vm149_vm0, %v656_v49, 0.0  ;;  %v187_v57 = vsel %vm149_vm0, %v661_v52, 0.0  ;;  %v671_v58 = vld [vmem:[%s565_s11 + $0xa8] sm:$0xff]  ;;  %v189_v60 = vsel %vm149_vm0, %v666_v55, 0.0  ;;  %v676_v61 = vld [vmem:[%s565_s11 + $0xb0] sm:$0xff]  ;;  %v681_v4 = vld [vmem:[%s565_s11 + $0xb8] sm:$0xff] }
  0x18   : > { %v158_v17 = vadd.f32 %v157_v12, %v156_v14  ;;  %v191_v63 = vsel %vm149_vm0, %v671_v58, 0.0  ;;  %v193_v6 = vsel %vm149_vm0, %v676_v61, 0.0  ;;  %v686_v8 = vld [vmem:[%s565_s11 + $0xc0] sm:$0xff]  ;;  %v195_v11 = vsel %vm149_vm0, %v681_v4, 0.0  ;;  %v691_v12 = vld [vmem:[%s565_s11 + $0xc8] sm:$0xff] }
  0x1a   : > { %v160_v20 = vadd.f32 %v159_v15, %v158_v17  ;;  %v197_v15 = vsel %vm149_vm0, %v686_v8, 0.0  ;;  %v696_v17 = vld [vmem:[%s565_s11 + $0xd0] sm:$0xff] }
  0x1c   : > { %v162_v23 = vadd.f32 %v161_v18, %v160_v20  ;;  %v199_v20 = vsel %vm149_vm0, %v691_v12, 0.0 }
  0x1e   : > { %v164_v26 = vadd.f32 %v163_v21, %v162_v23  ;;  %v701_v21 = vld [vmem:[%s565_s11 + $0xd8] sm:$0xff] }
  0x20   : > { %v166_v29 = vadd.f32 %v165_v24, %v164_v26  ;;  %v201_v24 = vsel %vm149_vm0, %v696_v17, 0.0  ;;  %v706_v26 = vld [vmem:[%s565_s11 + $0xe0] sm:$0xff] }
  0x22   : > { %v168_v32 = vadd.f32 %v167_v27, %v166_v29  ;;  %v203_v29 = vsel %vm149_vm0, %v701_v21, 0.0 }
  0x24   : > { %v170_v35 = vadd.f32 %v169_v30, %v168_v32  ;;  %v711_v30 = vld [vmem:[%s565_s11 + $0xe8] sm:$0xff] }
  0x26   : > { %v172_v38 = vadd.f32 %v171_v33, %v170_v35  ;;  %v205_v33 = vsel %vm149_vm0, %v706_v26, 0.0  ;;  %v716_v35 = vld [vmem:[%s565_s11 + $0xf0] sm:$0xff] }
  0x28   : > { %v174_v41 = vadd.f32 %v173_v36, %v172_v38  ;;  %v207_v38 = vsel %vm149_vm0, %v711_v30, 0.0 }
  0x2a   : > { %v176_v44 = vadd.f32 %v175_v39, %v174_v41  ;;  %v721_v39 = vld [vmem:[%s565_s11 + $0xf8] sm:$0xff] }
  0x2c   : > { %v178_v47 = vadd.f32 %v177_v42, %v176_v44  ;;  %v209_v42 = vsel %vm149_vm0, %v716_v35, 0.0 }
  0x2e   : > { %v180_v50 = vadd.f32 %v179_v45, %v178_v47  ;;  %v211_v45 = vsel %vm149_vm0, %v721_v39, 0.0 }
  0x30   : > { %v182_v53 = vadd.f32 %v181_v48, %v180_v50 }
  0x32   : > { %v184_v56 = vadd.f32 %v183_v51, %v182_v53 }
  0x34   : > { %v186_v59 = vadd.f32 %v185_v54, %v184_v56 }
  0x36   : > { %v188_v62 = vadd.f32 %v187_v57, %v186_v59 }
  0x38   : > { %v190_v5 = vadd.f32 %v189_v60, %v188_v62 }
  0x3a   : > { %v192_v9 = vadd.f32 %v191_v63, %v190_v5 }
  0x3c   : > { %v194_v14 = vadd.f32 %v193_v6, %v192_v9 }
  0x3e   : > { %v196_v18 = vadd.f32 %v195_v11, %v194_v14 }
  0x40   : > { %v198_v23 = vadd.f32 %v197_v15, %v196_v18 }
  0x42   : > { %v200_v27 = vadd.f32 %v199_v20, %v198_v23 }
  0x44   : > { %v202_v32 = vadd.f32 %v201_v24, %v200_v27 }
  0x46   : > { %v204_v36 = vadd.f32 %v203_v29, %v202_v32 }
  0x48   : > { %v206_v41 = vadd.f32 %v205_v33, %v204_v36 }
  0x4a   : > { %v208_v44 = vadd.f32 %v207_v38, %v206_v41 }
  0x4c   : > { %v210_v47 = vadd.f32 %v209_v42, %v208_v44 }
  0x4e   : > { %v212_v48 = vadd.f32 %v211_v45, %v210_v47 }
  0x50   : > { %v213_v50 = vrot.slane %v212_v48, 4 }
  0x52   : > { %v214_v51 = vadd.f32 %v213_v50, %v212_v48 }
  0x54   : > { %v215_v53 = vrot.slane %v214_v51, 2 }
  0x56   : > { %v216_v54 = vadd.f32 %v215_v53, %v214_v51 }
  0x58   : > { %v217_v56 = vrot.slane %v216_v54, 1 }
  0x5a   : > { %v218_v57 = vadd.f32 %v217_v56, %v216_v54 }
  0x5c   : > { %v727_v59 = vmul.f32 0.00390625, %v218_v57 }
  0x5e   : > { %v731_v60 = vsub.f32 %v568_v0, %v727_v59  ;;  %v735_v62 = vsub.f32 %v571_v1, %v727_v59  ;;  %v739_v63 = vsub.f32 %v574_v2, %v727_v59  ;;  %v743_v5 = vsub.f32 %v577_v3, %v727_v59 }
  0x5f   : > { %v747_v6 = vsub.f32 %v586_v7, %v727_v59  ;;  %v757_v2 = vsub.f32 %v591_v10, %v727_v59  ;;  %v763_v7 = vsub.f32 %v596_v13, %v727_v59  ;;  %v772_v10 = vsub.f32 %v601_v16, %v727_v59 }
  0x60   : > { %v253_v0 = vmul.f32 %v731_v60, %v731_v60  ;;  %v254_v9 = vmul.f32 %v735_v62, %v735_v62  ;;  %v255_v1 = vmul.f32 %v739_v63, %v739_v63  ;;  %v256_v3 = vmul.f32 %v743_v5, %v743_v5 }
  0x61   : > { %v257_v11 = vmul.f32 %v747_v6, %v747_v6  ;;  %v258_v23 = vmul.f32 %v757_v2, %v757_v2  ;;  %v779_v27 = vsub.f32 %v606_v19, %v727_v59  ;;  %v259_v29 = vmul.f32 %v763_v7, %v763_v7 }
  0x62   : > { %v285_v14 = vsel %vm149_vm0, %v253_v0, 0.0  ;;  %v286_v15 = vsel %vm149_vm0, %v254_v9, 0.0  ;;  %v288_v18 = vsel %vm149_vm0, %v255_v1, 0.0  ;;  %v290_v13 = vsel %vm149_vm0, %v256_v3, 0.0 }
  0x63   : > { %v287_v20 = vadd.f32 %v286_v15, %v285_v14  ;;  %v292_v32 = vsel %vm149_vm0, %v257_v11, 0.0  ;;  %v786_v16 = vsub.f32 %v611_v22, %v727_v59  ;;  %v260_v36 = vmul.f32 %v772_v10, %v772_v10 }
  0x64   : > { %v294_v38 = vsel %vm149_vm0, %v258_v23, 0.0  ;;  %v793_v19 = vsub.f32 %v616_v25, %v727_v59  ;;  %v261_v42 = vmul.f32 %v779_v27, %v779_v27  ;;  %v296_v44 = vsel %vm149_vm0, %v259_v29, 0.0 }
  0x65   : > { %v289_v24 = vadd.f32 %v288_v18, %v287_v20  ;;  %v800_v22 = vsub.f32 %v621_v28, %v727_v59  ;;  %v262_v47 = vmul.f32 %v786_v16, %v786_v16  ;;  %v298_v48 = vsel %vm149_vm0, %v260_v36, 0.0 }
  0x66   : > { %v807_v25 = vsub.f32 %v626_v31, %v727_v59  ;;  %v263_v51 = vmul.f32 %v793_v19, %v793_v19  ;;  %v300_v53 = vsel %vm149_vm0, %v261_v42, 0.0  ;;  %v814_v28 = vsub.f32 %v631_v34, %v727_v59 }
  0x67   : > { %v291_v33 = vadd.f32 %v290_v13, %v289_v24  ;;  %v264_v56 = vmul.f32 %v800_v22, %v800_v22  ;;  %v302_v57 = vsel %vm149_vm0, %v262_v47, 0.0  ;;  %v821_v31 = vsub.f32 %v636_v37, %v727_v59 }
  0x68   : > { %v265_v9 = vmul.f32 %v807_v25, %v807_v25  ;;  %v304_v1 = vsel %vm149_vm0, %v263_v51, 0.0  ;;  %v828_v34 = vsub.f32 %v641_v40, %v727_v59  ;;  %v266_v11 = vmul.f32 %v814_v28, %v814_v28 }
  0x69   : > { %v293_v41 = vadd.f32 %v292_v32, %v291_v33  ;;  %v306_v14 = vsel %vm149_vm0, %v264_v56, 0.0  ;;  %v835_v37 = vsub.f32 %v646_v43, %v727_v59  ;;  %v267_v18 = vmul.f32 %v821_v31, %v821_v31 }
  0x6a   : > { %v308_v20 = vsel %vm149_vm0, %v265_v9, 0.0  ;;  %v842_v40 = vsub.f32 %v651_v46, %v727_v59  ;;  %v268_v13 = vmul.f32 %v828_v34, %v828_v34  ;;  %v310_v24 = vsel %vm149_vm0, %v266_v11, 0.0 }
  0x6b   : > { %v295_v45 = vadd.f32 %v294_v38, %v293_v41  ;;  %v849_v43 = vsub.f32 %v656_v49, %v727_v59  ;;  %v269_v32 = vmul.f32 %v835_v37, %v835_v37  ;;  %v312_v33 = vsel %vm149_vm0, %v267_v18, 0.0 }
  0x6c   : > { %v856_v46 = vsub.f32 %v661_v52, %v727_v59  ;;  %v270_v38 = vmul.f32 %v842_v40, %v842_v40  ;;  %v314_v41 = vsel %vm149_vm0, %v268_v13, 0.0  ;;  %v863_v49 = vsub.f32 %v666_v55, %v727_v59 }
  0x6d   : > { %v297_v50 = vadd.f32 %v296_v44, %v295_v45  ;;  %v271_v44 = vmul.f32 %v849_v43, %v849_v43  ;;  %v316_v45 = vsel %vm149_vm0, %v269_v32, 0.0  ;;  %v870_v52 = vsub.f32 %v671_v58, %v727_v59 }
  0x6e   : > { %v877_v55 = vsub.f32 %v676_v61, %v727_v59  ;;  %v884_v58 = vsub.f32 %v681_v4, %v727_v59  ;;  %v891_v61 = vsub.f32 %v686_v8, %v727_v59  ;;  %v898_v4 = vsub.f32 %v691_v12, %v727_v59 }
  0x6f   : > { %v299_v54 = vadd.f32 %v298_v48, %v297_v50  ;;  %v272_v48 = vmul.f32 %v856_v46, %v856_v46  ;;  %v318_v50 = vsel %vm149_vm0, %v270_v38, 0.0  ;;  %v905_v8 = vsub.f32 %v696_v17, %v727_v59 }
  0x70   : > { %v912_v12 = vsub.f32 %v701_v21, %v727_v59  ;;  %v919_v17 = vsub.f32 %v706_v26, %v727_v59  ;;  %v926_v21 = vsub.f32 %v711_v30, %v727_v59  ;;  %v933_v26 = vsub.f32 %v716_v35, %v727_v59 }
  0x71   : > { %v301_v0 = vadd.f32 %v300_v53, %v299_v54  ;;  %v273_v53 = vmul.f32 %v863_v49, %v863_v49  ;;  %v320_v54 = vsel %vm149_vm0, %v271_v44, 0.0  ;;  %v940_v30 = vsub.f32 %v721_v39, %v727_v59 }
  0x72   : > { %v283_v35 = vmul.f32 %v933_v26, %v933_v26 }
  0x73   : > { %v303_v3 = vadd.f32 %v302_v57, %v301_v0  ;;  %v274_v57 = vmul.f32 %v870_v52, %v870_v52  ;;  %v322_v0 = vsel %vm149_vm0, %v272_v48, 0.0 }
  0x74   : > { %v344_v39 = vsel %vm149_vm0, %v283_v35, 0.0 }
  0x75   : > { %v305_v15 = vadd.f32 %v304_v1, %v303_v3  ;;  %v275_v1 = vmul.f32 %v877_v55, %v877_v55  ;;  %v324_v3 = vsel %vm149_vm0, %v273_v53, 0.0 }
  0x77   : > { %v307_v23 = vadd.f32 %v306_v14, %v305_v15  ;;  %v276_v14 = vmul.f32 %v884_v58, %v884_v58  ;;  %v326_v15 = vsel %vm149_vm0, %v274_v57, 0.0  ;;  %v284_v57 = vmul.f32 %v940_v30, %v940_v30 }
  0x79   : > { %v309_v29 = vadd.f32 %v308_v20, %v307_v23  ;;  %v277_v20 = vmul.f32 %v891_v61, %v891_v61  ;;  %v328_v23 = vsel %vm149_vm0, %v275_v1, 0.0  ;;  %v346_v1 = vsel %vm149_vm0, %v284_v57, 0.0 }
  0x7b   : > { %v311_v36 = vadd.f32 %v310_v24, %v309_v29  ;;  %v278_v24 = vmul.f32 %v898_v4, %v898_v4  ;;  %v330_v29 = vsel %vm149_vm0, %v276_v14, 0.0 }
  0x7d   : > { %v313_v42 = vadd.f32 %v312_v33, %v311_v36  ;;  %v279_v33 = vmul.f32 %v905_v8, %v905_v8  ;;  %v332_v36 = vsel %vm149_vm0, %v277_v20, 0.0 }
  0x7f   : > { %v315_v47 = vadd.f32 %v314_v41, %v313_v42  ;;  %v280_v41 = vmul.f32 %v912_v12, %v912_v12  ;;  %v334_v42 = vsel %vm149_vm0, %v278_v24, 0.0 }
  0x81   : > { %v317_v51 = vadd.f32 %v316_v45, %v315_v47  ;;  %v281_v45 = vmul.f32 %v919_v17, %v919_v17  ;;  %v336_v47 = vsel %vm149_vm0, %v279_v33, 0.0 }
  0x83   : > { %v319_v56 = vadd.f32 %v318_v50, %v317_v51  ;;  %v282_v50 = vmul.f32 %v926_v21, %v926_v21  ;;  %v338_v51 = vsel %vm149_vm0, %v280_v41, 0.0 }
  0x85   : > { %v321_v9 = vadd.f32 %v320_v54, %v319_v56  ;;  %v340_v54 = vsel %vm149_vm0, %v281_v45, 0.0 }
  0x87   : > { %v323_v11 = vadd.f32 %v322_v0, %v321_v9  ;;  %v342_v0 = vsel %vm149_vm0, %v282_v50, 0.0 }
  0x89   : > { %v325_v18 = vadd.f32 %v324_v3, %v323_v11 }
  0x8b   : > { %v327_v13 = vadd.f32 %v326_v15, %v325_v18 }
  0x8d   : > { %v329_v32 = vadd.f32 %v328_v23, %v327_v13 }
  0x8f   : > { %v331_v38 = vadd.f32 %v330_v29, %v329_v32 }
  0x91   : > { %v333_v44 = vadd.f32 %v332_v36, %v331_v38 }
  0x93   : > { %v335_v48 = vadd.f32 %v334_v42, %v333_v44 }
  0x95   : > { %v337_v53 = vadd.f32 %v336_v47, %v335_v48 }
  0x97   : > { %v339_v56 = vadd.f32 %v338_v51, %v337_v53 }
  0x99   : > { %v341_v9 = vadd.f32 %v340_v54, %v339_v56 }
  0x9b   : > { %v343_v59 = vadd.f32 %v342_v0, %v341_v9 }
  0x9d   : > { %v345_v3 = vadd.f32 %v344_v39, %v343_v59 }
  0x9f   : > { %v347_v11 = vadd.f32 %v346_v1, %v345_v3 }
  0xa1   : > { %v348_v14 = vrot.slane %v347_v11, 4 }
  0xa3   : > { %v349_v15 = vadd.f32 %v348_v14, %v347_v11 }
  0xa5   : > { %v350_v18 = vrot.slane %v349_v15, 2 }
  0xa7   : > { %v351_v20 = vadd.f32 %v350_v18, %v349_v15 }
  0xa9   : > { %v352_v23 = vrot.slane %v351_v20, 1 }
  0xab   : > { %v353_v13 = vadd.f32 %v352_v23, %v351_v20 }
  0xad   : > { %v354_v24 = vmul.f32 0.00390625, %v353_v13 }
  0xaf   : > { %v355_v29 = vadd.f32 1e-05, %v354_v24 }
  0xb1   : > { %529 = vrsqrt.f32 %v355_v29 }
  0xbb   : > { %v953_v32 = vpop.eup %529 }
  0xbc   : > { %v357_v33 = vmul.f32 %v953_v32, %v731_v60  ;;  %v358_v36 = vmul.f32 %v953_v32, %v735_v62  ;;  %v359_v38 = vmul.f32 %v953_v32, %v739_v63  ;;  %v360_v41 = vmul.f32 %v953_v32, %v743_v5 }
  0xbd   : > { %v361_v60 = vmul.f32 %v953_v32, %v747_v6  ;;  %v362_v62 = vmul.f32 %v953_v32, %v757_v2  ;;  %v363_v63 = vmul.f32 %v953_v32, %v763_v7  ;;  %v364_v5 = vmul.f32 %v953_v32, %v772_v10 }
  0xbe   : > { %v389_v42 = vmax.f32 %v357_v33, 0.0  ;;  %v390_v44 = vmax.f32 %v358_v36, 0.0  ;;  %v391_v45 = vmax.f32 %v359_v38, 0.0  ;;  %v392_v47 = vmax.f32 %v360_v41, 0.0 }
  0xbf   : > { %v393_v48 = vmax.f32 %v361_v60, 0.0  ;;  %v394_v50 = vmax.f32 %v362_v62, 0.0  ;;  %v395_v6 = vmax.f32 %v363_v63, 0.0  ;;  %v396_v51 = vmax.f32 %v364_v5, 0.0 }
  0xc0   : > { %421 = vst.msk [vmem:[%s968_s14] sm:$0xff] %vm149_vm0, %v389_v42  ;;  %422 = vst.msk [vmem:[%s968_s14 + $0x8] sm:$0xff] %vm149_vm0, %v390_v44  ;;  %v365_v2 = vmul.f32 %v953_v32, %v779_v27  ;;  %v366_v7 = vmul.f32 %v953_v32, %v786_v16  ;;  %v367_v10 = vmul.f32 %v953_v32, %v793_v19 }
  0xc1   : > { %423 = vst.msk [vmem:[%s968_s14 + $0x10] sm:$0xff] %vm149_vm0, %v391_v45  ;;  %424 = vst.msk [vmem:[%s968_s14 + $0x18] sm:$0xff] %vm149_vm0, %v392_v47  ;;  %v368_v53 = vmul.f32 %v953_v32, %v800_v22  ;;  %v369_v27 = vmul.f32 %v953_v32, %v807_v25  ;;  %v370_v16 = vmul.f32 %v953_v32, %v814_v28 }
  0xc2   : > { %425 = vst.msk [vmem:[%s968_s14 + $0x20] sm:$0xff] %vm149_vm0, %v393_v48  ;;  %426 = vst.msk [vmem:[%s968_s14 + $0x28] sm:$0xff] %vm149_vm0, %v394_v50  ;;  %v371_v19 = vmul.f32 %v953_v32, %v821_v31  ;;  %v372_v22 = vmul.f32 %v953_v32, %v828_v34  ;;  %v397_v35 = vmax.f32 %v365_v2, 0.0  ;;  %v398_v54 = vmax.f32 %v366_v7, 0.0 }
  0xc3   : > { %427 = vst.msk [vmem:[%s968_s14 + $0x30] sm:$0xff] %vm149_vm0, %v395_v6  ;;  %428 = vst.msk [vmem:[%s968_s14 + $0x38] sm:$0xff] %vm149_vm0, %v396_v51  ;;  %v399_v56 = vmax.f32 %v367_v10, 0.0  ;;  %v400_v57 = vmax.f32 %v368_v53, 0.0  ;;  %v401_v0 = vmax.f32 %v369_v27, 0.0  ;;  %v402_v9 = vmax.f32 %v370_v16, 0.0 }
  0xc4   : > { %v403_v25 = vmax.f32 %v371_v19, 0.0  ;;  %v404_v39 = vmax.f32 %v372_v22, 0.0  ;;  %429 = vst.msk [vmem:[%s968_s14 + $0x40] sm:$0xff] %vm149_vm0, %v397_v35  ;;  %430 = vst.msk [vmem:[%s968_s14 + $0x48] sm:$0xff] %vm149_vm0, %v398_v54  ;;  %v373_v28 = vmul.f32 %v953_v32, %v835_v37  ;;  %v374_v31 = vmul.f32 %v953_v32, %v842_v40 }
  0xc5   : > { %431 = vst.msk [vmem:[%s968_s14 + $0x50] sm:$0xff] %vm149_vm0, %v399_v56  ;;  %432 = vst.msk [vmem:[%s968_s14 + $0x58] sm:$0xff] %vm149_vm0, %v400_v57  ;;  %v375_v34 = vmul.f32 %v953_v32, %v849_v43  ;;  %v376_v59 = vmul.f32 %v953_v32, %v856_v46  ;;  %v377_v37 = vmul.f32 %v953_v32, %v863_v49 }
  0xc6   : > { %433 = vst.msk [vmem:[%s968_s14 + $0x60] sm:$0xff] %vm149_vm0, %v401_v0  ;;  %434 = vst.msk [vmem:[%s968_s14 + $0x68] sm:$0xff] %vm149_vm0, %v402_v9  ;;  %v378_v40 = vmul.f32 %v953_v32, %v870_v52  ;;  %v379_v43 = vmul.f32 %v953_v32, %v877_v55  ;;  %v380_v46 = vmul.f32 %v953_v32, %v884_v58  ;;  %v405_v1 = vmax.f32 %v373_v28, 0.0 }
  0xc7   : > { %435 = vst.msk [vmem:[%s968_s14 + $0x70] sm:$0xff] %vm149_vm0, %v403_v25  ;;  %436 = vst.msk [vmem:[%s968_s14 + $0x78] sm:$0xff] %vm149_vm0, %v404_v39  ;;  %v406_v3 = vmax.f32 %v374_v31, 0.0  ;;  %v407_v11 = vmax.f32 %v375_v34, 0.0  ;;  %v408_v14 = vmax.f32 %v376_v59, 0.0  ;;  %v409_v15 = vmax.f32 %v377_v37, 0.0 }
  0xc8   : > { %v410_v18 = vmax.f32 %v378_v40, 0.0  ;;  %v411_v49 = vmax.f32 %v379_v43, 0.0  ;;  %v412_v20 = vmax.f32 %v380_v46, 0.0  ;;  %437 = vst.msk [vmem:[%s968_s14 + $0x80] sm:$0xff] %vm149_vm0, %v405_v1  ;;  %v381_v52 = vmul.f32 %v953_v32, %v891_v61 }
  0xc9   : > { %438 = vst.msk [vmem:[%s968_s14 + $0x88] sm:$0xff] %vm149_vm0, %v406_v3  ;;  %439 = vst.msk [vmem:[%s968_s14 + $0x90] sm:$0xff] %vm149_vm0, %v407_v11  ;;  %v382_v55 = vmul.f32 %v953_v32, %v898_v4  ;;  %v383_v58 = vmul.f32 %v953_v32, %v905_v8  ;;  %v384_v23 = vmul.f32 %v953_v32, %v912_v12 }
  0xca   : > { %440 = vst.msk [vmem:[%s968_s14 + $0x98] sm:$0xff] %vm149_vm0, %v408_v14  ;;  %441 = vst.msk [vmem:[%s968_s14 + $0xa0] sm:$0xff] %vm149_vm0, %v409_v15  ;;  %v385_v61 = vmul.f32 %v953_v32, %v919_v17  ;;  %v386_v4 = vmul.f32 %v953_v32, %v926_v21  ;;  %v387_v8 = vmul.f32 %v953_v32, %v933_v26  ;;  %v413_v13 = vmax.f32 %v381_v52, 0.0 }
  0xcb   : > { %442 = vst.msk [vmem:[%s968_s14 + $0xa8] sm:$0xff] %vm149_vm0, %v410_v18  ;;  %443 = vst.msk [vmem:[%s968_s14 + $0xb0] sm:$0xff] %vm149_vm0, %v411_v49  ;;  %v388_v12 = vmul.f32 %v953_v32, %v940_v30  ;;  %v414_v24 = vmax.f32 %v382_v55, 0.0  ;;  %v415_v29 = vmax.f32 %v383_v58, 0.0  ;;  %v416_v33 = vmax.f32 %v384_v23, 0.0 }
  0xcc   : > { %444 = vst.msk [vmem:[%s968_s14 + $0xb8] sm:$0xff] %vm149_vm0, %v412_v20  ;;  %v417_v36 = vmax.f32 %v385_v61, 0.0  ;;  %v418_v38 = vmax.f32 %v386_v4, 0.0  ;;  %v419_v17 = vmax.f32 %v387_v8, 0.0  ;;  %445 = vst.msk [vmem:[%s968_s14 + $0xc0] sm:$0xff] %vm149_vm0, %v413_v13 }
  0xcd   : > { %v420_v41 = vmax.f32 %v388_v12, 0.0  ;;  %446 = vst.msk [vmem:[%s968_s14 + $0xc8] sm:$0xff] %vm149_vm0, %v414_v24  ;;  %447 = vst.msk [vmem:[%s968_s14 + $0xd0] sm:$0xff] %vm149_vm0, %v415_v29 }
  0xce   : > { %448 = vst.msk [vmem:[%s968_s14 + $0xd8] sm:$0xff] %vm149_vm0, %v416_v33  ;;  %449 = vst.msk [vmem:[%s968_s14 + $0xe0] sm:$0xff] %vm149_vm0, %v417_v36 }
  0xcf   : > { %450 = vst.msk [vmem:[%s968_s14 + $0xe8] sm:$0xff] %vm149_vm0, %v418_v38  ;;  %451 = vst.msk [vmem:[%s968_s14 + $0xf0] sm:$0xff] %vm149_vm0, %v419_v17 }
  0xd0   : > { %452 = vst.msk [vmem:[%s968_s14 + $0xf8] sm:$0xff] %vm149_vm0, %v420_v41 }
  0xd1 PF: > { %s11_s6 = sadd.s32 1, %s537_s6  }
  0xd2   : > { %p8_p4 = scmp.ge.s32.totalorder %s11_s6, 4  }
  0xd4   :  { %10 = sbr.rel (!%p8_p4) target bundleno = 1 (0x1), region = 54 }

// kernel: generator_forward.19
= control target key start
LH: loop header
LB: loop body
LE: loop exit
PB: predicated region body
PF: predicated region fallthrough
CT: control target
= control target key end

     0   :  { %s1425_s12 = smov 0   ;;  %s1427_s13 = smov 0   ;;  %s1618_s0 = inlined_call_operand.vmem [shape: bf16[512,256], index: 0, kind: input, shape index: {}]   ;;  %s1619_s1 = inlined_call_operand.vmem [shape: bf16[256,128], index: 1, kind: input, shape index: {}]   ;;  %s1620_s2 = inlined_call_operand.vmem [shape: f32[1,128], index: 2, kind: input, shape index: {}]   ;;  %s1621_s3 = inlined_call_operand.vmem [shape: f32[512,128], index: 3, kind: output, shape index: {}]  }
   0x1   :  { %s1429_s14 = smov 0  }
   0x2 LB: > { %s32_s15 = sadd.s32 1, %s1399_s13  ;;  %p1107_p0 = scmp.ge.s32.totalorder %s1403_s14, 1  ;;  %s1403_s14 = sphi %s1429_s14, %s13_s14   ;;  %s1399_s13 = sphi %s1427_s13, %s1623_s13   ;;  %s1395_s12 = sphi %s1425_s12, %s1622_s12  }
   0x3   : > { %p34_p1 = scmp.ge.s32.totalorder %s32_s15, 2  ;;  %p191_p2 = scmp.lt.s32.totalorder %s1403_s14, 3 }
   0x5   : > { %s1625_s15 = smov (%p34_p1, %s32_s15), 0  ;;  %p192_p3 = pnand %p1107_p0, %p191_p2 }
   0x6   : > { %v1317_v0 = vld [vmem:[%s1619_s1 + $0x40] sm:$0xff] (!%p192_p3)   ;;  %s1108_s18 = sshll.u32 (!%p192_p3), %s1395_s12, 5  ;;  %v1319_v2 = vld [vmem:[%s1619_s1 + $0x48] sm:$0xff] (!%p192_p3)   ;;  %v1321_v4 = vld [vmem:[%s1619_s1 + $0x50] sm:$0xff] (!%p192_p3)  }
   0x7   : > { %195 = sbr.rel (%p192_p3) target bundleno = 315 (0x13b), region = 32  ;;  %v1318_v1 = vld [vmem:[%s1619_s1] sm:$0xff] (!%p192_p3)   ;;  %1165 = vmatprep.subr.bf16.mxu0 (!%p192_p3), %v1317_v0  ;;  %1277 = vmatprep.subr.bf16.mxu1 (!%p192_p3), %v1317_v0  ;;  %v1320_v3 = vld [vmem:[%s1619_s1 + $0x8] sm:$0xff] (!%p192_p3)   ;;  %p236_p4 = scmp.lt.s32.totalorder (!%p192_p3), %s1108_s18, 63  ;;  %v1322_v5 = vld [vmem:[%s1619_s1 + $0x10] sm:$0xff] (!%p192_p3)  }
   0x8   : > { %1166 = vmatpush3.bf16.msra.mxu0 (!%p192_p3), %v1318_v1  ;;  %1285 = vmatpush3.bf16.msra.mxu1 (!%p192_p3), %v1318_v1  ;;  %v1323_v6 = vld [vmem:[%s1619_s1 + $0x58] sm:$0xff] (!%p192_p3)   ;;  %v1325_v8 = vld [vmem:[%s1619_s1 + $0x60] sm:$0xff] (!%p192_p3)   ;;  %v1327_v10 = vld [vmem:[%s1619_s1 + $0x68] sm:$0xff] (!%p192_p3)  }
   0x9   : > { %1167 = vmatprep.subr.bf16.mxu0 (!%p192_p3), %v1319_v2  ;;  %1278 = vmatprep.subr.bf16.mxu1 (!%p192_p3), %v1319_v2  ;;  %v1324_v7 = vld [vmem:[%s1619_s1 + $0x18] sm:$0xff] (!%p192_p3)   ;;  %v1326_v9 = vld [vmem:[%s1619_s1 + $0x20] sm:$0xff] (!%p192_p3)   ;;  %v1328_v13 = vld [vmem:[%s1619_s1 + $0x28] sm:$0xff] (!%p192_p3)  }
   0xa   : > { %v1329_v14 = vld [vmem:[%s1619_s1 + $0x70] sm:$0xff] (!%p192_p3)   ;;  %v1331_v16 = vld [vmem:[%s1619_s1 + $0x78] sm:$0xff] (!%p192_p3)   ;;  %v1536_v51 = vld [vmem:[%s1620_s2] ss:$0 sm:$0xff] (!%p192_p3) }
   0xb   : > { %v1330_v15 = vld [vmem:[%s1619_s1 + $0x30] sm:$0xff] (!%p192_p3)   ;;  %v1332_v17 = vld [vmem:[%s1619_s1 + $0x38] sm:$0xff] (!%p192_p3)  }
   0xc   : > { %1168 = vmatpush3.bf16.msra.mxu0 (!%p192_p3), %v1320_v3  ;;  %1286 = vmatpush3.bf16.msra.mxu1 (!%p192_p3), %v1320_v3 }
   0xd   : > { %1169 = vmatprep.subr.bf16.mxu0 (!%p192_p3), %v1321_v4  ;;  %1279 = vmatprep.subr.bf16.mxu1 (!%p192_p3), %v1321_v4 }
   0xe   : > { %s1627_s18 = smov (!%p236_p4, %s1108_s18), 63 }
   0xf   : > { %s1164_s6 = sshll.u32 %s1627_s18, 3 }
  0x10   : > { %1170 = vmatpush3.bf16.msra.mxu0 %v1322_v5  ;;  %1287 = vmatpush3.bf16.msra.mxu1 %v1322_v5  ;;  %s1478_s11 = scalar_lea.vmem %s1618_s0, %s1164_s6  ;;  %s1543_s8 = scalar_lea.vmem %s1621_s3, %s1164_s6 }
  0x11   : > { %1171 = vmatprep.subr.bf16.mxu0 %v1323_v6  ;;  %1280 = vmatprep.subr.bf16.mxu1 %v1323_v6  ;;  %v1335_v11 = vld [vmem:[%s1478_s11 + $0x4] ss:$8 sps:$4 sm:$0xff]   ;;  %v1333_v18 = vld [vmem:[%s1478_s11] ss:$8 sps:$4 sm:$0xff]   ;;  %v1339_v20 = vld [vmem:[%s1478_s11 + $0x14] ss:$8 sps:$4 sm:$0xff]  }
  0x12   : > { %v1338_v12 = vld [vmem:[%s1478_s11 + $0x84] ss:$8 sps:$4 sm:$0xff]   ;;  %688 = vmatprep.mubr.bf16.mxu0 %v1335_v11  ;;  %v1336_v19 = vld [vmem:[%s1478_s11 + $0x80] ss:$8 sps:$4 sm:$0xff]   ;;  %v1341_v21 = vld [vmem:[%s1478_s11 + $0x94] ss:$8 sps:$4 sm:$0xff]  }
  0x13   : > { %752 = vmatprep.mubr.bf16.mxu1 %v1338_v12  ;;  %v1343_v22 = vld [vmem:[%s1478_s11 + $0x10] ss:$8 sps:$4 sm:$0xff]   ;;  %v1345_v24 = vld [vmem:[%s1478_s11 + $0x24] ss:$8 sps:$4 sm:$0xff]   ;;  %v1349_v26 = vld [vmem:[%s1478_s11 + $0x20] ss:$8 sps:$4 sm:$0xff]  }
  0x14   : > { %1172 = vmatpush3.bf16.msra.mxu0 %v1324_v7  ;;  %1288 = vmatpush3.bf16.msra.mxu1 %v1324_v7  ;;  %v1344_v23 = vld [vmem:[%s1478_s11 + $0x90] ss:$8 sps:$4 sm:$0xff]   ;;  %v1347_v25 = vld [vmem:[%s1478_s11 + $0xa4] ss:$8 sps:$4 sm:$0xff]   ;;  %v1350_v27 = vld [vmem:[%s1478_s11 + $0xa0] ss:$8 sps:$4 sm:$0xff]  }
  0x15   : > { %1173 = vmatprep.subr.bf16.mxu0 %v1325_v8  ;;  %1281 = vmatprep.subr.bf16.mxu1 %v1325_v8  ;;  %v1351_v28 = vld [vmem:[%s1478_s11 + $0x34] ss:$8 sps:$4 sm:$0xff]   ;;  %v1355_v30 = vld [vmem:[%s1478_s11 + $0x30] ss:$8 sps:$4 sm:$0xff]   ;;  %v1357_v32 = vld [vmem:[%s1478_s11 + $0x44] ss:$8 sps:$4 sm:$0xff]  }
  0x16   : > { %v1353_v29 = vld [vmem:[%s1478_s11 + $0xb4] ss:$8 sps:$4 sm:$0xff]   ;;  %v1356_v31 = vld [vmem:[%s1478_s11 + $0xb0] ss:$8 sps:$4 sm:$0xff]   ;;  %v1359_v33 = vld [vmem:[%s1478_s11 + $0xc4] ss:$8 sps:$4 sm:$0xff]  }
  0x17   : > { %v1361_v34 = vld [vmem:[%s1478_s11 + $0x40] ss:$8 sps:$4 sm:$0xff]   ;;  %v1363_v36 = vld [vmem:[%s1478_s11 + $0x54] ss:$8 sps:$4 sm:$0xff]   ;;  %v1367_v38 = vld [vmem:[%s1478_s11 + $0x50] ss:$8 sps:$4 sm:$0xff]  }
  0x18   : > { %1174 = vmatpush3.bf16.msra.mxu0 %v1326_v9  ;;  %1289 = vmatpush3.bf16.msra.mxu1 %v1326_v9  ;;  %v1362_v35 = vld [vmem:[%s1478_s11 + $0xc0] ss:$8 sps:$4 sm:$0xff]   ;;  %v1365_v37 = vld [vmem:[%s1478_s11 + $0xd4] ss:$8 sps:$4 sm:$0xff]   ;;  %v1368_v39 = vld [vmem:[%s1478_s11 + $0xd0] ss:$8 sps:$4 sm:$0xff]  }
  0x19   : > { %1175 = vmatprep.subr.bf16.mxu0 %v1327_v10  ;;  %1282 = vmatprep.subr.bf16.mxu1 %v1327_v10  ;;  %v1369_v40 = vld [vmem:[%s1478_s11 + $0x64] ss:$8 sps:$4 sm:$0xff]   ;;  %v1373_v42 = vld [vmem:[%s1478_s11 + $0x60] ss:$8 sps:$4 sm:$0xff]   ;;  %v1375_v44 = vld [vmem:[%s1478_s11 + $0x74] ss:$8 sps:$4 sm:$0xff]  }
  0x1a   : > { %v1371_v41 = vld [vmem:[%s1478_s11 + $0xe4] ss:$8 sps:$4 sm:$0xff]   ;;  %v1374_v43 = vld [vmem:[%s1478_s11 + $0xe0] ss:$8 sps:$4 sm:$0xff]   ;;  %v1377_v45 = vld [vmem:[%s1478_s11 + $0xf4] ss:$8 sps:$4 sm:$0xff]  }
  0x1b   : > { %v1379_v46 = vld [vmem:[%s1478_s11 + $0x70] ss:$8 sps:$4 sm:$0xff]  }
  0x1c   : > { %1176 = vmatpush3.bf16.msra.mxu0 %v1328_v13  ;;  %1290 = vmatpush3.bf16.msra.mxu1 %v1328_v13  ;;  %v1380_v47 = vld [vmem:[%s1478_s11 + $0xf0] ss:$8 sps:$4 sm:$0xff]  }
  0x1d   : > { %1177 = vmatprep.subr.bf16.mxu0 %v1329_v14  ;;  %1283 = vmatprep.subr.bf16.mxu1 %v1329_v14 }
  0x20   : > { %1178 = vmatpush3.bf16.msra.mxu0 %v1330_v15  ;;  %1291 = vmatpush3.bf16.msra.mxu1 %v1330_v15 }
  0x21   : > { %1179 = vmatprep.subr.bf16.mxu0 %v1331_v16  ;;  %1284 = vmatprep.subr.bf16.mxu1 %v1331_v16 }
  0x24   : > { %1180 = vmatpush3.bf16.msra.mxu0 %v1332_v17  ;;  %1292 = vmatpush3.bf16.msra.mxu1 %v1332_v17 }
  0x27   : > { %689 = vmatmul.mubr.bf16.vlgmr.msra.gmra.mrb[0].mxu0 %v1333_v18  ;;  %753 = vmatmul.mubr.bf16.vlgmr.msra.gmra.mrb[0].mxu1 %v1336_v19 }
  0x28   : > { %696 = vmatprep.mubr.bf16.mxu0 %v1339_v20  ;;  %760 = vmatprep.mubr.bf16.mxu1 %v1341_v21 }
  0x2f   : > { %697 = vmatmul.mubr.bf16.gmra.mrb[4].mxu0 %v1343_v22  ;;  %761 = vmatmul.mubr.bf16.gmra.mrb[4].mxu1 %v1344_v23 }
  0x30   : > { %704 = vmatprep.mubr.bf16.mxu0 %v1345_v24  ;;  %768 = vmatprep.mubr.bf16.mxu1 %v1347_v25 }
  0x37   : > { %705 = vmatmul.mubr.bf16.gmra.mrb[8].mxu0 %v1349_v26  ;;  %769 = vmatmul.mubr.bf16.gmra.mrb[8].mxu1 %v1350_v27 }
  0x38   : > { %712 = vmatprep.mubr.bf16.mxu0 %v1351_v28  ;;  %776 = vmatprep.mubr.bf16.mxu1 %v1353_v29 }
  0x3f   : > { %713 = vmatmul.mubr.bf16.gmra.mrb[12].mxu0 %v1355_v30  ;;  %777 = vmatmul.mubr.bf16.gmra.mrb[12].mxu1 %v1356_v31 }
  0x40   : > { %720 = vmatprep.mubr.bf16.mxu0 %v1357_v32  ;;  %784 = vmatprep.mubr.bf16.mxu1 %v1359_v33 }
  0x47   : > { %721 = vmatmul.mubr.bf16.gmra.mrb[16].mxu0 %v1361_v34  ;;  %785 = vmatmul.mubr.bf16.gmra.mrb[16].mxu1 %v1362_v35 }
  0x48   : > { %728 = vmatprep.mubr.bf16.mxu0 %v1363_v36  ;;  %792 = vmatprep.mubr.bf16.mxu1 %v1365_v37 }
  0x4f   : > { %729 = vmatmul.mubr.bf16.gmra.mrb[20].mxu0 %v1367_v38  ;;  %793 = vmatmul.mubr.bf16.gmra.mrb[20].mxu1 %v1368_v39 }
  0x50   : > { %736 = vmatprep.mubr.bf16.mxu0 %v1369_v40  ;;  %800 = vmatprep.mubr.bf16.mxu1 %v1371_v41 }
  0x57   : > { %737 = vmatmul.mubr.bf16.gmra.mrb[24].mxu0 %v1373_v42  ;;  %801 = vmatmul.mubr.bf16.gmra.mrb[24].mxu1 %v1374_v43 }
  0x58   : > { %744 = vmatprep.mubr.bf16.mxu0 %v1375_v44  ;;  %808 = vmatprep.mubr.bf16.mxu1 %v1377_v45 }
  0x5f   : > { %745 = vmatmul.mubr.bf16.gmra.mrb[28].mxu0 %v1379_v46  ;;  %809 = vmatmul.mubr.bf16.gmra.mrb[28].mxu1 %v1380_v47 }
  0xfa   : > { %v1181_v48 = vpop.f32.mrb[0].mxu0  ;;  %v1229_v49 = vpop.f32.mrb[0].mxu1 }
  0xfb   : > { %v1182_v50 = vpop.f32.mrb[1].mxu0  ;;  %v1230_v52 = vpop.f32.mrb[1].mxu1 }
  0xfc   : > { %v1183_v53 = vadd.f32 %v1182_v50, %v1181_v48  ;;  %v1231_v54 = vadd.f32 %v1230_v52, %v1229_v49  ;;  %v1184_v55 = vpop.f32.mrb[2].mxu0  ;;  %v1232_v56 = vpop.f32.mrb[2].mxu1 }
  0xfd   : > { %v1185_v57 = vpop.f32.mrb[3].mxu0  ;;  %v1233_v58 = vpop.f32.mrb[3].mxu1 }
  0xfe   : > { %v923_v59 = vadd.f32 %v1183_v53, %v1536_v51  ;;  %v939_v60 = vadd.f32 %v1231_v54, %v1536_v51  ;;  %v1186_v61 = vadd.f32 %v1185_v57, %v1184_v55  ;;  %v1234_v62 = vadd.f32 %v1233_v58, %v1232_v56 }
 0x100   : > { %955 = vst [vmem:[%s1543_s8] sm:$0xff] %v923_v59  ;;  %971 = vst [vmem:[%s1543_s8 + $0x80] sm:$0xff] %v939_v60  ;;  %v924_v63 = vadd.f32 %v1186_v61, %v1536_v51  ;;  %v940_v0 = vadd.f32 %v1234_v62, %v1536_v51 }
 0x102   : > { %956 = vst [vmem:[%s1543_s8 + $0x8] sm:$0xff] %v924_v63  ;;  %972 = vst [vmem:[%s1543_s8 + $0x88] sm:$0xff] %v940_v0  ;;  %v1187_v1 = vpop.f32.mrb[4].mxu0  ;;  %v1235_v2 = vpop.f32.mrb[4].mxu1 }
 0x103   : > { %v1188_v3 = vpop.f32.mrb[5].mxu0  ;;  %v1236_v4 = vpop.f32.mrb[5].mxu1 }
 0x104   : > { %v1189_v5 = vadd.f32 %v1188_v3, %v1187_v1  ;;  %v1237_v6 = vadd.f32 %v1236_v4, %v1235_v2  ;;  %v1190_v7 = vpop.f32.mrb[6].mxu0  ;;  %v1238_v8 = vpop.f32.mrb[6].mxu1 }
 0x105   : > { %v1191_v9 = vpop.f32.mrb[7].mxu0  ;;  %v1239_v10 = vpop.f32.mrb[7].mxu1 }
 0x106   : > { %v925_v11 = vadd.f32 %v1189_v5, %v1536_v51  ;;  %v941_v12 = vadd.f32 %v1237_v6, %v1536_v51  ;;  %v1192_v13 = vadd.f32 %v1191_v9, %v1190_v7  ;;  %v1240_v14 = vadd.f32 %v1239_v10, %v1238_v8 }
 0x108   : > { %957 = vst [vmem:[%s1543_s8 + $0x10] sm:$0xff] %v925_v11  ;;  %973 = vst [vmem:[%s1543_s8 + $0x90] sm:$0xff] %v941_v12  ;;  %v926_v15 = vadd.f32 %v1192_v13, %v1536_v51  ;;  %v942_v16 = vadd.f32 %v1240_v14, %v1536_v51 }
 0x10a   : > { %958 = vst [vmem:[%s1543_s8 + $0x18] sm:$0xff] %v926_v15  ;;  %974 = vst [vmem:[%s1543_s8 + $0x98] sm:$0xff] %v942_v16  ;;  %v1193_v17 = vpop.f32.mrb[8].mxu0  ;;  %v1241_v18 = vpop.f32.mrb[8].mxu1 }
 0x10b   : > { %v1194_v19 = vpop.f32.mrb[9].mxu0  ;;  %v1242_v20 = vpop.f32.mrb[9].mxu1 }
 0x10c   : > { %v1195_v21 = vadd.f32 %v1194_v19, %v1193_v17  ;;  %v1243_v22 = vadd.f32 %v1242_v20, %v1241_v18  ;;  %v1196_v23 = vpop.f32.mrb[10].mxu0  ;;  %v1244_v24 = vpop.f32.mrb[10].mxu1 }
 0x10d   : > { %v1197_v25 = vpop.f32.mrb[11].mxu0  ;;  %v1245_v26 = vpop.f32.mrb[11].mxu1 }
 0x10e   : > { %v927_v27 = vadd.f32 %v1195_v21, %v1536_v51  ;;  %v943_v28 = vadd.f32 %v1243_v22, %v1536_v51  ;;  %v1198_v29 = vadd.f32 %v1197_v25, %v1196_v23  ;;  %v1246_v30 = vadd.f32 %v1245_v26, %v1244_v24 }
 0x110   : > { %959 = vst [vmem:[%s1543_s8 + $0x20] sm:$0xff] %v927_v27  ;;  %975 = vst [vmem:[%s1543_s8 + $0xa0] sm:$0xff] %v943_v28  ;;  %v928_v31 = vadd.f32 %v1198_v29, %v1536_v51  ;;  %v944_v32 = vadd.f32 %v1246_v30, %v1536_v51 }
 0x112   : > { %960 = vst [vmem:[%s1543_s8 + $0x28] sm:$0xff] %v928_v31  ;;  %976 = vst [vmem:[%s1543_s8 + $0xa8] sm:$0xff] %v944_v32  ;;  %v1199_v33 = vpop.f32.mrb[12].mxu0  ;;  %v1247_v34 = vpop.f32.mrb[12].mxu1 }
 0x113   : > { %v1200_v35 = vpop.f32.mrb[13].mxu0  ;;  %v1248_v36 = vpop.f32.mrb[13].mxu1 }
 0x114   : > { %v1201_v37 = vadd.f32 %v1200_v35, %v1199_v33  ;;  %v1249_v38 = vadd.f32 %v1248_v36, %v1247_v34  ;;  %v1202_v39 = vpop.f32.mrb[14].mxu0  ;;  %v1250_v40 = vpop.f32.mrb[14].mxu1 }
 0x115   : > { %v1203_v41 = vpop.f32.mrb[15].mxu0  ;;  %v1251_v42 = vpop.f32.mrb[15].mxu1 }
 0x116   : > { %v929_v43 = vadd.f32 %v1201_v37, %v1536_v51  ;;  %v945_v44 = vadd.f32 %v1249_v38, %v1536_v51  ;;  %v1204_v45 = vadd.f32 %v1203_v41, %v1202_v39  ;;  %v1252_v46 = vadd.f32 %v1251_v42, %v1250_v40 }
 0x118   : > { %961 = vst [vmem:[%s1543_s8 + $0x30] sm:$0xff] %v929_v43  ;;  %977 = vst [vmem:[%s1543_s8 + $0xb0] sm:$0xff] %v945_v44  ;;  %v930_v47 = vadd.f32 %v1204_v45, %v1536_v51  ;;  %v946_v48 = vadd.f32 %v1252_v46, %v1536_v51 }
 0x11a   : > { %962 = vst [vmem:[%s1543_s8 + $0x38] sm:$0xff] %v930_v47  ;;  %978 = vst [vmem:[%s1543_s8 + $0xb8] sm:$0xff] %v946_v48  ;;  %v1205_v49 = vpop.f32.mrb[16].mxu0  ;;  %v1253_v50 = vpop.f32.mrb[16].mxu1 }
 0x11b   : > { %v1206_v52 = vpop.f32.mrb[17].mxu0  ;;  %v1254_v53 = vpop.f32.mrb[17].mxu1 }
 0x11c   : > { %v1207_v54 = vadd.f32 %v1206_v52, %v1205_v49  ;;  %v1255_v55 = vadd.f32 %v1254_v53, %v1253_v50  ;;  %v1208_v56 = vpop.f32.mrb[18].mxu0  ;;  %v1256_v57 = vpop.f32.mrb[18].mxu1 }
 0x11d   : > { %v1209_v58 = vpop.f32.mrb[19].mxu0  ;;  %v1257_v59 = vpop.f32.mrb[19].mxu1 }
 0x11e   : > { %v931_v60 = vadd.f32 %v1207_v54, %v1536_v51  ;;  %v947_v61 = vadd.f32 %v1255_v55, %v1536_v51  ;;  %v1210_v62 = vadd.f32 %v1209_v58, %v1208_v56  ;;  %v1258_v63 = vadd.f32 %v1257_v59, %v1256_v57 }
 0x120   : > { %963 = vst [vmem:[%s1543_s8 + $0x40] sm:$0xff] %v931_v60  ;;  %979 = vst [vmem:[%s1543_s8 + $0xc0] sm:$0xff] %v947_v61  ;;  %v932_v0 = vadd.f32 %v1210_v62, %v1536_v51  ;;  %v948_v1 = vadd.f32 %v1258_v63, %v1536_v51 }
 0x122   : > { %964 = vst [vmem:[%s1543_s8 + $0x48] sm:$0xff] %v932_v0  ;;  %980 = vst [vmem:[%s1543_s8 + $0xc8] sm:$0xff] %v948_v1  ;;  %v1211_v2 = vpop.f32.mrb[20].mxu0  ;;  %v1259_v3 = vpop.f32.mrb[20].mxu1 }
 0x123   : > { %v1212_v4 = vpop.f32.mrb[21].mxu0  ;;  %v1260_v5 = vpop.f32.mrb[21].mxu1 }
 0x124   : > { %v1213_v6 = vadd.f32 %v1212_v4, %v1211_v2  ;;  %v1261_v7 = vadd.f32 %v1260_v5, %v1259_v3  ;;  %v1214_v8 = vpop.f32.mrb[22].mxu0  ;;  %v1262_v9 = vpop.f32.mrb[22].mxu1 }
 0x125   : > { %v1215_v10 = vpop.f32.mrb[23].mxu0  ;;  %v1263_v11 = vpop.f32.mrb[23].mxu1 }
 0x126   : > { %v933_v12 = vadd.f32 %v1213_v6, %v1536_v51  ;;  %v949_v13 = vadd.f32 %v1261_v7, %v1536_v51  ;;  %v1216_v14 = vadd.f32 %v1215_v10, %v1214_v8  ;;  %v1264_v15 = vadd.f32 %v1263_v11, %v1262_v9 }
 0x128   : > { %965 = vst [vmem:[%s1543_s8 + $0x50] sm:$0xff] %v933_v12  ;;  %981 = vst [vmem:[%s1543_s8 + $0xd0] sm:$0xff] %v949_v13  ;;  %v934_v16 = vadd.f32 %v1216_v14, %v1536_v51  ;;  %v950_v17 = vadd.f32 %v1264_v15, %v1536_v51 }
 0x12a   : > { %966 = vst [vmem:[%s1543_s8 + $0x58] sm:$0xff] %v934_v16  ;;  %982 = vst [vmem:[%s1543_s8 + $0xd8] sm:$0xff] %v950_v17  ;;  %v1217_v18 = vpop.f32.mrb[24].mxu0  ;;  %v1265_v19 = vpop.f32.mrb[24].mxu1 }
 0x12b   : > { %v1218_v20 = vpop.f32.mrb[25].mxu0  ;;  %v1266_v21 = vpop.f32.mrb[25].mxu1 }
 0x12c   : > { %v1219_v22 = vadd.f32 %v1218_v20, %v1217_v18  ;;  %v1267_v23 = vadd.f32 %v1266_v21, %v1265_v19  ;;  %v1220_v24 = vpop.f32.mrb[26].mxu0  ;;  %v1268_v25 = vpop.f32.mrb[26].mxu1 }
 0x12d   : > { %v1221_v26 = vpop.f32.mrb[27].mxu0  ;;  %v1269_v27 = vpop.f32.mrb[27].mxu1 }
 0x12e   : > { %v935_v28 = vadd.f32 %v1219_v22, %v1536_v51  ;;  %v951_v29 = vadd.f32 %v1267_v23, %v1536_v51  ;;  %v1222_v30 = vadd.f32 %v1221_v26, %v1220_v24  ;;  %v1270_v31 = vadd.f32 %v1269_v27, %v1268_v25 }
 0x130   : > { %967 = vst [vmem:[%s1543_s8 + $0x60] sm:$0xff] %v935_v28  ;;  %983 = vst [vmem:[%s1543_s8 + $0xe0] sm:$0xff] %v951_v29  ;;  %v936_v32 = vadd.f32 %v1222_v30, %v1536_v51  ;;  %v952_v33 = vadd.f32 %v1270_v31, %v1536_v51 }
 0x132   : > { %968 = vst [vmem:[%s1543_s8 + $0x68] sm:$0xff] %v936_v32  ;;  %984 = vst [vmem:[%s1543_s8 + $0xe8] sm:$0xff] %v952_v33  ;;  %v1223_v34 = vpop.f32.mrb[28].mxu0  ;;  %v1271_v35 = vpop.f32.mrb[28].mxu1 }
 0x133   : > { %v1224_v36 = vpop.f32.mrb[29].mxu0  ;;  %v1272_v37 = vpop.f32.mrb[29].mxu1 }
 0x134   : > { %v1225_v38 = vadd.f32 %v1224_v36, %v1223_v34  ;;  %v1273_v39 = vadd.f32 %v1272_v37, %v1271_v35  ;;  %v1226_v40 = vpop.f32.mrb[30].mxu0  ;;  %v1274_v41 = vpop.f32.mrb[30].mxu1 }
 0x135   : > { %v1227_v42 = vpop.f32.mrb[31].mxu0  ;;  %v1275_v43 = vpop.f32.mrb[31].mxu1 }
 0x136   : > { %v937_v44 = vadd.f32 %v1225_v38, %v1536_v51  ;;  %v953_v45 = vadd.f32 %v1273_v39, %v1536_v51  ;;  %v1228_v46 = vadd.f32 %v1227_v42, %v1226_v40  ;;  %v1276_v47 = vadd.f32 %v1275_v43, %v1274_v41 }
 0x138   : > { %969 = vst [vmem:[%s1543_s8 + $0x70] sm:$0xff] %v937_v44  ;;  %985 = vst [vmem:[%s1543_s8 + $0xf0] sm:$0xff] %v953_v45  ;;  %v938_v48 = vadd.f32 %v1228_v46, %v1536_v51  ;;  %v954_v49 = vadd.f32 %v1276_v47, %v1536_v51 }
 0x13a   : > { %970 = vst [vmem:[%s1543_s8 + $0x78] sm:$0xff] %v938_v48  ;;  %986 = vst [vmem:[%s1543_s8 + $0xf8] sm:$0xff] %v954_v49 }
 0x13b PF: > { %s13_s14 = sadd.s32 1, %s1403_s14   ;;  %s1622_s12 = smov %s1399_s13 }
 0x13c   : > { %p10_p5 = scmp.ge.s32.totalorder %s13_s14, 4   ;;  %s1623_s13 = smov %s1625_s15 }
 0x13e   :  { %12 = sbr.rel (!%p10_p5) target bundleno = 2 (0x2), region = 76 }

// kernel: generator_forward.21
= control target key start
LH: loop header
LB: loop body
LE: loop exit
PB: predicated region body
PF: predicated region fallthrough
CT: control target
= control target key end

     0   :  { %s1031_s12 = smov 0   ;;  %s1033_s13 = smov 0   ;;  %s1187_s0 = inlined_call_operand.vmem [shape: bf16[128,640], index: 0, kind: input, shape index: {}]   ;;  %s1188_s1 = inlined_call_operand.vmem [shape: bf16[640,128], index: 1, kind: input, shape index: {}]   ;;  %s1189_s2 = inlined_call_operand.vmem [shape: f32[1,128], index: 2, kind: input, shape index: {}]   ;;  %s1190_s3 = inlined_call_operand.vmem [shape: f32[128,128], index: 3, kind: output, shape index: {}]  }
   0x1   :  { %s1035_s14 = smov 0   ;;  %s1037_s15 = smov 0  }
   0x2   :  { %s1039_s16 = smov 0  }
   0x3 LB: > { %s25_s17 = sadd.s32 1, %s1004_s15  ;;  %p48_p1 = scmp.ne.s32.totalorder %s996_s13, %s992_s12  ;;  %s1008_s16 = sphi %s1039_s16, %s13_s16   ;;  %s1004_s15 = sphi %s1037_s15, %s1194_s15   ;;  %s1000_s14 = sphi %s1035_s14, %s1193_s14   ;;  %s996_s13 = sphi %s1033_s13, %s1192_s13   ;;  %s992_s12 = sphi %s1031_s12, %s1191_s12  }
   0x4   : > { %p26_p0 = scmp.ge.s32.totalorder %s25_s17, 5  ;;  %p49_p2 = scmp.eq.s32.totalorder %s1008_s16, 0 }
   0x5   : > { %s41_s19 = sadd.s32 1, %s996_s13  ;;  %p819_p5 = scmp.ge.s32.totalorder %s1008_s16, 5 }
   0x6   : > { %s1196_s17 = smov (%p26_p0, %s25_s17), 0  ;;  %p50_p3 = por %p49_p2, %p48_p1 }
   0x7   : > { %s37_s18 = ssub.s32 %s1004_s15, %s1196_s17  ;;  %162 = sbr.rel (%p819_p5) target bundleno = 28 (0x1c), region = 20 }
   0x8   : > { %p39_p4 = scmp.eq.s32.totalorder %s37_s18, 0 }
   0xa   : > { %s1066_s20 = scalar_select %p39_p4, %s996_s13, %s41_s19  }
   0xe   : > { %165 = sbr.rel (!%p50_p3) target bundleno = 28 (0x1c), region = 24  ;;  %s167_s21 = sand.u32 (%p50_p3), 1, %s996_s13  }
   0xf   : > { %s821_s22 = sshll.u32 (%p50_p3), %s1004_s15, 2  ;;  %s820_s23 = sshll.u32 (%p50_p3), %s167_s21, 6 }
  0x10   : > { %s1074_s26 = scalar_lea.vmem (%p50_p3), %s1187_s0, %s821_s22  ;;  %s169_s27 = scalar_lea.vmem (%p50_p3), [#allocation3], %s820_s23 }
  0x11   : > { %v190_v0 = vld [vmem:[%s1074_s26] sm:$0xf] (%p50_p3)  ;;  %v192_v1 = vld [vmem:[%s1074_s26 + $0x14] sm:$0xf] (%p50_p3)  ;;  %v194_v2 = vld [vmem:[%s1074_s26 + $0x28] sm:$0xf] (%p50_p3) }
  0x12   : > { %191 = vst [vmem:[%s169_s27] sm:$0xf] (%p50_p3), %v190_v0  ;;  %193 = vst [vmem:[%s169_s27 + $0x4] sm:$0xf] (%p50_p3), %v192_v1  ;;  %v196_v3 = vld [vmem:[%s1074_s26 + $0x3c] sm:$0xf] (%p50_p3) }
  0x13   : > { %v198_v4 = vld [vmem:[%s1074_s26 + $0x50] sm:$0xf] (%p50_p3)  ;;  %195 = vst [vmem:[%s169_s27 + $0x8] sm:$0xf] (%p50_p3), %v194_v2  ;;  %197 = vst [vmem:[%s169_s27 + $0xc] sm:$0xf] (%p50_p3), %v196_v3 }
  0x14   : > { %199 = vst [vmem:[%s169_s27 + $0x10] sm:$0xf] (%p50_p3), %v198_v4  ;;  %v200_v5 = vld [vmem:[%s1074_s26 + $0x64] sm:$0xf] (%p50_p3)  ;;  %v202_v6 = vld [vmem:[%s1074_s26 + $0x78] sm:$0xf] (%p50_p3) }
  0x15   : > { %v204_v7 = vld [vmem:[%s1074_s26 + $0x8c] sm:$0xf]  ;;  %201 = vst [vmem:[%s169_s27 + $0x14] sm:$0xf] %v200_v5  ;;  %203 = vst [vmem:[%s169_s27 + $0x18] sm:$0xf] %v202_v6 }
  0x16   : > { %205 = vst [vmem:[%s169_s27 + $0x1c] sm:$0xf] %v204_v7  ;;  %v206_v8 = vld [vmem:[%s1074_s26 + $0xa0] sm:$0xf]  ;;  %v208_v9 = vld [vmem:[%s1074_s26 + $0xb4] sm:$0xf] }
  0x17   : > { %v210_v10 = vld [vmem:[%s1074_s26 + $0xc8] sm:$0xf]  ;;  %207 = vst [vmem:[%s169_s27 + $0x20] sm:$0xf] %v206_v8  ;;  %209 = vst [vmem:[%s169_s27 + $0x24] sm:$0xf] %v208_v9 }
  0x18   : > { %211 = vst [vmem:[%s169_s27 + $0x28] sm:$0xf] %v210_v10  ;;  %v212_v11 = vld [vmem:[%s1074_s26 + $0xdc] sm:$0xf]  ;;  %v214_v12 = vld [vmem:[%s1074_s26 + $0xf0] sm:$0xf] }
  0x19   : > { %v216_v13 = vld [vmem:[%s1074_s26 + $0x104] sm:$0xf]  ;;  %213 = vst [vmem:[%s169_s27 + $0x2c] sm:$0xf] %v212_v11  ;;  %215 = vst [vmem:[%s169_s27 + $0x30] sm:$0xf] %v214_v12 }
  0x1a   : > { %217 = vst [vmem:[%s169_s27 + $0x34] sm:$0xf] %v216_v13  ;;  %v218_v14 = vld [vmem:[%s1074_s26 + $0x118] sm:$0xf]  ;;  %v220_v15 = vld [vmem:[%s1074_s26 + $0x12c] sm:$0xf] }
  0x1b   : > { %219 = vst [vmem:[%s169_s27 + $0x38] sm:$0xf] %v218_v14  ;;  %221 = vst [vmem:[%s169_s27 + $0x3c] sm:$0xf] %v220_v15 }
  0x1c PF: > { %p822_p6 = scmp.ge.s32.totalorder %s1008_s16, 1  ;;  %p287_p7 = scmp.lt.s32.totalorder %s1008_s16, 6 }
  0x1e   : > { %p288_p8 = pnand %p822_p6, %p287_p7 }
  0x1f   : > { %s294_s28 = sand.u32 (!%p288_p8), 1, %s992_s12   ;;  %s824_s29 = sshll.u32 (!%p288_p8), %s1000_s14, 4 }
  0x20   : > { %291 = sbr.rel (%p288_p8) target bundleno = 319 (0x13f), region = 69  ;;  %s823_s30 = sshll.u32 (!%p288_p8), %s294_s28, 6 }
  0x21   : > { %p333_p9 = scmp.lt.s32.totalorder (!%p288_p8), %s824_s29, 79  ;;  %s1101_s8 = scalar_lea.vmem (!%p288_p8), [#allocation3], %s823_s30 }
  0x22   : > { %p826_p10 = scmp.ne.s32.totalorder (!%p288_p8), %s1000_s14, 0 }
  0x27   : > { %s1198_s29 = smov (!%p333_p9, %s824_s29), 79  ;;  %357 = sbr.rel (%p826_p10) target bundleno = 49 (0x31), region = 77 }
  0x28   : > { %s825_s4 = sshll.u32 %s1198_s29, 2  ;;  %v1010_v16 = vmov (!%p826_p10), 0.0  }
  0x29   : > { %s1099_s7 = scalar_lea.vmem %s1188_s1, %s825_s4  ;;  %358 = vst [vmem:[#allocation2] sm:$0xff] (!%p826_p10), %v1010_v16  ;;  %359 = vst [vmem:[#allocation2 + $0x8] sm:$0xff] (!%p826_p10), %v1010_v16 }
  0x2a   : > { %360 = vst [vmem:[#allocation2 + $0x10] sm:$0xff] (!%p826_p10), %v1010_v16  ;;  %361 = vst [vmem:[#allocation2 + $0x18] sm:$0xff] (!%p826_p10), %v1010_v16 }
  0x2b   : > { %362 = vst [vmem:[#allocation2 + $0x20] sm:$0xff] (!%p826_p10), %v1010_v16  ;;  %363 = vst [vmem:[#allocation2 + $0x28] sm:$0xff] (!%p826_p10), %v1010_v16 }
  0x2c   : > { %364 = vst [vmem:[#allocation2 + $0x30] sm:$0xff] (!%p826_p10), %v1010_v16  ;;  %365 = vst [vmem:[#allocation2 + $0x38] sm:$0xff] (!%p826_p10), %v1010_v16 }
  0x2d   : > { %366 = vst [vmem:[#allocation2 + $0x40] sm:$0xff] (!%p826_p10), %v1010_v16  ;;  %367 = vst [vmem:[#allocation2 + $0x48] sm:$0xff] (!%p826_p10), %v1010_v16 }
  0x2e   : > { %368 = vst [vmem:[#allocation2 + $0x50] sm:$0xff] %v1010_v16  ;;  %369 = vst [vmem:[#allocation2 + $0x58] sm:$0xff] %v1010_v16 }
  0x2f   : > { %370 = vst [vmem:[#allocation2 + $0x60] sm:$0xff] %v1010_v16  ;;  %371 = vst [vmem:[#allocation2 + $0x68] sm:$0xff] %v1010_v16 }
  0x30   : > { %372 = vst [vmem:[#allocation2 + $0x70] sm:$0xff] %v1010_v16  ;;  %373 = vst [vmem:[#allocation2 + $0x78] sm:$0xff] %v1010_v16 }
  0x31 PF: > { %v954_v17 = vld [vmem:[%s1099_s7] sm:$0xff]   ;;  %v955_v18 = vld [vmem:[%s1099_s7 + $0x8] sm:$0xff]   ;;  %v956_v19 = vld [vmem:[%s1099_s7 + $0x10] sm:$0xff]   ;;  %p843_p11 = scmp.ne.s32.totalorder %s1000_s14, 4 }
  0x32   : > { %865 = vmatprep.subr.bf16.mxu0 %v954_v17  ;;  %897 = vmatprep.subr.bf16.mxu1 %v954_v17  ;;  %v957_v20 = vld [vmem:[%s1099_s7 + $0x18] sm:$0xff]   ;;  %v962_v21 = vld [vmem:[%s1101_s8] sm:$0xff]   ;;  %v959_v24 = vld [vmem:[%s1099_s7 + $0x28] sm:$0xff]  }
  0x33   : > { %866 = vmatpush3.bf16.msra.mxu0 %v954_v17  ;;  %905 = vmatpush3.bf16.msra.mxu1 %v954_v17  ;;  %v963_v22 = vld [vmem:[%s1101_s8 + $0x20] sm:$0xff]   ;;  %v960_v25 = vld [vmem:[%s1099_s7 + $0x30] sm:$0xff]   ;;  %v961_v26 = vld [vmem:[%s1099_s7 + $0x38] sm:$0xff]  }
  0x34   : > { %867 = vmatprep.subr.bf16.mxu0 %v955_v18  ;;  %898 = vmatprep.subr.bf16.mxu1 %v955_v18  ;;  %v958_v23 = vld [vmem:[%s1099_s7 + $0x20] sm:$0xff]   ;;  %v964_v27 = vld [vmem:[%s1101_s8 + $0x8] sm:$0xff]   ;;  %v966_v29 = vld [vmem:[%s1101_s8 + $0x10] sm:$0xff]  }
  0x35   : > { %881 = vmatprep.mubr.bf16.mxu0 %v962_v21  ;;  %889 = vmatprep.mubr.bf16.mxu1 %v963_v22  ;;  %v965_v28 = vld [vmem:[%s1101_s8 + $0x28] sm:$0xff]   ;;  %v967_v30 = vld [vmem:[%s1101_s8 + $0x30] sm:$0xff]   ;;  %v968_v31 = vld [vmem:[%s1101_s8 + $0x18] sm:$0xff]  }
  0x36   : > { %v969_v32 = vld [vmem:[%s1101_s8 + $0x38] sm:$0xff]   ;;  %v376_v33 = vld [vmem:[#allocation2 + $0x10] sm:$0xff]  ;;  %v374_v35 = vld [vmem:[#allocation2] sm:$0xff] }
  0x37   : > { %868 = vmatpush3.bf16.msra.mxu0 %v955_v18  ;;  %906 = vmatpush3.bf16.msra.mxu1 %v955_v18  ;;  %v384_v34 = vld [vmem:[#allocation2 + $0x50] sm:$0xff]  ;;  %v382_v36 = vld [vmem:[#allocation2 + $0x40] sm:$0xff]  ;;  %v377_v39 = vld [vmem:[#allocation2 + $0x18] sm:$0xff] }
  0x38   : > { %869 = vmatprep.subr.bf16.mxu0 %v956_v19  ;;  %899 = vmatprep.subr.bf16.mxu1 %v956_v19  ;;  %v385_v40 = vld [vmem:[#allocation2 + $0x58] sm:$0xff]  ;;  %v375_v45 = vld [vmem:[#allocation2 + $0x8] sm:$0xff]  ;;  %v380_v57 = vld [vmem:[#allocation2 + $0x30] sm:$0xff] }
  0x39   : > { %v383_v46 = vld [vmem:[#allocation2 + $0x48] sm:$0xff]  ;;  %v388_v58 = vld [vmem:[#allocation2 + $0x70] sm:$0xff]  ;;  %v378_v59 = vld [vmem:[#allocation2 + $0x20] sm:$0xff] }
  0x3a   : > { %v386_v60 = vld [vmem:[#allocation2 + $0x60] sm:$0xff]  ;;  %v381_v63 = vld [vmem:[#allocation2 + $0x38] sm:$0xff]  ;;  %v379_v5 = vld [vmem:[#allocation2 + $0x28] sm:$0xff] }
  0x3b   : > { %870 = vmatpush3.bf16.msra.mxu0 %v956_v19  ;;  %907 = vmatpush3.bf16.msra.mxu1 %v956_v19  ;;  %v389_v0 = vld [vmem:[#allocation2 + $0x78] sm:$0xff]  ;;  %v387_v6 = vld [vmem:[#allocation2 + $0x68] sm:$0xff]  ;;  %v844_v18 = vld [vmem:[%s1189_s2] ss:$0 sm:$0xff] (!%p843_p11) }
  0x3c   : > { %871 = vmatprep.subr.bf16.mxu0 %v957_v20  ;;  %900 = vmatprep.subr.bf16.mxu1 %v957_v20 }
  0x3f   : > { %872 = vmatpush3.bf16.msra.mxu0 %v957_v20  ;;  %908 = vmatpush3.bf16.msra.mxu1 %v957_v20 }
  0x40   : > { %873 = vmatprep.subr.bf16.mxu0 %v958_v23  ;;  %901 = vmatprep.subr.bf16.mxu1 %v958_v23 }
  0x43   : > { %874 = vmatpush3.bf16.msra.mxu0 %v958_v23  ;;  %909 = vmatpush3.bf16.msra.mxu1 %v958_v23 }
  0x44   : > { %875 = vmatprep.subr.bf16.mxu0 %v959_v24  ;;  %902 = vmatprep.subr.bf16.mxu1 %v959_v24 }
  0x47   : > { %876 = vmatpush3.bf16.msra.mxu0 %v959_v24  ;;  %910 = vmatpush3.bf16.msra.mxu1 %v959_v24 }
  0x48   : > { %877 = vmatprep.subr.bf16.mxu0 %v960_v25  ;;  %903 = vmatprep.subr.bf16.mxu1 %v960_v25 }
  0x4b   : > { %878 = vmatpush3.bf16.msra.mxu0 %v960_v25  ;;  %911 = vmatpush3.bf16.msra.mxu1 %v960_v25 }
  0x4c   : > { %879 = vmatprep.subr.bf16.mxu0 %v961_v26  ;;  %904 = vmatprep.subr.bf16.mxu1 %v961_v26 }
  0x4f   : > { %880 = vmatpush3.bf16.msra.mxu0 %v961_v26  ;;  %912 = vmatpush3.bf16.msra.mxu1 %v961_v26 }
  0x52   : > { %882 = vmatmul.mubr.bf16.vlgmr.msra.gmra.mrb[0].mxu0 %v964_v27  ;;  %890 = vmatmul.mubr.bf16.vlgmr.msra.gmra.mrb[0].mxu1 %v965_v28 }
  0x53   : > { %885 = vmatprep.mubr.bf16.mxu0 %v966_v29  ;;  %893 = vmatprep.mubr.bf16.mxu1 %v967_v30 }
  0x5a   : > { %886 = vmatmul.mubr.bf16.gmra.mrb[4].mxu0 %v968_v31  ;;  %894 = vmatmul.mubr.bf16.gmra.mrb[4].mxu1 %v969_v32 }
 0x125   : > { %v883_v37 = vpop.f32.mrb[0].mxu0  ;;  %v891_v38 = vpop.f32.mrb[0].mxu1 }
 0x126   : > { %v617_v41 = vadd.f32 %v883_v37, %v376_v33  ;;  %v625_v42 = vadd.f32 %v891_v38, %v384_v34  ;;  %v552_v43 = vpop.f32.mrb[1].mxu0  ;;  %v584_v44 = vpop.f32.mrb[1].mxu1 }
 0x127   : > { %v615_v47 = vadd.f32 %v552_v43, %v374_v35  ;;  %v623_v48 = vadd.f32 %v584_v44, %v382_v36  ;;  %v884_v49 = vpop.f32.mrb[2].mxu0  ;;  %v892_v50 = vpop.f32.mrb[2].mxu1 }
 0x128   : > { %633 = vst [vmem:[#allocation2 + $0x10] sm:$0xff] %v617_v41  ;;  %641 = vst [vmem:[#allocation2 + $0x50] sm:$0xff] %v625_v42  ;;  %v618_v51 = vadd.f32 %v884_v49, %v377_v39  ;;  %v626_v52 = vadd.f32 %v892_v50, %v385_v40  ;;  %v555_v53 = vpop.f32.mrb[3].mxu0  ;;  %v587_v54 = vpop.f32.mrb[3].mxu1 }
 0x129   : > { %631 = vst [vmem:[#allocation2] sm:$0xff] %v615_v47  ;;  %639 = vst [vmem:[#allocation2 + $0x40] sm:$0xff] %v623_v48  ;;  %v616_v55 = vadd.f32 %v555_v53, %v375_v45  ;;  %v624_v56 = vadd.f32 %v587_v54, %v383_v46 }
 0x12a   : > { %634 = vst [vmem:[#allocation2 + $0x18] sm:$0xff] %v618_v51  ;;  %642 = vst [vmem:[#allocation2 + $0x58] sm:$0xff] %v626_v52 }
 0x12b   : > { %632 = vst [vmem:[#allocation2 + $0x8] sm:$0xff] %v616_v55  ;;  %640 = vst [vmem:[#allocation2 + $0x48] sm:$0xff] %v624_v56 }
 0x12d   : > { %v887_v61 = vpop.f32.mrb[4].mxu0  ;;  %v895_v62 = vpop.f32.mrb[4].mxu1  ;;  %650 = sbr.rel (%p843_p11) target bundleno = 319 (0x13f), region = 81 }
 0x12e   : > { %v621_v1 = vadd.f32 %v887_v61, %v380_v57  ;;  %v629_v2 = vadd.f32 %v895_v62, %v388_v58  ;;  %v568_v3 = vpop.f32.mrb[5].mxu0  ;;  %v600_v4 = vpop.f32.mrb[5].mxu1 }
 0x12f   : > { %v619_v7 = vadd.f32 %v568_v3, %v378_v59  ;;  %v627_v8 = vadd.f32 %v600_v4, %v386_v60  ;;  %v888_v9 = vpop.f32.mrb[6].mxu0  ;;  %v896_v10 = vpop.f32.mrb[6].mxu1  ;;  %v653_v22 = vld [vmem:[#allocation2 + $0x10] sm:$0xff] (!%p843_p11) }
 0x130   : > { %637 = vst [vmem:[#allocation2 + $0x30] sm:$0xff] %v621_v1  ;;  %645 = vst [vmem:[#allocation2 + $0x70] sm:$0xff] %v629_v2  ;;  %v622_v11 = vadd.f32 %v888_v9, %v381_v63  ;;  %v630_v12 = vadd.f32 %v896_v10, %v389_v0  ;;  %v571_v13 = vpop.f32.mrb[7].mxu0  ;;  %v603_v14 = vpop.f32.mrb[7].mxu1  ;;  %v651_v17 = vld [vmem:[#allocation2] sm:$0xff] (!%p843_p11)  ;;  %v676_v25 = vadd.f32 (!%p843_p11), %v844_v18, %v653_v22  ;;  %v661_v36 = vld [vmem:[#allocation2 + $0x50] sm:$0xff] (!%p843_p11) }
 0x131   : > { %635 = vst [vmem:[#allocation2 + $0x20] sm:$0xff] %v619_v7  ;;  %643 = vst [vmem:[#allocation2 + $0x60] sm:$0xff] %v627_v8  ;;  %v620_v15 = vadd.f32 %v571_v13, %v379_v5  ;;  %v628_v16 = vadd.f32 %v603_v14, %v387_v6  ;;  %v674_v20 = vadd.f32 (!%p843_p11), %v844_v18, %v651_v17  ;;  %v654_v23 = vld [vmem:[#allocation2 + $0x18] sm:$0xff] (!%p843_p11)  ;;  %v659_v34 = vld [vmem:[#allocation2 + $0x40] sm:$0xff] (!%p843_p11) }
 0x132   : > { %638 = vst [vmem:[#allocation2 + $0x38] sm:$0xff] %v622_v11  ;;  %646 = vst [vmem:[#allocation2 + $0x78] sm:$0xff] %v630_v12  ;;  %v652_v19 = vld [vmem:[#allocation2 + $0x8] sm:$0xff] (!%p843_p11)  ;;  %v677_v26 = vadd.f32 (!%p843_p11), %v844_v18, %v654_v23  ;;  %v682_v37 = vadd.f32 (!%p843_p11), %v844_v18, %v659_v34  ;;  %v684_v39 = vadd.f32 (!%p843_p11), %v844_v18, %v661_v36  ;;  %v662_v40 = vld [vmem:[#allocation2 + $0x58] sm:$0xff] (!%p843_p11) }
 0x133   : > { %636 = vst [vmem:[#allocation2 + $0x28] sm:$0xff] %v620_v15  ;;  %644 = vst [vmem:[#allocation2 + $0x68] sm:$0xff] %v628_v16  ;;  %v675_v21 = vadd.f32 (!%p843_p11), %v844_v18, %v652_v19  ;;  %v660_v35 = vld [vmem:[#allocation2 + $0x48] sm:$0xff] (!%p843_p11)  ;;  %v685_v43 = vadd.f32 (!%p843_p11), %v844_v18, %v662_v40 }
 0x134   : > { %690 = vst [vmem:[%s1190_s3] sm:$0xff] %v674_v20  ;;  %692 = vst [vmem:[%s1190_s3 + $0x10] sm:$0xff] %v676_v25  ;;  %v683_v38 = vadd.f32 %v844_v18, %v660_v35 }
 0x135   : > { %691 = vst [vmem:[%s1190_s3 + $0x8] sm:$0xff] %v675_v21  ;;  %693 = vst [vmem:[%s1190_s3 + $0x18] sm:$0xff] %v677_v26 }
 0x136   : > { %698 = vst [vmem:[%s1190_s3 + $0x40] sm:$0xff] %v682_v37  ;;  %699 = vst [vmem:[%s1190_s3 + $0x48] sm:$0xff] %v683_v38 }
 0x137   : > { %v657_v29 = vld [vmem:[#allocation2 + $0x30] sm:$0xff]  ;;  %700 = vst [vmem:[%s1190_s3 + $0x50] sm:$0xff] %v684_v39  ;;  %701 = vst [vmem:[%s1190_s3 + $0x58] sm:$0xff] %v685_v43 }
 0x138   : > { %v655_v24 = vld [vmem:[#allocation2 + $0x20] sm:$0xff]  ;;  %v680_v32 = vadd.f32 %v844_v18, %v657_v29  ;;  %v665_v46 = vld [vmem:[#allocation2 + $0x70] sm:$0xff] }
 0x139   : > { %v678_v27 = vadd.f32 %v844_v18, %v655_v24  ;;  %v658_v30 = vld [vmem:[#allocation2 + $0x38] sm:$0xff]  ;;  %v663_v41 = vld [vmem:[#allocation2 + $0x60] sm:$0xff]  ;;  %v688_v48 = vadd.f32 %v844_v18, %v665_v46 }
 0x13a   : > { %v656_v28 = vld [vmem:[#allocation2 + $0x28] sm:$0xff]  ;;  %v681_v33 = vadd.f32 %v844_v18, %v658_v30  ;;  %696 = vst [vmem:[%s1190_s3 + $0x30] sm:$0xff] %v680_v32  ;;  %v686_v44 = vadd.f32 %v844_v18, %v663_v41  ;;  %v666_v47 = vld [vmem:[#allocation2 + $0x78] sm:$0xff] }
 0x13b   : > { %v679_v31 = vadd.f32 %v844_v18, %v656_v28  ;;  %694 = vst [vmem:[%s1190_s3 + $0x20] sm:$0xff] %v678_v27  ;;  %v664_v42 = vld [vmem:[#allocation2 + $0x68] sm:$0xff]  ;;  %v689_v49 = vadd.f32 %v844_v18, %v666_v47  ;;  %704 = vst [vmem:[%s1190_s3 + $0x70] sm:$0xff] %v688_v48 }
 0x13c   : > { %697 = vst [vmem:[%s1190_s3 + $0x38] sm:$0xff] %v681_v33  ;;  %v687_v45 = vadd.f32 %v844_v18, %v664_v42  ;;  %702 = vst [vmem:[%s1190_s3 + $0x60] sm:$0xff] %v686_v44 }
 0x13d   : > { %695 = vst [vmem:[%s1190_s3 + $0x28] sm:$0xff] %v679_v31  ;;  %705 = vst [vmem:[%s1190_s3 + $0x78] sm:$0xff] %v689_v49 }
 0x13e   : > { %703 = vst [vmem:[%s1190_s3 + $0x68] sm:$0xff] %v687_v45 }
 0x13f PF: > { %s13_s16 = sadd.s32 1, %s1008_s16   ;;  %s1191_s12 = smov %s996_s13 }
 0x140   : > { %p10_p12 = scmp.ge.s32.totalorder %s13_s16, 7   ;;  %s1192_s13 = smov %s1066_s20 }
 0x141   : > { %s1193_s14 = smov %s1004_s15  ;;  %s1194_s15 = smov %s1196_s17 }
 0x142   :  { %12 = sbr.rel (!%p10_p12) target bundleno = 3 (0x3), region = 122 }

// kernel: generator_forward.22
= control target key start
LH: loop header
LB: loop body
LE: loop exit
PB: predicated region body
PF: predicated region fallthrough
CT: control target
= control target key end

     0   :  { %s292_s6 = smov 0   ;;  %s316_s0 = inlined_call_operand.vmem [shape: f32[2,64,128], index: 0, kind: input, shape index: {}]   ;;  %s317_s1 = inlined_call_operand.vmem [shape: f32[2,64,128], index: 1, kind: output, shape index: {}]  }
   0x1 LB: > { %s251_s7 = sadd.s32 4294967295, %s280_s6   ;;  %p255_p0 = scmp.ge.s32.totalorder %s280_s6, 1  ;;  %s280_s6 = sphi %s292_s6, %s11_s6  }
   0x2   : > { %p87_p1 = scmp.lt.s32.totalorder %s280_s6, 3 }
   0x4   : > { %p88_p2 = pnand %p255_p0, %p87_p1 }
   0x5   : > { %p107_p3 = scmp.lt.s32.totalorder (!%p88_p2), %s251_s7, 1 }
   0x6   : > { %91 = sbr.rel (%p88_p2) target bundleno = 98 (0x62), region = 24 }
   0xd   : > { %s319_s7 = smov (!%p107_p3, %s251_s7), 1 }
   0xe   : > { %s262_s8 = sshll.u32 %s319_s7, 6 }
   0xf   : > { %s111_s11 = scalar_lea.vmem %s316_s0, %s262_s8  ;;  %s116_s14 = scalar_lea.vmem %s317_s1, %s262_s8 }
  0x10   : > { %v117_v0 = vld [vmem:[%s111_s11] sm:$0xff]  ;;  %v118_v1 = vld [vmem:[%s111_s11 + $0x8] sm:$0xff]  ;;  %v119_v2 = vld [vmem:[%s111_s11 + $0x10] sm:$0xff] }
  0x11   : > { %v125_v3 = vadd.f32 %v118_v1, %v117_v0  ;;  %v120_v4 = vld [vmem:[%s111_s11 + $0x18] sm:$0xff]  ;;  %v121_v6 = vld [vmem:[%s111_s11 + $0x20] sm:$0xff]  ;;  %v122_v8 = vld [vmem:[%s111_s11 + $0x28] sm:$0xff] }
  0x12   : > { %v123_v10 = vld [vmem:[%s111_s11 + $0x30] sm:$0xff]  ;;  %v124_v12 = vld [vmem:[%s111_s11 + $0x38] sm:$0xff] }
  0x13   : > { %v126_v5 = vadd.f32 %v125_v3, %v119_v2 }
  0x15   : > { %v127_v7 = vadd.f32 %v126_v5, %v120_v4 }
  0x17   : > { %v128_v9 = vadd.f32 %v127_v7, %v121_v6 }
  0x19   : > { %v129_v11 = vadd.f32 %v128_v9, %v122_v8 }
  0x1b   : > { %v130_v13 = vadd.f32 %v129_v11, %v123_v10 }
  0x1d   : > { %v131_v14 = vadd.f32 %v130_v13, %v124_v12 }
  0x1f   : > { %v132_v15 = vrot.slane %v131_v14, 4 }
  0x21   : > { %v133_v16 = vadd.f32 %v132_v15, %v131_v14 }
  0x23   : > { %v134_v17 = vrot.slane %v133_v16, 2 }
  0x25   : > { %v135_v18 = vadd.f32 %v134_v17, %v133_v16 }
  0x27   : > { %v136_v19 = vrot.slane %v135_v18, 1 }
  0x29   : > { %v137_v20 = vadd.f32 %v136_v19, %v135_v18 }
  0x2b   : > { %v139_v21 = vmul.f32 0.015625, %v137_v20 }
  0x2d   : > { %v140_v22 = vsub.f32 %v117_v0, %v139_v21  ;;  %v141_v23 = vsub.f32 %v118_v1, %v139_v21  ;;  %v142_v24 = vsub.f32 %v119_v2, %v139_v21  ;;  %v143_v25 = vsub.f32 %v120_v4, %v139_v21 }
  0x2e   : > { %v144_v26 = vsub.f32 %v121_v6, %v139_v21  ;;  %v145_v30 = vsub.f32 %v122_v8, %v139_v21  ;;  %v146_v33 = vsub.f32 %v123_v10, %v139_v21  ;;  %v147_v36 = vsub.f32 %v124_v12, %v139_v21 }
  0x2f   : > { %v148_v27 = vmul.f32 %v140_v22, %v140_v22  ;;  %v149_v28 = vmul.f32 %v141_v23, %v141_v23  ;;  %v150_v29 = vmul.f32 %v142_v24, %v142_v24  ;;  %v151_v31 = vmul.f32 %v143_v25, %v143_v25 }
  0x30   : > { %v152_v34 = vmul.f32 %v144_v26, %v144_v26  ;;  %v153_v37 = vmul.f32 %v145_v30, %v145_v30  ;;  %v154_v39 = vmul.f32 %v146_v33, %v146_v33  ;;  %v155_v41 = vmul.f32 %v147_v36, %v147_v36 }
  0x31   : > { %v156_v32 = vadd.f32 %v149_v28, %v148_v27 }
  0x33   : > { %v157_v35 = vadd.f32 %v156_v32, %v150_v29 }
  0x35   : > { %v158_v38 = vadd.f32 %v157_v35, %v151_v31 }
  0x37   : > { %v159_v40 = vadd.f32 %v158_v38, %v152_v34 }
  0x39   : > { %v160_v42 = vadd.f32 %v159_v40, %v153_v37 }
  0x3b   : > { %v161_v43 = vadd.f32 %v160_v42, %v154_v39 }
  0x3d   : > { %v162_v44 = vadd.f32 %v161_v43, %v155_v41 }
  0x3f   : > { %v163_v45 = vrot.slane %v162_v44, 4 }
  0x41   : > { %v164_v46 = vadd.f32 %v163_v45, %v162_v44 }
  0x43   : > { %v165_v47 = vrot.slane %v164_v46, 2 }
  0x45   : > { %v166_v48 = vadd.f32 %v165_v47, %v164_v46 }
  0x47   : > { %v167_v49 = vrot.slane %v166_v48, 1 }
  0x49   : > { %v168_v50 = vadd.f32 %v167_v49, %v166_v48 }
  0x4b   : > { %v169_v51 = vmul.f32 0.015625, %v168_v50 }
  0x4d   : > { %v170_v52 = vadd.f32 1e-05, %v169_v51 }
  0x4f   : > { %272 = vrsqrt.f32 %v170_v52 }
  0x59   : > { %v273_v53 = vpop.eup %272 }
  0x5a   : > { %v172_v54 = vmul.f32 %v273_v53, %v140_v22  ;;  %v173_v55 = vmul.f32 %v273_v53, %v141_v23  ;;  %v174_v56 = vmul.f32 %v273_v53, %v142_v24  ;;  %v175_v57 = vmul.f32 %v273_v53, %v143_v25 }
  0x5b   : > { %v176_v58 = vmul.f32 %v273_v53, %v144_v26  ;;  %v177_v59 = vmul.f32 %v273_v53, %v145_v30  ;;  %v178_v60 = vmul.f32 %v273_v53, %v146_v33  ;;  %v179_v61 = vmul.f32 %v273_v53, %v147_v36 }
  0x5c   : > { %v180_v62 = vmax.f32 %v172_v54, 0.0  ;;  %v181_v63 = vmax.f32 %v173_v55, 0.0  ;;  %v182_v0 = vmax.f32 %v174_v56, 0.0  ;;  %v183_v1 = vmax.f32 %v175_v57, 0.0 }
  0x5d   : > { %v184_v2 = vmax.f32 %v176_v58, 0.0  ;;  %v185_v3 = vmax.f32 %v177_v59, 0.0  ;;  %v186_v4 = vmax.f32 %v178_v60, 0.0  ;;  %v187_v5 = vmax.f32 %v179_v61, 0.0 }
  0x5e   : > { %188 = vst [vmem:[%s116_s14] sm:$0xff] %v180_v62  ;;  %189 = vst [vmem:[%s116_s14 + $0x8] sm:$0xff] %v181_v63 }
  0x5f   : > { %190 = vst [vmem:[%s116_s14 + $0x10] sm:$0xff] %v182_v0  ;;  %191 = vst [vmem:[%s116_s14 + $0x18] sm:$0xff] %v183_v1 }
  0x60   : > { %192 = vst [vmem:[%s116_s14 + $0x20] sm:$0xff] %v184_v2  ;;  %193 = vst [vmem:[%s116_s14 + $0x28] sm:$0xff] %v185_v3 }
  0x61   : > { %194 = vst [vmem:[%s116_s14 + $0x30] sm:$0xff] %v186_v4  ;;  %195 = vst [vmem:[%s116_s14 + $0x38] sm:$0xff] %v187_v5 }
  0x62 PF: > { %s11_s6 = sadd.s32 1, %s280_s6  }
  0x63   : > { %p8_p4 = scmp.ge.s32.totalorder %s11_s6, 4  }
  0x65   :  { %10 = sbr.rel (!%p8_p4) target bundleno = 1 (0x1), region = 54 }

// kernel: generator_forward.24
= control target key start
LH: loop header
LB: loop body
LE: loop exit
PB: predicated region body
PF: predicated region fallthrough
CT: control target
= control target key end

     0   :  { %s276_s6 = smov 0   ;;  %s300_s0 = inlined_call_operand.vmem [shape: f32[2,16,256], index: 0, kind: input, shape index: {}]   ;;  %s301_s1 = inlined_call_operand.vmem [shape: f32[2,16,256], index: 1, kind: output, shape index: {}]  }
   0x1 LB: > { %s233_s7 = sadd.s32 4294967295, %s264_s6   ;;  %p237_p0 = scmp.ge.s32.totalorder %s264_s6, 1  ;;  %s264_s6 = sphi %s276_s6, %s11_s6  }
   0x2   : > { %p87_p1 = scmp.lt.s32.totalorder %s264_s6, 3 }
   0x4   : > { %p88_p2 = pnand %p237_p0, %p87_p1 }
   0x5   : > { %p107_p3 = scmp.lt.s32.totalorder (!%p88_p2), %s233_s7, 1 }
   0x6   : > { %91 = sbr.rel (%p88_p2) target bundleno = 72 (0x48), region = 24 }
   0xd   : > { %s303_s7 = smov (!%p107_p3, %s233_s7), 1 }
   0xe   : > { %s244_s8 = sshll.u32 %s303_s7, 5 }
   0xf   : > { %s111_s11 = scalar_lea.vmem %s300_s0, %s244_s8  ;;  %s116_s14 = scalar_lea.vmem %s301_s1, %s244_s8 }
  0x10   : > { %v117_v0 = vld [vmem:[%s111_s11] sm:$0xff]  ;;  %v119_v1 = vld [vmem:[%s111_s11 + $0x10] sm:$0xff]  ;;  %v118_v2 = vld [vmem:[%s111_s11 + $0x8] sm:$0xff] }
  0x11   : > { %v121_v3 = vadd.f32 %v119_v1, %v117_v0  ;;  %v120_v4 = vld [vmem:[%s111_s11 + $0x18] sm:$0xff] }
  0x12   : > { %v128_v5 = vadd.f32 %v120_v4, %v118_v2 }
  0x13   : > { %v122_v6 = vrot.slane %v121_v3, 4 }
  0x14   : > { %v129_v7 = vrot.slane %v128_v5, 4 }
  0x15   : > { %v123_v8 = vadd.f32 %v122_v6, %v121_v3 }
  0x16   : > { %v130_v9 = vadd.f32 %v129_v7, %v128_v5 }
  0x17   : > { %v124_v10 = vrot.slane %v123_v8, 2 }
  0x18   : > { %v131_v11 = vrot.slane %v130_v9, 2 }
  0x19   : > { %v125_v12 = vadd.f32 %v124_v10, %v123_v8 }
  0x1a   : > { %v132_v13 = vadd.f32 %v131_v11, %v130_v9 }
  0x1b   : > { %v126_v14 = vrot.slane %v125_v12, 1 }
  0x1c   : > { %v133_v15 = vrot.slane %v132_v13, 1 }
  0x1d   : > { %v127_v16 = vadd.f32 %v126_v14, %v125_v12 }
  0x1e   : > { %v134_v17 = vadd.f32 %v133_v15, %v132_v13 }
  0x1f   : > { %v136_v18 = vmul.f32 0.0625, %v127_v16 }
  0x20   : > { %v137_v19 = vmul.f32 0.0625, %v134_v17 }
  0x21   : > { %v138_v20 = vsub.f32 %v117_v0, %v136_v18  ;;  %v140_v21 = vsub.f32 %v119_v1, %v136_v18 }
  0x22   : > { %v139_v22 = vsub.f32 %v118_v2, %v137_v19  ;;  %v141_v23 = vsub.f32 %v120_v4, %v137_v19 }
  0x23   : > { %v142_v24 = vmul.f32 %v138_v20, %v138_v20  ;;  %v144_v25 = vmul.f32 %v140_v21, %v140_v21 }
  0x24   : > { %v143_v26 = vmul.f32 %v139_v22, %v139_v22  ;;  %v145_v27 = vmul.f32 %v141_v23, %v141_v23 }
  0x25   : > { %v146_v28 = vadd.f32 %v144_v25, %v142_v24 }
  0x26   : > { %v153_v29 = vadd.f32 %v145_v27, %v143_v26 }
  0x27   : > { %v147_v30 = vrot.slane %v146_v28, 4 }
  0x28   : > { %v154_v31 = vrot.slane %v153_v29, 4 }
  0x29   : > { %v148_v32 = vadd.f32 %v147_v30, %v146_v28 }
  0x2a   : > { %v155_v33 = vadd.f32 %v154_v31, %v153_v29 }
  0x2b   : > { %v149_v34 = vrot.slane %v148_v32, 2 }
  0x2c   : > { %v156_v35 = vrot.slane %v155_v33, 2 }
  0x2d   : > { %v150_v36 = vadd.f32 %v149_v34, %v148_v32 }
  0x2e   : > { %v157_v37 = vadd.f32 %v156_v35, %v155_v33 }
  0x2f   : > { %v151_v38 = vrot.slane %v150_v36, 1 }
  0x30   : > { %v158_v39 = vrot.slane %v157_v37, 1 }
  0x31   : > { %v152_v40 = vadd.f32 %v151_v38, %v150_v36 }
  0x32   : > { %v159_v41 = vadd.f32 %v158_v39, %v157_v37 }
  0x33   : > { %v160_v42 = vmul.f32 0.0625, %v152_v40 }
  0x34   : > { %v161_v43 = vmul.f32 0.0625, %v159_v41 }
  0x35   : > { %v162_v44 = vadd.f32 1e-05, %v160_v42 }
  0x36   : > { %v163_v45 = vadd.f32 1e-05, %v161_v43 }
  0x37   : > { %254 = vrsqrt.f32 %v162_v44 }
  0x38   : > { %256 = vrsqrt.f32 %v163_v45 }
  0x41   : > { %v255_v46 = vpop.eup %254 }
  0x42   : > { %v257_v47 = vpop.eup %256  ;;  %v166_v48 = vmul.f32 %v255_v46, %v138_v20  ;;  %v168_v49 = vmul.f32 %v255_v46, %v140_v21 }
  0x43   : > { %v167_v50 = vmul.f32 %v257_v47, %v139_v22  ;;  %v169_v51 = vmul.f32 %v257_v47, %v141_v23 }
  0x44   : > { %v170_v52 = vmax.f32 %v166_v48, 0.0  ;;  %v172_v53 = vmax.f32 %v168_v49, 0.0 }
  0x45   : > { %v171_v54 = vmax.f32 %v167_v50, 0.0  ;;  %v173_v55 = vmax.f32 %v169_v51, 0.0 }
  0x46   : > { %174 = vst [vmem:[%s116_s14] sm:$0xff] %v170_v52  ;;  %176 = vst [vmem:[%s116_s14 + $0x10] sm:$0xff] %v172_v53 }
  0x47   : > { %175 = vst [vmem:[%s116_s14 + $0x8] sm:$0xff] %v171_v54  ;;  %177 = vst [vmem:[%s116_s14 + $0x18] sm:$0xff] %v173_v55 }
  0x48 PF: > { %s11_s6 = sadd.s32 1, %s264_s6  }
  0x49   : > { %p8_p4 = scmp.ge.s32.totalorder %s11_s6, 4  }
  0x4b   :  { %10 = sbr.rel (!%p8_p4) target bundleno = 1 (0x1), region = 54 }

// kernel: generator_forward.23
= control target key start
LH: loop header
LB: loop body
LE: loop exit
PB: predicated region body
PF: predicated region fallthrough
CT: control target
= control target key end

     0   :  { %s1770_s12 = smov 0   ;;  %s1772_s13 = smov 0   ;;  %s2145_s0 = inlined_call_operand.vmem [shape: bf16[128,1152], index: 0, kind: input, shape index: {}]   ;;  %s2146_s1 = inlined_call_operand.vmem [shape: bf16[1152,256], index: 1, kind: input, shape index: {}]   ;;  %s2147_s2 = inlined_call_operand.vmem [shape: f32[1,256], index: 2, kind: input, shape index: {}]   ;;  %s2148_s3 = inlined_call_operand.vmem [shape: f32[128,256], index: 3, kind: output, shape index: {}]  }
   0x1   :  { %s1774_s14 = smov 0   ;;  %s1776_s15 = smov 0  }
   0x2   :  { %s1778_s16 = smov 0  }
   0x3 LB: > { %s25_s17 = sadd.s32 1, %s1742_s15  ;;  %p48_p1 = scmp.ne.s32.totalorder %s1734_s13, %s1730_s12  ;;  %s1746_s16 = sphi %s1778_s16, %s13_s16   ;;  %s1742_s15 = sphi %s1776_s15, %s2152_s15   ;;  %s1738_s14 = sphi %s1774_s14, %s2151_s14   ;;  %s1734_s13 = sphi %s1772_s13, %s2150_s13   ;;  %s1730_s12 = sphi %s1770_s12, %s2149_s12  }
   0x4   : > { %p26_p0 = scmp.ge.s32.totalorder %s25_s17, 3  ;;  %p49_p2 = scmp.eq.s32.totalorder %s1746_s16, 0 }
   0x5   : > { %s41_s19 = sadd.s32 1, %s1734_s13  ;;  %p1411_p5 = scmp.ge.s32.totalorder %s1746_s16, 3 }
   0x6   : > { %s2154_s17 = smov (%p26_p0, %s25_s17), 0  ;;  %p50_p3 = por %p49_p2, %p48_p1 }
   0x7   : > { %s37_s18 = ssub.s32 %s1742_s15, %s2154_s17  ;;  %164 = sbr.rel (%p1411_p5) target bundleno = 37 (0x25), region = 20 }
   0x8   : > { %p39_p4 = scmp.eq.s32.totalorder %s37_s18, 0 }
   0xa   : > { %s1805_s20 = scalar_select %p39_p4, %s1734_s13, %s41_s19  }
   0xe   : > { %167 = sbr.rel (!%p50_p3) target bundleno = 37 (0x25), region = 24  ;;  %s169_s21 = sand.u32 (%p50_p3), 1, %s1734_s13  }
   0xf   : > { %s1526_s22 = smul.u32 (%p50_p3), 12, %s1742_s15 }
  0x10   : > { %s1560_s23 = smul.u32 (%p50_p3), 192, %s169_s21 }
  0x11   : > { %s1813_s26 = scalar_lea.vmem (%p50_p3), %s2145_s0, %s1526_s22 }
  0x12   : > { %v192_v0 = vld [vmem:[%s1813_s26] sm:$0xff] (%p50_p3)  ;;  %v196_v2 = vld [vmem:[%s1813_s26 + $0x48] sm:$0xff] (%p50_p3)  ;;  %s1818_s27 = scalar_lea.vmem (%p50_p3), [#allocation3], %s1560_s23  ;;  %v200_v4 = vld [vmem:[%s1813_s26 + $0x90] sm:$0xff] (%p50_p3) }
  0x13   : > { %v194_v1 = vld [vmem:[%s1813_s26 + $0x24] sm:$0xff] (%p50_p3)  ;;  %193 = vst [vmem:[%s1818_s27] sm:$0xff] (%p50_p3), %v192_v0  ;;  %197 = vst [vmem:[%s1818_s27 + $0x18] sm:$0xff] (%p50_p3), %v196_v2  ;;  %v198_v3 = vld [vmem:[%s1813_s26 + $0x6c] sm:$0xff] (%p50_p3) }
  0x14   : > { %195 = vst [vmem:[%s1818_s27 + $0xc] sm:$0xff] (%p50_p3), %v194_v1  ;;  %v202_v5 = vld [vmem:[%s1813_s26 + $0xb4] sm:$0xff] (%p50_p3)  ;;  %199 = vst [vmem:[%s1818_s27 + $0x24] sm:$0xff] (%p50_p3), %v198_v3  ;;  %v206_v7 = vld [vmem:[%s1813_s26 + $0xfc] sm:$0xff] (%p50_p3) }
  0x15   : > { %201 = vst [vmem:[%s1818_s27 + $0x30] sm:$0xff] %v200_v4  ;;  %203 = vst [vmem:[%s1818_s27 + $0x3c] sm:$0xff] %v202_v5  ;;  %v204_v6 = vld [vmem:[%s1813_s26 + $0xd8] sm:$0xff]  ;;  %v208_v8 = vld [vmem:[%s1813_s26 + $0x120] sm:$0xff] }
  0x16   : > { %205 = vst [vmem:[%s1818_s27 + $0x48] sm:$0xff] %v204_v6  ;;  %207 = vst [vmem:[%s1818_s27 + $0x54] sm:$0xff] %v206_v7  ;;  %v210_v9 = vld [vmem:[%s1813_s26 + $0x144] sm:$0xff]  ;;  %v214_v11 = vld [vmem:[%s1813_s26 + $0x18c] sm:$0xff] }
  0x17   : > { %209 = vst [vmem:[%s1818_s27 + $0x60] sm:$0xff] %v208_v8  ;;  %v212_v10 = vld [vmem:[%s1813_s26 + $0x168] sm:$0xff]  ;;  %211 = vst [vmem:[%s1818_s27 + $0x6c] sm:$0xff] %v210_v9  ;;  %v216_v12 = vld [vmem:[%s1813_s26 + $0x1b0] sm:$0xff] }
  0x18   : > { %213 = vst [vmem:[%s1818_s27 + $0x78] sm:$0xff] %v212_v10  ;;  %215 = vst [vmem:[%s1818_s27 + $0x84] sm:$0xff] %v214_v11  ;;  %v218_v13 = vld [vmem:[%s1813_s26 + $0x1d4] sm:$0xff]  ;;  %v222_v15 = vld [vmem:[%s1813_s26 + $0x21c] sm:$0xff] }
  0x19   : > { %v220_v14 = vld [vmem:[%s1813_s26 + $0x1f8] sm:$0xff]  ;;  %217 = vst [vmem:[%s1818_s27 + $0x90] sm:$0xff] %v216_v12  ;;  %219 = vst [vmem:[%s1818_s27 + $0x9c] sm:$0xff] %v218_v13  ;;  %v1413_v16 = vld [vmem:[%s1813_s26 + $0x8] sm:$0xf] }
  0x1a   : > { %221 = vst [vmem:[%s1818_s27 + $0xa8] sm:$0xff] %v220_v14  ;;  %v1415_v17 = vld [vmem:[%s1813_s26 + $0x2c] sm:$0xf]  ;;  %223 = vst [vmem:[%s1818_s27 + $0xb4] sm:$0xff] %v222_v15  ;;  %v1417_v18 = vld [vmem:[%s1813_s26 + $0x50] sm:$0xf] }
  0x1b   : > { %1414 = vst [vmem:[%s1818_s27 + $0x8] sm:$0xf] %v1413_v16  ;;  %1416 = vst [vmem:[%s1818_s27 + $0x14] sm:$0xf] %v1415_v17  ;;  %v1419_v19 = vld [vmem:[%s1813_s26 + $0x74] sm:$0xf] }
  0x1c   : > { %v1421_v20 = vld [vmem:[%s1813_s26 + $0x98] sm:$0xf]  ;;  %1418 = vst [vmem:[%s1818_s27 + $0x20] sm:$0xf] %v1417_v18  ;;  %1420 = vst [vmem:[%s1818_s27 + $0x2c] sm:$0xf] %v1419_v19 }
  0x1d   : > { %1422 = vst [vmem:[%s1818_s27 + $0x38] sm:$0xf] %v1421_v20  ;;  %v1423_v21 = vld [vmem:[%s1813_s26 + $0xbc] sm:$0xf]  ;;  %v1425_v22 = vld [vmem:[%s1813_s26 + $0xe0] sm:$0xf] }
  0x1e   : > { %v1427_v23 = vld [vmem:[%s1813_s26 + $0x104] sm:$0xf]  ;;  %1424 = vst [vmem:[%s1818_s27 + $0x44] sm:$0xf] %v1423_v21  ;;  %1426 = vst [vmem:[%s1818_s27 + $0x50] sm:$0xf] %v1425_v22 }
  0x1f   : > { %1428 = vst [vmem:[%s1818_s27 + $0x5c] sm:$0xf] %v1427_v23  ;;  %v1429_v24 = vld [vmem:[%s1813_s26 + $0x128] sm:$0xf]  ;;  %v1431_v25 = vld [vmem:[%s1813_s26 + $0x14c] sm:$0xf] }
  0x20   : > { %v1433_v26 = vld [vmem:[%s1813_s26 + $0x170] sm:$0xf]  ;;  %1430 = vst [vmem:[%s1818_s27 + $0x68] sm:$0xf] %v1429_v24  ;;  %1432 = vst [vmem:[%s1818_s27 + $0x74] sm:$0xf] %v1431_v25 }
  0x21   : > { %1434 = vst [vmem:[%s1818_s27 + $0x80] sm:$0xf] %v1433_v26  ;;  %v1435_v27 = vld [vmem:[%s1813_s26 + $0x194] sm:$0xf]  ;;  %v1437_v28 = vld [vmem:[%s1813_s26 + $0x1b8] sm:$0xf] }
  0x22   : > { %v1439_v29 = vld [vmem:[%s1813_s26 + $0x1dc] sm:$0xf]  ;;  %1436 = vst [vmem:[%s1818_s27 + $0x8c] sm:$0xf] %v1435_v27  ;;  %1438 = vst [vmem:[%s1818_s27 + $0x98] sm:$0xf] %v1437_v28 }
  0x23   : > { %1440 = vst [vmem:[%s1818_s27 + $0xa4] sm:$0xf] %v1439_v29  ;;  %v1441_v30 = vld [vmem:[%s1813_s26 + $0x200] sm:$0xf]  ;;  %v1443_v31 = vld [vmem:[%s1813_s26 + $0x224] sm:$0xf] }
  0x24   : > { %1442 = vst [vmem:[%s1818_s27 + $0xb0] sm:$0xf] %v1441_v30  ;;  %1444 = vst [vmem:[%s1818_s27 + $0xbc] sm:$0xf] %v1443_v31 }
  0x25 PF: > { %p1445_p6 = scmp.ge.s32.totalorder %s1746_s16, 1  ;;  %p282_p7 = scmp.lt.s32.totalorder %s1746_s16, 4 }
  0x27   : > { %p283_p8 = pnand %p1445_p6, %p282_p7 }
  0x28   : > { %s289_s28 = sand.u32 (!%p283_p8), 1, %s1730_s12   ;;  %s333_s29 = smul.u32 (!%p283_p8), 48, %s1738_s14 }
  0x29   : > { %286 = sbr.rel (%p283_p8) target bundleno = 419 (0x1a3), region = 54  ;;  %p1448_p10 = scmp.ne.s32.totalorder (!%p283_p8), %s1738_s14, 0 }
  0x2a   : > { %s1561_s30 = smul.u32 (!%p283_p8), 192, %s289_s28  ;;  %p335_p9 = scmp.lt.s32.totalorder (!%p283_p8), %s333_s29, 143 }
  0x2c   : > { %s1890_s8 = scalar_lea.vmem (!%p283_p8), [#allocation3], %s1561_s30 }
  0x30   : > { %s2156_s29 = smov (!%p335_p9, %s333_s29), 143  ;;  %366 = sbr.rel (%p1448_p10) target bundleno = 66 (0x42), region = 62 }
  0x31   : > { %s1527_s4 = sshll.u32 %s2156_s29, 3  ;;  %v1748_v32 = vmov (!%p1448_p10), 0.0  }
  0x32   : > { %s1888_s7 = scalar_lea.vmem %s2146_s1, %s1527_s4  ;;  %367 = vst [vmem:[#allocation2] sm:$0xff] (!%p1448_p10), %v1748_v32  ;;  %368 = vst [vmem:[#allocation2 + $0x8] sm:$0xff] (!%p1448_p10), %v1748_v32 }
  0x33   : > { %369 = vst [vmem:[#allocation2 + $0x10] sm:$0xff] (!%p1448_p10), %v1748_v32  ;;  %370 = vst [vmem:[#allocation2 + $0x18] sm:$0xff] (!%p1448_p10), %v1748_v32 }
  0x34   : > { %371 = vst [vmem:[#allocation2 + $0x20] sm:$0xff] (!%p1448_p10), %v1748_v32  ;;  %372 = vst [vmem:[#allocation2 + $0x28] sm:$0xff] (!%p1448_p10), %v1748_v32 }
  0x35   : > { %373 = vst [vmem:[#allocation2 + $0x30] sm:$0xff] (!%p1448_p10), %v1748_v32  ;;  %374 = vst [vmem:[#allocation2 + $0x38] sm:$0xff] (!%p1448_p10), %v1748_v32 }
  0x36   : > { %375 = vst [vmem:[#allocation2 + $0x40] sm:$0xff] (!%p1448_p10), %v1748_v32  ;;  %376 = vst [vmem:[#allocation2 + $0x48] sm:$0xff] (!%p1448_p10), %v1748_v32 }
  0x37   : > { %377 = vst [vmem:[#allocation2 + $0x50] sm:$0xff] %v1748_v32  ;;  %378 = vst [vmem:[#allocation2 + $0x58] sm:$0xff] %v1748_v32 }
  0x38   : > { %379 = vst [vmem:[#allocation2 + $0x60] sm:$0xff] %v1748_v32  ;;  %380 = vst [vmem:[#allocation2 + $0x68] sm:$0xff] %v1748_v32 }
  0x39   : > { %381 = vst [vmem:[#allocation2 + $0x70] sm:$0xff] %v1748_v32  ;;  %382 = vst [vmem:[#allocation2 + $0x78] sm:$0xff] %v1748_v32 }
  0x3a   : > { %383 = vst [vmem:[#allocation2 + $0x80] sm:$0xff] %v1748_v32  ;;  %384 = vst [vmem:[#allocation2 + $0x88] sm:$0xff] %v1748_v32 }
  0x3b   : > { %385 = vst [vmem:[#allocation2 + $0x90] sm:$0xff] %v1748_v32  ;;  %386 = vst [vmem:[#allocation2 + $0x98] sm:$0xff] %v1748_v32 }
  0x3c   : > { %387 = vst [vmem:[#allocation2 + $0xa0] sm:$0xff] %v1748_v32  ;;  %388 = vst [vmem:[#allocation2 + $0xa8] sm:$0xff] %v1748_v32 }
  0x3d   : > { %389 = vst [vmem:[#allocation2 + $0xb0] sm:$0xff] %v1748_v32  ;;  %390 = vst [vmem:[#allocation2 + $0xb8] sm:$0xff] %v1748_v32 }
  0x3e   : > { %391 = vst [vmem:[#allocation2 + $0xc0] sm:$0xff] %v1748_v32  ;;  %392 = vst [vmem:[#allocation2 + $0xc8] sm:$0xff] %v1748_v32 }
  0x3f   : > { %393 = vst [vmem:[#allocation2 + $0xd0] sm:$0xff] %v1748_v32  ;;  %394 = vst [vmem:[#allocation2 + $0xd8] sm:$0xff] %v1748_v32 }
  0x40   : > { %395 = vst [vmem:[#allocation2 + $0xe0] sm:$0xff] %v1748_v32  ;;  %396 = vst [vmem:[#allocation2 + $0xe8] sm:$0xff] %v1748_v32 }
  0x41   : > { %397 = vst [vmem:[#allocation2 + $0xf0] sm:$0xff] %v1748_v32  ;;  %398 = vst [vmem:[#allocation2 + $0xf8] sm:$0xff] %v1748_v32 }
  0x42 PF: > { %v1604_v33 = vld [vmem:[%s1888_s7 + $0x4] ss:$8 sps:$4 sm:$0xff]   ;;  %v1606_v34 = vld [vmem:[%s1888_s7] ss:$8 sps:$4 sm:$0xff]   ;;  %v1749_v35 = vmov 0   ;;  %p1521_p11 = scmp.ne.s32.totalorder %s1738_s14, 2 }
  0x43   : > { %1024 = vmatprep.mubr.bf16.mxu0 %v1749_v35  ;;  %879 = vmatprep.subr.bf16.mxu1 %v1604_v33  ;;  %v1607_v36 = vld [vmem:[%s1888_s7 + $0x14] ss:$8 sps:$4 sm:$0xff]   ;;  %v1609_v37 = vld [vmem:[%s1888_s7 + $0x10] ss:$8 sps:$4 sm:$0xff]   ;;  %v1610_v38 = vld [vmem:[%s1888_s7 + $0x24] ss:$8 sps:$4 sm:$0xff]  }
  0x44   : > { %880 = vmatpush1.bf16.msra.mxu1 %v1606_v34  ;;  %v1612_v39 = vld [vmem:[%s1888_s7 + $0x20] ss:$8 sps:$4 sm:$0xff]   ;;  %v1613_v40 = vld [vmem:[%s1888_s7 + $0x34] ss:$8 sps:$4 sm:$0xff]   ;;  %v1615_v41 = vld [vmem:[%s1888_s7 + $0x30] ss:$8 sps:$4 sm:$0xff]  }
  0x45   : > { %881 = vmatprep.subr.bf16.mxu1 %v1607_v36  ;;  %v1628_v42 = vld [vmem:[%s1888_s7 + $0x104] ss:$8 sps:$4 sm:$0xff]   ;;  %v1630_v43 = vld [vmem:[%s1888_s7 + $0x100] ss:$8 sps:$4 sm:$0xff]   ;;  %v1634_v45 = vld [vmem:[%s1888_s7 + $0x114] ss:$8 sps:$4 sm:$0xff]  }
  0x46   : > { %v1616_v44 = vld [vmem:[%s1888_s7 + $0x44] ss:$8 sps:$4 sm:$0xff]   ;;  %992 = vmatprep.subr.bf16.mxu0 %v1628_v42  ;;  %v1636_v46 = vld [vmem:[%s1888_s7 + $0x110] ss:$8 sps:$4 sm:$0xff]   ;;  %v1618_v47 = vld [vmem:[%s1888_s7 + $0x40] ss:$8 sps:$4 sm:$0xff]  }
  0x47   : > { %993 = vmatpush1.bf16.msra.mxu0 %v1630_v43  ;;  %v1619_v48 = vld [vmem:[%s1888_s7 + $0x54] ss:$8 sps:$4 sm:$0xff]   ;;  %v1640_v49 = vld [vmem:[%s1888_s7 + $0x124] ss:$8 sps:$4 sm:$0xff]   ;;  %v1642_v50 = vld [vmem:[%s1888_s7 + $0x120] ss:$8 sps:$4 sm:$0xff]  }
  0x48   : > { %882 = vmatpush1.bf16.msra.mxu1 %v1609_v37  ;;  %994 = vmatprep.subr.bf16.mxu0 %v1634_v45  ;;  %v1621_v51 = vld [vmem:[%s1888_s7 + $0x50] ss:$8 sps:$4 sm:$0xff]   ;;  %v1646_v52 = vld [vmem:[%s1888_s7 + $0x134] ss:$8 sps:$4 sm:$0xff]   ;;  %v1622_v53 = vld [vmem:[%s1888_s7 + $0x64] ss:$8 sps:$4 sm:$0xff]  }
  0x49   : > { %883 = vmatprep.subr.bf16.mxu1 %v1610_v38  ;;  %v1648_v54 = vld [vmem:[%s1888_s7 + $0x130] ss:$8 sps:$4 sm:$0xff]   ;;  %v1624_v55 = vld [vmem:[%s1888_s7 + $0x60] ss:$8 sps:$4 sm:$0xff]   ;;  %v1652_v56 = vld [vmem:[%s1888_s7 + $0x144] ss:$8 sps:$4 sm:$0xff]  }
  0x4a   : > { %v1625_v57 = vld [vmem:[%s1888_s7 + $0x74] ss:$8 sps:$4 sm:$0xff]   ;;  %v1654_v58 = vld [vmem:[%s1888_s7 + $0x140] ss:$8 sps:$4 sm:$0xff]   ;;  %v1627_v59 = vld [vmem:[%s1888_s7 + $0x70] ss:$8 sps:$4 sm:$0xff]  }
  0x4b   : > { %995 = vmatpush1.bf16.msra.mxu0 %v1636_v46  ;;  %v1658_v60 = vld [vmem:[%s1888_s7 + $0x154] ss:$8 sps:$4 sm:$0xff]   ;;  %v1631_v61 = vld [vmem:[%s1888_s7 + $0x84] ss:$8 sps:$4 sm:$0xff]   ;;  %v1660_v62 = vld [vmem:[%s1888_s7 + $0x150] ss:$8 sps:$4 sm:$0xff]  }
  0x4c   : > { %884 = vmatpush1.bf16.msra.mxu1 %v1612_v39  ;;  %996 = vmatprep.subr.bf16.mxu0 %v1640_v49  ;;  %v1633_v63 = vld [vmem:[%s1888_s7 + $0x80] ss:$8 sps:$4 sm:$0xff]   ;;  %v1664_v0 = vld [vmem:[%s1888_s7 + $0x164] ss:$8 sps:$4 sm:$0xff]   ;;  %v1637_v1 = vld [vmem:[%s1888_s7 + $0x94] ss:$8 sps:$4 sm:$0xff]  }
  0x4d   : > { %885 = vmatprep.subr.bf16.mxu1 %v1613_v40  ;;  %v1639_v2 = vld [vmem:[%s1888_s7 + $0x90] ss:$8 sps:$4 sm:$0xff]   ;;  %v1666_v3 = vld [vmem:[%s1888_s7 + $0x160] ss:$8 sps:$4 sm:$0xff]   ;;  %v1670_v5 = vld [vmem:[%s1888_s7 + $0x174] ss:$8 sps:$4 sm:$0xff]  }
  0x4e   : > { %v1679_v4 = vld [vmem:[%s1890_s8 + $0x4] ss:$12 sps:$4 sm:$0xff]   ;;  %v1645_v8 = vld [vmem:[%s1888_s7 + $0xa0] ss:$8 sps:$4 sm:$0xff]   ;;  %v1649_v9 = vld [vmem:[%s1888_s7 + $0xb4] ss:$8 sps:$4 sm:$0xff]  }
  0x4f   : > { %997 = vmatpush1.bf16.msra.mxu0 %v1642_v50  ;;  %v1643_v6 = vld [vmem:[%s1888_s7 + $0xa4] ss:$8 sps:$4 sm:$0xff]   ;;  %911 = vmatprep.mubr.bf16.mxu1 %v1679_v4  ;;  %v1672_v7 = vld [vmem:[%s1888_s7 + $0x170] ss:$8 sps:$4 sm:$0xff]   ;;  %v1676_v10 = vld [vmem:[%s1890_s8 + $0x8] ss:$12 sps:$4 sm:$0xff]  }
  0x50   : > { %886 = vmatpush1.bf16.msra.mxu1 %v1615_v41  ;;  %998 = vmatprep.subr.bf16.mxu0 %v1646_v52  ;;  %v1651_v11 = vld [vmem:[%s1888_s7 + $0xb0] ss:$8 sps:$4 sm:$0xff]   ;;  %v1655_v12 = vld [vmem:[%s1888_s7 + $0xc4] ss:$8 sps:$4 sm:$0xff]   ;;  %v1657_v13 = vld [vmem:[%s1888_s7 + $0xc0] ss:$8 sps:$4 sm:$0xff]  }
  0x51   : > { %887 = vmatprep.subr.bf16.mxu1 %v1616_v44  ;;  %v1661_v14 = vld [vmem:[%s1888_s7 + $0xd4] ss:$8 sps:$4 sm:$0xff]   ;;  %v1680_v15 = vld [vmem:[%s1890_s8 + $0x20] ss:$12 sps:$4 sm:$0xff]   ;;  %v1663_v16 = vld [vmem:[%s1888_s7 + $0xd0] ss:$8 sps:$4 sm:$0xff]  }
  0x52   : > { %v1667_v17 = vld [vmem:[%s1888_s7 + $0xe4] ss:$8 sps:$4 sm:$0xff]   ;;  %v1669_v18 = vld [vmem:[%s1888_s7 + $0xe0] ss:$8 sps:$4 sm:$0xff]   ;;  %v1673_v19 = vld [vmem:[%s1888_s7 + $0xf4] ss:$8 sps:$4 sm:$0xff]  }
  0x53   : > { %999 = vmatpush1.bf16.msra.mxu0 %v1648_v54  ;;  %v1684_v20 = vld [vmem:[%s1890_s8 + $0x38] ss:$12 sps:$4 sm:$0xff]   ;;  %v1677_v22 = vld [vmem:[%s1890_s8] ss:$12 sps:$4 sm:$0xff]   ;;  %v1681_v23 = vld [vmem:[%s1890_s8 + $0x1c] ss:$12 sps:$4 sm:$0xff]  }
  0x54   : > { %888 = vmatpush1.bf16.msra.mxu1 %v1618_v47  ;;  %1000 = vmatprep.subr.bf16.mxu0 %v1652_v56  ;;  %v1675_v21 = vld [vmem:[%s1888_s7 + $0xf0] ss:$8 sps:$4 sm:$0xff]   ;;  %v1685_v26 = vld [vmem:[%s1890_s8 + $0x34] ss:$12 sps:$4 sm:$0xff]   ;;  %v1697_v36 = vld [vmem:[%s1890_s8 + $0x7c] ss:$12 sps:$4 sm:$0xff]  }
  0x55   : > { %889 = vmatprep.subr.bf16.mxu1 %v1619_v48  ;;  %v1688_v24 = vld [vmem:[%s1890_s8 + $0x50] ss:$12 sps:$4 sm:$0xff]   ;;  %v1683_v25 = vld [vmem:[%s1890_s8 + $0x18] ss:$12 sps:$4 sm:$0xff]   ;;  %v1692_v27 = vld [vmem:[%s1890_s8 + $0x68] ss:$12 sps:$4 sm:$0xff]  }
  0x56   : > { %v1687_v28 = vld [vmem:[%s1890_s8 + $0x30] ss:$12 sps:$4 sm:$0xff]   ;;  %v1689_v29 = vld [vmem:[%s1890_s8 + $0x4c] ss:$12 sps:$4 sm:$0xff]   ;;  %v1691_v31 = vld [vmem:[%s1890_s8 + $0x48] ss:$12 sps:$4 sm:$0xff]  }
  0x57   : > { %1001 = vmatpush1.bf16.msra.mxu0 %v1654_v58  ;;  %v1696_v30 = vld [vmem:[%s1890_s8 + $0x80] ss:$12 sps:$4 sm:$0xff]   ;;  %v1693_v32 = vld [vmem:[%s1890_s8 + $0x64] ss:$12 sps:$4 sm:$0xff]   ;;  %v1707_v42 = vld [vmem:[%s1890_s8 + $0xa8] ss:$12 sps:$4 sm:$0xff]  }
  0x58   : > { %890 = vmatpush1.bf16.msra.mxu1 %v1621_v51  ;;  %1002 = vmatprep.subr.bf16.mxu0 %v1658_v60  ;;  %v1700_v33 = vld [vmem:[%s1890_s8 + $0x98] ss:$12 sps:$4 sm:$0xff]   ;;  %v1695_v34 = vld [vmem:[%s1890_s8 + $0x60] ss:$12 sps:$4 sm:$0xff]   ;;  %v1704_v37 = vld [vmem:[%s1890_s8 + $0xb0] ss:$12 sps:$4 sm:$0xff]  }
  0x59   : > { %891 = vmatprep.subr.bf16.mxu1 %v1622_v53  ;;  %v1699_v38 = vld [vmem:[%s1890_s8 + $0x78] ss:$12 sps:$4 sm:$0xff]   ;;  %v1701_v39 = vld [vmem:[%s1890_s8 + $0x94] ss:$12 sps:$4 sm:$0xff]   ;;  %v1703_v40 = vld [vmem:[%s1890_s8 + $0x90] ss:$12 sps:$4 sm:$0xff]  }
  0x5a   : > { %v1705_v41 = vld [vmem:[%s1890_s8 + $0xac] ss:$12 sps:$4 sm:$0xff]   ;;  %v399_v54 = vld [vmem:[#allocation2] sm:$0xff]  ;;  %v401_v60 = vld [vmem:[#allocation2 + $0x10] sm:$0xff] }
  0x5b   : > { %1003 = vmatpush1.bf16.msra.mxu0 %v1660_v62 }
  0x5c   : > { %892 = vmatpush1.bf16.msra.mxu1 %v1624_v55  ;;  %1004 = vmatprep.subr.bf16.mxu0 %v1664_v0  ;;  %v402_v0 = vld [vmem:[#allocation2 + $0x18] sm:$0xff] }
  0x5d   : > { %893 = vmatprep.subr.bf16.mxu1 %v1625_v57  ;;  %v400_v57 = vld [vmem:[#allocation2 + $0x8] sm:$0xff] }
  0x5f   : > { %1005 = vmatpush1.bf16.msra.mxu0 %v1666_v3 }
  0x60   : > { %894 = vmatpush1.bf16.msra.mxu1 %v1627_v59  ;;  %1006 = vmatprep.subr.bf16.mxu0 %v1670_v5 }
  0x61   : > { %895 = vmatprep.subr.bf16.mxu1 %v1631_v61 }
  0x63   : > { %1007 = vmatpush1.bf16.msra.mxu0 %v1672_v7 }
  0x64   : > { %896 = vmatpush1.bf16.msra.mxu1 %v1633_v63 }
  0x65   : > { %897 = vmatprep.subr.bf16.mxu1 %v1637_v1 }
  0x66   : > { %1025 = vmatmul.mubr.bf16.vlgmr.msra.gmra.mrb[0].mxu0 %v1676_v10  ;;  %v403_v10 = vld [vmem:[#allocation2 + $0x20] sm:$0xff] }
  0x67   : > { %1034 = vmatprep.mubr.bf16.mxu0 %v1749_v35 }
  0x68   : > { %898 = vmatpush1.bf16.msra.mxu1 %v1639_v2 }
  0x69   : > { %899 = vmatprep.subr.bf16.mxu1 %v1643_v6 }
  0x6c   : > { %900 = vmatpush1.bf16.msra.mxu1 %v1645_v8 }
  0x6d   : > { %901 = vmatprep.subr.bf16.mxu1 %v1649_v9 }
  0x6e   : > { %1035 = vmatmul.mubr.bf16.gmra.mrb[4].mxu0 %v1680_v15 }
  0x6f   : > { %1044 = vmatprep.mubr.bf16.mxu0 %v1749_v35 }
  0x70   : > { %902 = vmatpush1.bf16.msra.mxu1 %v1651_v11 }
  0x71   : > { %903 = vmatprep.subr.bf16.mxu1 %v1655_v12 }
  0x74   : > { %904 = vmatpush1.bf16.msra.mxu1 %v1657_v13  ;;  %v404_v13 = vld [vmem:[#allocation2 + $0x28] sm:$0xff] }
  0x75   : > { %905 = vmatprep.subr.bf16.mxu1 %v1661_v14 }
  0x76   : > { %1045 = vmatmul.mubr.bf16.gmra.mrb[8].mxu0 %v1684_v20  ;;  %v406_v20 = vld [vmem:[#allocation2 + $0x38] sm:$0xff] }
  0x77   : > { %1054 = vmatprep.mubr.bf16.mxu0 %v1749_v35 }
  0x78   : > { %906 = vmatpush1.bf16.msra.mxu1 %v1663_v16  ;;  %v405_v16 = vld [vmem:[#allocation2 + $0x30] sm:$0xff] }
  0x79   : > { %907 = vmatprep.subr.bf16.mxu1 %v1667_v17 }
  0x7c   : > { %908 = vmatpush1.bf16.msra.mxu1 %v1669_v18 }
  0x7d   : > { %909 = vmatprep.subr.bf16.mxu1 %v1673_v19 }
  0x7e   : > { %1055 = vmatmul.mubr.bf16.gmra.mrb[12].mxu0 %v1688_v24 }
  0x7f   : > { %1064 = vmatprep.mubr.bf16.mxu0 %v1749_v35 }
  0x80   : > { %910 = vmatpush1.bf16.msra.mxu1 %v1675_v21 }
  0x83   : > { %912 = vmatmul.mubr.bf16.vlgmr.msra.gmra.mrb[0].mxu1 %v1677_v22 }
  0x84   : > { %921 = vmatprep.mubr.bf16.mxu1 %v1681_v23 }
  0x86   : > { %1065 = vmatmul.mubr.bf16.gmra.mrb[16].mxu0 %v1692_v27 }
  0x87   : > { %1074 = vmatprep.mubr.bf16.mxu0 %v1749_v35 }
  0x8b   : > { %922 = vmatmul.mubr.bf16.gmra.mrb[4].mxu1 %v1683_v25 }
  0x8c   : > { %931 = vmatprep.mubr.bf16.mxu1 %v1685_v26 }
  0x8e   : > { %1075 = vmatmul.mubr.bf16.gmra.mrb[20].mxu0 %v1696_v30  ;;  %v407_v30 = vld [vmem:[#allocation2 + $0x40] sm:$0xff] }
  0x8f   : > { %1084 = vmatprep.mubr.bf16.mxu0 %v1749_v35 }
  0x93   : > { %932 = vmatmul.mubr.bf16.gmra.mrb[8].mxu1 %v1687_v28 }
  0x94   : > { %941 = vmatprep.mubr.bf16.mxu1 %v1689_v29 }
  0x96   : > { %1085 = vmatmul.mubr.bf16.gmra.mrb[24].mxu0 %v1700_v33  ;;  %v408_v33 = vld [vmem:[#allocation2 + $0x48] sm:$0xff] }
  0x97   : > { %1094 = vmatprep.mubr.bf16.mxu0 %v1749_v35 }
  0x9b   : > { %942 = vmatmul.mubr.bf16.gmra.mrb[12].mxu1 %v1691_v31 }
  0x9c   : > { %951 = vmatprep.mubr.bf16.mxu1 %v1693_v32 }
  0x9e   : > { %1095 = vmatmul.mubr.bf16.gmra.mrb[28].mxu0 %v1704_v37  ;;  %v409_v37 = vld [vmem:[#allocation2 + $0x50] sm:$0xff] }
  0xa3   : > { %952 = vmatmul.mubr.bf16.gmra.mrb[16].mxu1 %v1695_v34 }
  0xa4   : > { %961 = vmatprep.mubr.bf16.mxu1 %v1697_v36 }
  0xab   : > { %962 = vmatmul.mubr.bf16.gmra.mrb[20].mxu1 %v1699_v38 }
  0xac   : > { %971 = vmatprep.mubr.bf16.mxu1 %v1701_v39 }
  0xb3   : > { %972 = vmatmul.mubr.bf16.gmra.mrb[24].mxu1 %v1703_v40 }
  0xb4   : > { %981 = vmatprep.mubr.bf16.mxu1 %v1705_v41  ;;  %v410_v41 = vld [vmem:[#allocation2 + $0x58] sm:$0xff] }
  0xbb   : > { %982 = vmatmul.mubr.bf16.gmra.mrb[28].mxu1 %v1707_v42 }
 0x139   : > { %v1026_v43 = vpop.f32.mrb[0].mxu0 }
 0x13a   : > { %v1028_v44 = vpop.f32.mrb[1].mxu0 }
 0x13b   : > { %v1030_v45 = vpop.f32.mrb[2].mxu0 }
 0x13c   : > { %v1032_v46 = vpop.f32.mrb[3].mxu0 }
 0x141   : > { %v1036_v35 = vpop.f32.mrb[4].mxu0 }
 0x142   : > { %v1038_v47 = vpop.f32.mrb[5].mxu0 }
 0x143   : > { %v1040_v48 = vpop.f32.mrb[6].mxu0 }
 0x144   : > { %v1042_v49 = vpop.f32.mrb[7].mxu0 }
 0x149   : > { %v1046_v50 = vpop.f32.mrb[8].mxu0 }
 0x14a   : > { %v1048_v51 = vpop.f32.mrb[9].mxu0 }
 0x14b   : > { %v1050_v52 = vpop.f32.mrb[10].mxu0 }
 0x14c   : > { %v1973_v53 = vpop.f32.mrb[11].mxu0 }
 0x151   : > { %v1056_v2 = vpop.f32.mrb[12].mxu0 }
 0x152   : > { %v1058_v5 = vpop.f32.mrb[13].mxu0 }
 0x153   : > { %v1975_v7 = vpop.f32.mrb[14].mxu0 }
 0x154   : > { %v1977_v9 = vpop.f32.mrb[15].mxu0 }
 0x156   : > { %v913_v55 = vpop.f32.mrb[0].mxu1 }
 0x157   : > { %v1027_v56 = vadd.f32 %v1026_v43, %v913_v55  ;;  %v915_v58 = vpop.f32.mrb[1].mxu1 }
 0x158   : > { %v1029_v59 = vadd.f32 %v1028_v44, %v915_v58  ;;  %v917_v61 = vpop.f32.mrb[2].mxu1 }
 0x159   : > { %v1105_v62 = vadd.f32 %v1027_v56, %v399_v54  ;;  %v1031_v63 = vadd.f32 %v1030_v45, %v917_v61  ;;  %v919_v1 = vpop.f32.mrb[3].mxu1  ;;  %v1066_v22 = vpop.f32.mrb[16].mxu0  ;;  %v412_v54 = vld [vmem:[#allocation2 + $0x68] sm:$0xff] }
 0x15a   : > { %v1106_v3 = vadd.f32 %v1029_v59, %v400_v57  ;;  %v1033_v4 = vadd.f32 %v1032_v46, %v919_v1  ;;  %v1068_v25 = vpop.f32.mrb[17].mxu0  ;;  %v413_v57 = vld [vmem:[#allocation2 + $0x70] sm:$0xff] }
 0x15b   : > { %1137 = vst [vmem:[#allocation2] sm:$0xff] %v1105_v62  ;;  %v1107_v6 = vadd.f32 %v1031_v63, %v401_v60  ;;  %v1979_v27 = vpop.f32.mrb[18].mxu0  ;;  %v414_v60 = vld [vmem:[#allocation2 + $0x78] sm:$0xff] }
 0x15c   : > { %1138 = vst [vmem:[#allocation2 + $0x8] sm:$0xff] %v1106_v3  ;;  %v1108_v8 = vadd.f32 %v1033_v4, %v402_v0  ;;  %v1981_v29 = vpop.f32.mrb[19].mxu0 }
 0x15d   : > { %1139 = vst [vmem:[#allocation2 + $0x10] sm:$0xff] %v1107_v6 }
 0x15e   : > { %1140 = vst [vmem:[#allocation2 + $0x18] sm:$0xff] %v1108_v8  ;;  %v923_v11 = vpop.f32.mrb[4].mxu1 }
 0x15f   : > { %v1037_v12 = vadd.f32 %v1036_v35, %v923_v11  ;;  %v925_v14 = vpop.f32.mrb[5].mxu1  ;;  %v416_v11 = vld [vmem:[#allocation2 + $0x88] sm:$0xff] }
 0x160   : > { %v1039_v15 = vadd.f32 %v1038_v47, %v925_v14  ;;  %v927_v17 = vpop.f32.mrb[6].mxu1 }
 0x161   : > { %v1109_v18 = vadd.f32 %v1037_v12, %v403_v10  ;;  %v1041_v19 = vadd.f32 %v1040_v48, %v927_v17  ;;  %v929_v21 = vpop.f32.mrb[7].mxu1  ;;  %v1076_v43 = vpop.f32.mrb[20].mxu0 }
 0x162   : > { %v1110_v23 = vadd.f32 %v1039_v15, %v404_v13  ;;  %v1043_v24 = vadd.f32 %v1042_v49, %v929_v21  ;;  %v1078_v46 = vpop.f32.mrb[21].mxu0  ;;  %v417_v13 = vld [vmem:[#allocation2 + $0x90] sm:$0xff] }
 0x163   : > { %1141 = vst [vmem:[#allocation2 + $0x20] sm:$0xff] %v1109_v18  ;;  %v1111_v26 = vadd.f32 %v1041_v19, %v405_v16  ;;  %v1984_v47 = vpop.f32.mrb[22].mxu0  ;;  %v418_v16 = vld [vmem:[#allocation2 + $0x98] sm:$0xff] }
 0x164   : > { %1142 = vst [vmem:[#allocation2 + $0x28] sm:$0xff] %v1110_v23  ;;  %v1112_v28 = vadd.f32 %v1043_v24, %v406_v20  ;;  %v1986_v49 = vpop.f32.mrb[23].mxu0 }
 0x165   : > { %1143 = vst [vmem:[#allocation2 + $0x30] sm:$0xff] %v1111_v26 }
 0x166   : > { %1144 = vst [vmem:[#allocation2 + $0x38] sm:$0xff] %v1112_v28  ;;  %v933_v31 = vpop.f32.mrb[8].mxu1 }
 0x167   : > { %v1047_v32 = vadd.f32 %v1046_v50, %v933_v31  ;;  %v935_v34 = vpop.f32.mrb[9].mxu1  ;;  %v411_v50 = vld [vmem:[#allocation2 + $0x60] sm:$0xff]  ;;  %v420_v31 = vld [vmem:[#allocation2 + $0xa8] sm:$0xff] }
 0x168   : > { %v1049_v36 = vadd.f32 %v1048_v51, %v935_v34  ;;  %v937_v38 = vpop.f32.mrb[10].mxu1 }
 0x169   : > { %v1113_v39 = vadd.f32 %v1047_v32, %v407_v30  ;;  %v1051_v40 = vadd.f32 %v1050_v52, %v937_v38  ;;  %v939_v42 = vpop.f32.mrb[11].mxu1  ;;  %v1086_v62 = vpop.f32.mrb[24].mxu0 }
 0x16a   : > { %v1114_v44 = vadd.f32 %v1049_v36, %v408_v33  ;;  %v1053_v45 = vadd.f32 %v1973_v53, %v939_v42  ;;  %v1088_v1 = vpop.f32.mrb[25].mxu0  ;;  %v421_v33 = vld [vmem:[#allocation2 + $0xb0] sm:$0xff] }
 0x16b   : > { %1145 = vst [vmem:[#allocation2 + $0x40] sm:$0xff] %v1113_v39  ;;  %v1115_v35 = vadd.f32 %v1051_v40, %v409_v37  ;;  %v1090_v4 = vpop.f32.mrb[26].mxu0  ;;  %v422_v37 = vld [vmem:[#allocation2 + $0xb8] sm:$0xff] }
 0x16c   : > { %1146 = vst [vmem:[#allocation2 + $0x48] sm:$0xff] %v1114_v44  ;;  %v1116_v48 = vadd.f32 %v1053_v45, %v410_v41  ;;  %v1092_v6 = vpop.f32.mrb[27].mxu0 }
 0x16d   : > { %1147 = vst [vmem:[#allocation2 + $0x50] sm:$0xff] %v1115_v35 }
 0x16e   : > { %1148 = vst [vmem:[#allocation2 + $0x58] sm:$0xff] %v1116_v48  ;;  %v943_v51 = vpop.f32.mrb[12].mxu1 }
 0x16f   : > { %v1057_v52 = vadd.f32 %v1056_v2, %v943_v51  ;;  %v945_v55 = vpop.f32.mrb[13].mxu1 }
 0x170   : > { %v1059_v56 = vadd.f32 %v1058_v5, %v945_v55  ;;  %v947_v58 = vpop.f32.mrb[14].mxu1  ;;  %v415_v5 = vld [vmem:[#allocation2 + $0x80] sm:$0xff] }
 0x171   : > { %v1117_v53 = vadd.f32 %v1057_v52, %v411_v50  ;;  %v1061_v59 = vadd.f32 %v1975_v7, %v947_v58  ;;  %v949_v61 = vpop.f32.mrb[15].mxu1  ;;  %v1096_v18 = vpop.f32.mrb[28].mxu0  ;;  %v425_v50 = vld [vmem:[#allocation2 + $0xd0] sm:$0xff] }
 0x172   : > { %v1118_v63 = vadd.f32 %v1059_v56, %v412_v54  ;;  %v1063_v0 = vadd.f32 %v1977_v9, %v949_v61  ;;  %v1098_v21 = vpop.f32.mrb[29].mxu0  ;;  %v426_v54 = vld [vmem:[#allocation2 + $0xd8] sm:$0xff]  ;;  %v428_v61 = vld [vmem:[#allocation2 + $0xe8] sm:$0xff] }
 0x173   : > { %1149 = vst [vmem:[#allocation2 + $0x60] sm:$0xff] %v1117_v53  ;;  %v1119_v3 = vadd.f32 %v1061_v59, %v413_v57  ;;  %v1100_v24 = vpop.f32.mrb[30].mxu0  ;;  %v427_v53 = vld [vmem:[#allocation2 + $0xe0] sm:$0xff] }
 0x174   : > { %1150 = vst [vmem:[#allocation2 + $0x68] sm:$0xff] %v1118_v63  ;;  %v1120_v2 = vadd.f32 %v1063_v0, %v414_v60  ;;  %v1102_v26 = vpop.f32.mrb[31].mxu0  ;;  %v429_v0 = vld [vmem:[#allocation2 + $0xf0] sm:$0xff] }
 0x175   : > { %1151 = vst [vmem:[#allocation2 + $0x70] sm:$0xff] %v1119_v3 }
 0x176   : > { %1152 = vst [vmem:[#allocation2 + $0x78] sm:$0xff] %v1120_v2  ;;  %v953_v8 = vpop.f32.mrb[16].mxu1  ;;  %v430_v2 = vld [vmem:[#allocation2 + $0xf8] sm:$0xff] }
 0x177   : > { %v1067_v10 = vadd.f32 %v1066_v22, %v953_v8  ;;  %v955_v7 = vpop.f32.mrb[17].mxu1 }
 0x178   : > { %v1069_v12 = vadd.f32 %v1068_v25, %v955_v7  ;;  %v957_v14 = vpop.f32.mrb[18].mxu1  ;;  %v419_v25 = vld [vmem:[#allocation2 + $0xa0] sm:$0xff]  ;;  %v1207_v7 = vlaneseq (!%p1521_p11) }
 0x179   : > { %v1121_v15 = vadd.f32 %v1067_v10, %v415_v5  ;;  %v1071_v9 = vadd.f32 %v1979_v27, %v957_v14  ;;  %v959_v17 = vpop.f32.mrb[19].mxu1  ;;  %v1173_v14 = vld [vmem:[#allocation2] sm:$0xff] (!%p1521_p11) }
 0x17a   : > { %v1122_v19 = vadd.f32 %v1069_v12, %v416_v11  ;;  %v1073_v20 = vadd.f32 %v1981_v29, %v959_v17  ;;  %v1205_v12 = vld [vmem:[%s2147_s2] sm:$0x3] (!%p1521_p11) }
 0x17b   : > { %1153 = vst [vmem:[#allocation2 + $0x80] sm:$0xff] %v1121_v15  ;;  %v1123_v23 = vadd.f32 %v1071_v9, %v417_v13  ;;  %v1208_v13 = vshrl.u32 (!%p1521_p11), %v1207_v7, 7  ;;  %v1174_v15 = vld [vmem:[#allocation2 + $0x8] sm:$0xff] (!%p1521_p11)  ;;  %v1175_v9 = vld [vmem:[#allocation2 + $0x10] sm:$0xff] (!%p1521_p11) }
 0x17c   : > { %1154 = vst [vmem:[#allocation2 + $0x88] sm:$0xff] %v1122_v19  ;;  %v1124_v22 = vadd.f32 %v1073_v20, %v418_v16  ;;  %v1176_v16 = vld [vmem:[#allocation2 + $0x18] sm:$0xff] (!%p1521_p11)  ;;  %v1177_v19 = vld [vmem:[#allocation2 + $0x20] sm:$0xff] (!%p1521_p11)  ;;  %v1178_v20 = vld [vmem:[#allocation2 + $0x28] sm:$0xff] (!%p1521_p11) }
 0x17d   : > { %1155 = vst [vmem:[#allocation2 + $0x90] sm:$0xff] %v1123_v23  ;;  %v1209_v17 = vsub.s32 (!%p1521_p11), 0, %v1208_v13  ;;  %v1180_v23 = vld [vmem:[#allocation2 + $0x38] sm:$0xff] (!%p1521_p11) }
 0x17e   : > { %1156 = vst [vmem:[#allocation2 + $0x98] sm:$0xff] %v1124_v22  ;;  %v963_v28 = vpop.f32.mrb[20].mxu1  ;;  %v1182_v22 = vld [vmem:[#allocation2 + $0x48] sm:$0xff] (!%p1521_p11) }
 0x17f   : > { %v1077_v30 = vadd.f32 %v1076_v43, %v963_v28  ;;  %v965_v27 = vpop.f32.mrb[21].mxu1  ;;  %v423_v43 = vld [vmem:[#allocation2 + $0xc0] sm:$0xff] }
 0x180   : > { %v1079_v32 = vadd.f32 %v1078_v46, %v965_v27  ;;  %v967_v34 = vpop.f32.mrb[22].mxu1  ;;  %v424_v46 = vld [vmem:[#allocation2 + $0xc8] sm:$0xff] }
 0x181   : > { %v1125_v36 = vadd.f32 %v1077_v30, %v419_v25  ;;  %v1081_v29 = vadd.f32 %v1984_v47, %v967_v34  ;;  %v969_v38 = vpop.f32.mrb[23].mxu1  ;;  %v1998_v25 = vrot.slane (!%p1521_p11), %v1205_v12, %v1209_v17  ;;  %v1184_v30 = vld [vmem:[#allocation2 + $0x58] sm:$0xff] (!%p1521_p11)  ;;  %v1186_v27 = vld [vmem:[#allocation2 + $0x68] sm:$0xff] (!%p1521_p11) }
 0x182   : > { %v1126_v39 = vadd.f32 %v1079_v32, %v420_v31  ;;  %v1083_v40 = vadd.f32 %v1986_v49, %v969_v38  ;;  %v1185_v31 = vld [vmem:[#allocation2 + $0x60] sm:$0xff] (!%p1521_p11)  ;;  %v1187_v32 = vld [vmem:[#allocation2 + $0x70] sm:$0xff] (!%p1521_p11) }
 0x183   : > { %1157 = vst [vmem:[#allocation2 + $0xa0] sm:$0xff] %v1125_v36  ;;  %v1127_v41 = vadd.f32 %v1081_v29, %v421_v33  ;;  %v1188_v33 = vld [vmem:[#allocation2 + $0x78] sm:$0xff] (!%p1521_p11)  ;;  %v1189_v34 = vld [vmem:[#allocation2 + $0x80] sm:$0xff] (!%p1521_p11)  ;;  %v1217_v36 = vadd.f32 (!%p1521_p11), %v1998_v25, %v1173_v14 }
 0x184   : > { %1158 = vst [vmem:[#allocation2 + $0xa8] sm:$0xff] %v1126_v39  ;;  %v1128_v42 = vadd.f32 %v1083_v40, %v422_v37  ;;  %v1219_v37 = vadd.f32 (!%p1521_p11), %v1998_v25, %v1175_v9  ;;  %v1190_v39 = vld [vmem:[#allocation2 + $0x88] sm:$0xff] (!%p1521_p11)  ;;  %v1191_v40 = vld [vmem:[#allocation2 + $0x90] sm:$0xff] (!%p1521_p11) }
 0x185   : > { %1159 = vst [vmem:[#allocation2 + $0xb0] sm:$0xff] %v1127_v41  ;;  %v1192_v41 = vld [vmem:[#allocation2 + $0x98] sm:$0xff] (!%p1521_p11)  ;;  %1249 = vst [vmem:[%s2148_s3] sm:$0xff] (!%p1521_p11), %v1217_v36 }
 0x186   : > { %1160 = vst [vmem:[#allocation2 + $0xb8] sm:$0xff] %v1128_v42  ;;  %v973_v44 = vpop.f32.mrb[24].mxu1  ;;  %v1221_v42 = vadd.f32 (!%p1521_p11), %v1998_v25, %v1177_v19  ;;  %1251 = vst [vmem:[%s2148_s3 + $0x10] sm:$0xff] (!%p1521_p11), %v1219_v37 }
 0x187   : > { %v1087_v45 = vadd.f32 %v1086_v62, %v973_v44  ;;  %v975_v35 = vpop.f32.mrb[25].mxu1 }
 0x188   : > { %v1089_v48 = vadd.f32 %v1088_v1, %v975_v35  ;;  %v977_v51 = vpop.f32.mrb[26].mxu1  ;;  %1253 = vst [vmem:[%s2148_s3 + $0x20] sm:$0xff] (!%p1521_p11), %v1221_v42 }
 0x189   : > { %v1129_v47 = vadd.f32 %v1087_v45, %v423_v43  ;;  %v1091_v52 = vadd.f32 %v1090_v4, %v977_v51  ;;  %v979_v55 = vpop.f32.mrb[27].mxu1 }
 0x18a   : > { %v1130_v56 = vadd.f32 %v1089_v48, %v424_v46  ;;  %v1093_v49 = vadd.f32 %v1092_v6, %v979_v55  ;;  %v1193_v46 = vld [vmem:[#allocation2 + $0xa0] sm:$0xff] (!%p1521_p11) }
 0x18b   : > { %1161 = vst [vmem:[#allocation2 + $0xc0] sm:$0xff] %v1129_v47  ;;  %v1131_v57 = vadd.f32 %v1091_v52, %v425_v50  ;;  %v1194_v35 = vld [vmem:[#allocation2 + $0xa8] sm:$0xff] (!%p1521_p11) }
 0x18c   : > { %1162 = vst [vmem:[#allocation2 + $0xc8] sm:$0xff] %v1130_v56  ;;  %v1132_v58 = vadd.f32 %v1093_v49, %v426_v54  ;;  %v1195_v48 = vld [vmem:[#allocation2 + $0xb0] sm:$0xff] (!%p1521_p11)  ;;  %v1229_v49 = vadd.f32 (!%p1521_p11), %v1998_v25, %v1185_v31 }
 0x18d   : > { %1163 = vst [vmem:[#allocation2 + $0xd0] sm:$0xff] %v1131_v57  ;;  %v1196_v54 = vld [vmem:[#allocation2 + $0xb8] sm:$0xff] (!%p1521_p11) }
 0x18e   : > { %1164 = vst [vmem:[#allocation2 + $0xd8] sm:$0xff] %v1132_v58  ;;  %v983_v59 = vpop.f32.mrb[28].mxu1  ;;  %v1231_v58 = vadd.f32 (!%p1521_p11), %v1998_v25, %v1187_v32  ;;  %1261 = vst [vmem:[%s2148_s3 + $0x60] sm:$0xff] (!%p1521_p11), %v1229_v49 }
 0x18f   : > { %v1097_v60 = vadd.f32 %v1096_v18, %v983_v59  ;;  %v985_v62 = vpop.f32.mrb[29].mxu1  ;;  %v1213_v18 = vsub.s32 (!%p1521_p11), 1, %v1208_v13 }
 0x190   : > { %v1099_v63 = vadd.f32 %v1098_v21, %v985_v62  ;;  %v987_v1 = vpop.f32.mrb[30].mxu1  ;;  %1172 = sbr.rel (%p1521_p11) target bundleno = 419 (0x1a3), region = 66  ;;  %v1179_v21 = vld [vmem:[#allocation2 + $0x30] sm:$0xff] (!%p1521_p11)  ;;  %v1233_v62 = vadd.f32 (!%p1521_p11), %v1998_v25, %v1189_v34  ;;  %1263 = vst [vmem:[%s2148_s3 + $0x70] sm:$0xff] (!%p1521_p11), %v1231_v58 }
 0x191   : > { %v1133_v3 = vadd.f32 %v1097_v60, %v427_v53  ;;  %v1101_v4 = vadd.f32 %v1100_v24, %v987_v1  ;;  %v989_v5 = vpop.f32.mrb[31].mxu1  ;;  %v1181_v24 = vld [vmem:[#allocation2 + $0x40] sm:$0xff] (!%p1521_p11)  ;;  %v2000_v28 = vrot.slane (!%p1521_p11), %v1205_v12, %v1213_v18  ;;  %v1223_v44 = vadd.f32 (!%p1521_p11), %v1998_v25, %v1179_v21 }
 0x192   : > { %v1134_v8 = vadd.f32 %v1099_v63, %v428_v61  ;;  %v1103_v6 = vadd.f32 %v1102_v26, %v989_v5  ;;  %v1183_v26 = vld [vmem:[#allocation2 + $0x50] sm:$0xff] (!%p1521_p11)  ;;  %v1225_v50 = vadd.f32 (!%p1521_p11), %v1998_v25, %v1181_v24  ;;  %v1197_v55 = vld [vmem:[#allocation2 + $0xc0] sm:$0xff] (!%p1521_p11)  ;;  %v1237_v5 = vadd.f32 (!%p1521_p11), %v1998_v25, %v1193_v46  ;;  %1265 = vst [vmem:[%s2148_s3 + $0x80] sm:$0xff] (!%p1521_p11), %v1233_v62 }
 0x193   : > { %1165 = vst [vmem:[#allocation2 + $0xe0] sm:$0xff] %v1133_v3  ;;  %v1135_v10 = vadd.f32 %v1101_v4, %v429_v0  ;;  %v1218_v29 = vadd.f32 (!%p1521_p11), %v2000_v28, %v1174_v15  ;;  %v1220_v38 = vadd.f32 (!%p1521_p11), %v2000_v28, %v1176_v16  ;;  %v1222_v43 = vadd.f32 (!%p1521_p11), %v2000_v28, %v1178_v20  ;;  %v1198_v56 = vld [vmem:[#allocation2 + $0xc8] sm:$0xff] (!%p1521_p11) }
 0x194   : > { %1166 = vst [vmem:[#allocation2 + $0xe8] sm:$0xff] %v1134_v8  ;;  %v1136_v11 = vadd.f32 %v1103_v6, %v430_v2  ;;  %v1224_v45 = vadd.f32 (!%p1521_p11), %v2000_v28, %v1180_v23  ;;  %v1226_v51 = vadd.f32 (!%p1521_p11), %v2000_v28, %v1182_v22  ;;  %v1227_v47 = vadd.f32 (!%p1521_p11), %v1998_v25, %v1183_v26  ;;  %v1199_v59 = vld [vmem:[#allocation2 + $0xd0] sm:$0xff] (!%p1521_p11) }
 0x195   : > { %1167 = vst [vmem:[#allocation2 + $0xf0] sm:$0xff] %v1135_v10  ;;  %1250 = vst [vmem:[%s2148_s3 + $0x8] sm:$0xff] (!%p1521_p11), %v1218_v29  ;;  %v1228_v52 = vadd.f32 (!%p1521_p11), %v2000_v28, %v1184_v30  ;;  %v1230_v57 = vadd.f32 (!%p1521_p11), %v2000_v28, %v1186_v27  ;;  %v1232_v53 = vadd.f32 (!%p1521_p11), %v2000_v28, %v1188_v33  ;;  %v1200_v60 = vld [vmem:[#allocation2 + $0xd8] sm:$0xff] (!%p1521_p11) }
 0x196   : > { %1168 = vst [vmem:[#allocation2 + $0xf8] sm:$0xff] %v1136_v11  ;;  %1252 = vst [vmem:[%s2148_s3 + $0x18] sm:$0xff] (!%p1521_p11), %v1220_v38  ;;  %v1234_v63 = vadd.f32 (!%p1521_p11), %v2000_v28, %v1190_v39  ;;  %v1235_v0 = vadd.f32 (!%p1521_p11), %v1998_v25, %v1191_v40  ;;  %v1236_v1 = vadd.f32 (!%p1521_p11), %v2000_v28, %v1192_v41 }
 0x197   : > { %1254 = vst [vmem:[%s2148_s3 + $0x28] sm:$0xff] %v1222_v43  ;;  %1255 = vst [vmem:[%s2148_s3 + $0x30] sm:$0xff] %v1223_v44  ;;  %v1238_v8 = vadd.f32 %v2000_v28, %v1194_v35  ;;  %v1239_v6 = vadd.f32 %v1998_v25, %v1195_v48  ;;  %v1240_v10 = vadd.f32 %v2000_v28, %v1196_v54 }
 0x198   : > { %1256 = vst [vmem:[%s2148_s3 + $0x38] sm:$0xff] %v1224_v45  ;;  %1257 = vst [vmem:[%s2148_s3 + $0x40] sm:$0xff] %v1225_v50  ;;  %v1241_v11 = vadd.f32 %v1998_v25, %v1197_v55  ;;  %v1242_v7 = vadd.f32 %v2000_v28, %v1198_v56  ;;  %v1243_v12 = vadd.f32 %v1998_v25, %v1199_v59 }
 0x199   : > { %1258 = vst [vmem:[%s2148_s3 + $0x48] sm:$0xff] %v1226_v51  ;;  %1259 = vst [vmem:[%s2148_s3 + $0x50] sm:$0xff] %v1227_v47  ;;  %v1244_v13 = vadd.f32 %v2000_v28, %v1200_v60 }
 0x19a   : > { %v1201_v61 = vld [vmem:[#allocation2 + $0xe0] sm:$0xff]  ;;  %1260 = vst [vmem:[%s2148_s3 + $0x58] sm:$0xff] %v1228_v52  ;;  %1262 = vst [vmem:[%s2148_s3 + $0x68] sm:$0xff] %v1230_v57 }
 0x19b   : > { %v1202_v3 = vld [vmem:[#allocation2 + $0xe8] sm:$0xff]  ;;  %1264 = vst [vmem:[%s2148_s3 + $0x78] sm:$0xff] %v1232_v53  ;;  %1266 = vst [vmem:[%s2148_s3 + $0x88] sm:$0xff] %v1234_v63  ;;  %v1245_v14 = vadd.f32 %v1998_v25, %v1201_v61 }
 0x19c   : > { %v1203_v4 = vld [vmem:[#allocation2 + $0xf0] sm:$0xff]  ;;  %1267 = vst [vmem:[%s2148_s3 + $0x90] sm:$0xff] %v1235_v0  ;;  %1268 = vst [vmem:[%s2148_s3 + $0x98] sm:$0xff] %v1236_v1  ;;  %v1246_v15 = vadd.f32 %v2000_v28, %v1202_v3 }
 0x19d   : > { %v1204_v2 = vld [vmem:[#allocation2 + $0xf8] sm:$0xff]  ;;  %1269 = vst [vmem:[%s2148_s3 + $0xa0] sm:$0xff] %v1237_v5  ;;  %1270 = vst [vmem:[%s2148_s3 + $0xa8] sm:$0xff] %v1238_v8  ;;  %v1247_v9 = vadd.f32 %v1998_v25, %v1203_v4 }
 0x19e   : > { %1271 = vst [vmem:[%s2148_s3 + $0xb0] sm:$0xff] %v1239_v6  ;;  %1272 = vst [vmem:[%s2148_s3 + $0xb8] sm:$0xff] %v1240_v10  ;;  %v1248_v16 = vadd.f32 %v2000_v28, %v1204_v2 }
 0x19f   : > { %1273 = vst [vmem:[%s2148_s3 + $0xc0] sm:$0xff] %v1241_v11  ;;  %1274 = vst [vmem:[%s2148_s3 + $0xc8] sm:$0xff] %v1242_v7 }
 0x1a0   : > { %1275 = vst [vmem:[%s2148_s3 + $0xd0] sm:$0xff] %v1243_v12  ;;  %1276 = vst [vmem:[%s2148_s3 + $0xd8] sm:$0xff] %v1244_v13 }
 0x1a1   : > { %1277 = vst [vmem:[%s2148_s3 + $0xe0] sm:$0xff] %v1245_v14  ;;  %1278 = vst [vmem:[%s2148_s3 + $0xe8] sm:$0xff] %v1246_v15 }
 0x1a2   : > { %1279 = vst [vmem:[%s2148_s3 + $0xf0] sm:$0xff] %v1247_v9  ;;  %1280 = vst [vmem:[%s2148_s3 + $0xf8] sm:$0xff] %v1248_v16 }
 0x1a3 PF: > { %s13_s16 = sadd.s32 1, %s1746_s16   ;;  %s2149_s12 = smov %s1734_s13 }
 0x1a4   : > { %p10_p12 = scmp.ge.s32.totalorder %s13_s16, 5   ;;  %s2150_s13 = smov %s1805_s20 }
 0x1a5   : > { %s2151_s14 = smov %s1742_s15  ;;  %s2152_s15 = smov %s2154_s17 }
 0x1a6   :  { %12 = sbr.rel (!%p10_p12) target bundleno = 3 (0x3), region = 113 }

// kernel: generator_forward.28
= control target key start
LH: loop header
LB: loop body
LE: loop exit
PB: predicated region body
PF: predicated region fallthrough
CT: control target
= control target key end

     0   :  { %s347_s9 = smov 0   ;;  %s372_s0 = inlined_call_operand.vmem [shape: f32[2,16,256], index: 0, kind: input, shape index: {}]   ;;  %s373_s1 = inlined_call_operand.vmem [shape: f32[2,16,256], index: 1, kind: input, shape index: {}]   ;;  %s374_s2 = inlined_call_operand.vmem [shape: f32[2,16,256], index: 2, kind: output, shape index: {}]  }
   0x1 LB: > { %s296_s10 = sadd.s32 4294967295, %s330_s9   ;;  %p300_p0 = scmp.ge.s32.totalorder %s330_s9, 1  ;;  %s330_s9 = sphi %s347_s9, %s12_s9  }
   0x2   : > { %p122_p1 = scmp.lt.s32.totalorder %s330_s9, 3 }
   0x4   : > { %p123_p2 = pnand %p300_p0, %p122_p1 }
   0x5   : > { %p149_p3 = scmp.lt.s32.totalorder (!%p123_p2), %s296_s10, 1 }
   0x6   : > { %126 = sbr.rel (%p123_p2) target bundleno = 72 (0x48), region = 28 }
   0xd   : > { %s376_s10 = smov (!%p149_p3, %s296_s10), 1 }
   0xe   : > { %s355_s11 = sshll.u32 %s376_s10, 5 }
   0xf   : > { %s153_s14 = scalar_lea.vmem %s372_s0, %s355_s11  ;;  %s158_s17 = scalar_lea.vmem %s373_s1, %s355_s11 }
  0x10   : > { %v164_v0 = vld [vmem:[%s153_s14] sm:$0xff]  ;;  %v166_v1 = vld [vmem:[%s153_s14 + $0x10] sm:$0xff]  ;;  %v165_v3 = vld [vmem:[%s153_s14 + $0x8] sm:$0xff]  ;;  %s163_s20 = scalar_lea.vmem %s374_s2, %s355_s11 }
  0x11   : > { %v168_v2 = vadd.f32 %v166_v1, %v164_v0  ;;  %v167_v4 = vld [vmem:[%s153_s14 + $0x18] sm:$0xff]  ;;  %v217_v47 = vld [vmem:[%s158_s17] sm:$0xff]  ;;  %v219_v48 = vld [vmem:[%s158_s17 + $0x10] sm:$0xff] }
  0x12   : > { %v175_v5 = vadd.f32 %v167_v4, %v165_v3  ;;  %v218_v51 = vld [vmem:[%s158_s17 + $0x8] sm:$0xff]  ;;  %v220_v53 = vld [vmem:[%s158_s17 + $0x18] sm:$0xff] }
  0x13   : > { %v169_v6 = vrot.slane %v168_v2, 4 }
  0x14   : > { %v176_v7 = vrot.slane %v175_v5, 4 }
  0x15   : > { %v170_v8 = vadd.f32 %v169_v6, %v168_v2 }
  0x16   : > { %v177_v9 = vadd.f32 %v176_v7, %v175_v5 }
  0x17   : > { %v171_v10 = vrot.slane %v170_v8, 2 }
  0x18   : > { %v178_v11 = vrot.slane %v177_v9, 2 }
  0x19   : > { %v172_v12 = vadd.f32 %v171_v10, %v170_v8 }
  0x1a   : > { %v179_v13 = vadd.f32 %v178_v11, %v177_v9 }
  0x1b   : > { %v173_v14 = vrot.slane %v172_v12, 1 }
  0x1c   : > { %v180_v15 = vrot.slane %v179_v13, 1 }
  0x1d   : > { %v174_v16 = vadd.f32 %v173_v14, %v172_v12 }
  0x1e   : > { %v181_v17 = vadd.f32 %v180_v15, %v179_v13 }
  0x1f   : > { %v183_v18 = vmul.f32 0.0625, %v174_v16 }
  0x20   : > { %v184_v19 = vmul.f32 0.0625, %v181_v17 }
  0x21   : > { %v185_v20 = vsub.f32 %v164_v0, %v183_v18  ;;  %v187_v21 = vsub.f32 %v166_v1, %v183_v18 }
  0x22   : > { %v186_v22 = vsub.f32 %v165_v3, %v184_v19  ;;  %v188_v23 = vsub.f32 %v167_v4, %v184_v19 }
  0x23   : > { %v189_v24 = vmul.f32 %v185_v20, %v185_v20  ;;  %v191_v25 = vmul.f32 %v187_v21, %v187_v21 }
  0x24   : > { %v190_v26 = vmul.f32 %v186_v22, %v186_v22  ;;  %v192_v27 = vmul.f32 %v188_v23, %v188_v23 }
  0x25   : > { %v193_v28 = vadd.f32 %v191_v25, %v189_v24 }
  0x26   : > { %v200_v29 = vadd.f32 %v192_v27, %v190_v26 }
  0x27   : > { %v194_v30 = vrot.slane %v193_v28, 4 }
  0x28   : > { %v201_v31 = vrot.slane %v200_v29, 4 }
  0x29   : > { %v195_v32 = vadd.f32 %v194_v30, %v193_v28 }
  0x2a   : > { %v202_v33 = vadd.f32 %v201_v31, %v200_v29 }
  0x2b   : > { %v196_v34 = vrot.slane %v195_v32, 2 }
  0x2c   : > { %v203_v35 = vrot.slane %v202_v33, 2 }
  0x2d   : > { %v197_v36 = vadd.f32 %v196_v34, %v195_v32 }
  0x2e   : > { %v204_v37 = vadd.f32 %v203_v35, %v202_v33 }
  0x2f   : > { %v198_v38 = vrot.slane %v197_v36, 1 }
  0x30   : > { %v205_v39 = vrot.slane %v204_v37, 1 }
  0x31   : > { %v199_v40 = vadd.f32 %v198_v38, %v197_v36 }
  0x32   : > { %v206_v41 = vadd.f32 %v205_v39, %v204_v37 }
  0x33   : > { %v207_v42 = vmul.f32 0.0625, %v199_v40 }
  0x34   : > { %v208_v43 = vmul.f32 0.0625, %v206_v41 }
  0x35   : > { %v209_v44 = vadd.f32 1e-05, %v207_v42 }
  0x36   : > { %v210_v45 = vadd.f32 1e-05, %v208_v43 }
  0x37   : > { %320 = vrsqrt.f32 %v209_v44 }
  0x38   : > { %322 = vrsqrt.f32 %v210_v45 }
  0x41   : > { %v321_v46 = vpop.eup %320 }
  0x42   : > { %v323_v49 = vpop.eup %322  ;;  %v213_v50 = vmul.f32 %v321_v46, %v185_v20  ;;  %v215_v52 = vmul.f32 %v321_v46, %v187_v21 }
  0x43   : > { %v214_v54 = vmul.f32 %v323_v49, %v186_v22  ;;  %v216_v55 = vmul.f32 %v323_v49, %v188_v23 }
  0x44   : > { %v221_v56 = vadd.f32 %v217_v47, %v213_v50  ;;  %v223_v57 = vadd.f32 %v219_v48, %v215_v52 }
  0x45   : > { %v222_v58 = vadd.f32 %v218_v51, %v214_v54  ;;  %v224_v59 = vadd.f32 %v220_v53, %v216_v55 }
  0x46   : > { %225 = vst [vmem:[%s163_s20] sm:$0xff] %v221_v56  ;;  %227 = vst [vmem:[%s163_s20 + $0x10] sm:$0xff] %v223_v57 }
  0x47   : > { %226 = vst [vmem:[%s163_s20 + $0x8] sm:$0xff] %v222_v58  ;;  %228 = vst [vmem:[%s163_s20 + $0x18] sm:$0xff] %v224_v59 }
  0x48 PF: > { %s12_s9 = sadd.s32 1, %s330_s9  }
  0x49   : > { %p9_p4 = scmp.ge.s32.totalorder %s12_s9, 4  }
  0x4b   :  { %11 = sbr.rel (!%p9_p4) target bundleno = 1 (0x1), region = 61 }

// kernel: generator_forward.25
= control target key start
LH: loop header
LB: loop body
LE: loop exit
PB: predicated region body
PF: predicated region fallthrough
CT: control target
= control target key end

     0   :  { %s1770_s12 = smov 0   ;;  %s1772_s13 = smov 0   ;;  %s2145_s0 = inlined_call_operand.vmem [shape: bf16[128,2304], index: 0, kind: input, shape index: {}]   ;;  %s2146_s1 = inlined_call_operand.vmem [shape: bf16[2304,256], index: 1, kind: input, shape index: {}]   ;;  %s2147_s2 = inlined_call_operand.vmem [shape: f32[1,256], index: 2, kind: input, shape index: {}]   ;;  %s2148_s3 = inlined_call_operand.vmem [shape: f32[128,256], index: 3, kind: output, shape index: {}]  }
   0x1   :  { %s1774_s14 = smov 0   ;;  %s1776_s15 = smov 0  }
   0x2   :  { %s1778_s16 = smov 0  }
   0x3 LB: > { %s25_s17 = sadd.s32 1, %s1742_s15  ;;  %p48_p1 = scmp.ne.s32.totalorder %s1734_s13, %s1730_s12  ;;  %s1746_s16 = sphi %s1778_s16, %s13_s16   ;;  %s1742_s15 = sphi %s1776_s15, %s2152_s15   ;;  %s1738_s14 = sphi %s1774_s14, %s2151_s14   ;;  %s1734_s13 = sphi %s1772_s13, %s2150_s13   ;;  %s1730_s12 = sphi %s1770_s12, %s2149_s12  }
   0x4   : > { %p26_p0 = scmp.ge.s32.totalorder %s25_s17, 6  ;;  %p49_p2 = scmp.eq.s32.totalorder %s1746_s16, 0 }
   0x5   : > { %s41_s19 = sadd.s32 1, %s1734_s13  ;;  %p1411_p5 = scmp.ge.s32.totalorder %s1746_s16, 6 }
   0x6   : > { %s2154_s17 = smov (%p26_p0, %s25_s17), 0  ;;  %p50_p3 = por %p49_p2, %p48_p1 }
   0x7   : > { %s37_s18 = ssub.s32 %s1742_s15, %s2154_s17  ;;  %164 = sbr.rel (%p1411_p5) target bundleno = 37 (0x25), region = 20 }
   0x8   : > { %p39_p4 = scmp.eq.s32.totalorder %s37_s18, 0 }
   0xa   : > { %s1805_s20 = scalar_select %p39_p4, %s1734_s13, %s41_s19  }
   0xe   : > { %167 = sbr.rel (!%p50_p3) target bundleno = 37 (0x25), region = 24  ;;  %s169_s21 = sand.u32 (%p50_p3), 1, %s1734_s13  }
   0xf   : > { %s1526_s22 = smul.u32 (%p50_p3), 12, %s1742_s15 }
  0x10   : > { %s1560_s23 = smul.u32 (%p50_p3), 192, %s169_s21 }
  0x11   : > { %s1813_s26 = scalar_lea.vmem (%p50_p3), %s2145_s0, %s1526_s22 }
  0x12   : > { %v192_v0 = vld [vmem:[%s1813_s26] sm:$0xff] (%p50_p3)  ;;  %v194_v1 = vld [vmem:[%s1813_s26 + $0x48] sm:$0xff] (%p50_p3)  ;;  %v196_v2 = vld [vmem:[%s1813_s26 + $0x90] sm:$0xff] (%p50_p3)  ;;  %s1818_s27 = scalar_lea.vmem (%p50_p3), [#allocation3], %s1560_s23 }
  0x13   : > { %193 = vst [vmem:[%s1818_s27] sm:$0xff] (%p50_p3), %v192_v0  ;;  %195 = vst [vmem:[%s1818_s27 + $0xc] sm:$0xff] (%p50_p3), %v194_v1  ;;  %v198_v3 = vld [vmem:[%s1813_s26 + $0xd8] sm:$0xff] (%p50_p3)  ;;  %v200_v4 = vld [vmem:[%s1813_s26 + $0x120] sm:$0xff] (%p50_p3) }
  0x14   : > { %197 = vst [vmem:[%s1818_s27 + $0x18] sm:$0xff] (%p50_p3), %v196_v2  ;;  %v202_v5 = vld [vmem:[%s1813_s26 + $0x168] sm:$0xff] (%p50_p3)  ;;  %199 = vst [vmem:[%s1818_s27 + $0x24] sm:$0xff] (%p50_p3), %v198_v3  ;;  %v204_v6 = vld [vmem:[%s1813_s26 + $0x1b0] sm:$0xff] (%p50_p3) }
  0x15   : > { %201 = vst [vmem:[%s1818_s27 + $0x30] sm:$0xff] %v200_v4  ;;  %203 = vst [vmem:[%s1818_s27 + $0x3c] sm:$0xff] %v202_v5  ;;  %v206_v7 = vld [vmem:[%s1813_s26 + $0x1f8] sm:$0xff]  ;;  %v208_v8 = vld [vmem:[%s1813_s26 + $0x240] sm:$0xff] }
  0x16   : > { %205 = vst [vmem:[%s1818_s27 + $0x48] sm:$0xff] %v204_v6  ;;  %207 = vst [vmem:[%s1818_s27 + $0x54] sm:$0xff] %v206_v7  ;;  %v210_v9 = vld [vmem:[%s1813_s26 + $0x288] sm:$0xff]  ;;  %v212_v10 = vld [vmem:[%s1813_s26 + $0x2d0] sm:$0xff] }
  0x17   : > { %209 = vst [vmem:[%s1818_s27 + $0x60] sm:$0xff] %v208_v8  ;;  %v214_v11 = vld [vmem:[%s1813_s26 + $0x318] sm:$0xff]  ;;  %211 = vst [vmem:[%s1818_s27 + $0x6c] sm:$0xff] %v210_v9  ;;  %v216_v12 = vld [vmem:[%s1813_s26 + $0x360] sm:$0xff] }
  0x18   : > { %213 = vst [vmem:[%s1818_s27 + $0x78] sm:$0xff] %v212_v10  ;;  %215 = vst [vmem:[%s1818_s27 + $0x84] sm:$0xff] %v214_v11  ;;  %v218_v13 = vld [vmem:[%s1813_s26 + $0x3a8] sm:$0xff]  ;;  %v220_v14 = vld [vmem:[%s1813_s26 + $0x3f0] sm:$0xff] }
  0x19   : > { %217 = vst [vmem:[%s1818_s27 + $0x90] sm:$0xff] %v216_v12  ;;  %219 = vst [vmem:[%s1818_s27 + $0x9c] sm:$0xff] %v218_v13  ;;  %v222_v15 = vld [vmem:[%s1813_s26 + $0x438] sm:$0xff]  ;;  %v1413_v16 = vld [vmem:[%s1813_s26 + $0x8] sm:$0xf] }
  0x1a   : > { %221 = vst [vmem:[%s1818_s27 + $0xa8] sm:$0xff] %v220_v14  ;;  %v1415_v17 = vld [vmem:[%s1813_s26 + $0x50] sm:$0xf]  ;;  %223 = vst [vmem:[%s1818_s27 + $0xb4] sm:$0xff] %v222_v15  ;;  %v1417_v18 = vld [vmem:[%s1813_s26 + $0x98] sm:$0xf] }
  0x1b   : > { %1414 = vst [vmem:[%s1818_s27 + $0x8] sm:$0xf] %v1413_v16  ;;  %1416 = vst [vmem:[%s1818_s27 + $0x14] sm:$0xf] %v1415_v17  ;;  %v1419_v19 = vld [vmem:[%s1813_s26 + $0xe0] sm:$0xf] }
  0x1c   : > { %v1421_v20 = vld [vmem:[%s1813_s26 + $0x128] sm:$0xf]  ;;  %1418 = vst [vmem:[%s1818_s27 + $0x20] sm:$0xf] %v1417_v18  ;;  %1420 = vst [vmem:[%s1818_s27 + $0x2c] sm:$0xf] %v1419_v19 }
  0x1d   : > { %1422 = vst [vmem:[%s1818_s27 + $0x38] sm:$0xf] %v1421_v20  ;;  %v1423_v21 = vld [vmem:[%s1813_s26 + $0x170] sm:$0xf]  ;;  %v1425_v22 = vld [vmem:[%s1813_s26 + $0x1b8] sm:$0xf] }
  0x1e   : > { %v1427_v23 = vld [vmem:[%s1813_s26 + $0x200] sm:$0xf]  ;;  %1424 = vst [vmem:[%s1818_s27 + $0x44] sm:$0xf] %v1423_v21  ;;  %1426 = vst [vmem:[%s1818_s27 + $0x50] sm:$0xf] %v1425_v22 }
  0x1f   : > { %1428 = vst [vmem:[%s1818_s27 + $0x5c] sm:$0xf] %v1427_v23  ;;  %v1429_v24 = vld [vmem:[%s1813_s26 + $0x248] sm:$0xf]  ;;  %v1431_v25 = vld [vmem:[%s1813_s26 + $0x290] sm:$0xf] }
  0x20   : > { %v1433_v26 = vld [vmem:[%s1813_s26 + $0x2d8] sm:$0xf]  ;;  %1430 = vst [vmem:[%s1818_s27 + $0x68] sm:$0xf] %v1429_v24  ;;  %1432 = vst [vmem:[%s1818_s27 + $0x74] sm:$0xf] %v1431_v25 }
  0x21   : > { %1434 = vst [vmem:[%s1818_s27 + $0x80] sm:$0xf] %v1433_v26  ;;  %v1435_v27 = vld [vmem:[%s1813_s26 + $0x320] sm:$0xf]  ;;  %v1437_v28 = vld [vmem:[%s1813_s26 + $0x368] sm:$0xf] }
  0x22   : > { %v1439_v29 = vld [vmem:[%s1813_s26 + $0x3b0] sm:$0xf]  ;;  %1436 = vst [vmem:[%s1818_s27 + $0x8c] sm:$0xf] %v1435_v27  ;;  %1438 = vst [vmem:[%s1818_s27 + $0x98] sm:$0xf] %v1437_v28 }
  0x23   : > { %1440 = vst [vmem:[%s1818_s27 + $0xa4] sm:$0xf] %v1439_v29  ;;  %v1441_v30 = vld [vmem:[%s1813_s26 + $0x3f8] sm:$0xf]  ;;  %v1443_v31 = vld [vmem:[%s1813_s26 + $0x440] sm:$0xf] }
  0x24   : > { %1442 = vst [vmem:[%s1818_s27 + $0xb0] sm:$0xf] %v1441_v30  ;;  %1444 = vst [vmem:[%s1818_s27 + $0xbc] sm:$0xf] %v1443_v31 }
  0x25 PF: > { %p1445_p6 = scmp.ge.s32.totalorder %s1746_s16, 1  ;;  %p282_p7 = scmp.lt.s32.totalorder %s1746_s16, 7 }
  0x27   : > { %p283_p8 = pnand %p1445_p6, %p282_p7 }
  0x28   : > { %s289_s28 = sand.u32 (!%p283_p8), 1, %s1730_s12   ;;  %s333_s29 = smul.u32 (!%p283_p8), 48, %s1738_s14 }
  0x29   : > { %286 = sbr.rel (%p283_p8) target bundleno = 419 (0x1a3), region = 54  ;;  %p1448_p10 = scmp.ne.s32.totalorder (!%p283_p8), %s1738_s14, 0 }
  0x2a   : > { %s1561_s30 = smul.u32 (!%p283_p8), 192, %s289_s28  ;;  %p335_p9 = scmp.lt.s32.totalorder (!%p283_p8), %s333_s29, 287 }
  0x2c   : > { %s1890_s8 = scalar_lea.vmem (!%p283_p8), [#allocation3], %s1561_s30 }
  0x30   : > { %s2156_s29 = smov (!%p335_p9, %s333_s29), 287  ;;  %366 = sbr.rel (%p1448_p10) target bundleno = 66 (0x42), region = 62 }
  0x31   : > { %s1527_s4 = sshll.u32 %s2156_s29, 3  ;;  %v1748_v32 = vmov (!%p1448_p10), 0.0  }
  0x32   : > { %s1888_s7 = scalar_lea.vmem %s2146_s1, %s1527_s4  ;;  %367 = vst [vmem:[#allocation2] sm:$0xff] (!%p1448_p10), %v1748_v32  ;;  %368 = vst [vmem:[#allocation2 + $0x8] sm:$0xff] (!%p1448_p10), %v1748_v32 }
  0x33   : > { %369 = vst [vmem:[#allocation2 + $0x10] sm:$0xff] (!%p1448_p10), %v1748_v32  ;;  %370 = vst [vmem:[#allocation2 + $0x18] sm:$0xff] (!%p1448_p10), %v1748_v32 }
  0x34   : > { %371 = vst [vmem:[#allocation2 + $0x20] sm:$0xff] (!%p1448_p10), %v1748_v32  ;;  %372 = vst [vmem:[#allocation2 + $0x28] sm:$0xff] (!%p1448_p10), %v1748_v32 }
  0x35   : > { %373 = vst [vmem:[#allocation2 + $0x30] sm:$0xff] (!%p1448_p10), %v1748_v32  ;;  %374 = vst [vmem:[#allocation2 + $0x38] sm:$0xff] (!%p1448_p10), %v1748_v32 }
  0x36   : > { %375 = vst [vmem:[#allocation2 + $0x40] sm:$0xff] (!%p1448_p10), %v1748_v32  ;;  %376 = vst [vmem:[#allocation2 + $0x48] sm:$0xff] (!%p1448_p10), %v1748_v32 }
  0x37   : > { %377 = vst [vmem:[#allocation2 + $0x50] sm:$0xff] %v1748_v32  ;;  %378 = vst [vmem:[#allocation2 + $0x58] sm:$0xff] %v1748_v32 }
  0x38   : > { %379 = vst [vmem:[#allocation2 + $0x60] sm:$0xff] %v1748_v32  ;;  %380 = vst [vmem:[#allocation2 + $0x68] sm:$0xff] %v1748_v32 }
  0x39   : > { %381 = vst [vmem:[#allocation2 + $0x70] sm:$0xff] %v1748_v32  ;;  %382 = vst [vmem:[#allocation2 + $0x78] sm:$0xff] %v1748_v32 }
  0x3a   : > { %383 = vst [vmem:[#allocation2 + $0x80] sm:$0xff] %v1748_v32  ;;  %384 = vst [vmem:[#allocation2 + $0x88] sm:$0xff] %v1748_v32 }
  0x3b   : > { %385 = vst [vmem:[#allocation2 + $0x90] sm:$0xff] %v1748_v32  ;;  %386 = vst [vmem:[#allocation2 + $0x98] sm:$0xff] %v1748_v32 }
  0x3c   : > { %387 = vst [vmem:[#allocation2 + $0xa0] sm:$0xff] %v1748_v32  ;;  %388 = vst [vmem:[#allocation2 + $0xa8] sm:$0xff] %v1748_v32 }
  0x3d   : > { %389 = vst [vmem:[#allocation2 + $0xb0] sm:$0xff] %v1748_v32  ;;  %390 = vst [vmem:[#allocation2 + $0xb8] sm:$0xff] %v1748_v32 }
  0x3e   : > { %391 = vst [vmem:[#allocation2 + $0xc0] sm:$0xff] %v1748_v32  ;;  %392 = vst [vmem:[#allocation2 + $0xc8] sm:$0xff] %v1748_v32 }
  0x3f   : > { %393 = vst [vmem:[#allocation2 + $0xd0] sm:$0xff] %v1748_v32  ;;  %394 = vst [vmem:[#allocation2 + $0xd8] sm:$0xff] %v1748_v32 }
  0x40   : > { %395 = vst [vmem:[#allocation2 + $0xe0] sm:$0xff] %v1748_v32  ;;  %396 = vst [vmem:[#allocation2 + $0xe8] sm:$0xff] %v1748_v32 }
  0x41   : > { %397 = vst [vmem:[#allocation2 + $0xf0] sm:$0xff] %v1748_v32  ;;  %398 = vst [vmem:[#allocation2 + $0xf8] sm:$0xff] %v1748_v32 }
  0x42 PF: > { %v1604_v33 = vld [vmem:[%s1888_s7 + $0x4] ss:$8 sps:$4 sm:$0xff]   ;;  %v1606_v34 = vld [vmem:[%s1888_s7] ss:$8 sps:$4 sm:$0xff]   ;;  %v1749_v35 = vmov 0   ;;  %p1521_p11 = scmp.ne.s32.totalorder %s1738_s14, 5 }
  0x43   : > { %1024 = vmatprep.mubr.bf16.mxu0 %v1749_v35  ;;  %879 = vmatprep.subr.bf16.mxu1 %v1604_v33  ;;  %v1607_v36 = vld [vmem:[%s1888_s7 + $0x14] ss:$8 sps:$4 sm:$0xff]   ;;  %v1609_v37 = vld [vmem:[%s1888_s7 + $0x10] ss:$8 sps:$4 sm:$0xff]   ;;  %v1610_v38 = vld [vmem:[%s1888_s7 + $0x24] ss:$8 sps:$4 sm:$0xff]  }
  0x44   : > { %880 = vmatpush1.bf16.msra.mxu1 %v1606_v34  ;;  %v1612_v39 = vld [vmem:[%s1888_s7 + $0x20] ss:$8 sps:$4 sm:$0xff]   ;;  %v1613_v40 = vld [vmem:[%s1888_s7 + $0x34] ss:$8 sps:$4 sm:$0xff]   ;;  %v1615_v41 = vld [vmem:[%s1888_s7 + $0x30] ss:$8 sps:$4 sm:$0xff]  }
  0x45   : > { %881 = vmatprep.subr.bf16.mxu1 %v1607_v36  ;;  %v1628_v42 = vld [vmem:[%s1888_s7 + $0x104] ss:$8 sps:$4 sm:$0xff]   ;;  %v1630_v43 = vld [vmem:[%s1888_s7 + $0x100] ss:$8 sps:$4 sm:$0xff]   ;;  %v1634_v45 = vld [vmem:[%s1888_s7 + $0x114] ss:$8 sps:$4 sm:$0xff]  }
  0x46   : > { %v1616_v44 = vld [vmem:[%s1888_s7 + $0x44] ss:$8 sps:$4 sm:$0xff]   ;;  %992 = vmatprep.subr.bf16.mxu0 %v1628_v42  ;;  %v1636_v46 = vld [vmem:[%s1888_s7 + $0x110] ss:$8 sps:$4 sm:$0xff]   ;;  %v1618_v47 = vld [vmem:[%s1888_s7 + $0x40] ss:$8 sps:$4 sm:$0xff]  }
  0x47   : > { %993 = vmatpush1.bf16.msra.mxu0 %v1630_v43  ;;  %v1619_v48 = vld [vmem:[%s1888_s7 + $0x54] ss:$8 sps:$4 sm:$0xff]   ;;  %v1640_v49 = vld [vmem:[%s1888_s7 + $0x124] ss:$8 sps:$4 sm:$0xff]   ;;  %v1642_v50 = vld [vmem:[%s1888_s7 + $0x120] ss:$8 sps:$4 sm:$0xff]  }
  0x48   : > { %882 = vmatpush1.bf16.msra.mxu1 %v1609_v37  ;;  %994 = vmatprep.subr.bf16.mxu0 %v1634_v45  ;;  %v1621_v51 = vld [vmem:[%s1888_s7 + $0x50] ss:$8 sps:$4 sm:$0xff]   ;;  %v1646_v52 = vld [vmem:[%s1888_s7 + $0x134] ss:$8 sps:$4 sm:$0xff]   ;;  %v1622_v53 = vld [vmem:[%s1888_s7 + $0x64] ss:$8 sps:$4 sm:$0xff]  }
  0x49   : > { %883 = vmatprep.subr.bf16.mxu1 %v1610_v38  ;;  %v1648_v54 = vld [vmem:[%s1888_s7 + $0x130] ss:$8 sps:$4 sm:$0xff]   ;;  %v1624_v55 = vld [vmem:[%s1888_s7 + $0x60] ss:$8 sps:$4 sm:$0xff]   ;;  %v1652_v56 = vld [vmem:[%s1888_s7 + $0x144] ss:$8 sps:$4 sm:$0xff]  }
  0x4a   : > { %v1625_v57 = vld [vmem:[%s1888_s7 + $0x74] ss:$8 sps:$4 sm:$0xff]   ;;  %v1654_v58 = vld [vmem:[%s1888_s7 + $0x140] ss:$8 sps:$4 sm:$0xff]   ;;  %v1627_v59 = vld [vmem:[%s1888_s7 + $0x70] ss:$8 sps:$4 sm:$0xff]  }
  0x4b   : > { %995 = vmatpush1.bf16.msra.mxu0 %v1636_v46  ;;  %v1658_v60 = vld [vmem:[%s1888_s7 + $0x154] ss:$8 sps:$4 sm:$0xff]   ;;  %v1631_v61 = vld [vmem:[%s1888_s7 + $0x84] ss:$8 sps:$4 sm:$0xff]   ;;  %v1660_v62 = vld [vmem:[%s1888_s7 + $0x150] ss:$8 sps:$4 sm:$0xff]  }
  0x4c   : > { %884 = vmatpush1.bf16.msra.mxu1 %v1612_v39  ;;  %996 = vmatprep.subr.bf16.mxu0 %v1640_v49  ;;  %v1633_v63 = vld [vmem:[%s1888_s7 + $0x80] ss:$8 sps:$4 sm:$0xff]   ;;  %v1664_v0 = vld [vmem:[%s1888_s7 + $0x164] ss:$8 sps:$4 sm:$0xff]   ;;  %v1637_v1 = vld [vmem:[%s1888_s7 + $0x94] ss:$8 sps:$4 sm:$0xff]  }
  0x4d   : > { %885 = vmatprep.subr.bf16.mxu1 %v1613_v40  ;;  %v1639_v2 = vld [vmem:[%s1888_s7 + $0x90] ss:$8 sps:$4 sm:$0xff]   ;;  %v1666_v3 = vld [vmem:[%s1888_s7 + $0x160] ss:$8 sps:$4 sm:$0xff]   ;;  %v1670_v5 = vld [vmem:[%s1888_s7 + $0x174] ss:$8 sps:$4 sm:$0xff]  }
  0x4e   : > { %v1679_v4 = vld [vmem:[%s1890_s8 + $0x4] ss:$12 sps:$4 sm:$0xff]   ;;  %v1645_v8 = vld [vmem:[%s1888_s7 + $0xa0] ss:$8 sps:$4 sm:$0xff]   ;;  %v1649_v9 = vld [vmem:[%s1888_s7 + $0xb4] ss:$8 sps:$4 sm:$0xff]  }
  0x4f   : > { %997 = vmatpush1.bf16.msra.mxu0 %v1642_v50  ;;  %v1643_v6 = vld [vmem:[%s1888_s7 + $0xa4] ss:$8 sps:$4 sm:$0xff]   ;;  %911 = vmatprep.mubr.bf16.mxu1 %v1679_v4  ;;  %v1672_v7 = vld [vmem:[%s1888_s7 + $0x170] ss:$8 sps:$4 sm:$0xff]   ;;  %v1676_v10 = vld [vmem:[%s1890_s8 + $0x8] ss:$12 sps:$4 sm:$0xff]  }
  0x50   : > { %886 = vmatpush1.bf16.msra.mxu1 %v1615_v41  ;;  %998 = vmatprep.subr.bf16.mxu0 %v1646_v52  ;;  %v1651_v11 = vld [vmem:[%s1888_s7 + $0xb0] ss:$8 sps:$4 sm:$0xff]   ;;  %v1655_v12 = vld [vmem:[%s1888_s7 + $0xc4] ss:$8 sps:$4 sm:$0xff]   ;;  %v1657_v13 = vld [vmem:[%s1888_s7 + $0xc0] ss:$8 sps:$4 sm:$0xff]  }
  0x51   : > { %887 = vmatprep.subr.bf16.mxu1 %v1616_v44  ;;  %v1661_v14 = vld [vmem:[%s1888_s7 + $0xd4] ss:$8 sps:$4 sm:$0xff]   ;;  %v1680_v15 = vld [vmem:[%s1890_s8 + $0x20] ss:$12 sps:$4 sm:$0xff]   ;;  %v1663_v16 = vld [vmem:[%s1888_s7 + $0xd0] ss:$8 sps:$4 sm:$0xff]  }
  0x52   : > { %v1667_v17 = vld [vmem:[%s1888_s7 + $0xe4] ss:$8 sps:$4 sm:$0xff]   ;;  %v1669_v18 = vld [vmem:[%s1888_s7 + $0xe0] ss:$8 sps:$4 sm:$0xff]   ;;  %v1673_v19 = vld [vmem:[%s1888_s7 + $0xf4] ss:$8 sps:$4 sm:$0xff]  }
  0x53   : > { %999 = vmatpush1.bf16.msra.mxu0 %v1648_v54  ;;  %v1684_v20 = vld [vmem:[%s1890_s8 + $0x38] ss:$12 sps:$4 sm:$0xff]   ;;  %v1677_v22 = vld [vmem:[%s1890_s8] ss:$12 sps:$4 sm:$0xff]   ;;  %v1681_v23 = vld [vmem:[%s1890_s8 + $0x1c] ss:$12 sps:$4 sm:$0xff]  }
  0x54   : > { %888 = vmatpush1.bf16.msra.mxu1 %v1618_v47  ;;  %1000 = vmatprep.subr.bf16.mxu0 %v1652_v56  ;;  %v1675_v21 = vld [vmem:[%s1888_s7 + $0xf0] ss:$8 sps:$4 sm:$0xff]   ;;  %v1685_v26 = vld [vmem:[%s1890_s8 + $0x34] ss:$12 sps:$4 sm:$0xff]   ;;  %v1697_v36 = vld [vmem:[%s1890_s8 + $0x7c] ss:$12 sps:$4 sm:$0xff]  }
  0x55   : > { %889 = vmatprep.subr.bf16.mxu1 %v1619_v48  ;;  %v1688_v24 = vld [vmem:[%s1890_s8 + $0x50] ss:$12 sps:$4 sm:$0xff]   ;;  %v1683_v25 = vld [vmem:[%s1890_s8 + $0x18] ss:$12 sps:$4 sm:$0xff]   ;;  %v1692_v27 = vld [vmem:[%s1890_s8 + $0x68] ss:$12 sps:$4 sm:$0xff]  }
  0x56   : > { %v1687_v28 = vld [vmem:[%s1890_s8 + $0x30] ss:$12 sps:$4 sm:$0xff]   ;;  %v1689_v29 = vld [vmem:[%s1890_s8 + $0x4c] ss:$12 sps:$4 sm:$0xff]   ;;  %v1691_v31 = vld [vmem:[%s1890_s8 + $0x48] ss:$12 sps:$4 sm:$0xff]  }
  0x57   : > { %1001 = vmatpush1.bf16.msra.mxu0 %v1654_v58  ;;  %v1696_v30 = vld [vmem:[%s1890_s8 + $0x80] ss:$12 sps:$4 sm:$0xff]   ;;  %v1693_v32 = vld [vmem:[%s1890_s8 + $0x64] ss:$12 sps:$4 sm:$0xff]   ;;  %v1707_v42 = vld [vmem:[%s1890_s8 + $0xa8] ss:$12 sps:$4 sm:$0xff]  }
  0x58   : > { %890 = vmatpush1.bf16.msra.mxu1 %v1621_v51  ;;  %1002 = vmatprep.subr.bf16.mxu0 %v1658_v60  ;;  %v1700_v33 = vld [vmem:[%s1890_s8 + $0x98] ss:$12 sps:$4 sm:$0xff]   ;;  %v1695_v34 = vld [vmem:[%s1890_s8 + $0x60] ss:$12 sps:$4 sm:$0xff]   ;;  %v1704_v37 = vld [vmem:[%s1890_s8 + $0xb0] ss:$12 sps:$4 sm:$0xff]  }
  0x59   : > { %891 = vmatprep.subr.bf16.mxu1 %v1622_v53  ;;  %v1699_v38 = vld [vmem:[%s1890_s8 + $0x78] ss:$12 sps:$4 sm:$0xff]   ;;  %v1701_v39 = vld [vmem:[%s1890_s8 + $0x94] ss:$12 sps:$4 sm:$0xff]   ;;  %v1703_v40 = vld [vmem:[%s1890_s8 + $0x90] ss:$12 sps:$4 sm:$0xff]  }
  0x5a   : > { %v1705_v41 = vld [vmem:[%s1890_s8 + $0xac] ss:$12 sps:$4 sm:$0xff]   ;;  %v399_v54 = vld [vmem:[#allocation2] sm:$0xff]  ;;  %v401_v60 = vld [vmem:[#allocation2 + $0x10] sm:$0xff] }
  0x5b   : > { %1003 = vmatpush1.bf16.msra.mxu0 %v1660_v62 }
  0x5c   : > { %892 = vmatpush1.bf16.msra.mxu1 %v1624_v55  ;;  %1004 = vmatprep.subr.bf16.mxu0 %v1664_v0  ;;  %v402_v0 = vld [vmem:[#allocation2 + $0x18] sm:$0xff] }
  0x5d   : > { %893 = vmatprep.subr.bf16.mxu1 %v1625_v57  ;;  %v400_v57 = vld [vmem:[#allocation2 + $0x8] sm:$0xff] }
  0x5f   : > { %1005 = vmatpush1.bf16.msra.mxu0 %v1666_v3 }
  0x60   : > { %894 = vmatpush1.bf16.msra.mxu1 %v1627_v59  ;;  %1006 = vmatprep.subr.bf16.mxu0 %v1670_v5 }
  0x61   : > { %895 = vmatprep.subr.bf16.mxu1 %v1631_v61 }
  0x63   : > { %1007 = vmatpush1.bf16.msra.mxu0 %v1672_v7 }
  0x64   : > { %896 = vmatpush1.bf16.msra.mxu1 %v1633_v63 }
  0x65   : > { %897 = vmatprep.subr.bf16.mxu1 %v1637_v1 }
  0x66   : > { %1025 = vmatmul.mubr.bf16.vlgmr.msra.gmra.mrb[0].mxu0 %v1676_v10  ;;  %v403_v10 = vld [vmem:[#allocation2 + $0x20] sm:$0xff] }
  0x67   : > { %1034 = vmatprep.mubr.bf16.mxu0 %v1749_v35 }
  0x68   : > { %898 = vmatpush1.bf16.msra.mxu1 %v1639_v2 }
  0x69   : > { %899 = vmatprep.subr.bf16.mxu1 %v1643_v6 }
  0x6c   : > { %900 = vmatpush1.bf16.msra.mxu1 %v1645_v8 }
  0x6d   : > { %901 = vmatprep.subr.bf16.mxu1 %v1649_v9 }
  0x6e   : > { %1035 = vmatmul.mubr.bf16.gmra.mrb[4].mxu0 %v1680_v15 }
  0x6f   : > { %1044 = vmatprep.mubr.bf16.mxu0 %v1749_v35 }
  0x70   : > { %902 = vmatpush1.bf16.msra.mxu1 %v1651_v11 }
  0x71   : > { %903 = vmatprep.subr.bf16.mxu1 %v1655_v12 }
  0x74   : > { %904 = vmatpush1.bf16.msra.mxu1 %v1657_v13  ;;  %v404_v13 = vld [vmem:[#allocation2 + $0x28] sm:$0xff] }
  0x75   : > { %905 = vmatprep.subr.bf16.mxu1 %v1661_v14 }
  0x76   : > { %1045 = vmatmul.mubr.bf16.gmra.mrb[8].mxu0 %v1684_v20  ;;  %v406_v20 = vld [vmem:[#allocation2 + $0x38] sm:$0xff] }
  0x77   : > { %1054 = vmatprep.mubr.bf16.mxu0 %v1749_v35 }
  0x78   : > { %906 = vmatpush1.bf16.msra.mxu1 %v1663_v16  ;;  %v405_v16 = vld [vmem:[#allocation2 + $0x30] sm:$0xff] }
  0x79   : > { %907 = vmatprep.subr.bf16.mxu1 %v1667_v17 }
  0x7c   : > { %908 = vmatpush1.bf16.msra.mxu1 %v1669_v18 }
  0x7d   : > { %909 = vmatprep.subr.bf16.mxu1 %v1673_v19 }
  0x7e   : > { %1055 = vmatmul.mubr.bf16.gmra.mrb[12].mxu0 %v1688_v24 }
  0x7f   : > { %1064 = vmatprep.mubr.bf16.mxu0 %v1749_v35 }
  0x80   : > { %910 = vmatpush1.bf16.msra.mxu1 %v1675_v21 }
  0x83   : > { %912 = vmatmul.mubr.bf16.vlgmr.msra.gmra.mrb[0].mxu1 %v1677_v22 }
  0x84   : > { %921 = vmatprep.mubr.bf16.mxu1 %v1681_v23 }
  0x86   : > { %1065 = vmatmul.mubr.bf16.gmra.mrb[16].mxu0 %v1692_v27 }
  0x87   : > { %1074 = vmatprep.mubr.bf16.mxu0 %v1749_v35 }
  0x8b   : > { %922 = vmatmul.mubr.bf16.gmra.mrb[4].mxu1 %v1683_v25 }
  0x8c   : > { %931 = vmatprep.mubr.bf16.mxu1 %v1685_v26 }
  0x8e   : > { %1075 = vmatmul.mubr.bf16.gmra.mrb[20].mxu0 %v1696_v30  ;;  %v407_v30 = vld [vmem:[#allocation2 + $0x40] sm:$0xff] }
  0x8f   : > { %1084 = vmatprep.mubr.bf16.mxu0 %v1749_v35 }
  0x93   : > { %932 = vmatmul.mubr.bf16.gmra.mrb[8].mxu1 %v1687_v28 }
  0x94   : > { %941 = vmatprep.mubr.bf16.mxu1 %v1689_v29 }
  0x96   : > { %1085 = vmatmul.mubr.bf16.gmra.mrb[24].mxu0 %v1700_v33  ;;  %v408_v33 = vld [vmem:[#allocation2 + $0x48] sm:$0xff] }
  0x97   : > { %1094 = vmatprep.mubr.bf16.mxu0 %v1749_v35 }
  0x9b   : > { %942 = vmatmul.mubr.bf16.gmra.mrb[12].mxu1 %v1691_v31 }
  0x9c   : > { %951 = vmatprep.mubr.bf16.mxu1 %v1693_v32 }
  0x9e   : > { %1095 = vmatmul.mubr.bf16.gmra.mrb[28].mxu0 %v1704_v37  ;;  %v409_v37 = vld [vmem:[#allocation2 + $0x50] sm:$0xff] }
  0xa3   : > { %952 = vmatmul.mubr.bf16.gmra.mrb[16].mxu1 %v1695_v34 }
  0xa4   : > { %961 = vmatprep.mubr.bf16.mxu1 %v1697_v36 }
  0xab   : > { %962 = vmatmul.mubr.bf16.gmra.mrb[20].mxu1 %v1699_v38 }
  0xac   : > { %971 = vmatprep.mubr.bf16.mxu1 %v1701_v39 }
  0xb3   : > { %972 = vmatmul.mubr.bf16.gmra.mrb[24].mxu1 %v1703_v40 }
  0xb4   : > { %981 = vmatprep.mubr.bf16.mxu1 %v1705_v41  ;;  %v410_v41 = vld [vmem:[#allocation2 + $0x58] sm:$0xff] }
  0xbb   : > { %982 = vmatmul.mubr.bf16.gmra.mrb[28].mxu1 %v1707_v42 }
 0x139   : > { %v1026_v43 = vpop.f32.mrb[0].mxu0 }
 0x13a   : > { %v1028_v44 = vpop.f32.mrb[1].mxu0 }
 0x13b   : > { %v1030_v45 = vpop.f32.mrb[2].mxu0 }
 0x13c   : > { %v1032_v46 = vpop.f32.mrb[3].mxu0 }
 0x141   : > { %v1036_v35 = vpop.f32.mrb[4].mxu0 }
 0x142   : > { %v1038_v47 = vpop.f32.mrb[5].mxu0 }
 0x143   : > { %v1040_v48 = vpop.f32.mrb[6].mxu0 }
 0x144   : > { %v1042_v49 = vpop.f32.mrb[7].mxu0 }
 0x149   : > { %v1046_v50 = vpop.f32.mrb[8].mxu0 }
 0x14a   : > { %v1048_v51 = vpop.f32.mrb[9].mxu0 }
 0x14b   : > { %v1050_v52 = vpop.f32.mrb[10].mxu0 }
 0x14c   : > { %v1973_v53 = vpop.f32.mrb[11].mxu0 }
 0x151   : > { %v1056_v2 = vpop.f32.mrb[12].mxu0 }
 0x152   : > { %v1058_v5 = vpop.f32.mrb[13].mxu0 }
 0x153   : > { %v1975_v7 = vpop.f32.mrb[14].mxu0 }
 0x154   : > { %v1977_v9 = vpop.f32.mrb[15].mxu0 }
 0x156   : > { %v913_v55 = vpop.f32.mrb[0].mxu1 }
 0x157   : > { %v1027_v56 = vadd.f32 %v1026_v43, %v913_v55  ;;  %v915_v58 = vpop.f32.mrb[1].mxu1 }
 0x158   : > { %v1029_v59 = vadd.f32 %v1028_v44, %v915_v58  ;;  %v917_v61 = vpop.f32.mrb[2].mxu1 }
 0x159   : > { %v1105_v62 = vadd.f32 %v1027_v56, %v399_v54  ;;  %v1031_v63 = vadd.f32 %v1030_v45, %v917_v61  ;;  %v919_v1 = vpop.f32.mrb[3].mxu1  ;;  %v1066_v22 = vpop.f32.mrb[16].mxu0  ;;  %v412_v54 = vld [vmem:[#allocation2 + $0x68] sm:$0xff] }
 0x15a   : > { %v1106_v3 = vadd.f32 %v1029_v59, %v400_v57  ;;  %v1033_v4 = vadd.f32 %v1032_v46, %v919_v1  ;;  %v1068_v25 = vpop.f32.mrb[17].mxu0  ;;  %v413_v57 = vld [vmem:[#allocation2 + $0x70] sm:$0xff] }
 0x15b   : > { %1137 = vst [vmem:[#allocation2] sm:$0xff] %v1105_v62  ;;  %v1107_v6 = vadd.f32 %v1031_v63, %v401_v60  ;;  %v1979_v27 = vpop.f32.mrb[18].mxu0  ;;  %v414_v60 = vld [vmem:[#allocation2 + $0x78] sm:$0xff] }
 0x15c   : > { %1138 = vst [vmem:[#allocation2 + $0x8] sm:$0xff] %v1106_v3  ;;  %v1108_v8 = vadd.f32 %v1033_v4, %v402_v0  ;;  %v1981_v29 = vpop.f32.mrb[19].mxu0 }
 0x15d   : > { %1139 = vst [vmem:[#allocation2 + $0x10] sm:$0xff] %v1107_v6 }
 0x15e   : > { %1140 = vst [vmem:[#allocation2 + $0x18] sm:$0xff] %v1108_v8  ;;  %v923_v11 = vpop.f32.mrb[4].mxu1 }
 0x15f   : > { %v1037_v12 = vadd.f32 %v1036_v35, %v923_v11  ;;  %v925_v14 = vpop.f32.mrb[5].mxu1  ;;  %v416_v11 = vld [vmem:[#allocation2 + $0x88] sm:$0xff] }
 0x160   : > { %v1039_v15 = vadd.f32 %v1038_v47, %v925_v14  ;;  %v927_v17 = vpop.f32.mrb[6].mxu1 }
 0x161   : > { %v1109_v18 = vadd.f32 %v1037_v12, %v403_v10  ;;  %v1041_v19 = vadd.f32 %v1040_v48, %v927_v17  ;;  %v929_v21 = vpop.f32.mrb[7].mxu1  ;;  %v1076_v43 = vpop.f32.mrb[20].mxu0 }
 0x162   : > { %v1110_v23 = vadd.f32 %v1039_v15, %v404_v13  ;;  %v1043_v24 = vadd.f32 %v1042_v49, %v929_v21  ;;  %v1078_v46 = vpop.f32.mrb[21].mxu0  ;;  %v417_v13 = vld [vmem:[#allocation2 + $0x90] sm:$0xff] }
 0x163   : > { %1141 = vst [vmem:[#allocation2 + $0x20] sm:$0xff] %v1109_v18  ;;  %v1111_v26 = vadd.f32 %v1041_v19, %v405_v16  ;;  %v1984_v47 = vpop.f32.mrb[22].mxu0  ;;  %v418_v16 = vld [vmem:[#allocation2 + $0x98] sm:$0xff] }
 0x164   : > { %1142 = vst [vmem:[#allocation2 + $0x28] sm:$0xff] %v1110_v23  ;;  %v1112_v28 = vadd.f32 %v1043_v24, %v406_v20  ;;  %v1986_v49 = vpop.f32.mrb[23].mxu0 }
 0x165   : > { %1143 = vst [vmem:[#allocation2 + $0x30] sm:$0xff] %v1111_v26 }
 0x166   : > { %1144 = vst [vmem:[#allocation2 + $0x38] sm:$0xff] %v1112_v28  ;;  %v933_v31 = vpop.f32.mrb[8].mxu1 }
 0x167   : > { %v1047_v32 = vadd.f32 %v1046_v50, %v933_v31  ;;  %v935_v34 = vpop.f32.mrb[9].mxu1  ;;  %v411_v50 = vld [vmem:[#allocation2 + $0x60] sm:$0xff]  ;;  %v420_v31 = vld [vmem:[#allocation2 + $0xa8] sm:$0xff] }
 0x168   : > { %v1049_v36 = vadd.f32 %v1048_v51, %v935_v34  ;;  %v937_v38 = vpop.f32.mrb[10].mxu1 }
 0x169   : > { %v1113_v39 = vadd.f32 %v1047_v32, %v407_v30  ;;  %v1051_v40 = vadd.f32 %v1050_v52, %v937_v38  ;;  %v939_v42 = vpop.f32.mrb[11].mxu1  ;;  %v1086_v62 = vpop.f32.mrb[24].mxu0 }
 0x16a   : > { %v1114_v44 = vadd.f32 %v1049_v36, %v408_v33  ;;  %v1053_v45 = vadd.f32 %v1973_v53, %v939_v42  ;;  %v1088_v1 = vpop.f32.mrb[25].mxu0  ;;  %v421_v33 = vld [vmem:[#allocation2 + $0xb0] sm:$0xff] }
 0x16b   : > { %1145 = vst [vmem:[#allocation2 + $0x40] sm:$0xff] %v1113_v39  ;;  %v1115_v35 = vadd.f32 %v1051_v40, %v409_v37  ;;  %v1090_v4 = vpop.f32.mrb[26].mxu0  ;;  %v422_v37 = vld [vmem:[#allocation2 + $0xb8] sm:$0xff] }
 0x16c   : > { %1146 = vst [vmem:[#allocation2 + $0x48] sm:$0xff] %v1114_v44  ;;  %v1116_v48 = vadd.f32 %v1053_v45, %v410_v41  ;;  %v1092_v6 = vpop.f32.mrb[27].mxu0 }
 0x16d   : > { %1147 = vst [vmem:[#allocation2 + $0x50] sm:$0xff] %v1115_v35 }
 0x16e   : > { %1148 = vst [vmem:[#allocation2 + $0x58] sm:$0xff] %v1116_v48  ;;  %v943_v51 = vpop.f32.mrb[12].mxu1 }
 0x16f   : > { %v1057_v52 = vadd.f32 %v1056_v2, %v943_v51  ;;  %v945_v55 = vpop.f32.mrb[13].mxu1 }
 0x170   : > { %v1059_v56 = vadd.f32 %v1058_v5, %v945_v55  ;;  %v947_v58 = vpop.f32.mrb[14].mxu1  ;;  %v415_v5 = vld [vmem:[#allocation2 + $0x80] sm:$0xff] }
 0x171   : > { %v1117_v53 = vadd.f32 %v1057_v52, %v411_v50  ;;  %v1061_v59 = vadd.f32 %v1975_v7, %v947_v58  ;;  %v949_v61 = vpop.f32.mrb[15].mxu1  ;;  %v1096_v18 = vpop.f32.mrb[28].mxu0  ;;  %v425_v50 = vld [vmem:[#allocation2 + $0xd0] sm:$0xff] }
 0x172   : > { %v1118_v63 = vadd.f32 %v1059_v56, %v412_v54  ;;  %v1063_v0 = vadd.f32 %v1977_v9, %v949_v61  ;;  %v1098_v21 = vpop.f32.mrb[29].mxu0  ;;  %v426_v54 = vld [vmem:[#allocation2 + $0xd8] sm:$0xff]  ;;  %v428_v61 = vld [vmem:[#allocation2 + $0xe8] sm:$0xff] }
 0x173   : > { %1149 = vst [vmem:[#allocation2 + $0x60] sm:$0xff] %v1117_v53  ;;  %v1119_v3 = vadd.f32 %v1061_v59, %v413_v57  ;;  %v1100_v24 = vpop.f32.mrb[30].mxu0  ;;  %v427_v53 = vld [vmem:[#allocation2 + $0xe0] sm:$0xff] }
 0x174   : > { %1150 = vst [vmem:[#allocation2 + $0x68] sm:$0xff] %v1118_v63  ;;  %v1120_v2 = vadd.f32 %v1063_v0, %v414_v60  ;;  %v1102_v26 = vpop.f32.mrb[31].mxu0  ;;  %v429_v0 = vld [vmem:[#allocation2 + $0xf0] sm:$0xff] }
 0x175   : > { %1151 = vst [vmem:[#allocation2 + $0x70] sm:$0xff] %v1119_v3 }
 0x176   : > { %1152 = vst [vmem:[#allocation2 + $0x78] sm:$0xff] %v1120_v2  ;;  %v953_v8 = vpop.f32.mrb[16].mxu1  ;;  %v430_v2 = vld [vmem:[#allocation2 + $0xf8] sm:$0xff] }
 0x177   : > { %v1067_v10 = vadd.f32 %v1066_v22, %v953_v8  ;;  %v955_v7 = vpop.f32.mrb[17].mxu1 }
 0x178   : > { %v1069_v12 = vadd.f32 %v1068_v25, %v955_v7  ;;  %v957_v14 = vpop.f32.mrb[18].mxu1  ;;  %v419_v25 = vld [vmem:[#allocation2 + $0xa0] sm:$0xff]  ;;  %v1207_v7 = vlaneseq (!%p1521_p11) }
 0x179   : > { %v1121_v15 = vadd.f32 %v1067_v10, %v415_v5  ;;  %v1071_v9 = vadd.f32 %v1979_v27, %v957_v14  ;;  %v959_v17 = vpop.f32.mrb[19].mxu1  ;;  %v1173_v14 = vld [vmem:[#allocation2] sm:$0xff] (!%p1521_p11) }
 0x17a   : > { %v1122_v19 = vadd.f32 %v1069_v12, %v416_v11  ;;  %v1073_v20 = vadd.f32 %v1981_v29, %v959_v17  ;;  %v1205_v12 = vld [vmem:[%s2147_s2] sm:$0x3] (!%p1521_p11) }
 0x17b   : > { %1153 = vst [vmem:[#allocation2 + $0x80] sm:$0xff] %v1121_v15  ;;  %v1123_v23 = vadd.f32 %v1071_v9, %v417_v13  ;;  %v1208_v13 = vshrl.u32 (!%p1521_p11), %v1207_v7, 7  ;;  %v1174_v15 = vld [vmem:[#allocation2 + $0x8] sm:$0xff] (!%p1521_p11)  ;;  %v1175_v9 = vld [vmem:[#allocation2 + $0x10] sm:$0xff] (!%p1521_p11) }
 0x17c   : > { %1154 = vst [vmem:[#allocation2 + $0x88] sm:$0xff] %v1122_v19  ;;  %v1124_v22 = vadd.f32 %v1073_v20, %v418_v16  ;;  %v1176_v16 = vld [vmem:[#allocation2 + $0x18] sm:$0xff] (!%p1521_p11)  ;;  %v1177_v19 = vld [vmem:[#allocation2 + $0x20] sm:$0xff] (!%p1521_p11)  ;;  %v1178_v20 = vld [vmem:[#allocation2 + $0x28] sm:$0xff] (!%p1521_p11) }
 0x17d   : > { %1155 = vst [vmem:[#allocation2 + $0x90] sm:$0xff] %v1123_v23  ;;  %v1209_v17 = vsub.s32 (!%p1521_p11), 0, %v1208_v13  ;;  %v1180_v23 = vld [vmem:[#allocation2 + $0x38] sm:$0xff] (!%p1521_p11) }
 0x17e   : > { %1156 = vst [vmem:[#allocation2 + $0x98] sm:$0xff] %v1124_v22  ;;  %v963_v28 = vpop.f32.mrb[20].mxu1  ;;  %v1182_v22 = vld [vmem:[#allocation2 + $0x48] sm:$0xff] (!%p1521_p11) }
 0x17f   : > { %v1077_v30 = vadd.f32 %v1076_v43, %v963_v28  ;;  %v965_v27 = vpop.f32.mrb[21].mxu1  ;;  %v423_v43 = vld [vmem:[#allocation2 + $0xc0] sm:$0xff] }
 0x180   : > { %v1079_v32 = vadd.f32 %v1078_v46, %v965_v27  ;;  %v967_v34 = vpop.f32.mrb[22].mxu1  ;;  %v424_v46 = vld [vmem:[#allocation2 + $0xc8] sm:$0xff] }
 0x181   : > { %v1125_v36 = vadd.f32 %v1077_v30, %v419_v25  ;;  %v1081_v29 = vadd.f32 %v1984_v47, %v967_v34  ;;  %v969_v38 = vpop.f32.mrb[23].mxu1  ;;  %v1998_v25 = vrot.slane (!%p1521_p11), %v1205_v12, %v1209_v17  ;;  %v1184_v30 = vld [vmem:[#allocation2 + $0x58] sm:$0xff] (!%p1521_p11)  ;;  %v1186_v27 = vld [vmem:[#allocation2 + $0x68] sm:$0xff] (!%p1521_p11) }
 0x182   : > { %v1126_v39 = vadd.f32 %v1079_v32, %v420_v31  ;;  %v1083_v40 = vadd.f32 %v1986_v49, %v969_v38  ;;  %v1185_v31 = vld [vmem:[#allocation2 + $0x60] sm:$0xff] (!%p1521_p11)  ;;  %v1187_v32 = vld [vmem:[#allocation2 + $0x70] sm:$0xff] (!%p1521_p11) }
 0x183   : > { %1157 = vst [vmem:[#allocation2 + $0xa0] sm:$0xff] %v1125_v36  ;;  %v1127_v41 = vadd.f32 %v1081_v29, %v421_v33  ;;  %v1188_v33 = vld [vmem:[#allocation2 + $0x78] sm:$0xff] (!%p1521_p11)  ;;  %v1189_v34 = vld [vmem:[#allocation2 + $0x80] sm:$0xff] (!%p1521_p11)  ;;  %v1217_v36 = vadd.f32 (!%p1521_p11), %v1998_v25, %v1173_v14 }
 0x184   : > { %1158 = vst [vmem:[#allocation2 + $0xa8] sm:$0xff] %v1126_v39  ;;  %v1128_v42 = vadd.f32 %v1083_v40, %v422_v37  ;;  %v1219_v37 = vadd.f32 (!%p1521_p11), %v1998_v25, %v1175_v9  ;;  %v1190_v39 = vld [vmem:[#allocation2 + $0x88] sm:$0xff] (!%p1521_p11)  ;;  %v1191_v40 = vld [vmem:[#allocation2 + $0x90] sm:$0xff] (!%p1521_p11) }
 0x185   : > { %1159 = vst [vmem:[#allocation2 + $0xb0] sm:$0xff] %v1127_v41  ;;  %v1192_v41 = vld [vmem:[#allocation2 + $0x98] sm:$0xff] (!%p1521_p11)  ;;  %1249 = vst [vmem:[%s2148_s3] sm:$0xff] (!%p1521_p11), %v1217_v36 }
 0x186   : > { %1160 = vst [vmem:[#allocation2 + $0xb8] sm:$0xff] %v1128_v42  ;;  %v973_v44 = vpop.f32.mrb[24].mxu1  ;;  %v1221_v42 = vadd.f32 (!%p1521_p11), %v1998_v25, %v1177_v19  ;;  %1251 = vst [vmem:[%s2148_s3 + $0x10] sm:$0xff] (!%p1521_p11), %v1219_v37 }
 0x187   : > { %v1087_v45 = vadd.f32 %v1086_v62, %v973_v44  ;;  %v975_v35 = vpop.f32.mrb[25].mxu1 }
 0x188   : > { %v1089_v48 = vadd.f32 %v1088_v1, %v975_v35  ;;  %v977_v51 = vpop.f32.mrb[26].mxu1  ;;  %1253 = vst [vmem:[%s2148_s3 + $0x20] sm:$0xff] (!%p1521_p11), %v1221_v42 }
 0x189   : > { %v1129_v47 = vadd.f32 %v1087_v45, %v423_v43  ;;  %v1091_v52 = vadd.f32 %v1090_v4, %v977_v51  ;;  %v979_v55 = vpop.f32.mrb[27].mxu1 }
 0x18a   : > { %v1130_v56 = vadd.f32 %v1089_v48, %v424_v46  ;;  %v1093_v49 = vadd.f32 %v1092_v6, %v979_v55  ;;  %v1193_v46 = vld [vmem:[#allocation2 + $0xa0] sm:$0xff] (!%p1521_p11) }
 0x18b   : > { %1161 = vst [vmem:[#allocation2 + $0xc0] sm:$0xff] %v1129_v47  ;;  %v1131_v57 = vadd.f32 %v1091_v52, %v425_v50  ;;  %v1194_v35 = vld [vmem:[#allocation2 + $0xa8] sm:$0xff] (!%p1521_p11) }
 0x18c   : > { %1162 = vst [vmem:[#allocation2 + $0xc8] sm:$0xff] %v1130_v56  ;;  %v1132_v58 = vadd.f32 %v1093_v49, %v426_v54  ;;  %v1195_v48 = vld [vmem:[#allocation2 + $0xb0] sm:$0xff] (!%p1521_p11)  ;;  %v1229_v49 = vadd.f32 (!%p1521_p11), %v1998_v25, %v1185_v31 }
 0x18d   : > { %1163 = vst [vmem:[#allocation2 + $0xd0] sm:$0xff] %v1131_v57  ;;  %v1196_v54 = vld [vmem:[#allocation2 + $0xb8] sm:$0xff] (!%p1521_p11) }
 0x18e   : > { %1164 = vst [vmem:[#allocation2 + $0xd8] sm:$0xff] %v1132_v58  ;;  %v983_v59 = vpop.f32.mrb[28].mxu1  ;;  %v1231_v58 = vadd.f32 (!%p1521_p11), %v1998_v25, %v1187_v32  ;;  %1261 = vst [vmem:[%s2148_s3 + $0x60] sm:$0xff] (!%p1521_p11), %v1229_v49 }
 0x18f   : > { %v1097_v60 = vadd.f32 %v1096_v18, %v983_v59  ;;  %v985_v62 = vpop.f32.mrb[29].mxu1  ;;  %v1213_v18 = vsub.s32 (!%p1521_p11), 1, %v1208_v13 }
 0x190   : > { %v1099_v63 = vadd.f32 %v1098_v21, %v985_v62  ;;  %v987_v1 = vpop.f32.mrb[30].mxu1  ;;  %1172 = sbr.rel (%p1521_p11) target bundleno = 419 (0x1a3), region = 66  ;;  %v1179_v21 = vld [vmem:[#allocation2 + $0x30] sm:$0xff] (!%p1521_p11)  ;;  %v1233_v62 = vadd.f32 (!%p1521_p11), %v1998_v25, %v1189_v34  ;;  %1263 = vst [vmem:[%s2148_s3 + $0x70] sm:$0xff] (!%p1521_p11), %v1231_v58 }
 0x191   : > { %v1133_v3 = vadd.f32 %v1097_v60, %v427_v53  ;;  %v1101_v4 = vadd.f32 %v1100_v24, %v987_v1  ;;  %v989_v5 = vpop.f32.mrb[31].mxu1  ;;  %v1181_v24 = vld [vmem:[#allocation2 + $0x40] sm:$0xff] (!%p1521_p11)  ;;  %v2000_v28 = vrot.slane (!%p1521_p11), %v1205_v12, %v1213_v18  ;;  %v1223_v44 = vadd.f32 (!%p1521_p11), %v1998_v25, %v1179_v21 }
 0x192   : > { %v1134_v8 = vadd.f32 %v1099_v63, %v428_v61  ;;  %v1103_v6 = vadd.f32 %v1102_v26, %v989_v5  ;;  %v1183_v26 = vld [vmem:[#allocation2 + $0x50] sm:$0xff] (!%p1521_p11)  ;;  %v1225_v50 = vadd.f32 (!%p1521_p11), %v1998_v25, %v1181_v24  ;;  %v1197_v55 = vld [vmem:[#allocation2 + $0xc0] sm:$0xff] (!%p1521_p11)  ;;  %v1237_v5 = vadd.f32 (!%p1521_p11), %v1998_v25, %v1193_v46  ;;  %1265 = vst [vmem:[%s2148_s3 + $0x80] sm:$0xff] (!%p1521_p11), %v1233_v62 }
 0x193   : > { %1165 = vst [vmem:[#allocation2 + $0xe0] sm:$0xff] %v1133_v3  ;;  %v1135_v10 = vadd.f32 %v1101_v4, %v429_v0  ;;  %v1218_v29 = vadd.f32 (!%p1521_p11), %v2000_v28, %v1174_v15  ;;  %v1220_v38 = vadd.f32 (!%p1521_p11), %v2000_v28, %v1176_v16  ;;  %v1222_v43 = vadd.f32 (!%p1521_p11), %v2000_v28, %v1178_v20  ;;  %v1198_v56 = vld [vmem:[#allocation2 + $0xc8] sm:$0xff] (!%p1521_p11) }
 0x194   : > { %1166 = vst [vmem:[#allocation2 + $0xe8] sm:$0xff] %v1134_v8  ;;  %v1136_v11 = vadd.f32 %v1103_v6, %v430_v2  ;;  %v1224_v45 = vadd.f32 (!%p1521_p11), %v2000_v28, %v1180_v23  ;;  %v1226_v51 = vadd.f32 (!%p1521_p11), %v2000_v28, %v1182_v22  ;;  %v1227_v47 = vadd.f32 (!%p1521_p11), %v1998_v25, %v1183_v26  ;;  %v1199_v59 = vld [vmem:[#allocation2 + $0xd0] sm:$0xff] (!%p1521_p11) }
 0x195   : > { %1167 = vst [vmem:[#allocation2 + $0xf0] sm:$0xff] %v1135_v10  ;;  %1250 = vst [vmem:[%s2148_s3 + $0x8] sm:$0xff] (!%p1521_p11), %v1218_v29  ;;  %v1228_v52 = vadd.f32 (!%p1521_p11), %v2000_v28, %v1184_v30  ;;  %v1230_v57 = vadd.f32 (!%p1521_p11), %v2000_v28, %v1186_v27  ;;  %v1232_v53 = vadd.f32 (!%p1521_p11), %v2000_v28, %v1188_v33  ;;  %v1200_v60 = vld [vmem:[#allocation2 + $0xd8] sm:$0xff] (!%p1521_p11) }
 0x196   : > { %1168 = vst [vmem:[#allocation2 + $0xf8] sm:$0xff] %v1136_v11  ;;  %1252 = vst [vmem:[%s2148_s3 + $0x18] sm:$0xff] (!%p1521_p11), %v1220_v38  ;;  %v1234_v63 = vadd.f32 (!%p1521_p11), %v2000_v28, %v1190_v39  ;;  %v1235_v0 = vadd.f32 (!%p1521_p11), %v1998_v25, %v1191_v40  ;;  %v1236_v1 = vadd.f32 (!%p1521_p11), %v2000_v28, %v1192_v41 }
 0x197   : > { %1254 = vst [vmem:[%s2148_s3 + $0x28] sm:$0xff] %v1222_v43  ;;  %1255 = vst [vmem:[%s2148_s3 + $0x30] sm:$0xff] %v1223_v44  ;;  %v1238_v8 = vadd.f32 %v2000_v28, %v1194_v35  ;;  %v1239_v6 = vadd.f32 %v1998_v25, %v1195_v48  ;;  %v1240_v10 = vadd.f32 %v2000_v28, %v1196_v54 }
 0x198   : > { %1256 = vst [vmem:[%s2148_s3 + $0x38] sm:$0xff] %v1224_v45  ;;  %1257 = vst [vmem:[%s2148_s3 + $0x40] sm:$0xff] %v1225_v50  ;;  %v1241_v11 = vadd.f32 %v1998_v25, %v1197_v55  ;;  %v1242_v7 = vadd.f32 %v2000_v28, %v1198_v56  ;;  %v1243_v12 = vadd.f32 %v1998_v25, %v1199_v59 }
 0x199   : > { %1258 = vst [vmem:[%s2148_s3 + $0x48] sm:$0xff] %v1226_v51  ;;  %1259 = vst [vmem:[%s2148_s3 + $0x50] sm:$0xff] %v1227_v47  ;;  %v1244_v13 = vadd.f32 %v2000_v28, %v1200_v60 }
 0x19a   : > { %v1201_v61 = vld [vmem:[#allocation2 + $0xe0] sm:$0xff]  ;;  %1260 = vst [vmem:[%s2148_s3 + $0x58] sm:$0xff] %v1228_v52  ;;  %1262 = vst [vmem:[%s2148_s3 + $0x68] sm:$0xff] %v1230_v57 }
 0x19b   : > { %v1202_v3 = vld [vmem:[#allocation2 + $0xe8] sm:$0xff]  ;;  %1264 = vst [vmem:[%s2148_s3 + $0x78] sm:$0xff] %v1232_v53  ;;  %1266 = vst [vmem:[%s2148_s3 + $0x88] sm:$0xff] %v1234_v63  ;;  %v1245_v14 = vadd.f32 %v1998_v25, %v1201_v61 }
 0x19c   : > { %v1203_v4 = vld [vmem:[#allocation2 + $0xf0] sm:$0xff]  ;;  %1267 = vst [vmem:[%s2148_s3 + $0x90] sm:$0xff] %v1235_v0  ;;  %1268 = vst [vmem:[%s2148_s3 + $0x98] sm:$0xff] %v1236_v1  ;;  %v1246_v15 = vadd.f32 %v2000_v28, %v1202_v3 }
 0x19d   : > { %v1204_v2 = vld [vmem:[#allocation2 + $0xf8] sm:$0xff]  ;;  %1269 = vst [vmem:[%s2148_s3 + $0xa0] sm:$0xff] %v1237_v5  ;;  %1270 = vst [vmem:[%s2148_s3 + $0xa8] sm:$0xff] %v1238_v8  ;;  %v1247_v9 = vadd.f32 %v1998_v25, %v1203_v4 }
 0x19e   : > { %1271 = vst [vmem:[%s2148_s3 + $0xb0] sm:$0xff] %v1239_v6  ;;  %1272 = vst [vmem:[%s2148_s3 + $0xb8] sm:$0xff] %v1240_v10  ;;  %v1248_v16 = vadd.f32 %v2000_v28, %v1204_v2 }
 0x19f   : > { %1273 = vst [vmem:[%s2148_s3 + $0xc0] sm:$0xff] %v1241_v11  ;;  %1274 = vst [vmem:[%s2148_s3 + $0xc8] sm:$0xff] %v1242_v7 }
 0x1a0   : > { %1275 = vst [vmem:[%s2148_s3 + $0xd0] sm:$0xff] %v1243_v12  ;;  %1276 = vst [vmem:[%s2148_s3 + $0xd8] sm:$0xff] %v1244_v13 }
 0x1a1   : > { %1277 = vst [vmem:[%s2148_s3 + $0xe0] sm:$0xff] %v1245_v14  ;;  %1278 = vst [vmem:[%s2148_s3 + $0xe8] sm:$0xff] %v1246_v15 }
 0x1a2   : > { %1279 = vst [vmem:[%s2148_s3 + $0xf0] sm:$0xff] %v1247_v9  ;;  %1280 = vst [vmem:[%s2148_s3 + $0xf8] sm:$0xff] %v1248_v16 }
 0x1a3 PF: > { %s13_s16 = sadd.s32 1, %s1746_s16   ;;  %s2149_s12 = smov %s1734_s13 }
 0x1a4   : > { %p10_p12 = scmp.ge.s32.totalorder %s13_s16, 8   ;;  %s2150_s13 = smov %s1805_s20 }
 0x1a5   : > { %s2151_s14 = smov %s1742_s15  ;;  %s2152_s15 = smov %s2154_s17 }
 0x1a6   :  { %12 = sbr.rel (!%p10_p12) target bundleno = 3 (0x3), region = 113 }

// kernel: tile.13
= control target key start
LH: loop header
LB: loop body
LE: loop exit
PB: predicated region body
PF: predicated region fallthrough
CT: control target
= control target key end

     0   :  { %s22_s0 = inlined_call_operand.vmem [shape: f32[128], index: 0, kind: input, shape index: {}]   ;;  %s23_s1 = inlined_call_operand.vmem [shape: f32[4,128], index: 1, kind: output, shape index: {}]  }
   0x1   :  { %v4_v0 = vld [vmem:[%s22_s0] ss:$0 sm:$0xff] }
   0x2   :  { %5 = vst [vmem:[%s23_s1] sm:$0xf] %v4_v0 }

// kernel: generator_forward.33
= control target key start
LH: loop header
LB: loop body
LE: loop exit
PB: predicated region body
PF: predicated region fallthrough
CT: control target
= control target key end

     0   :  { %s2960_s0 = inlined_call_operand.vmem [shape: bf16[128,1024], index: 0, kind: input, shape index: {}]   ;;  %s2961_s1 = inlined_call_operand.vmem [shape: bf16[1024,512], index: 1, kind: input, shape index: {}]   ;;  %s2962_s2 = inlined_call_operand.vmem [shape: f32[1,512], index: 2, kind: input, shape index: {}]   ;;  %s2963_s3 = inlined_call_operand.vmem [shape: f32[128,512], index: 3, kind: output, shape index: {}]  }
   0x1   :  { %2965 = sst [smem:[#allocation7_spill]] %s2960_s0 }
   0x2   :  { %2966 = sst [smem:[#allocation8_spill]] %s2961_s1 }
   0x3   :  { %s2352_s12 = smov 0   ;;  %s2354_s13 = smov 0  }
   0x4   :  { %s2356_s14 = smov 0   ;;  %s2358_s15 = smov 0  }
   0x5   :  { %s2360_s16 = smov 0   ;;  %s2362_s17 = smov 0  }
   0x6   :  { %s2364_s18 = smov 0   ;;  %s2366_s19 = smov 0  }
   0x7   :  { %s2368_s20 = smov 0   ;;  %s2370_s21 = smov 0  }
   0x8   :  { %s2372_s22 = smov 0  }
   0x9 LB: > { %s1855_s23 = sadd.s32 4294967295, %s2329_s22   ;;  %s25_s24 = sadd.s32 1, %s2321_s20  ;;  %s2329_s22 = sphi %s2372_s22, %s13_s22   ;;  %s2325_s21 = sphi %s2370_s21, %s2983_s21   ;;  %s2321_s20 = sphi %s2368_s20, %s2982_s20   ;;  %s2317_s19 = sphi %s2366_s19, %s2981_s19   ;;  %s2313_s18 = sphi %s2364_s18, %s2980_s18   ;;  %s2309_s17 = sphi %s2362_s17, %s2979_s17   ;;  %s2305_s16 = sphi %s2360_s16, %s2978_s16   ;;  %s2301_s15 = sphi %s2358_s15, %s2977_s15   ;;  %s2297_s14 = sphi %s2356_s14, %s2976_s14   ;;  %s2293_s13 = sphi %s2354_s13, %s2975_s13   ;;  %s2289_s12 = sphi %s2352_s12, %s2974_s12  }
   0xa   : > { %p26_p0 = scmp.ge.s32.totalorder %s25_s24, 2  ;;  %s28_s25 = sadd.s32 1, %s2325_s21 }
   0xb   : > { %s41_s26 = sadd.s32 1, %s2309_s17  ;;  %p48_p1 = scmp.ne.s32.totalorder %s2309_s17, %s2305_s16 }
   0xc   : > { %s2985_s24 = smov (%p26_p0, %s25_s24), 0  ;;  %s2987_s25 = smov (!%p26_p0, %s28_s25), %s2325_s21 }
   0xd   : > { %s37_s27 = ssub.s32 %s2321_s20, %s2985_s24  ;;  %p49_p2 = scmp.eq.s32.totalorder %s2329_s22, 0 }
   0xe   : > { %p30_p3 = scmp.ge.s32.totalorder %s2987_s25, 2  ;;  %p39_p4 = scmp.eq.s32.totalorder %s37_s27, 0 }
   0xf   : > { %p2419_p5 = por %p49_p2, %p48_p1  ;;  %s69_s29 = sadd.s32 1, %s2301_s15 }
  0x10   : > { %s2989_s25 = smov (%p30_p3, %s2987_s25), 0  ;;  %p76_p6 = scmp.ne.s32.totalorder %s2301_s15, %s2297_s14 }
  0x11   : > { %2968 = sst [smem:[#allocation6_spill]] %s2989_s25  ;;  %s65_s4 = ssub.s32 %s2325_s21, %s2989_s25 }
  0x12   : > { %s2427_s30 = scalar_select %p39_p4, %s2309_s17, %s41_s26  }
  0x13   : > { %s66_s5 = sor.u32 %s65_s4, %s37_s27  ;;  %p121_p7 = scmp.eq.s32.totalorder %s65_s4, 0 }
  0x14   : > { %p67_p8 = scmp.eq.s32.totalorder %s66_s5, 0  ;;  %p2433_p9 = por %p76_p6, %p49_p2 }
  0x15   : > { %s123_s7 = sadd.s32 1, %s2293_s13  ;;  %p133_p10 = scmp.ne.s32.totalorder %s2293_s13, %s2289_s12 }
  0x16   : > { %s2441_s8 = scalar_select %p67_p8, %s2301_s15, %s69_s29  }
  0x17   : > { %s2444_s9 = scalar_select %p121_p7, %s2293_s13, %s123_s7  }
  0x18   : > { %p134_p11 = scmp.eq.s32.totalorder %s1855_s23, 3  ;;  %p1858_p13 = scmp.ge.s32.totalorder %s2329_s22, 4 }
  0x1a   : > { %p2446_p12 = por %p134_p11, %p133_p10  ;;  %156 = sbr.rel (%p1858_p13) target bundleno = 101 (0x65), region = 16 }
  0x21   : > { %159 = sbr.rel (!%p2419_p5) target bundleno = 59 (0x3b), region = 20  ;;  %s161_s11 = sand.u32 (%p2419_p5), 1, %s2309_s17  }
  0x22   : > { %s1975_s26 = sshll.u32 (%p2419_p5), %s2321_s20, 4  ;;  %s1859_s27 = sshll.u32 (%p2419_p5), %s161_s11, 8 }
  0x23   : > { %s2971_s0 = sld [smem:[#allocation7_spill]] (%p2419_p5)  ;;  %s2463_s23 = scalar_lea.vmem (%p2419_p5), [#allocation3], %s1859_s27 }
  0x29   : > { %s2458_s5 = scalar_lea.vmem %s2971_s0, %s1975_s26 }
  0x2a   : > { %v182_v0 = vld [vmem:[%s2458_s5] sm:$0xff]  ;;  %v184_v1 = vld [vmem:[%s2458_s5 + $0x8] sm:$0xff] }
  0x2b   : > { %v186_v2 = vld [vmem:[%s2458_s5 + $0x20] sm:$0xff]  ;;  %183 = vst [vmem:[%s2463_s23] sm:$0xff] %v182_v0  ;;  %185 = vst [vmem:[%s2463_s23 + $0x8] sm:$0xff] %v184_v1  ;;  %v188_v3 = vld [vmem:[%s2458_s5 + $0x28] sm:$0xff] }
  0x2c   : > { %187 = vst [vmem:[%s2463_s23 + $0x10] sm:$0xff] %v186_v2  ;;  %v190_v4 = vld [vmem:[%s2458_s5 + $0x40] sm:$0xff]  ;;  %v192_v5 = vld [vmem:[%s2458_s5 + $0x48] sm:$0xff]  ;;  %189 = vst [vmem:[%s2463_s23 + $0x18] sm:$0xff] %v188_v3 }
  0x2d   : > { %191 = vst [vmem:[%s2463_s23 + $0x20] sm:$0xff] %v190_v4  ;;  %193 = vst [vmem:[%s2463_s23 + $0x28] sm:$0xff] %v192_v5  ;;  %v194_v6 = vld [vmem:[%s2458_s5 + $0x60] sm:$0xff]  ;;  %v196_v7 = vld [vmem:[%s2458_s5 + $0x68] sm:$0xff] }
  0x2e   : > { %v198_v8 = vld [vmem:[%s2458_s5 + $0x80] sm:$0xff]  ;;  %195 = vst [vmem:[%s2463_s23 + $0x30] sm:$0xff] %v194_v6  ;;  %197 = vst [vmem:[%s2463_s23 + $0x38] sm:$0xff] %v196_v7  ;;  %v200_v9 = vld [vmem:[%s2458_s5 + $0x88] sm:$0xff] }
  0x2f   : > { %199 = vst [vmem:[%s2463_s23 + $0x40] sm:$0xff] %v198_v8  ;;  %v202_v10 = vld [vmem:[%s2458_s5 + $0xa0] sm:$0xff]  ;;  %v204_v11 = vld [vmem:[%s2458_s5 + $0xa8] sm:$0xff]  ;;  %201 = vst [vmem:[%s2463_s23 + $0x48] sm:$0xff] %v200_v9 }
  0x30   : > { %203 = vst [vmem:[%s2463_s23 + $0x50] sm:$0xff] %v202_v10  ;;  %205 = vst [vmem:[%s2463_s23 + $0x58] sm:$0xff] %v204_v11  ;;  %v206_v12 = vld [vmem:[%s2458_s5 + $0xc0] sm:$0xff]  ;;  %v208_v13 = vld [vmem:[%s2458_s5 + $0xc8] sm:$0xff] }
  0x31   : > { %v210_v14 = vld [vmem:[%s2458_s5 + $0xe0] sm:$0xff]  ;;  %207 = vst [vmem:[%s2463_s23 + $0x60] sm:$0xff] %v206_v12  ;;  %209 = vst [vmem:[%s2463_s23 + $0x68] sm:$0xff] %v208_v13  ;;  %v212_v15 = vld [vmem:[%s2458_s5 + $0xe8] sm:$0xff] }
  0x32   : > { %211 = vst [vmem:[%s2463_s23 + $0x70] sm:$0xff] %v210_v14  ;;  %v214_v16 = vld [vmem:[%s2458_s5 + $0x100] sm:$0xff]  ;;  %v216_v17 = vld [vmem:[%s2458_s5 + $0x108] sm:$0xff]  ;;  %213 = vst [vmem:[%s2463_s23 + $0x78] sm:$0xff] %v212_v15 }
  0x33   : > { %215 = vst [vmem:[%s2463_s23 + $0x80] sm:$0xff] %v214_v16  ;;  %217 = vst [vmem:[%s2463_s23 + $0x88] sm:$0xff] %v216_v17  ;;  %v218_v18 = vld [vmem:[%s2458_s5 + $0x120] sm:$0xff]  ;;  %v220_v19 = vld [vmem:[%s2458_s5 + $0x128] sm:$0xff] }
  0x34   : > { %v222_v20 = vld [vmem:[%s2458_s5 + $0x140] sm:$0xff]  ;;  %219 = vst [vmem:[%s2463_s23 + $0x90] sm:$0xff] %v218_v18  ;;  %221 = vst [vmem:[%s2463_s23 + $0x98] sm:$0xff] %v220_v19  ;;  %v224_v21 = vld [vmem:[%s2458_s5 + $0x148] sm:$0xff] }
  0x35   : > { %223 = vst [vmem:[%s2463_s23 + $0xa0] sm:$0xff] %v222_v20  ;;  %v226_v22 = vld [vmem:[%s2458_s5 + $0x160] sm:$0xff]  ;;  %v228_v23 = vld [vmem:[%s2458_s5 + $0x168] sm:$0xff]  ;;  %225 = vst [vmem:[%s2463_s23 + $0xa8] sm:$0xff] %v224_v21 }
  0x36   : > { %227 = vst [vmem:[%s2463_s23 + $0xb0] sm:$0xff] %v226_v22  ;;  %229 = vst [vmem:[%s2463_s23 + $0xb8] sm:$0xff] %v228_v23  ;;  %v230_v24 = vld [vmem:[%s2458_s5 + $0x180] sm:$0xff]  ;;  %v232_v25 = vld [vmem:[%s2458_s5 + $0x188] sm:$0xff] }
  0x37   : > { %v234_v26 = vld [vmem:[%s2458_s5 + $0x1a0] sm:$0xff]  ;;  %231 = vst [vmem:[%s2463_s23 + $0xc0] sm:$0xff] %v230_v24  ;;  %233 = vst [vmem:[%s2463_s23 + $0xc8] sm:$0xff] %v232_v25  ;;  %v236_v27 = vld [vmem:[%s2458_s5 + $0x1a8] sm:$0xff] }
  0x38   : > { %235 = vst [vmem:[%s2463_s23 + $0xd0] sm:$0xff] %v234_v26  ;;  %v238_v28 = vld [vmem:[%s2458_s5 + $0x1c0] sm:$0xff]  ;;  %v240_v29 = vld [vmem:[%s2458_s5 + $0x1c8] sm:$0xff]  ;;  %237 = vst [vmem:[%s2463_s23 + $0xd8] sm:$0xff] %v236_v27 }
  0x39   : > { %239 = vst [vmem:[%s2463_s23 + $0xe0] sm:$0xff] %v238_v28  ;;  %241 = vst [vmem:[%s2463_s23 + $0xe8] sm:$0xff] %v240_v29  ;;  %v242_v30 = vld [vmem:[%s2458_s5 + $0x1e0] sm:$0xff]  ;;  %v244_v31 = vld [vmem:[%s2458_s5 + $0x1e8] sm:$0xff] }
  0x3a   : > { %243 = vst [vmem:[%s2463_s23 + $0xf0] sm:$0xff] %v242_v30  ;;  %245 = vst [vmem:[%s2463_s23 + $0xf8] sm:$0xff] %v244_v31 }
  0x3b PF: > { %251 = sbr.rel (!%p2433_p9) target bundleno = 101 (0x65), region = 43  ;;  %s253_s28 = sand.u32 (%p2433_p9), 1, %s2301_s15  }
  0x3c   : > { %s1864_s7 = sshll.u32 (%p2433_p9), %s2325_s21, 1  ;;  %s1862_s11 = sshll.u32 (%p2433_p9), %s253_s28, 9 }
  0x3d   : > { %s1976_s26 = sshll.u32 (%p2433_p9), %s2321_s20, 8  ;;  %s2972_s1 = sld [smem:[#allocation8_spill]] (%p2433_p9) }
  0x3e   : > { %s259_s27 = sadd.s32 (%p2433_p9), %s1976_s26, %s1864_s7  ;;  %s2539_s6 = scalar_lea.vmem (%p2433_p9), [#allocation4], %s1862_s11 }
  0x3f   : > { %s1866_s29 = sshll.u32 (%p2433_p9), %s259_s27, 2 }
  0x43   : > { %s2534_s25 = scalar_lea.vmem %s2972_s1, %s1866_s29 }
  0x44   : > { %v415_v32 = vld [vmem:[%s2534_s25] sm:$0xff]  ;;  %v417_v33 = vld [vmem:[%s2534_s25 + $0x10] sm:$0xff] }
  0x45   : > { %v419_v34 = vld [vmem:[%s2534_s25 + $0x20] sm:$0xff]  ;;  %416 = vst [vmem:[%s2539_s6] sm:$0xff] %v415_v32  ;;  %418 = vst [vmem:[%s2539_s6 + $0x8] sm:$0xff] %v417_v33  ;;  %v421_v35 = vld [vmem:[%s2534_s25 + $0x30] sm:$0xff] }
  0x46   : > { %420 = vst [vmem:[%s2539_s6 + $0x10] sm:$0xff] %v419_v34  ;;  %v423_v36 = vld [vmem:[%s2534_s25 + $0x40] sm:$0xff]  ;;  %v425_v37 = vld [vmem:[%s2534_s25 + $0x50] sm:$0xff]  ;;  %422 = vst [vmem:[%s2539_s6 + $0x18] sm:$0xff] %v421_v35 }
  0x47   : > { %424 = vst [vmem:[%s2539_s6 + $0x20] sm:$0xff] %v423_v36  ;;  %426 = vst [vmem:[%s2539_s6 + $0x28] sm:$0xff] %v425_v37  ;;  %v427_v38 = vld [vmem:[%s2534_s25 + $0x60] sm:$0xff]  ;;  %v429_v39 = vld [vmem:[%s2534_s25 + $0x70] sm:$0xff] }
  0x48   : > { %v431_v40 = vld [vmem:[%s2534_s25 + $0x80] sm:$0xff]  ;;  %428 = vst [vmem:[%s2539_s6 + $0x30] sm:$0xff] %v427_v38  ;;  %430 = vst [vmem:[%s2539_s6 + $0x38] sm:$0xff] %v429_v39  ;;  %v433_v41 = vld [vmem:[%s2534_s25 + $0x90] sm:$0xff] }
  0x49   : > { %432 = vst [vmem:[%s2539_s6 + $0x40] sm:$0xff] %v431_v40  ;;  %v435_v42 = vld [vmem:[%s2534_s25 + $0xa0] sm:$0xff]  ;;  %v437_v43 = vld [vmem:[%s2534_s25 + $0xb0] sm:$0xff]  ;;  %434 = vst [vmem:[%s2539_s6 + $0x48] sm:$0xff] %v433_v41 }
  0x4a   : > { %436 = vst [vmem:[%s2539_s6 + $0x50] sm:$0xff] %v435_v42  ;;  %438 = vst [vmem:[%s2539_s6 + $0x58] sm:$0xff] %v437_v43  ;;  %v439_v44 = vld [vmem:[%s2534_s25 + $0xc0] sm:$0xff]  ;;  %v441_v45 = vld [vmem:[%s2534_s25 + $0xd0] sm:$0xff] }
  0x4b   : > { %v443_v46 = vld [vmem:[%s2534_s25 + $0xe0] sm:$0xff]  ;;  %440 = vst [vmem:[%s2539_s6 + $0x60] sm:$0xff] %v439_v44  ;;  %442 = vst [vmem:[%s2539_s6 + $0x68] sm:$0xff] %v441_v45  ;;  %v445_v47 = vld [vmem:[%s2534_s25 + $0xf0] sm:$0xff] }
  0x4c   : > { %444 = vst [vmem:[%s2539_s6 + $0x70] sm:$0xff] %v443_v46  ;;  %v447_v48 = vld [vmem:[%s2534_s25 + $0x100] sm:$0xff]  ;;  %v449_v49 = vld [vmem:[%s2534_s25 + $0x110] sm:$0xff]  ;;  %446 = vst [vmem:[%s2539_s6 + $0x78] sm:$0xff] %v445_v47 }
  0x4d   : > { %448 = vst [vmem:[%s2539_s6 + $0x80] sm:$0xff] %v447_v48  ;;  %450 = vst [vmem:[%s2539_s6 + $0x88] sm:$0xff] %v449_v49  ;;  %v451_v50 = vld [vmem:[%s2534_s25 + $0x120] sm:$0xff]  ;;  %v453_v51 = vld [vmem:[%s2534_s25 + $0x130] sm:$0xff] }
  0x4e   : > { %v455_v52 = vld [vmem:[%s2534_s25 + $0x140] sm:$0xff]  ;;  %452 = vst [vmem:[%s2539_s6 + $0x90] sm:$0xff] %v451_v50  ;;  %454 = vst [vmem:[%s2539_s6 + $0x98] sm:$0xff] %v453_v51  ;;  %v457_v53 = vld [vmem:[%s2534_s25 + $0x150] sm:$0xff] }
  0x4f   : > { %456 = vst [vmem:[%s2539_s6 + $0xa0] sm:$0xff] %v455_v52  ;;  %v459_v54 = vld [vmem:[%s2534_s25 + $0x160] sm:$0xff]  ;;  %v461_v55 = vld [vmem:[%s2534_s25 + $0x170] sm:$0xff]  ;;  %458 = vst [vmem:[%s2539_s6 + $0xa8] sm:$0xff] %v457_v53 }
  0x50   : > { %460 = vst [vmem:[%s2539_s6 + $0xb0] sm:$0xff] %v459_v54  ;;  %462 = vst [vmem:[%s2539_s6 + $0xb8] sm:$0xff] %v461_v55  ;;  %v463_v56 = vld [vmem:[%s2534_s25 + $0x180] sm:$0xff]  ;;  %v465_v57 = vld [vmem:[%s2534_s25 + $0x190] sm:$0xff] }
  0x51   : > { %v467_v58 = vld [vmem:[%s2534_s25 + $0x1a0] sm:$0xff]  ;;  %464 = vst [vmem:[%s2539_s6 + $0xc0] sm:$0xff] %v463_v56  ;;  %466 = vst [vmem:[%s2539_s6 + $0xc8] sm:$0xff] %v465_v57  ;;  %v469_v59 = vld [vmem:[%s2534_s25 + $0x1b0] sm:$0xff] }
  0x52   : > { %468 = vst [vmem:[%s2539_s6 + $0xd0] sm:$0xff] %v467_v58  ;;  %v471_v60 = vld [vmem:[%s2534_s25 + $0x1c0] sm:$0xff]  ;;  %v473_v61 = vld [vmem:[%s2534_s25 + $0x1d0] sm:$0xff]  ;;  %470 = vst [vmem:[%s2539_s6 + $0xd8] sm:$0xff] %v469_v59 }
  0x53   : > { %472 = vst [vmem:[%s2539_s6 + $0xe0] sm:$0xff] %v471_v60  ;;  %474 = vst [vmem:[%s2539_s6 + $0xe8] sm:$0xff] %v473_v61  ;;  %v475_v62 = vld [vmem:[%s2534_s25 + $0x1e0] sm:$0xff]  ;;  %v477_v63 = vld [vmem:[%s2534_s25 + $0x1f0] sm:$0xff] }
  0x54   : > { %v479_v0 = vld [vmem:[%s2534_s25 + $0x200] sm:$0xff]  ;;  %476 = vst [vmem:[%s2539_s6 + $0xf0] sm:$0xff] %v475_v62  ;;  %478 = vst [vmem:[%s2539_s6 + $0xf8] sm:$0xff] %v477_v63  ;;  %v481_v1 = vld [vmem:[%s2534_s25 + $0x210] sm:$0xff] }
  0x55   : > { %480 = vst [vmem:[%s2539_s6 + $0x100] sm:$0xff] %v479_v0  ;;  %v483_v2 = vld [vmem:[%s2534_s25 + $0x220] sm:$0xff]  ;;  %v485_v3 = vld [vmem:[%s2534_s25 + $0x230] sm:$0xff]  ;;  %482 = vst [vmem:[%s2539_s6 + $0x108] sm:$0xff] %v481_v1 }
  0x56   : > { %484 = vst [vmem:[%s2539_s6 + $0x110] sm:$0xff] %v483_v2  ;;  %486 = vst [vmem:[%s2539_s6 + $0x118] sm:$0xff] %v485_v3  ;;  %v487_v4 = vld [vmem:[%s2534_s25 + $0x240] sm:$0xff]  ;;  %v489_v5 = vld [vmem:[%s2534_s25 + $0x250] sm:$0xff] }
  0x57   : > { %v491_v6 = vld [vmem:[%s2534_s25 + $0x260] sm:$0xff]  ;;  %488 = vst [vmem:[%s2539_s6 + $0x120] sm:$0xff] %v487_v4  ;;  %490 = vst [vmem:[%s2539_s6 + $0x128] sm:$0xff] %v489_v5  ;;  %v493_v7 = vld [vmem:[%s2534_s25 + $0x270] sm:$0xff] }
  0x58   : > { %492 = vst [vmem:[%s2539_s6 + $0x130] sm:$0xff] %v491_v6  ;;  %v495_v8 = vld [vmem:[%s2534_s25 + $0x280] sm:$0xff]  ;;  %v497_v9 = vld [vmem:[%s2534_s25 + $0x290] sm:$0xff]  ;;  %494 = vst [vmem:[%s2539_s6 + $0x138] sm:$0xff] %v493_v7 }
  0x59   : > { %496 = vst [vmem:[%s2539_s6 + $0x140] sm:$0xff] %v495_v8  ;;  %498 = vst [vmem:[%s2539_s6 + $0x148] sm:$0xff] %v497_v9  ;;  %v499_v10 = vld [vmem:[%s2534_s25 + $0x2a0] sm:$0xff]  ;;  %v501_v11 = vld [vmem:[%s2534_s25 + $0x2b0] sm:$0xff] }
  0x5a   : > { %v503_v12 = vld [vmem:[%s2534_s25 + $0x2c0] sm:$0xff]  ;;  %500 = vst [vmem:[%s2539_s6 + $0x150] sm:$0xff] %v499_v10  ;;  %502 = vst [vmem:[%s2539_s6 + $0x158] sm:$0xff] %v501_v11  ;;  %v505_v13 = vld [vmem:[%s2534_s25 + $0x2d0] sm:$0xff] }
  0x5b   : > { %504 = vst [vmem:[%s2539_s6 + $0x160] sm:$0xff] %v503_v12  ;;  %v507_v14 = vld [vmem:[%s2534_s25 + $0x2e0] sm:$0xff]  ;;  %v509_v15 = vld [vmem:[%s2534_s25 + $0x2f0] sm:$0xff]  ;;  %506 = vst [vmem:[%s2539_s6 + $0x168] sm:$0xff] %v505_v13 }
  0x5c   : > { %508 = vst [vmem:[%s2539_s6 + $0x170] sm:$0xff] %v507_v14  ;;  %510 = vst [vmem:[%s2539_s6 + $0x178] sm:$0xff] %v509_v15  ;;  %v511_v16 = vld [vmem:[%s2534_s25 + $0x300] sm:$0xff]  ;;  %v513_v17 = vld [vmem:[%s2534_s25 + $0x310] sm:$0xff] }
  0x5d   : > { %v515_v18 = vld [vmem:[%s2534_s25 + $0x320] sm:$0xff]  ;;  %512 = vst [vmem:[%s2539_s6 + $0x180] sm:$0xff] %v511_v16  ;;  %514 = vst [vmem:[%s2539_s6 + $0x188] sm:$0xff] %v513_v17  ;;  %v517_v19 = vld [vmem:[%s2534_s25 + $0x330] sm:$0xff] }
  0x5e   : > { %516 = vst [vmem:[%s2539_s6 + $0x190] sm:$0xff] %v515_v18  ;;  %v519_v20 = vld [vmem:[%s2534_s25 + $0x340] sm:$0xff]  ;;  %v521_v21 = vld [vmem:[%s2534_s25 + $0x350] sm:$0xff]  ;;  %518 = vst [vmem:[%s2539_s6 + $0x198] sm:$0xff] %v517_v19 }
  0x5f   : > { %520 = vst [vmem:[%s2539_s6 + $0x1a0] sm:$0xff] %v519_v20  ;;  %522 = vst [vmem:[%s2539_s6 + $0x1a8] sm:$0xff] %v521_v21  ;;  %v523_v22 = vld [vmem:[%s2534_s25 + $0x360] sm:$0xff]  ;;  %v525_v23 = vld [vmem:[%s2534_s25 + $0x370] sm:$0xff] }
  0x60   : > { %v527_v24 = vld [vmem:[%s2534_s25 + $0x380] sm:$0xff]  ;;  %524 = vst [vmem:[%s2539_s6 + $0x1b0] sm:$0xff] %v523_v22  ;;  %526 = vst [vmem:[%s2539_s6 + $0x1b8] sm:$0xff] %v525_v23  ;;  %v529_v25 = vld [vmem:[%s2534_s25 + $0x390] sm:$0xff] }
  0x61   : > { %528 = vst [vmem:[%s2539_s6 + $0x1c0] sm:$0xff] %v527_v24  ;;  %v531_v26 = vld [vmem:[%s2534_s25 + $0x3a0] sm:$0xff]  ;;  %v533_v27 = vld [vmem:[%s2534_s25 + $0x3b0] sm:$0xff]  ;;  %530 = vst [vmem:[%s2539_s6 + $0x1c8] sm:$0xff] %v529_v25 }
  0x62   : > { %532 = vst [vmem:[%s2539_s6 + $0x1d0] sm:$0xff] %v531_v26  ;;  %534 = vst [vmem:[%s2539_s6 + $0x1d8] sm:$0xff] %v533_v27  ;;  %v535_v28 = vld [vmem:[%s2534_s25 + $0x3c0] sm:$0xff]  ;;  %v537_v29 = vld [vmem:[%s2534_s25 + $0x3d0] sm:$0xff] }
  0x63   : > { %v539_v30 = vld [vmem:[%s2534_s25 + $0x3e0] sm:$0xff]  ;;  %536 = vst [vmem:[%s2539_s6 + $0x1e0] sm:$0xff] %v535_v28  ;;  %538 = vst [vmem:[%s2539_s6 + $0x1e8] sm:$0xff] %v537_v29  ;;  %v541_v31 = vld [vmem:[%s2534_s25 + $0x3f0] sm:$0xff] }
  0x64   : > { %540 = vst [vmem:[%s2539_s6 + $0x1f0] sm:$0xff] %v539_v30  ;;  %542 = vst [vmem:[%s2539_s6 + $0x1f8] sm:$0xff] %v541_v31 }
  0x65 PF: > { %p1867_p0 = scmp.ge.s32.totalorder %s2329_s22, 1  ;;  %p555_p1 = scmp.lt.s32.totalorder %s2329_s22, 5 }
  0x67   : > { %p556_p2 = pnand %p1867_p0, %p555_p1 }
  0x68   : > { %s562_s0 = sand.u32 (!%p556_p2), 1, %s2305_s16   ;;  %s569_s5 = sand.u32 (!%p556_p2), 1, %s2297_s14  }
  0x69   : > { %559 = sbr.rel (%p556_p2) target bundleno = 500 (0x1f4), region = 85  ;;  %s1868_s23 = sshll.u32 (!%p556_p2), %s562_s0, 8 }
  0x6a   : > { %s1869_s28 = sshll.u32 (!%p556_p2), %s569_s5, 9  ;;  %s596_s7 = sand.u32 (!%p556_p2), 1, %s2289_s12  }
  0x6b   : > { %s1871_s11 = sshll.u32 (!%p556_p2), %s2317_s19, 1  ;;  %s1870_s25 = sshll.u32 (!%p556_p2), %s596_s7, 8 }
  0x6c   : > { %p604_p3 = scmp.lt.s32.totalorder (!%p556_p2), %s1871_s11, 3  ;;  %s2678_s4 = scalar_lea.vmem (!%p556_p2), [#allocation3], %s1868_s23 }
  0x6d   : > { %s2680_s6 = scalar_lea.vmem (!%p556_p2), [#allocation4], %s1869_s28  ;;  %s2682_s1 = scalar_lea.vmem (!%p556_p2), [#allocation5], %s1870_s25 }
  0x6e   : > { %p1872_p4 = scmp.ne.s32.totalorder (!%p556_p2), %s2313_s18, 0 }
  0x70   : > { %s2991_s11 = smov (!%p604_p3, %s1871_s11), 3  ;;  %613 = sbr.rel (%p1872_p4) target bundleno = 130 (0x82), region = 97 }
  0x71   : > { %s606_s29 = scalar_lea.vmem %s2962_s2, %s2991_s11  ;;  %v2331_v32 = vmov (!%p1872_p4), 0.0  }
  0x72   : > { %614 = vst [vmem:[#allocation2] sm:$0xff] (!%p1872_p4), %v2331_v32  ;;  %615 = vst [vmem:[#allocation2 + $0x8] sm:$0xff] (!%p1872_p4), %v2331_v32 }
  0x73   : > { %616 = vst [vmem:[#allocation2 + $0x10] sm:$0xff] (!%p1872_p4), %v2331_v32  ;;  %617 = vst [vmem:[#allocation2 + $0x18] sm:$0xff] (!%p1872_p4), %v2331_v32 }
  0x74   : > { %618 = vst [vmem:[#allocation2 + $0x20] sm:$0xff] (!%p1872_p4), %v2331_v32  ;;  %619 = vst [vmem:[#allocation2 + $0x28] sm:$0xff] (!%p1872_p4), %v2331_v32 }
  0x75   : > { %620 = vst [vmem:[#allocation2 + $0x30] sm:$0xff] (!%p1872_p4), %v2331_v32  ;;  %621 = vst [vmem:[#allocation2 + $0x38] sm:$0xff] (!%p1872_p4), %v2331_v32 }
  0x76   : > { %622 = vst [vmem:[#allocation2 + $0x40] sm:$0xff] (!%p1872_p4), %v2331_v32  ;;  %623 = vst [vmem:[#allocation2 + $0x48] sm:$0xff] (!%p1872_p4), %v2331_v32 }
  0x77   : > { %624 = vst [vmem:[#allocation2 + $0x50] sm:$0xff] %v2331_v32  ;;  %625 = vst [vmem:[#allocation2 + $0x58] sm:$0xff] %v2331_v32 }
  0x78   : > { %626 = vst [vmem:[#allocation2 + $0x60] sm:$0xff] %v2331_v32  ;;  %627 = vst [vmem:[#allocation2 + $0x68] sm:$0xff] %v2331_v32 }
  0x79   : > { %628 = vst [vmem:[#allocation2 + $0x70] sm:$0xff] %v2331_v32  ;;  %629 = vst [vmem:[#allocation2 + $0x78] sm:$0xff] %v2331_v32 }
  0x7a   : > { %630 = vst [vmem:[#allocation2 + $0x80] sm:$0xff] %v2331_v32  ;;  %631 = vst [vmem:[#allocation2 + $0x88] sm:$0xff] %v2331_v32 }
  0x7b   : > { %632 = vst [vmem:[#allocation2 + $0x90] sm:$0xff] %v2331_v32  ;;  %633 = vst [vmem:[#allocation2 + $0x98] sm:$0xff] %v2331_v32 }
  0x7c   : > { %634 = vst [vmem:[#allocation2 + $0xa0] sm:$0xff] %v2331_v32  ;;  %635 = vst [vmem:[#allocation2 + $0xa8] sm:$0xff] %v2331_v32 }
  0x7d   : > { %636 = vst [vmem:[#allocation2 + $0xb0] sm:$0xff] %v2331_v32  ;;  %637 = vst [vmem:[#allocation2 + $0xb8] sm:$0xff] %v2331_v32 }
  0x7e   : > { %638 = vst [vmem:[#allocation2 + $0xc0] sm:$0xff] %v2331_v32  ;;  %639 = vst [vmem:[#allocation2 + $0xc8] sm:$0xff] %v2331_v32 }
  0x7f   : > { %640 = vst [vmem:[#allocation2 + $0xd0] sm:$0xff] %v2331_v32  ;;  %641 = vst [vmem:[#allocation2 + $0xd8] sm:$0xff] %v2331_v32 }
  0x80   : > { %642 = vst [vmem:[#allocation2 + $0xe0] sm:$0xff] %v2331_v32  ;;  %643 = vst [vmem:[#allocation2 + $0xe8] sm:$0xff] %v2331_v32 }
  0x81   : > { %644 = vst [vmem:[#allocation2 + $0xf0] sm:$0xff] %v2331_v32  ;;  %645 = vst [vmem:[#allocation2 + $0xf8] sm:$0xff] %v2331_v32 }
  0x82 PF: > { %v2099_v33 = vld [vmem:[%s2680_s6 + $0x4] ss:$8 sps:$4 sm:$0xff]   ;;  %v2103_v35 = vld [vmem:[%s2680_s6] ss:$8 sps:$4 sm:$0xff]   ;;  %v2105_v37 = vld [vmem:[%s2680_s6 + $0x14] ss:$8 sps:$4 sm:$0xff]  }
  0x83   : > { %v2101_v34 = vld [vmem:[%s2680_s6 + $0x104] ss:$8 sps:$4 sm:$0xff]   ;;  %1254 = vmatprep.subr.bf16.mxu1 %v2099_v33  ;;  %v2104_v36 = vld [vmem:[%s2680_s6 + $0x100] ss:$8 sps:$4 sm:$0xff]   ;;  %v2107_v38 = vld [vmem:[%s2680_s6 + $0x114] ss:$8 sps:$4 sm:$0xff]  }
  0x84   : > { %1367 = vmatprep.subr.bf16.mxu0 %v2101_v34  ;;  %1255 = vmatpush1.bf16.msra.mxu1 %v2103_v35  ;;  %v2109_v39 = vld [vmem:[%s2680_s6 + $0x10] ss:$8 sps:$4 sm:$0xff]   ;;  %v2111_v41 = vld [vmem:[%s2680_s6 + $0x24] ss:$8 sps:$4 sm:$0xff]   ;;  %v2115_v43 = vld [vmem:[%s2680_s6 + $0x20] ss:$8 sps:$4 sm:$0xff]  }
  0x85   : > { %1368 = vmatpush1.bf16.msra.mxu0 %v2104_v36  ;;  %1256 = vmatprep.subr.bf16.mxu1 %v2105_v37  ;;  %v2110_v40 = vld [vmem:[%s2680_s6 + $0x110] ss:$8 sps:$4 sm:$0xff]   ;;  %v2113_v42 = vld [vmem:[%s2680_s6 + $0x124] ss:$8 sps:$4 sm:$0xff]   ;;  %v2116_v44 = vld [vmem:[%s2680_s6 + $0x120] ss:$8 sps:$4 sm:$0xff]  }
  0x86   : > { %1369 = vmatprep.subr.bf16.mxu0 %v2107_v38  ;;  %v2117_v45 = vld [vmem:[%s2680_s6 + $0x34] ss:$8 sps:$4 sm:$0xff]   ;;  %v2121_v47 = vld [vmem:[%s2680_s6 + $0x30] ss:$8 sps:$4 sm:$0xff]   ;;  %v2123_v49 = vld [vmem:[%s2680_s6 + $0x44] ss:$8 sps:$4 sm:$0xff]  }
  0x87   : > { %v2119_v46 = vld [vmem:[%s2680_s6 + $0x134] ss:$8 sps:$4 sm:$0xff]   ;;  %v2122_v48 = vld [vmem:[%s2680_s6 + $0x130] ss:$8 sps:$4 sm:$0xff]   ;;  %v2125_v50 = vld [vmem:[%s2680_s6 + $0x144] ss:$8 sps:$4 sm:$0xff]  }
  0x88   : > { %1257 = vmatpush1.bf16.msra.mxu1 %v2109_v39  ;;  %v2127_v51 = vld [vmem:[%s2680_s6 + $0x40] ss:$8 sps:$4 sm:$0xff]   ;;  %v2129_v53 = vld [vmem:[%s2680_s6 + $0x54] ss:$8 sps:$4 sm:$0xff]   ;;  %v2133_v55 = vld [vmem:[%s2680_s6 + $0x50] ss:$8 sps:$4 sm:$0xff]  }
  0x89   : > { %1370 = vmatpush1.bf16.msra.mxu0 %v2110_v40  ;;  %1258 = vmatprep.subr.bf16.mxu1 %v2111_v41  ;;  %v2128_v52 = vld [vmem:[%s2680_s6 + $0x140] ss:$8 sps:$4 sm:$0xff]   ;;  %v2131_v54 = vld [vmem:[%s2680_s6 + $0x154] ss:$8 sps:$4 sm:$0xff]   ;;  %v2134_v56 = vld [vmem:[%s2680_s6 + $0x150] ss:$8 sps:$4 sm:$0xff]  }
  0x8a   : > { %1371 = vmatprep.subr.bf16.mxu0 %v2113_v42  ;;  %v2135_v57 = vld [vmem:[%s2680_s6 + $0x64] ss:$8 sps:$4 sm:$0xff]   ;;  %v2139_v59 = vld [vmem:[%s2680_s6 + $0x60] ss:$8 sps:$4 sm:$0xff]   ;;  %v2141_v61 = vld [vmem:[%s2680_s6 + $0x74] ss:$8 sps:$4 sm:$0xff]  }
  0x8b   : > { %v2137_v58 = vld [vmem:[%s2680_s6 + $0x164] ss:$8 sps:$4 sm:$0xff]   ;;  %v2140_v60 = vld [vmem:[%s2680_s6 + $0x160] ss:$8 sps:$4 sm:$0xff]   ;;  %v2143_v62 = vld [vmem:[%s2680_s6 + $0x174] ss:$8 sps:$4 sm:$0xff]  }
  0x8c   : > { %1259 = vmatpush1.bf16.msra.mxu1 %v2115_v43  ;;  %v2145_v63 = vld [vmem:[%s2680_s6 + $0x70] ss:$8 sps:$4 sm:$0xff]   ;;  %v2147_v1 = vld [vmem:[%s2680_s6 + $0x84] ss:$8 sps:$4 sm:$0xff]   ;;  %v2151_v3 = vld [vmem:[%s2680_s6 + $0x80] ss:$8 sps:$4 sm:$0xff]  }
  0x8d   : > { %1372 = vmatpush1.bf16.msra.mxu0 %v2116_v44  ;;  %1260 = vmatprep.subr.bf16.mxu1 %v2117_v45  ;;  %v2146_v0 = vld [vmem:[%s2680_s6 + $0x170] ss:$8 sps:$4 sm:$0xff]   ;;  %v2149_v2 = vld [vmem:[%s2680_s6 + $0x184] ss:$8 sps:$4 sm:$0xff]   ;;  %v2152_v4 = vld [vmem:[%s2680_s6 + $0x180] ss:$8 sps:$4 sm:$0xff]  }
  0x8e   : > { %1373 = vmatprep.subr.bf16.mxu0 %v2119_v46  ;;  %v2153_v5 = vld [vmem:[%s2680_s6 + $0x94] ss:$8 sps:$4 sm:$0xff]   ;;  %v2157_v7 = vld [vmem:[%s2680_s6 + $0x90] ss:$8 sps:$4 sm:$0xff]   ;;  %v2159_v9 = vld [vmem:[%s2680_s6 + $0xa4] ss:$8 sps:$4 sm:$0xff]  }
  0x8f   : > { %v2155_v6 = vld [vmem:[%s2680_s6 + $0x194] ss:$8 sps:$4 sm:$0xff]   ;;  %v2158_v8 = vld [vmem:[%s2680_s6 + $0x190] ss:$8 sps:$4 sm:$0xff]   ;;  %v2161_v10 = vld [vmem:[%s2680_s6 + $0x1a4] ss:$8 sps:$4 sm:$0xff]  }
  0x90   : > { %1261 = vmatpush1.bf16.msra.mxu1 %v2121_v47  ;;  %v2163_v11 = vld [vmem:[%s2680_s6 + $0xa0] ss:$8 sps:$4 sm:$0xff]   ;;  %v2165_v13 = vld [vmem:[%s2680_s6 + $0xb4] ss:$8 sps:$4 sm:$0xff]   ;;  %v2169_v15 = vld [vmem:[%s2680_s6 + $0xb0] ss:$8 sps:$4 sm:$0xff]  }
  0x91   : > { %1374 = vmatpush1.bf16.msra.mxu0 %v2122_v48  ;;  %1262 = vmatprep.subr.bf16.mxu1 %v2123_v49  ;;  %v2164_v12 = vld [vmem:[%s2680_s6 + $0x1a0] ss:$8 sps:$4 sm:$0xff]   ;;  %v2167_v14 = vld [vmem:[%s2680_s6 + $0x1b4] ss:$8 sps:$4 sm:$0xff]   ;;  %v2170_v16 = vld [vmem:[%s2680_s6 + $0x1b0] ss:$8 sps:$4 sm:$0xff]  }
  0x92   : > { %1375 = vmatprep.subr.bf16.mxu0 %v2125_v50  ;;  %v2171_v17 = vld [vmem:[%s2680_s6 + $0xc4] ss:$8 sps:$4 sm:$0xff]   ;;  %v2175_v21 = vld [vmem:[%s2680_s6 + $0xc0] ss:$8 sps:$4 sm:$0xff]   ;;  %v2177_v23 = vld [vmem:[%s2680_s6 + $0xd4] ss:$8 sps:$4 sm:$0xff]  }
  0x93   : > { %v2197_v18 = vld [vmem:[%s2678_s4 + $0x4] ss:$16 sps:$4 sm:$0xff]   ;;  %v2200_v20 = vld [vmem:[%s2678_s4 + $0xc] ss:$16 sps:$4 sm:$0xff]   ;;  %v2176_v22 = vld [vmem:[%s2680_s6 + $0x1c0] ss:$8 sps:$4 sm:$0xff]  }
  0x94   : > { %1263 = vmatpush1.bf16.msra.mxu1 %v2127_v51  ;;  %v2173_v19 = vld [vmem:[%s2680_s6 + $0x1c4] ss:$8 sps:$4 sm:$0xff]   ;;  %1286 = vmatprep.mubr.bf16.mxu1 %v2197_v18  ;;  %v2179_v24 = vld [vmem:[%s2680_s6 + $0x1d4] ss:$8 sps:$4 sm:$0xff]   ;;  %v2181_v25 = vld [vmem:[%s2680_s6 + $0xd0] ss:$8 sps:$4 sm:$0xff]  }
  0x95   : > { %1376 = vmatpush1.bf16.msra.mxu0 %v2128_v52  ;;  %1264 = vmatprep.subr.bf16.mxu1 %v2129_v53  ;;  %v2182_v26 = vld [vmem:[%s2680_s6 + $0x1d0] ss:$8 sps:$4 sm:$0xff]   ;;  %v2183_v27 = vld [vmem:[%s2680_s6 + $0xe4] ss:$8 sps:$4 sm:$0xff]   ;;  %v2187_v29 = vld [vmem:[%s2680_s6 + $0xe0] ss:$8 sps:$4 sm:$0xff]  }
  0x96   : > { %1377 = vmatprep.subr.bf16.mxu0 %v2131_v54  ;;  %1399 = vmatprep.mubr.bf16.mxu0 %v2200_v20  ;;  %v2185_v28 = vld [vmem:[%s2680_s6 + $0x1e4] ss:$8 sps:$4 sm:$0xff]   ;;  %v2188_v30 = vld [vmem:[%s2680_s6 + $0x1e0] ss:$8 sps:$4 sm:$0xff]   ;;  %v2189_v31 = vld [vmem:[%s2680_s6 + $0xf4] ss:$8 sps:$4 sm:$0xff]  }
  0x97   : > { %v2191_v32 = vld [vmem:[%s2680_s6 + $0x1f4] ss:$8 sps:$4 sm:$0xff]   ;;  %v2193_v33 = vld [vmem:[%s2680_s6 + $0xf0] ss:$8 sps:$4 sm:$0xff]   ;;  %p1969_p5 = scmp.ne.s32.totalorder %s2313_s18, 1 }
  0x98   : > { %1265 = vmatpush1.bf16.msra.mxu1 %v2133_v55  ;;  %v2194_v34 = vld [vmem:[%s2680_s6 + $0x1f0] ss:$8 sps:$4 sm:$0xff]   ;;  %v2201_v37 = vld [vmem:[%s2678_s4 + $0x24] ss:$16 sps:$4 sm:$0xff]   ;;  %v2203_v38 = vld [vmem:[%s2678_s4 + $0x2c] ss:$16 sps:$4 sm:$0xff]  }
  0x99   : > { %1378 = vmatpush1.bf16.msra.mxu0 %v2134_v56  ;;  %1266 = vmatprep.subr.bf16.mxu1 %v2135_v57  ;;  %v2195_v35 = vld [vmem:[%s2678_s4] ss:$16 sps:$4 sm:$0xff]   ;;  %v2198_v36 = vld [vmem:[%s2678_s4 + $0x8] ss:$16 sps:$4 sm:$0xff]   ;;  %v2207_v41 = vld [vmem:[%s2678_s4 + $0x44] ss:$16 sps:$4 sm:$0xff]  }
  0x9a   : > { %1379 = vmatprep.subr.bf16.mxu0 %v2137_v58  ;;  %v2205_v39 = vld [vmem:[%s2678_s4 + $0x20] ss:$16 sps:$4 sm:$0xff]   ;;  %v2206_v40 = vld [vmem:[%s2678_s4 + $0x28] ss:$16 sps:$4 sm:$0xff]   ;;  %v2209_v42 = vld [vmem:[%s2678_s4 + $0x4c] ss:$16 sps:$4 sm:$0xff]  }
  0x9b   : > { %v2211_v43 = vld [vmem:[%s2678_s4 + $0x40] ss:$16 sps:$4 sm:$0xff]   ;;  %v2212_v44 = vld [vmem:[%s2678_s4 + $0x48] ss:$16 sps:$4 sm:$0xff]   ;;  %v2213_v45 = vld [vmem:[%s2678_s4 + $0x64] ss:$16 sps:$4 sm:$0xff]  }
  0x9c   : > { %1267 = vmatpush1.bf16.msra.mxu1 %v2139_v59  ;;  %v2215_v46 = vld [vmem:[%s2678_s4 + $0x6c] ss:$16 sps:$4 sm:$0xff]   ;;  %v2217_v47 = vld [vmem:[%s2678_s4 + $0x60] ss:$16 sps:$4 sm:$0xff]   ;;  %v2218_v48 = vld [vmem:[%s2678_s4 + $0x68] ss:$16 sps:$4 sm:$0xff]  }
  0x9d   : > { %1380 = vmatpush1.bf16.msra.mxu0 %v2140_v60  ;;  %1268 = vmatprep.subr.bf16.mxu1 %v2141_v61  ;;  %v2219_v49 = vld [vmem:[%s2678_s4 + $0x84] ss:$16 sps:$4 sm:$0xff]   ;;  %v2221_v50 = vld [vmem:[%s2678_s4 + $0x8c] ss:$16 sps:$4 sm:$0xff]   ;;  %v2223_v51 = vld [vmem:[%s2678_s4 + $0x80] ss:$16 sps:$4 sm:$0xff]  }
  0x9e   : > { %1381 = vmatprep.subr.bf16.mxu0 %v2143_v62  ;;  %v2224_v52 = vld [vmem:[%s2678_s4 + $0x88] ss:$16 sps:$4 sm:$0xff]   ;;  %v2225_v53 = vld [vmem:[%s2678_s4 + $0xa4] ss:$16 sps:$4 sm:$0xff]   ;;  %v2227_v54 = vld [vmem:[%s2678_s4 + $0xac] ss:$16 sps:$4 sm:$0xff]  }
  0x9f   : > { %v2229_v55 = vld [vmem:[%s2678_s4 + $0xa0] ss:$16 sps:$4 sm:$0xff]   ;;  %v2230_v56 = vld [vmem:[%s2678_s4 + $0xa8] ss:$16 sps:$4 sm:$0xff]   ;;  %v2231_v57 = vld [vmem:[%s2678_s4 + $0xc4] ss:$16 sps:$4 sm:$0xff]  }
  0xa0   : > { %1269 = vmatpush1.bf16.msra.mxu1 %v2145_v63  ;;  %v2233_v58 = vld [vmem:[%s2678_s4 + $0xcc] ss:$16 sps:$4 sm:$0xff]   ;;  %v2235_v59 = vld [vmem:[%s2678_s4 + $0xc0] ss:$16 sps:$4 sm:$0xff]   ;;  %v2236_v60 = vld [vmem:[%s2678_s4 + $0xc8] ss:$16 sps:$4 sm:$0xff]  }
  0xa1   : > { %1382 = vmatpush1.bf16.msra.mxu0 %v2146_v0  ;;  %1270 = vmatprep.subr.bf16.mxu1 %v2147_v1  ;;  %v2237_v61 = vld [vmem:[%s2678_s4 + $0xe4] ss:$16 sps:$4 sm:$0xff]   ;;  %v2239_v62 = vld [vmem:[%s2678_s4 + $0xec] ss:$16 sps:$4 sm:$0xff]   ;;  %v2241_v63 = vld [vmem:[%s2678_s4 + $0xe0] ss:$16 sps:$4 sm:$0xff]  }
  0xa2   : > { %1383 = vmatprep.subr.bf16.mxu0 %v2149_v2  ;;  %v2242_v0 = vld [vmem:[%s2678_s4 + $0xe8] ss:$16 sps:$4 sm:$0xff]   ;;  %v646_v2 = vld [vmem:[#allocation2] sm:$0xff] }
  0xa4   : > { %1271 = vmatpush1.bf16.msra.mxu1 %v2151_v3 }
  0xa5   : > { %1384 = vmatpush1.bf16.msra.mxu0 %v2152_v4  ;;  %1272 = vmatprep.subr.bf16.mxu1 %v2153_v5 }
  0xa6   : > { %1385 = vmatprep.subr.bf16.mxu0 %v2155_v6  ;;  %v647_v6 = vld [vmem:[#allocation2 + $0x8] sm:$0xff] }
  0xa8   : > { %1273 = vmatpush1.bf16.msra.mxu1 %v2157_v7 }
  0xa9   : > { %1386 = vmatpush1.bf16.msra.mxu0 %v2158_v8  ;;  %1274 = vmatprep.subr.bf16.mxu1 %v2159_v9 }
  0xaa   : > { %1387 = vmatprep.subr.bf16.mxu0 %v2161_v10  ;;  %v648_v10 = vld [vmem:[#allocation2 + $0x10] sm:$0xff] }
  0xac   : > { %1275 = vmatpush1.bf16.msra.mxu1 %v2163_v11 }
  0xad   : > { %1388 = vmatpush1.bf16.msra.mxu0 %v2164_v12  ;;  %1276 = vmatprep.subr.bf16.mxu1 %v2165_v13 }
  0xae   : > { %1389 = vmatprep.subr.bf16.mxu0 %v2167_v14 }
  0xb0   : > { %1277 = vmatpush1.bf16.msra.mxu1 %v2169_v15  ;;  %v649_v15 = vld [vmem:[#allocation2 + $0x18] sm:$0xff] }
  0xb1   : > { %1390 = vmatpush1.bf16.msra.mxu0 %v2170_v16  ;;  %1278 = vmatprep.subr.bf16.mxu1 %v2171_v17 }
  0xb2   : > { %1391 = vmatprep.subr.bf16.mxu0 %v2173_v19 }
  0xb4   : > { %1279 = vmatpush1.bf16.msra.mxu1 %v2175_v21 }
  0xb5   : > { %1392 = vmatpush1.bf16.msra.mxu0 %v2176_v22  ;;  %1280 = vmatprep.subr.bf16.mxu1 %v2177_v23  ;;  %v650_v22 = vld [vmem:[#allocation2 + $0x20] sm:$0xff] }
  0xb6   : > { %1393 = vmatprep.subr.bf16.mxu0 %v2179_v24 }
  0xb8   : > { %1281 = vmatpush1.bf16.msra.mxu1 %v2181_v25 }
  0xb9   : > { %1394 = vmatpush1.bf16.msra.mxu0 %v2182_v26  ;;  %1282 = vmatprep.subr.bf16.mxu1 %v2183_v27  ;;  %v651_v26 = vld [vmem:[#allocation2 + $0x28] sm:$0xff] }
  0xba   : > { %1395 = vmatprep.subr.bf16.mxu0 %v2185_v28 }
  0xbc   : > { %1283 = vmatpush1.bf16.msra.mxu1 %v2187_v29 }
  0xbd   : > { %1396 = vmatpush1.bf16.msra.mxu0 %v2188_v30  ;;  %1284 = vmatprep.subr.bf16.mxu1 %v2189_v31  ;;  %v652_v30 = vld [vmem:[#allocation2 + $0x30] sm:$0xff] }
  0xbe   : > { %1397 = vmatprep.subr.bf16.mxu0 %v2191_v32 }
  0xc0   : > { %1285 = vmatpush1.bf16.msra.mxu1 %v2193_v33 }
  0xc1   : > { %1398 = vmatpush1.bf16.msra.mxu0 %v2194_v34 }
  0xc3   : > { %1287 = vmatmul.mubr.bf16.vlgmr.msra.gmra.mrb[0].mxu1 %v2195_v35  ;;  %v653_v35 = vld [vmem:[#allocation2 + $0x38] sm:$0xff] }
  0xc4   : > { %1400 = vmatmul.mubr.bf16.vlgmr.msra.gmra.mrb[0].mxu0 %v2198_v36  ;;  %1296 = vmatprep.mubr.bf16.mxu1 %v2201_v37 }
  0xc5   : > { %1409 = vmatprep.mubr.bf16.mxu0 %v2203_v38 }
  0xcb   : > { %1297 = vmatmul.mubr.bf16.gmra.mrb[4].mxu1 %v2205_v39 }
  0xcc   : > { %1410 = vmatmul.mubr.bf16.gmra.mrb[4].mxu0 %v2206_v40  ;;  %1306 = vmatprep.mubr.bf16.mxu1 %v2207_v41 }
  0xcd   : > { %1419 = vmatprep.mubr.bf16.mxu0 %v2209_v42  ;;  %v654_v42 = vld [vmem:[#allocation2 + $0x40] sm:$0xff] }
  0xd3   : > { %1307 = vmatmul.mubr.bf16.gmra.mrb[8].mxu1 %v2211_v43 }
  0xd4   : > { %1420 = vmatmul.mubr.bf16.gmra.mrb[8].mxu0 %v2212_v44  ;;  %1316 = vmatprep.mubr.bf16.mxu1 %v2213_v45 }
  0xd5   : > { %1429 = vmatprep.mubr.bf16.mxu0 %v2215_v46  ;;  %v655_v46 = vld [vmem:[#allocation2 + $0x48] sm:$0xff] }
  0xdb   : > { %1317 = vmatmul.mubr.bf16.gmra.mrb[12].mxu1 %v2217_v47 }
  0xdc   : > { %1430 = vmatmul.mubr.bf16.gmra.mrb[12].mxu0 %v2218_v48  ;;  %1326 = vmatprep.mubr.bf16.mxu1 %v2219_v49 }
  0xdd   : > { %1439 = vmatprep.mubr.bf16.mxu0 %v2221_v50  ;;  %v656_v50 = vld [vmem:[#allocation2 + $0x50] sm:$0xff] }
  0xe3   : > { %1327 = vmatmul.mubr.bf16.gmra.mrb[16].mxu1 %v2223_v51 }
  0xe4   : > { %1440 = vmatmul.mubr.bf16.gmra.mrb[16].mxu0 %v2224_v52  ;;  %1336 = vmatprep.mubr.bf16.mxu1 %v2225_v53 }
  0xe5   : > { %1449 = vmatprep.mubr.bf16.mxu0 %v2227_v54 }
  0xeb   : > { %1337 = vmatmul.mubr.bf16.gmra.mrb[20].mxu1 %v2229_v55  ;;  %v657_v55 = vld [vmem:[#allocation2 + $0x58] sm:$0xff] }
  0xec   : > { %1450 = vmatmul.mubr.bf16.gmra.mrb[20].mxu0 %v2230_v56  ;;  %1346 = vmatprep.mubr.bf16.mxu1 %v2231_v57 }
  0xed   : > { %1459 = vmatprep.mubr.bf16.mxu0 %v2233_v58 }
  0xf3   : > { %1347 = vmatmul.mubr.bf16.gmra.mrb[24].mxu1 %v2235_v59 }
  0xf4   : > { %1460 = vmatmul.mubr.bf16.gmra.mrb[24].mxu0 %v2236_v60  ;;  %1356 = vmatprep.mubr.bf16.mxu1 %v2237_v61 }
  0xf5   : > { %1469 = vmatprep.mubr.bf16.mxu0 %v2239_v62  ;;  %v658_v62 = vld [vmem:[#allocation2 + $0x60] sm:$0xff] }
  0xfb   : > { %1357 = vmatmul.mubr.bf16.gmra.mrb[28].mxu1 %v2241_v63 }
  0xfc   : > { %1470 = vmatmul.mubr.bf16.gmra.mrb[28].mxu0 %v2242_v0 }
 0x196   : > { %v1288_v1 = vpop.f32.mrb[0].mxu1 }
 0x197   : > { %v1401_v3 = vpop.f32.mrb[0].mxu0  ;;  %v1290_v5 = vpop.f32.mrb[1].mxu1 }
 0x198   : > { %v1402_v4 = vadd.f32 %v1401_v3, %v1288_v1  ;;  %v1403_v7 = vpop.f32.mrb[1].mxu0  ;;  %v1292_v9 = vpop.f32.mrb[2].mxu1 }
 0x199   : > { %v1404_v8 = vadd.f32 %v1403_v7, %v1290_v5  ;;  %v1405_v11 = vpop.f32.mrb[2].mxu0  ;;  %v1294_v14 = vpop.f32.mrb[3].mxu1 }
 0x19a   : > { %v1480_v12 = vadd.f32 %v1402_v4, %v646_v2  ;;  %v1406_v13 = vadd.f32 %v1405_v11, %v1292_v9  ;;  %v1407_v16 = vpop.f32.mrb[3].mxu0  ;;  %v659_v2 = vld [vmem:[#allocation2 + $0x68] sm:$0xff]  ;;  %v661_v11 = vld [vmem:[#allocation2 + $0x78] sm:$0xff] }
 0x19b   : > { %v1481_v17 = vadd.f32 %v1404_v8, %v647_v6  ;;  %v1408_v18 = vadd.f32 %v1407_v16, %v1294_v14  ;;  %v660_v6 = vld [vmem:[#allocation2 + $0x70] sm:$0xff] }
 0x19c   : > { %1512 = vst [vmem:[#allocation2] sm:$0xff] %v1480_v12  ;;  %v1482_v19 = vadd.f32 %v1406_v13, %v648_v10 }
 0x19d   : > { %1513 = vst [vmem:[#allocation2 + $0x8] sm:$0xff] %v1481_v17  ;;  %v1483_v20 = vadd.f32 %v1408_v18, %v649_v15  ;;  %v662_v18 = vld [vmem:[#allocation2 + $0x80] sm:$0xff] }
 0x19e   : > { %1514 = vst [vmem:[#allocation2 + $0x10] sm:$0xff] %v1482_v19  ;;  %v1298_v21 = vpop.f32.mrb[4].mxu1 }
 0x19f   : > { %1515 = vst [vmem:[#allocation2 + $0x18] sm:$0xff] %v1483_v20  ;;  %v1411_v23 = vpop.f32.mrb[4].mxu0  ;;  %v1300_v25 = vpop.f32.mrb[5].mxu1 }
 0x1a0   : > { %v1412_v24 = vadd.f32 %v1411_v23, %v1298_v21  ;;  %v1413_v27 = vpop.f32.mrb[5].mxu0  ;;  %v1302_v29 = vpop.f32.mrb[6].mxu1 }
 0x1a1   : > { %v1414_v28 = vadd.f32 %v1413_v27, %v1300_v25  ;;  %v1415_v31 = vpop.f32.mrb[6].mxu0  ;;  %v1304_v34 = vpop.f32.mrb[7].mxu1 }
 0x1a2   : > { %v1484_v32 = vadd.f32 %v1412_v24, %v650_v22  ;;  %v1416_v33 = vadd.f32 %v1415_v31, %v1302_v29  ;;  %v1417_v36 = vpop.f32.mrb[7].mxu0  ;;  %v663_v22 = vld [vmem:[#allocation2 + $0x88] sm:$0xff]  ;;  %v665_v31 = vld [vmem:[#allocation2 + $0x98] sm:$0xff] }
 0x1a3   : > { %v1485_v37 = vadd.f32 %v1414_v28, %v651_v26  ;;  %v1418_v38 = vadd.f32 %v1417_v36, %v1304_v34  ;;  %v664_v26 = vld [vmem:[#allocation2 + $0x90] sm:$0xff] }
 0x1a4   : > { %1516 = vst [vmem:[#allocation2 + $0x20] sm:$0xff] %v1484_v32  ;;  %v1486_v39 = vadd.f32 %v1416_v33, %v652_v30 }
 0x1a5   : > { %1517 = vst [vmem:[#allocation2 + $0x28] sm:$0xff] %v1485_v37  ;;  %v1487_v40 = vadd.f32 %v1418_v38, %v653_v35  ;;  %v666_v38 = vld [vmem:[#allocation2 + $0xa0] sm:$0xff] }
 0x1a6   : > { %1518 = vst [vmem:[#allocation2 + $0x30] sm:$0xff] %v1486_v39  ;;  %v1308_v41 = vpop.f32.mrb[8].mxu1 }
 0x1a7   : > { %1519 = vst [vmem:[#allocation2 + $0x38] sm:$0xff] %v1487_v40  ;;  %v1421_v43 = vpop.f32.mrb[8].mxu0  ;;  %v1310_v45 = vpop.f32.mrb[9].mxu1 }
 0x1a8   : > { %v1422_v44 = vadd.f32 %v1421_v43, %v1308_v41  ;;  %v1423_v47 = vpop.f32.mrb[9].mxu0  ;;  %v1312_v49 = vpop.f32.mrb[10].mxu1 }
 0x1a9   : > { %v1424_v48 = vadd.f32 %v1423_v47, %v1310_v45  ;;  %v1425_v51 = vpop.f32.mrb[10].mxu0  ;;  %v1314_v54 = vpop.f32.mrb[11].mxu1 }
 0x1aa   : > { %v1488_v52 = vadd.f32 %v1422_v44, %v654_v42  ;;  %v1426_v53 = vadd.f32 %v1425_v51, %v1312_v49  ;;  %v1427_v56 = vpop.f32.mrb[11].mxu0  ;;  %v667_v42 = vld [vmem:[#allocation2 + $0xa8] sm:$0xff]  ;;  %v669_v51 = vld [vmem:[#allocation2 + $0xb8] sm:$0xff] }
 0x1ab   : > { %v1489_v57 = vadd.f32 %v1424_v48, %v655_v46  ;;  %v1428_v58 = vadd.f32 %v1427_v56, %v1314_v54  ;;  %v668_v46 = vld [vmem:[#allocation2 + $0xb0] sm:$0xff] }
 0x1ac   : > { %1520 = vst [vmem:[#allocation2 + $0x40] sm:$0xff] %v1488_v52  ;;  %v1490_v59 = vadd.f32 %v1426_v53, %v656_v50 }
 0x1ad   : > { %1521 = vst [vmem:[#allocation2 + $0x48] sm:$0xff] %v1489_v57  ;;  %v1491_v60 = vadd.f32 %v1428_v58, %v657_v55  ;;  %v670_v58 = vld [vmem:[#allocation2 + $0xc0] sm:$0xff] }
 0x1ae   : > { %1522 = vst [vmem:[#allocation2 + $0x50] sm:$0xff] %v1490_v59  ;;  %v1318_v61 = vpop.f32.mrb[12].mxu1 }
 0x1af   : > { %1523 = vst [vmem:[#allocation2 + $0x58] sm:$0xff] %v1491_v60  ;;  %v1431_v63 = vpop.f32.mrb[12].mxu0  ;;  %v1320_v1 = vpop.f32.mrb[13].mxu1 }
 0x1b0   : > { %v1432_v0 = vadd.f32 %v1431_v63, %v1318_v61  ;;  %v1433_v3 = vpop.f32.mrb[13].mxu0  ;;  %v1322_v5 = vpop.f32.mrb[14].mxu1 }
 0x1b1   : > { %v1434_v4 = vadd.f32 %v1433_v3, %v1320_v1  ;;  %v1435_v7 = vpop.f32.mrb[14].mxu0  ;;  %v1324_v10 = vpop.f32.mrb[15].mxu1 }
 0x1b2   : > { %v1492_v8 = vadd.f32 %v1432_v0, %v658_v62  ;;  %v1436_v9 = vadd.f32 %v1435_v7, %v1322_v5  ;;  %v1437_v12 = vpop.f32.mrb[15].mxu0  ;;  %v671_v62 = vld [vmem:[#allocation2 + $0xc8] sm:$0xff]  ;;  %v673_v7 = vld [vmem:[#allocation2 + $0xd8] sm:$0xff] }
 0x1b3   : > { %v1493_v13 = vadd.f32 %v1434_v4, %v659_v2  ;;  %v1438_v14 = vadd.f32 %v1437_v12, %v1324_v10  ;;  %v672_v2 = vld [vmem:[#allocation2 + $0xd0] sm:$0xff] }
 0x1b4   : > { %1524 = vst [vmem:[#allocation2 + $0x60] sm:$0xff] %v1492_v8  ;;  %v1494_v15 = vadd.f32 %v1436_v9, %v660_v6 }
 0x1b5   : > { %1525 = vst [vmem:[#allocation2 + $0x68] sm:$0xff] %v1493_v13  ;;  %v1495_v16 = vadd.f32 %v1438_v14, %v661_v11  ;;  %v674_v14 = vld [vmem:[#allocation2 + $0xe0] sm:$0xff] }
 0x1b6   : > { %1526 = vst [vmem:[#allocation2 + $0x70] sm:$0xff] %v1494_v15  ;;  %v1328_v17 = vpop.f32.mrb[16].mxu1 }
 0x1b7   : > { %1527 = vst [vmem:[#allocation2 + $0x78] sm:$0xff] %v1495_v16  ;;  %v1441_v19 = vpop.f32.mrb[16].mxu0  ;;  %v1330_v21 = vpop.f32.mrb[17].mxu1 }
 0x1b8   : > { %v1442_v20 = vadd.f32 %v1441_v19, %v1328_v17  ;;  %v1443_v23 = vpop.f32.mrb[17].mxu0  ;;  %v1332_v25 = vpop.f32.mrb[18].mxu1 }
 0x1b9   : > { %v1444_v24 = vadd.f32 %v1443_v23, %v1330_v21  ;;  %v1445_v27 = vpop.f32.mrb[18].mxu0  ;;  %v1334_v30 = vpop.f32.mrb[19].mxu1 }
 0x1ba   : > { %v1496_v28 = vadd.f32 %v1442_v20, %v662_v18  ;;  %v1446_v29 = vadd.f32 %v1445_v27, %v1332_v25  ;;  %v1447_v32 = vpop.f32.mrb[19].mxu0  ;;  %v675_v18 = vld [vmem:[#allocation2 + $0xe8] sm:$0xff]  ;;  %v677_v27 = vld [vmem:[#allocation2 + $0xf8] sm:$0xff] }
 0x1bb   : > { %v1497_v33 = vadd.f32 %v1444_v24, %v663_v22  ;;  %v1448_v34 = vadd.f32 %v1447_v32, %v1334_v30  ;;  %v676_v22 = vld [vmem:[#allocation2 + $0xf0] sm:$0xff] }
 0x1bc   : > { %1528 = vst [vmem:[#allocation2 + $0x80] sm:$0xff] %v1496_v28  ;;  %v1498_v35 = vadd.f32 %v1446_v29, %v664_v26 }
 0x1bd   : > { %1529 = vst [vmem:[#allocation2 + $0x88] sm:$0xff] %v1497_v33  ;;  %v1499_v36 = vadd.f32 %v1448_v34, %v665_v31  ;;  %v1582_v33 = vlaneseq (!%p1969_p5)  ;;  %v1580_v34 = vld [vmem:[%s606_s29] sm:$0x3] (!%p1969_p5) }
 0x1be   : > { %1530 = vst [vmem:[#allocation2 + $0x90] sm:$0xff] %v1498_v35  ;;  %v1338_v37 = vpop.f32.mrb[20].mxu1 }
 0x1bf   : > { %1531 = vst [vmem:[#allocation2 + $0x98] sm:$0xff] %v1499_v36  ;;  %v1451_v39 = vpop.f32.mrb[20].mxu0  ;;  %v1340_v41 = vpop.f32.mrb[21].mxu1  ;;  %v1583_v35 = vshrl.u32 (!%p1969_p5), %v1582_v33, 7  ;;  %v1548_v36 = vld [vmem:[#allocation2] sm:$0xff] (!%p1969_p5) }
 0x1c0   : > { %v1452_v40 = vadd.f32 %v1451_v39, %v1338_v37  ;;  %v1453_v43 = vpop.f32.mrb[21].mxu0  ;;  %v1342_v45 = vpop.f32.mrb[22].mxu1  ;;  %v1549_v37 = vld [vmem:[#allocation2 + $0x8] sm:$0xff] (!%p1969_p5)  ;;  %v1551_v39 = vld [vmem:[#allocation2 + $0x18] sm:$0xff] (!%p1969_p5) }
 0x1c1   : > { %v1454_v44 = vadd.f32 %v1453_v43, %v1340_v41  ;;  %v1455_v47 = vpop.f32.mrb[22].mxu0  ;;  %v1344_v50 = vpop.f32.mrb[23].mxu1  ;;  %v1588_v41 = vsub.s32 (!%p1969_p5), 1, %v1583_v35  ;;  %v1553_v43 = vld [vmem:[#allocation2 + $0x28] sm:$0xff] (!%p1969_p5) }
 0x1c2   : > { %v1500_v48 = vadd.f32 %v1452_v40, %v666_v38  ;;  %v1456_v49 = vadd.f32 %v1455_v47, %v1342_v45  ;;  %v1457_v52 = vpop.f32.mrb[23].mxu0  ;;  %v1550_v38 = vld [vmem:[#allocation2 + $0x10] sm:$0xff] (!%p1969_p5)  ;;  %v1584_v40 = vsub.s32 (!%p1969_p5), 0, %v1583_v35  ;;  %v1555_v45 = vld [vmem:[#allocation2 + $0x38] sm:$0xff] (!%p1969_p5)  ;;  %v1557_v47 = vld [vmem:[#allocation2 + $0x48] sm:$0xff] (!%p1969_p5) }
 0x1c3   : > { %v1501_v53 = vadd.f32 %v1454_v44, %v667_v42  ;;  %v1458_v54 = vadd.f32 %v1457_v52, %v1344_v50  ;;  %v1552_v42 = vld [vmem:[#allocation2 + $0x20] sm:$0xff] (!%p1969_p5)  ;;  %v1554_v44 = vld [vmem:[#allocation2 + $0x30] sm:$0xff] (!%p1969_p5)  ;;  %v2789_v50 = vrot.slane (!%p1969_p5), %v1580_v34, %v1588_v41 }
 0x1c4   : > { %1532 = vst [vmem:[#allocation2 + $0xa0] sm:$0xff] %v1500_v48  ;;  %v1502_v55 = vadd.f32 %v1456_v49, %v668_v46  ;;  %v1556_v46 = vld [vmem:[#allocation2 + $0x40] sm:$0xff] (!%p1969_p5)  ;;  %v1558_v48 = vld [vmem:[#allocation2 + $0x50] sm:$0xff] (!%p1969_p5)  ;;  %v2787_v49 = vrot.slane (!%p1969_p5), %v1580_v34, %v1584_v40 }
 0x1c5   : > { %1533 = vst [vmem:[#allocation2 + $0xa8] sm:$0xff] %v1501_v53  ;;  %v1503_v56 = vadd.f32 %v1458_v54, %v669_v51  ;;  %v1559_v51 = vld [vmem:[#allocation2 + $0x58] sm:$0xff] (!%p1969_p5)  ;;  %v1560_v52 = vld [vmem:[#allocation2 + $0x60] sm:$0xff] (!%p1969_p5)  ;;  %v1561_v53 = vld [vmem:[#allocation2 + $0x68] sm:$0xff] (!%p1969_p5) }
 0x1c6   : > { %1534 = vst [vmem:[#allocation2 + $0xb0] sm:$0xff] %v1502_v55  ;;  %v1348_v57 = vpop.f32.mrb[24].mxu1  ;;  %v1562_v54 = vld [vmem:[#allocation2 + $0x70] sm:$0xff] (!%p1969_p5)  ;;  %v1563_v55 = vld [vmem:[#allocation2 + $0x78] sm:$0xff] (!%p1969_p5) }
 0x1c7   : > { %1535 = vst [vmem:[#allocation2 + $0xb8] sm:$0xff] %v1503_v56  ;;  %v1461_v59 = vpop.f32.mrb[24].mxu0  ;;  %v1350_v61 = vpop.f32.mrb[25].mxu1  ;;  %v1564_v56 = vld [vmem:[#allocation2 + $0x80] sm:$0xff] (!%p1969_p5) }
 0x1c8   : > { %v1462_v60 = vadd.f32 %v1461_v59, %v1348_v57  ;;  %v1463_v63 = vpop.f32.mrb[25].mxu0  ;;  %v1352_v1 = vpop.f32.mrb[26].mxu1  ;;  %v1592_v57 = vadd.f32 (!%p1969_p5), %v2787_v49, %v1548_v36  ;;  %v1594_v59 = vadd.f32 (!%p1969_p5), %v2787_v49, %v1550_v38 }
 0x1c9   : > { %v1464_v0 = vadd.f32 %v1463_v63, %v1350_v61  ;;  %v1465_v3 = vpop.f32.mrb[26].mxu0  ;;  %v1354_v6 = vpop.f32.mrb[27].mxu1  ;;  %v1565_v61 = vld [vmem:[#allocation2 + $0x88] sm:$0xff] (!%p1969_p5)  ;;  %v1567_v63 = vld [vmem:[#allocation2 + $0x98] sm:$0xff] (!%p1969_p5) }
 0x1ca   : > { %v1504_v4 = vadd.f32 %v1462_v60, %v670_v58  ;;  %v1466_v5 = vadd.f32 %v1465_v3, %v1352_v1  ;;  %v1467_v8 = vpop.f32.mrb[27].mxu0  ;;  %v1593_v58 = vadd.f32 (!%p1969_p5), %v2789_v50, %v1549_v37  ;;  %v1595_v60 = vadd.f32 (!%p1969_p5), %v2789_v50, %v1551_v39  ;;  %1624 = vst [vmem:[%s2682_s1] sm:$0xff] (!%p1969_p5), %v1592_v57 }
 0x1cb   : > { %v1505_v9 = vadd.f32 %v1464_v0, %v671_v62  ;;  %v1468_v10 = vadd.f32 %v1467_v8, %v1354_v6  ;;  %v1566_v62 = vld [vmem:[#allocation2 + $0x90] sm:$0xff] (!%p1969_p5)  ;;  %v1596_v0 = vadd.f32 (!%p1969_p5), %v2787_v49, %v1552_v42  ;;  %v1597_v1 = vadd.f32 (!%p1969_p5), %v2789_v50, %v1553_v43  ;;  %1626 = vst [vmem:[%s2682_s1 + $0x10] sm:$0xff] (!%p1969_p5), %v1594_v59 }
 0x1cc   : > { %1536 = vst [vmem:[#allocation2 + $0xc0] sm:$0xff] %v1504_v4  ;;  %v1506_v11 = vadd.f32 %v1466_v5, %v672_v2  ;;  %v1598_v2 = vadd.f32 (!%p1969_p5), %v2787_v49, %v1554_v44  ;;  %v1599_v3 = vadd.f32 (!%p1969_p5), %v2789_v50, %v1555_v45  ;;  %v1568_v4 = vld [vmem:[#allocation2 + $0xa0] sm:$0xff] (!%p1969_p5)  ;;  %v1569_v5 = vld [vmem:[#allocation2 + $0xa8] sm:$0xff] (!%p1969_p5)  ;;  %1625 = vst [vmem:[%s2682_s1 + $0x8] sm:$0xff] (!%p1969_p5), %v1593_v58 }
 0x1cd   : > { %1537 = vst [vmem:[#allocation2 + $0xc8] sm:$0xff] %v1505_v9  ;;  %v1507_v12 = vadd.f32 %v1468_v10, %v673_v7  ;;  %v1570_v6 = vld [vmem:[#allocation2 + $0xb0] sm:$0xff] (!%p1969_p5)  ;;  %1627 = vst [vmem:[%s2682_s1 + $0x18] sm:$0xff] (!%p1969_p5), %v1595_v60  ;;  %v1600_v7 = vadd.f32 (!%p1969_p5), %v2787_v49, %v1556_v46  ;;  %v1601_v8 = vadd.f32 (!%p1969_p5), %v2789_v50, %v1557_v47 }
 0x1ce   : > { %1538 = vst [vmem:[#allocation2 + $0xd0] sm:$0xff] %v1506_v11  ;;  %v1358_v13 = vpop.f32.mrb[28].mxu1  ;;  %v1602_v9 = vadd.f32 (!%p1969_p5), %v2787_v49, %v1558_v48  ;;  %v1603_v10 = vadd.f32 (!%p1969_p5), %v2789_v50, %v1559_v51  ;;  %v1571_v11 = vld [vmem:[#allocation2 + $0xb8] sm:$0xff] (!%p1969_p5)  ;;  %1628 = vst [vmem:[%s2682_s1 + $0x20] sm:$0xff] (!%p1969_p5), %v1596_v0 }
 0x1cf   : > { %1539 = vst [vmem:[#allocation2 + $0xd8] sm:$0xff] %v1507_v12  ;;  %v1471_v15 = vpop.f32.mrb[28].mxu0  ;;  %v1360_v17 = vpop.f32.mrb[29].mxu1  ;;  %1629 = vst [vmem:[%s2682_s1 + $0x28] sm:$0xff] (!%p1969_p5), %v1597_v1 }
 0x1d0   : > { %v1472_v16 = vadd.f32 %v1471_v15, %v1358_v13  ;;  %v1473_v19 = vpop.f32.mrb[29].mxu0  ;;  %v1362_v21 = vpop.f32.mrb[30].mxu1  ;;  %1630 = vst [vmem:[%s2682_s1 + $0x30] sm:$0xff] (!%p1969_p5), %v1598_v2  ;;  %1631 = vst [vmem:[%s2682_s1 + $0x38] sm:$0xff] (!%p1969_p5), %v1599_v3  ;;  %v1605_v15 = vadd.f32 (!%p1969_p5), %v2789_v50, %v1561_v53 }
 0x1d1   : > { %v1474_v20 = vadd.f32 %v1473_v19, %v1360_v17  ;;  %v1475_v23 = vpop.f32.mrb[30].mxu0  ;;  %v1364_v26 = vpop.f32.mrb[31].mxu1  ;;  %1547 = sbr.rel (%p1969_p5) target bundleno = 482 (0x1e2), region = 101  ;;  %v1607_v17 = vadd.f32 (!%p1969_p5), %v2789_v50, %v1563_v55  ;;  %1632 = vst [vmem:[%s2682_s1 + $0x40] sm:$0xff] (!%p1969_p5), %v1600_v7  ;;  %1633 = vst [vmem:[%s2682_s1 + $0x48] sm:$0xff] (!%p1969_p5), %v1601_v8 }
 0x1d2   : > { %v1508_v24 = vadd.f32 %v1472_v16, %v674_v14  ;;  %v1476_v25 = vadd.f32 %v1475_v23, %v1362_v21  ;;  %v1477_v28 = vpop.f32.mrb[31].mxu0  ;;  %v1604_v14 = vadd.f32 (!%p1969_p5), %v2787_v49, %v1560_v52  ;;  %v1606_v16 = vadd.f32 (!%p1969_p5), %v2787_v49, %v1562_v54  ;;  %1634 = vst [vmem:[%s2682_s1 + $0x50] sm:$0xff] (!%p1969_p5), %v1602_v9 }
 0x1d3   : > { %v1509_v29 = vadd.f32 %v1474_v20, %v675_v18  ;;  %v1478_v30 = vadd.f32 %v1477_v28, %v1364_v26  ;;  %v1572_v12 = vld [vmem:[#allocation2 + $0xc0] sm:$0xff] (!%p1969_p5)  ;;  %1635 = vst [vmem:[%s2682_s1 + $0x58] sm:$0xff] (!%p1969_p5), %v1603_v10  ;;  %v1608_v21 = vadd.f32 (!%p1969_p5), %v2787_v49, %v1564_v56  ;;  %v1610_v23 = vadd.f32 (!%p1969_p5), %v2787_v49, %v1566_v62 }
 0x1d4   : > { %1540 = vst [vmem:[#allocation2 + $0xe0] sm:$0xff] %v1508_v24  ;;  %v1510_v31 = vadd.f32 %v1476_v25, %v676_v22  ;;  %v1573_v13 = vld [vmem:[#allocation2 + $0xc8] sm:$0xff] (!%p1969_p5)  ;;  %v1609_v22 = vadd.f32 (!%p1969_p5), %v2789_v50, %v1565_v61  ;;  %v1611_v24 = vadd.f32 (!%p1969_p5), %v2789_v50, %v1567_v63  ;;  %1636 = vst [vmem:[%s2682_s1 + $0x60] sm:$0xff] (!%p1969_p5), %v1604_v14 }
 0x1d5   : > { %1541 = vst [vmem:[#allocation2 + $0xe8] sm:$0xff] %v1509_v29  ;;  %v1511_v32 = vadd.f32 %v1478_v30, %v677_v27  ;;  %v1574_v18 = vld [vmem:[#allocation2 + $0xd0] sm:$0xff] (!%p1969_p5)  ;;  %1637 = vst [vmem:[%s2682_s1 + $0x68] sm:$0xff] (!%p1969_p5), %v1605_v15  ;;  %v1612_v28 = vadd.f32 (!%p1969_p5), %v2787_v49, %v1568_v4  ;;  %v1613_v29 = vadd.f32 (!%p1969_p5), %v2789_v50, %v1569_v5 }
 0x1d6   : > { %1542 = vst [vmem:[#allocation2 + $0xf0] sm:$0xff] %v1510_v31  ;;  %v1575_v19 = vld [vmem:[#allocation2 + $0xd8] sm:$0xff] (!%p1969_p5)  ;;  %1638 = vst [vmem:[%s2682_s1 + $0x70] sm:$0xff] (!%p1969_p5), %v1606_v16  ;;  %v1614_v30 = vadd.f32 (!%p1969_p5), %v2787_v49, %v1570_v6  ;;  %v1615_v31 = vadd.f32 (!%p1969_p5), %v2789_v50, %v1571_v11  ;;  %v1617_v33 = vadd.f32 (!%p1969_p5), %v2789_v50, %v1573_v13 }
 0x1d7   : > { %1543 = vst [vmem:[#allocation2 + $0xf8] sm:$0xff] %v1511_v32  ;;  %1639 = vst [vmem:[%s2682_s1 + $0x78] sm:$0xff] (!%p1969_p5), %v1607_v17  ;;  %v1616_v32 = vadd.f32 (!%p1969_p5), %v2787_v49, %v1572_v12  ;;  %v1618_v34 = vadd.f32 (!%p1969_p5), %v2787_v49, %v1574_v18  ;;  %v1619_v35 = vadd.f32 (!%p1969_p5), %v2789_v50, %v1575_v19 }
 0x1d8   : > { %1640 = vst [vmem:[%s2682_s1 + $0x80] sm:$0xff] %v1608_v21  ;;  %1641 = vst [vmem:[%s2682_s1 + $0x88] sm:$0xff] %v1609_v22 }
 0x1d9   : > { %1642 = vst [vmem:[%s2682_s1 + $0x90] sm:$0xff] %v1610_v23  ;;  %1643 = vst [vmem:[%s2682_s1 + $0x98] sm:$0xff] %v1611_v24 }
 0x1da   : > { %1644 = vst [vmem:[%s2682_s1 + $0xa0] sm:$0xff] %v1612_v28  ;;  %1645 = vst [vmem:[%s2682_s1 + $0xa8] sm:$0xff] %v1613_v29 }
 0x1db   : > { %v1576_v20 = vld [vmem:[#allocation2 + $0xe0] sm:$0xff]  ;;  %1646 = vst [vmem:[%s2682_s1 + $0xb0] sm:$0xff] %v1614_v30  ;;  %1647 = vst [vmem:[%s2682_s1 + $0xb8] sm:$0xff] %v1615_v31 }
 0x1dc   : > { %v1577_v25 = vld [vmem:[#allocation2 + $0xe8] sm:$0xff]  ;;  %v1620_v36 = vadd.f32 %v2787_v49, %v1576_v20  ;;  %1648 = vst [vmem:[%s2682_s1 + $0xc0] sm:$0xff] %v1616_v32  ;;  %1649 = vst [vmem:[%s2682_s1 + $0xc8] sm:$0xff] %v1617_v33 }
 0x1dd   : > { %v1578_v26 = vld [vmem:[#allocation2 + $0xf0] sm:$0xff]  ;;  %v1621_v37 = vadd.f32 %v2789_v50, %v1577_v25  ;;  %1650 = vst [vmem:[%s2682_s1 + $0xd0] sm:$0xff] %v1618_v34  ;;  %1651 = vst [vmem:[%s2682_s1 + $0xd8] sm:$0xff] %v1619_v35 }
 0x1de   : > { %v1579_v27 = vld [vmem:[#allocation2 + $0xf8] sm:$0xff]  ;;  %v1622_v38 = vadd.f32 %v2787_v49, %v1578_v26  ;;  %1652 = vst [vmem:[%s2682_s1 + $0xe0] sm:$0xff] %v1620_v36 }
 0x1df   : > { %v1623_v39 = vadd.f32 %v2789_v50, %v1579_v27  ;;  %1653 = vst [vmem:[%s2682_s1 + $0xe8] sm:$0xff] %v1621_v37 }
 0x1e0   : > { %1654 = vst [vmem:[%s2682_s1 + $0xf0] sm:$0xff] %v1622_v38 }
 0x1e1   : > { %1655 = vst [vmem:[%s2682_s1 + $0xf8] sm:$0xff] %v1623_v39 }
 0x1e2 PF: > { %1662 = sbr.rel (!%p2446_p12) target bundleno = 500 (0x1f4), region = 105  ;;  %s1977_s16 = sshll.u32 (%p2446_p12), %s2317_s19, 4  ;;  %v1681_v40 = vld [vmem:[%s2682_s1] sm:$0xff] (%p2446_p12)  ;;  %v1683_v41 = vld [vmem:[%s2682_s1 + $0x8] sm:$0xff] (%p2446_p12)  ;;  %v1685_v42 = vld [vmem:[%s2682_s1 + $0x10] sm:$0xff] (%p2446_p12) }
 0x1e3   : > { %s2864_s5 = scalar_lea.vmem (%p2446_p12), %s2963_s3, %s1977_s16  ;;  %v1687_v43 = vld [vmem:[%s2682_s1 + $0x18] sm:$0xff] (%p2446_p12)  ;;  %v1689_v44 = vld [vmem:[%s2682_s1 + $0x20] sm:$0xff] (%p2446_p12)  ;;  %v1691_v45 = vld [vmem:[%s2682_s1 + $0x28] sm:$0xff] (%p2446_p12) }
 0x1e4   : > { %1682 = vst [vmem:[%s2864_s5] sm:$0xff] (%p2446_p12), %v1681_v40  ;;  %1684 = vst [vmem:[%s2864_s5 + $0x8] sm:$0xff] (%p2446_p12), %v1683_v41  ;;  %v1693_v46 = vld [vmem:[%s2682_s1 + $0x30] sm:$0xff] (%p2446_p12)  ;;  %v1695_v47 = vld [vmem:[%s2682_s1 + $0x38] sm:$0xff] (%p2446_p12) }
 0x1e5   : > { %1686 = vst [vmem:[%s2864_s5 + $0x20] sm:$0xff] (%p2446_p12), %v1685_v42  ;;  %1688 = vst [vmem:[%s2864_s5 + $0x28] sm:$0xff] (%p2446_p12), %v1687_v43  ;;  %v1697_v48 = vld [vmem:[%s2682_s1 + $0x40] sm:$0xff] (%p2446_p12)  ;;  %v1699_v49 = vld [vmem:[%s2682_s1 + $0x48] sm:$0xff] (%p2446_p12) }
 0x1e6   : > { %1690 = vst [vmem:[%s2864_s5 + $0x40] sm:$0xff] (%p2446_p12), %v1689_v44  ;;  %1692 = vst [vmem:[%s2864_s5 + $0x48] sm:$0xff] (%p2446_p12), %v1691_v45  ;;  %v1701_v50 = vld [vmem:[%s2682_s1 + $0x50] sm:$0xff] (%p2446_p12)  ;;  %v1703_v51 = vld [vmem:[%s2682_s1 + $0x58] sm:$0xff] (%p2446_p12) }
 0x1e7   : > { %1694 = vst [vmem:[%s2864_s5 + $0x60] sm:$0xff] (%p2446_p12), %v1693_v46  ;;  %1696 = vst [vmem:[%s2864_s5 + $0x68] sm:$0xff] (%p2446_p12), %v1695_v47  ;;  %v1705_v52 = vld [vmem:[%s2682_s1 + $0x60] sm:$0xff] (%p2446_p12)  ;;  %v1707_v53 = vld [vmem:[%s2682_s1 + $0x68] sm:$0xff] (%p2446_p12) }
 0x1e8   : > { %1698 = vst [vmem:[%s2864_s5 + $0x80] sm:$0xff] (%p2446_p12), %v1697_v48  ;;  %1700 = vst [vmem:[%s2864_s5 + $0x88] sm:$0xff] (%p2446_p12), %v1699_v49  ;;  %v1709_v54 = vld [vmem:[%s2682_s1 + $0x70] sm:$0xff] (%p2446_p12)  ;;  %v1711_v55 = vld [vmem:[%s2682_s1 + $0x78] sm:$0xff] (%p2446_p12) }
 0x1e9   : > { %1702 = vst [vmem:[%s2864_s5 + $0xa0] sm:$0xff] %v1701_v50  ;;  %1704 = vst [vmem:[%s2864_s5 + $0xa8] sm:$0xff] %v1703_v51  ;;  %v1713_v56 = vld [vmem:[%s2682_s1 + $0x80] sm:$0xff]  ;;  %v1715_v57 = vld [vmem:[%s2682_s1 + $0x88] sm:$0xff] }
 0x1ea   : > { %1706 = vst [vmem:[%s2864_s5 + $0xc0] sm:$0xff] %v1705_v52  ;;  %1708 = vst [vmem:[%s2864_s5 + $0xc8] sm:$0xff] %v1707_v53  ;;  %v1717_v58 = vld [vmem:[%s2682_s1 + $0x90] sm:$0xff]  ;;  %v1719_v59 = vld [vmem:[%s2682_s1 + $0x98] sm:$0xff] }
 0x1eb   : > { %1710 = vst [vmem:[%s2864_s5 + $0xe0] sm:$0xff] %v1709_v54  ;;  %1712 = vst [vmem:[%s2864_s5 + $0xe8] sm:$0xff] %v1711_v55  ;;  %v1721_v60 = vld [vmem:[%s2682_s1 + $0xa0] sm:$0xff]  ;;  %v1723_v61 = vld [vmem:[%s2682_s1 + $0xa8] sm:$0xff] }
 0x1ec   : > { %1714 = vst [vmem:[%s2864_s5 + $0x100] sm:$0xff] %v1713_v56  ;;  %1716 = vst [vmem:[%s2864_s5 + $0x108] sm:$0xff] %v1715_v57  ;;  %v1725_v62 = vld [vmem:[%s2682_s1 + $0xb0] sm:$0xff]  ;;  %v1727_v63 = vld [vmem:[%s2682_s1 + $0xb8] sm:$0xff] }
 0x1ed   : > { %1718 = vst [vmem:[%s2864_s5 + $0x120] sm:$0xff] %v1717_v58  ;;  %1720 = vst [vmem:[%s2864_s5 + $0x128] sm:$0xff] %v1719_v59  ;;  %v1729_v0 = vld [vmem:[%s2682_s1 + $0xc0] sm:$0xff]  ;;  %v1731_v1 = vld [vmem:[%s2682_s1 + $0xc8] sm:$0xff] }
 0x1ee   : > { %1722 = vst [vmem:[%s2864_s5 + $0x140] sm:$0xff] %v1721_v60  ;;  %1724 = vst [vmem:[%s2864_s5 + $0x148] sm:$0xff] %v1723_v61  ;;  %v1733_v2 = vld [vmem:[%s2682_s1 + $0xd0] sm:$0xff]  ;;  %v1735_v3 = vld [vmem:[%s2682_s1 + $0xd8] sm:$0xff] }
 0x1ef   : > { %1726 = vst [vmem:[%s2864_s5 + $0x160] sm:$0xff] %v1725_v62  ;;  %1728 = vst [vmem:[%s2864_s5 + $0x168] sm:$0xff] %v1727_v63  ;;  %v1737_v4 = vld [vmem:[%s2682_s1 + $0xe0] sm:$0xff]  ;;  %v1739_v5 = vld [vmem:[%s2682_s1 + $0xe8] sm:$0xff] }
 0x1f0   : > { %1730 = vst [vmem:[%s2864_s5 + $0x180] sm:$0xff] %v1729_v0  ;;  %1732 = vst [vmem:[%s2864_s5 + $0x188] sm:$0xff] %v1731_v1  ;;  %v1741_v6 = vld [vmem:[%s2682_s1 + $0xf0] sm:$0xff]  ;;  %v1743_v7 = vld [vmem:[%s2682_s1 + $0xf8] sm:$0xff] }
 0x1f1   : > { %1734 = vst [vmem:[%s2864_s5 + $0x1a0] sm:$0xff] %v1733_v2  ;;  %1736 = vst [vmem:[%s2864_s5 + $0x1a8] sm:$0xff] %v1735_v3 }
 0x1f2   : > { %1738 = vst [vmem:[%s2864_s5 + $0x1c0] sm:$0xff] %v1737_v4  ;;  %1740 = vst [vmem:[%s2864_s5 + $0x1c8] sm:$0xff] %v1739_v5 }
 0x1f3   : > { %1742 = vst [vmem:[%s2864_s5 + $0x1e0] sm:$0xff] %v1741_v6  ;;  %1744 = vst [vmem:[%s2864_s5 + $0x1e8] sm:$0xff] %v1743_v7 }
 0x1f4 PF: > { %s13_s22 = sadd.s32 1, %s2329_s22   ;;  %s2973_s10 = sld [smem:[#allocation6_spill]] }
 0x1f5   : > { %p10_p6 = scmp.ge.s32.totalorder %s13_s22, 6   ;;  %s2974_s12 = smov %s2293_s13 }
 0x1f6   : > { %s2975_s13 = smov %s2444_s9  ;;  %s2976_s14 = smov %s2301_s15 }
 0x1f7   : > { %s2977_s15 = smov %s2441_s8  ;;  %s2978_s16 = smov %s2309_s17 }
 0x1f8   : > { %s2979_s17 = smov %s2427_s30  ;;  %s2980_s18 = smov %s2321_s20 }
 0x1f9   : > { %s2981_s19 = smov %s2325_s21  ;;  %s2982_s20 = smov %s2985_s24 }
 0x1fa   : > { %s2983_s21 = smov %s2973_s10  ;;  %12 = sbr.rel (!%p10_p6) target bundleno = 9 (0x9), region = 170 }

// kernel: tile.18
= control target key start
LH: loop header
LB: loop body
LE: loop exit
PB: predicated region body
PF: predicated region fallthrough
CT: control target
= control target key end

     0   :  { %s22_s0 = inlined_call_operand.vmem [shape: f32[64], index: 0, kind: input, shape index: {}]   ;;  %s23_s1 = inlined_call_operand.vmem [shape: f32[4,64], index: 1, kind: output, shape index: {}]  }
   0x1   :  { %v4_v0 = vld [vmem:[%s22_s0] ss:$0 sm:$0xff] }
   0x2   :  { %5 = vst [vmem:[%s23_s1] sm:$0xf] %v4_v0 }

// kernel: generator_forward.35
= control target key start
LH: loop header
LB: loop body
LE: loop exit
PB: predicated region body
PF: predicated region fallthrough
CT: control target
= control target key end

     0   :  { %s1778_s1 = inlined_call_operand.vmem [shape: bf16[512,256], index: 1, kind: input, shape index: {}]   ;;  %s1779_s0 = inlined_call_operand.vmem [shape: bf16[128,512], index: 0, kind: input, shape index: {}]   ;;  %s1780_s2 = inlined_call_operand.vmem [shape: f32[1,256], index: 2, kind: input, shape index: {}]   ;;  %s1781_s3 = inlined_call_operand.vmem [shape: f32[128,256], index: 3, kind: output, shape index: {}]  }
   0x1   :  { %v1191_v0 = vld [vmem:[%s1778_s1 + $0x4] ss:$8 sps:$4 sm:$0xff]   ;;  %v1195_v2 = vld [vmem:[%s1778_s1] ss:$8 sps:$4 sm:$0xff]   ;;  %v1197_v4 = vld [vmem:[%s1778_s1 + $0x14] ss:$8 sps:$4 sm:$0xff]  }
   0x2   :  { %v1193_v1 = vld [vmem:[%s1778_s1 + $0x104] ss:$8 sps:$4 sm:$0xff]   ;;  %658 = vmatprep.subr.bf16.mxu1 %v1191_v0  ;;  %v1196_v3 = vld [vmem:[%s1778_s1 + $0x100] ss:$8 sps:$4 sm:$0xff]   ;;  %v1199_v5 = vld [vmem:[%s1778_s1 + $0x114] ss:$8 sps:$4 sm:$0xff]  }
   0x3   :  { %771 = vmatprep.subr.bf16.mxu0 %v1193_v1  ;;  %659 = vmatpush1.bf16.msra.mxu1 %v1195_v2  ;;  %v1201_v6 = vld [vmem:[%s1778_s1 + $0x10] ss:$8 sps:$4 sm:$0xff]   ;;  %v1203_v8 = vld [vmem:[%s1778_s1 + $0x24] ss:$8 sps:$4 sm:$0xff]   ;;  %v1207_v10 = vld [vmem:[%s1778_s1 + $0x20] ss:$8 sps:$4 sm:$0xff]  }
   0x4   :  { %772 = vmatpush1.bf16.msra.mxu0 %v1196_v3  ;;  %660 = vmatprep.subr.bf16.mxu1 %v1197_v4  ;;  %v1202_v7 = vld [vmem:[%s1778_s1 + $0x110] ss:$8 sps:$4 sm:$0xff]   ;;  %v1205_v9 = vld [vmem:[%s1778_s1 + $0x124] ss:$8 sps:$4 sm:$0xff]   ;;  %v1208_v11 = vld [vmem:[%s1778_s1 + $0x120] ss:$8 sps:$4 sm:$0xff]  }
   0x5   :  { %773 = vmatprep.subr.bf16.mxu0 %v1199_v5  ;;  %v1209_v12 = vld [vmem:[%s1778_s1 + $0x34] ss:$8 sps:$4 sm:$0xff]   ;;  %v1213_v14 = vld [vmem:[%s1778_s1 + $0x30] ss:$8 sps:$4 sm:$0xff]   ;;  %v1215_v16 = vld [vmem:[%s1778_s1 + $0x44] ss:$8 sps:$4 sm:$0xff]  }
   0x6   :  { %v1211_v13 = vld [vmem:[%s1778_s1 + $0x134] ss:$8 sps:$4 sm:$0xff]   ;;  %v1214_v15 = vld [vmem:[%s1778_s1 + $0x130] ss:$8 sps:$4 sm:$0xff]   ;;  %v1217_v17 = vld [vmem:[%s1778_s1 + $0x144] ss:$8 sps:$4 sm:$0xff]  }
   0x7   :  { %661 = vmatpush1.bf16.msra.mxu1 %v1201_v6  ;;  %v1219_v18 = vld [vmem:[%s1778_s1 + $0x40] ss:$8 sps:$4 sm:$0xff]   ;;  %v1221_v20 = vld [vmem:[%s1778_s1 + $0x54] ss:$8 sps:$4 sm:$0xff]   ;;  %v1225_v22 = vld [vmem:[%s1778_s1 + $0x50] ss:$8 sps:$4 sm:$0xff]  }
   0x8   :  { %774 = vmatpush1.bf16.msra.mxu0 %v1202_v7  ;;  %662 = vmatprep.subr.bf16.mxu1 %v1203_v8  ;;  %v1220_v19 = vld [vmem:[%s1778_s1 + $0x140] ss:$8 sps:$4 sm:$0xff]   ;;  %v1223_v21 = vld [vmem:[%s1778_s1 + $0x154] ss:$8 sps:$4 sm:$0xff]   ;;  %v1226_v23 = vld [vmem:[%s1778_s1 + $0x150] ss:$8 sps:$4 sm:$0xff]  }
   0x9   :  { %775 = vmatprep.subr.bf16.mxu0 %v1205_v9  ;;  %v1227_v24 = vld [vmem:[%s1778_s1 + $0x64] ss:$8 sps:$4 sm:$0xff]   ;;  %v1231_v26 = vld [vmem:[%s1778_s1 + $0x60] ss:$8 sps:$4 sm:$0xff]   ;;  %v1233_v28 = vld [vmem:[%s1778_s1 + $0x74] ss:$8 sps:$4 sm:$0xff]  }
   0xa   :  { %v1229_v25 = vld [vmem:[%s1778_s1 + $0x164] ss:$8 sps:$4 sm:$0xff]   ;;  %v1232_v27 = vld [vmem:[%s1778_s1 + $0x160] ss:$8 sps:$4 sm:$0xff]   ;;  %v1235_v29 = vld [vmem:[%s1778_s1 + $0x174] ss:$8 sps:$4 sm:$0xff]  }
   0xb   :  { %663 = vmatpush1.bf16.msra.mxu1 %v1207_v10  ;;  %v1237_v30 = vld [vmem:[%s1778_s1 + $0x70] ss:$8 sps:$4 sm:$0xff]   ;;  %v1239_v32 = vld [vmem:[%s1778_s1 + $0x84] ss:$8 sps:$4 sm:$0xff]   ;;  %v1243_v34 = vld [vmem:[%s1778_s1 + $0x80] ss:$8 sps:$4 sm:$0xff]  }
   0xc   :  { %776 = vmatpush1.bf16.msra.mxu0 %v1208_v11  ;;  %664 = vmatprep.subr.bf16.mxu1 %v1209_v12  ;;  %v1238_v31 = vld [vmem:[%s1778_s1 + $0x170] ss:$8 sps:$4 sm:$0xff]   ;;  %v1241_v33 = vld [vmem:[%s1778_s1 + $0x184] ss:$8 sps:$4 sm:$0xff]   ;;  %v1244_v35 = vld [vmem:[%s1778_s1 + $0x180] ss:$8 sps:$4 sm:$0xff]  }
   0xd   :  { %777 = vmatprep.subr.bf16.mxu0 %v1211_v13  ;;  %v1245_v36 = vld [vmem:[%s1778_s1 + $0x94] ss:$8 sps:$4 sm:$0xff]   ;;  %v1249_v38 = vld [vmem:[%s1778_s1 + $0x90] ss:$8 sps:$4 sm:$0xff]   ;;  %v1251_v40 = vld [vmem:[%s1778_s1 + $0xa4] ss:$8 sps:$4 sm:$0xff]  }
   0xe   :  { %v1247_v37 = vld [vmem:[%s1778_s1 + $0x194] ss:$8 sps:$4 sm:$0xff]   ;;  %v1250_v39 = vld [vmem:[%s1778_s1 + $0x190] ss:$8 sps:$4 sm:$0xff]   ;;  %v1253_v41 = vld [vmem:[%s1778_s1 + $0x1a4] ss:$8 sps:$4 sm:$0xff]  }
   0xf   :  { %665 = vmatpush1.bf16.msra.mxu1 %v1213_v14  ;;  %v1255_v42 = vld [vmem:[%s1778_s1 + $0xa0] ss:$8 sps:$4 sm:$0xff]   ;;  %v1257_v44 = vld [vmem:[%s1778_s1 + $0xb4] ss:$8 sps:$4 sm:$0xff]   ;;  %v1261_v46 = vld [vmem:[%s1778_s1 + $0xb0] ss:$8 sps:$4 sm:$0xff]  }
  0x10   :  { %778 = vmatpush1.bf16.msra.mxu0 %v1214_v15  ;;  %666 = vmatprep.subr.bf16.mxu1 %v1215_v16  ;;  %v1256_v43 = vld [vmem:[%s1778_s1 + $0x1a0] ss:$8 sps:$4 sm:$0xff]   ;;  %v1259_v45 = vld [vmem:[%s1778_s1 + $0x1b4] ss:$8 sps:$4 sm:$0xff]   ;;  %v1262_v47 = vld [vmem:[%s1778_s1 + $0x1b0] ss:$8 sps:$4 sm:$0xff]  }
  0x11   :  { %779 = vmatprep.subr.bf16.mxu0 %v1217_v17  ;;  %v1263_v48 = vld [vmem:[%s1778_s1 + $0xc4] ss:$8 sps:$4 sm:$0xff]   ;;  %v1267_v52 = vld [vmem:[%s1778_s1 + $0xc0] ss:$8 sps:$4 sm:$0xff]   ;;  %v1269_v54 = vld [vmem:[%s1778_s1 + $0xd4] ss:$8 sps:$4 sm:$0xff]  }
  0x12   :  { %v1289_v49 = vld [vmem:[%s1779_s0 + $0x4] ss:$16 sps:$4 sm:$0xff]   ;;  %v1292_v51 = vld [vmem:[%s1779_s0 + $0xc] ss:$16 sps:$4 sm:$0xff]   ;;  %v1268_v53 = vld [vmem:[%s1778_s1 + $0x1c0] ss:$8 sps:$4 sm:$0xff]  }
  0x13   :  { %667 = vmatpush1.bf16.msra.mxu1 %v1219_v18  ;;  %v1265_v50 = vld [vmem:[%s1778_s1 + $0x1c4] ss:$8 sps:$4 sm:$0xff]   ;;  %690 = vmatprep.mubr.bf16.mxu1 %v1289_v49  ;;  %v1271_v55 = vld [vmem:[%s1778_s1 + $0x1d4] ss:$8 sps:$4 sm:$0xff]   ;;  %v1273_v56 = vld [vmem:[%s1778_s1 + $0xd0] ss:$8 sps:$4 sm:$0xff]  }
  0x14   :  { %780 = vmatpush1.bf16.msra.mxu0 %v1220_v19  ;;  %668 = vmatprep.subr.bf16.mxu1 %v1221_v20  ;;  %v1274_v57 = vld [vmem:[%s1778_s1 + $0x1d0] ss:$8 sps:$4 sm:$0xff]   ;;  %v1275_v58 = vld [vmem:[%s1778_s1 + $0xe4] ss:$8 sps:$4 sm:$0xff]   ;;  %v1279_v60 = vld [vmem:[%s1778_s1 + $0xe0] ss:$8 sps:$4 sm:$0xff]  }
  0x15   :  { %781 = vmatprep.subr.bf16.mxu0 %v1223_v21  ;;  %803 = vmatprep.mubr.bf16.mxu0 %v1292_v51  ;;  %v1277_v59 = vld [vmem:[%s1778_s1 + $0x1e4] ss:$8 sps:$4 sm:$0xff]   ;;  %v1280_v61 = vld [vmem:[%s1778_s1 + $0x1e0] ss:$8 sps:$4 sm:$0xff]   ;;  %v1281_v62 = vld [vmem:[%s1778_s1 + $0xf4] ss:$8 sps:$4 sm:$0xff]  }
  0x16   :  { %v1283_v63 = vld [vmem:[%s1778_s1 + $0x1f4] ss:$8 sps:$4 sm:$0xff]   ;;  %v1285_v0 = vld [vmem:[%s1778_s1 + $0xf0] ss:$8 sps:$4 sm:$0xff]  }
  0x17   :  { %669 = vmatpush1.bf16.msra.mxu1 %v1225_v22  ;;  %v1286_v1 = vld [vmem:[%s1778_s1 + $0x1f0] ss:$8 sps:$4 sm:$0xff]   ;;  %v1293_v4 = vld [vmem:[%s1779_s0 + $0x24] ss:$16 sps:$4 sm:$0xff]   ;;  %v1295_v5 = vld [vmem:[%s1779_s0 + $0x2c] ss:$16 sps:$4 sm:$0xff]  }
  0x18   :  { %782 = vmatpush1.bf16.msra.mxu0 %v1226_v23  ;;  %670 = vmatprep.subr.bf16.mxu1 %v1227_v24  ;;  %v1287_v2 = vld [vmem:[%s1779_s0] ss:$16 sps:$4 sm:$0xff]   ;;  %v1290_v3 = vld [vmem:[%s1779_s0 + $0x8] ss:$16 sps:$4 sm:$0xff]   ;;  %v1299_v8 = vld [vmem:[%s1779_s0 + $0x44] ss:$16 sps:$4 sm:$0xff]  }
  0x19   :  { %783 = vmatprep.subr.bf16.mxu0 %v1229_v25  ;;  %v1297_v6 = vld [vmem:[%s1779_s0 + $0x20] ss:$16 sps:$4 sm:$0xff]   ;;  %v1298_v7 = vld [vmem:[%s1779_s0 + $0x28] ss:$16 sps:$4 sm:$0xff]   ;;  %v1301_v9 = vld [vmem:[%s1779_s0 + $0x4c] ss:$16 sps:$4 sm:$0xff]  }
  0x1a   :  { %v1303_v10 = vld [vmem:[%s1779_s0 + $0x40] ss:$16 sps:$4 sm:$0xff]   ;;  %v1304_v11 = vld [vmem:[%s1779_s0 + $0x48] ss:$16 sps:$4 sm:$0xff]   ;;  %v1305_v12 = vld [vmem:[%s1779_s0 + $0x64] ss:$16 sps:$4 sm:$0xff]  }
  0x1b   :  { %671 = vmatpush1.bf16.msra.mxu1 %v1231_v26  ;;  %v1307_v13 = vld [vmem:[%s1779_s0 + $0x6c] ss:$16 sps:$4 sm:$0xff]   ;;  %v1309_v14 = vld [vmem:[%s1779_s0 + $0x60] ss:$16 sps:$4 sm:$0xff]   ;;  %v1310_v15 = vld [vmem:[%s1779_s0 + $0x68] ss:$16 sps:$4 sm:$0xff]  }
  0x1c   :  { %784 = vmatpush1.bf16.msra.mxu0 %v1232_v27  ;;  %672 = vmatprep.subr.bf16.mxu1 %v1233_v28  ;;  %v1311_v16 = vld [vmem:[%s1779_s0 + $0x84] ss:$16 sps:$4 sm:$0xff]   ;;  %v1313_v17 = vld [vmem:[%s1779_s0 + $0x8c] ss:$16 sps:$4 sm:$0xff]   ;;  %v1315_v18 = vld [vmem:[%s1779_s0 + $0x80] ss:$16 sps:$4 sm:$0xff]  }
  0x1d   :  { %785 = vmatprep.subr.bf16.mxu0 %v1235_v29  ;;  %v1316_v19 = vld [vmem:[%s1779_s0 + $0x88] ss:$16 sps:$4 sm:$0xff]   ;;  %v1317_v20 = vld [vmem:[%s1779_s0 + $0xa4] ss:$16 sps:$4 sm:$0xff]   ;;  %v1319_v21 = vld [vmem:[%s1779_s0 + $0xac] ss:$16 sps:$4 sm:$0xff]  }
  0x1e   :  { %v1321_v22 = vld [vmem:[%s1779_s0 + $0xa0] ss:$16 sps:$4 sm:$0xff]   ;;  %v1322_v23 = vld [vmem:[%s1779_s0 + $0xa8] ss:$16 sps:$4 sm:$0xff]   ;;  %v1323_v24 = vld [vmem:[%s1779_s0 + $0xc4] ss:$16 sps:$4 sm:$0xff]  }
  0x1f   :  { %673 = vmatpush1.bf16.msra.mxu1 %v1237_v30  ;;  %v1325_v25 = vld [vmem:[%s1779_s0 + $0xcc] ss:$16 sps:$4 sm:$0xff]   ;;  %v1327_v26 = vld [vmem:[%s1779_s0 + $0xc0] ss:$16 sps:$4 sm:$0xff]   ;;  %v1328_v27 = vld [vmem:[%s1779_s0 + $0xc8] ss:$16 sps:$4 sm:$0xff]  }
  0x20   :  { %786 = vmatpush1.bf16.msra.mxu0 %v1238_v31  ;;  %674 = vmatprep.subr.bf16.mxu1 %v1239_v32  ;;  %v1329_v28 = vld [vmem:[%s1779_s0 + $0xe4] ss:$16 sps:$4 sm:$0xff]   ;;  %v1331_v29 = vld [vmem:[%s1779_s0 + $0xec] ss:$16 sps:$4 sm:$0xff]   ;;  %v1333_v30 = vld [vmem:[%s1779_s0 + $0xe0] ss:$16 sps:$4 sm:$0xff]   ;;  %v985_v32 = vlaneseq }
  0x21   :  { %787 = vmatprep.subr.bf16.mxu0 %v1241_v33  ;;  %v1334_v31 = vld [vmem:[%s1779_s0 + $0xe8] ss:$16 sps:$4 sm:$0xff]  }
  0x22   :  { %v986_v33 = vshrl.u32 %v985_v32, 7 }
  0x23   :  { %675 = vmatpush1.bf16.msra.mxu1 %v1243_v34 }
  0x24   :  { %788 = vmatpush1.bf16.msra.mxu0 %v1244_v35  ;;  %676 = vmatprep.subr.bf16.mxu1 %v1245_v36  ;;  %v987_v34 = vsub.s32 0, %v986_v33  ;;  %v983_v35 = vld [vmem:[%s1780_s2] sm:$0x3]  ;;  %v991_v36 = vsub.s32 1, %v986_v33 }
  0x25   :  { %789 = vmatprep.subr.bf16.mxu0 %v1247_v37 }
  0x26   :  { %v1646_v37 = vrot.slane %v983_v35, %v987_v34 }
  0x27   :  { %677 = vmatpush1.bf16.msra.mxu1 %v1249_v38 }
  0x28   :  { %790 = vmatpush1.bf16.msra.mxu0 %v1250_v39  ;;  %678 = vmatprep.subr.bf16.mxu1 %v1251_v40  ;;  %v1648_v40 = vrot.slane %v983_v35, %v991_v36 }
  0x29   :  { %791 = vmatprep.subr.bf16.mxu0 %v1253_v41 }
  0x2b   :  { %679 = vmatpush1.bf16.msra.mxu1 %v1255_v42 }
  0x2c   :  { %792 = vmatpush1.bf16.msra.mxu0 %v1256_v43  ;;  %680 = vmatprep.subr.bf16.mxu1 %v1257_v44 }
  0x2d   :  { %793 = vmatprep.subr.bf16.mxu0 %v1259_v45 }
  0x2f   :  { %681 = vmatpush1.bf16.msra.mxu1 %v1261_v46 }
  0x30   :  { %794 = vmatpush1.bf16.msra.mxu0 %v1262_v47  ;;  %682 = vmatprep.subr.bf16.mxu1 %v1263_v48 }
  0x31   :  { %795 = vmatprep.subr.bf16.mxu0 %v1265_v50 }
  0x33   :  { %683 = vmatpush1.bf16.msra.mxu1 %v1267_v52 }
  0x34   :  { %796 = vmatpush1.bf16.msra.mxu0 %v1268_v53  ;;  %684 = vmatprep.subr.bf16.mxu1 %v1269_v54 }
  0x35   :  { %797 = vmatprep.subr.bf16.mxu0 %v1271_v55 }
  0x37   :  { %685 = vmatpush1.bf16.msra.mxu1 %v1273_v56 }
  0x38   :  { %798 = vmatpush1.bf16.msra.mxu0 %v1274_v57  ;;  %686 = vmatprep.subr.bf16.mxu1 %v1275_v58 }
  0x39   :  { %799 = vmatprep.subr.bf16.mxu0 %v1277_v59 }
  0x3b   :  { %687 = vmatpush1.bf16.msra.mxu1 %v1279_v60 }
  0x3c   :  { %800 = vmatpush1.bf16.msra.mxu0 %v1280_v61  ;;  %688 = vmatprep.subr.bf16.mxu1 %v1281_v62 }
  0x3d   :  { %801 = vmatprep.subr.bf16.mxu0 %v1283_v63 }
  0x3f   :  { %689 = vmatpush1.bf16.msra.mxu1 %v1285_v0 }
  0x40   :  { %802 = vmatpush1.bf16.msra.mxu0 %v1286_v1 }
  0x42   :  { %691 = vmatmul.mubr.bf16.vlgmr.msra.gmra.mrb[0].mxu1 %v1287_v2 }
  0x43   :  { %804 = vmatmul.mubr.bf16.vlgmr.msra.gmra.mrb[0].mxu0 %v1290_v3  ;;  %700 = vmatprep.mubr.bf16.mxu1 %v1293_v4 }
  0x44   :  { %813 = vmatprep.mubr.bf16.mxu0 %v1295_v5 }
  0x4a   :  { %701 = vmatmul.mubr.bf16.gmra.mrb[4].mxu1 %v1297_v6 }
  0x4b   :  { %814 = vmatmul.mubr.bf16.gmra.mrb[4].mxu0 %v1298_v7  ;;  %710 = vmatprep.mubr.bf16.mxu1 %v1299_v8 }
  0x4c   :  { %823 = vmatprep.mubr.bf16.mxu0 %v1301_v9 }
  0x52   :  { %711 = vmatmul.mubr.bf16.gmra.mrb[8].mxu1 %v1303_v10 }
  0x53   :  { %824 = vmatmul.mubr.bf16.gmra.mrb[8].mxu0 %v1304_v11  ;;  %720 = vmatprep.mubr.bf16.mxu1 %v1305_v12 }
  0x54   :  { %833 = vmatprep.mubr.bf16.mxu0 %v1307_v13 }
  0x5a   :  { %721 = vmatmul.mubr.bf16.gmra.mrb[12].mxu1 %v1309_v14 }
  0x5b   :  { %834 = vmatmul.mubr.bf16.gmra.mrb[12].mxu0 %v1310_v15  ;;  %730 = vmatprep.mubr.bf16.mxu1 %v1311_v16 }
  0x5c   :  { %843 = vmatprep.mubr.bf16.mxu0 %v1313_v17 }
  0x62   :  { %731 = vmatmul.mubr.bf16.gmra.mrb[16].mxu1 %v1315_v18 }
  0x63   :  { %844 = vmatmul.mubr.bf16.gmra.mrb[16].mxu0 %v1316_v19  ;;  %740 = vmatprep.mubr.bf16.mxu1 %v1317_v20 }
  0x64   :  { %853 = vmatprep.mubr.bf16.mxu0 %v1319_v21 }
  0x6a   :  { %741 = vmatmul.mubr.bf16.gmra.mrb[20].mxu1 %v1321_v22 }
  0x6b   :  { %854 = vmatmul.mubr.bf16.gmra.mrb[20].mxu0 %v1322_v23  ;;  %750 = vmatprep.mubr.bf16.mxu1 %v1323_v24 }
  0x6c   :  { %863 = vmatprep.mubr.bf16.mxu0 %v1325_v25 }
  0x72   :  { %751 = vmatmul.mubr.bf16.gmra.mrb[24].mxu1 %v1327_v26 }
  0x73   :  { %864 = vmatmul.mubr.bf16.gmra.mrb[24].mxu0 %v1328_v27  ;;  %760 = vmatprep.mubr.bf16.mxu1 %v1329_v28 }
  0x74   :  { %873 = vmatprep.mubr.bf16.mxu0 %v1331_v29 }
  0x7a   :  { %761 = vmatmul.mubr.bf16.gmra.mrb[28].mxu1 %v1333_v30 }
  0x7b   :  { %874 = vmatmul.mubr.bf16.gmra.mrb[28].mxu0 %v1334_v31 }
 0x115   :  { %v692_v38 = vpop.f32.mrb[0].mxu1 }
 0x116   :  { %v805_v39 = vpop.f32.mrb[0].mxu0  ;;  %v694_v42 = vpop.f32.mrb[1].mxu1 }
 0x117   :  { %v806_v41 = vadd.f32 %v805_v39, %v692_v38  ;;  %v807_v43 = vpop.f32.mrb[1].mxu0  ;;  %v696_v45 = vpop.f32.mrb[2].mxu1 }
 0x118   :  { %v808_v44 = vadd.f32 %v807_v43, %v694_v42  ;;  %v809_v46 = vpop.f32.mrb[2].mxu0  ;;  %v698_v49 = vpop.f32.mrb[3].mxu1 }
 0x119   :  { %v995_v47 = vadd.f32 %v1646_v37, %v806_v41  ;;  %v810_v48 = vadd.f32 %v809_v46, %v696_v45  ;;  %v811_v50 = vpop.f32.mrb[3].mxu0 }
 0x11a   :  { %v996_v51 = vadd.f32 %v1648_v40, %v808_v44  ;;  %v812_v52 = vadd.f32 %v811_v50, %v698_v49 }
 0x11b   :  { %1027 = vst [vmem:[%s1781_s3] sm:$0xff] %v995_v47  ;;  %v997_v53 = vadd.f32 %v1646_v37, %v810_v48 }
 0x11c   :  { %1028 = vst [vmem:[%s1781_s3 + $0x8] sm:$0xff] %v996_v51  ;;  %v998_v54 = vadd.f32 %v1648_v40, %v812_v52 }
 0x11d   :  { %1029 = vst [vmem:[%s1781_s3 + $0x10] sm:$0xff] %v997_v53  ;;  %v702_v55 = vpop.f32.mrb[4].mxu1 }
 0x11e   :  { %1030 = vst [vmem:[%s1781_s3 + $0x18] sm:$0xff] %v998_v54  ;;  %v815_v56 = vpop.f32.mrb[4].mxu0  ;;  %v704_v58 = vpop.f32.mrb[5].mxu1 }
 0x11f   :  { %v816_v57 = vadd.f32 %v815_v56, %v702_v55  ;;  %v817_v59 = vpop.f32.mrb[5].mxu0  ;;  %v706_v61 = vpop.f32.mrb[6].mxu1 }
 0x120   :  { %v818_v60 = vadd.f32 %v817_v59, %v704_v58  ;;  %v819_v62 = vpop.f32.mrb[6].mxu0  ;;  %v708_v1 = vpop.f32.mrb[7].mxu1 }
 0x121   :  { %v999_v63 = vadd.f32 %v1646_v37, %v816_v57  ;;  %v820_v0 = vadd.f32 %v819_v62, %v706_v61  ;;  %v821_v2 = vpop.f32.mrb[7].mxu0 }
 0x122   :  { %v1000_v3 = vadd.f32 %v1648_v40, %v818_v60  ;;  %v822_v4 = vadd.f32 %v821_v2, %v708_v1 }
 0x123   :  { %1031 = vst [vmem:[%s1781_s3 + $0x20] sm:$0xff] %v999_v63  ;;  %v1001_v5 = vadd.f32 %v1646_v37, %v820_v0 }
 0x124   :  { %1032 = vst [vmem:[%s1781_s3 + $0x28] sm:$0xff] %v1000_v3  ;;  %v1002_v6 = vadd.f32 %v1648_v40, %v822_v4 }
 0x125   :  { %1033 = vst [vmem:[%s1781_s3 + $0x30] sm:$0xff] %v1001_v5  ;;  %v712_v7 = vpop.f32.mrb[8].mxu1 }
 0x126   :  { %1034 = vst [vmem:[%s1781_s3 + $0x38] sm:$0xff] %v1002_v6  ;;  %v825_v8 = vpop.f32.mrb[8].mxu0  ;;  %v714_v10 = vpop.f32.mrb[9].mxu1 }
 0x127   :  { %v826_v9 = vadd.f32 %v825_v8, %v712_v7  ;;  %v827_v11 = vpop.f32.mrb[9].mxu0  ;;  %v716_v13 = vpop.f32.mrb[10].mxu1 }
 0x128   :  { %v828_v12 = vadd.f32 %v827_v11, %v714_v10  ;;  %v829_v14 = vpop.f32.mrb[10].mxu0  ;;  %v718_v17 = vpop.f32.mrb[11].mxu1 }
 0x129   :  { %v1003_v15 = vadd.f32 %v1646_v37, %v826_v9  ;;  %v830_v16 = vadd.f32 %v829_v14, %v716_v13  ;;  %v831_v18 = vpop.f32.mrb[11].mxu0 }
 0x12a   :  { %v1004_v19 = vadd.f32 %v1648_v40, %v828_v12  ;;  %v832_v20 = vadd.f32 %v831_v18, %v718_v17 }
 0x12b   :  { %1035 = vst [vmem:[%s1781_s3 + $0x40] sm:$0xff] %v1003_v15  ;;  %v1005_v21 = vadd.f32 %v1646_v37, %v830_v16 }
 0x12c   :  { %1036 = vst [vmem:[%s1781_s3 + $0x48] sm:$0xff] %v1004_v19  ;;  %v1006_v22 = vadd.f32 %v1648_v40, %v832_v20 }
 0x12d   :  { %1037 = vst [vmem:[%s1781_s3 + $0x50] sm:$0xff] %v1005_v21  ;;  %v722_v23 = vpop.f32.mrb[12].mxu1 }
 0x12e   :  { %1038 = vst [vmem:[%s1781_s3 + $0x58] sm:$0xff] %v1006_v22  ;;  %v835_v24 = vpop.f32.mrb[12].mxu0  ;;  %v724_v26 = vpop.f32.mrb[13].mxu1 }
 0x12f   :  { %v836_v25 = vadd.f32 %v835_v24, %v722_v23  ;;  %v837_v27 = vpop.f32.mrb[13].mxu0  ;;  %v726_v29 = vpop.f32.mrb[14].mxu1 }
 0x130   :  { %v838_v28 = vadd.f32 %v837_v27, %v724_v26  ;;  %v839_v30 = vpop.f32.mrb[14].mxu0  ;;  %v728_v33 = vpop.f32.mrb[15].mxu1 }
 0x131   :  { %v1007_v31 = vadd.f32 %v1646_v37, %v836_v25  ;;  %v840_v32 = vadd.f32 %v839_v30, %v726_v29  ;;  %v841_v34 = vpop.f32.mrb[15].mxu0 }
 0x132   :  { %v1008_v35 = vadd.f32 %v1648_v40, %v838_v28  ;;  %v842_v36 = vadd.f32 %v841_v34, %v728_v33 }
 0x133   :  { %1039 = vst [vmem:[%s1781_s3 + $0x60] sm:$0xff] %v1007_v31  ;;  %v1009_v38 = vadd.f32 %v1646_v37, %v840_v32 }
 0x134   :  { %1040 = vst [vmem:[%s1781_s3 + $0x68] sm:$0xff] %v1008_v35  ;;  %v1010_v39 = vadd.f32 %v1648_v40, %v842_v36 }
 0x135   :  { %1041 = vst [vmem:[%s1781_s3 + $0x70] sm:$0xff] %v1009_v38  ;;  %v732_v41 = vpop.f32.mrb[16].mxu1 }
 0x136   :  { %1042 = vst [vmem:[%s1781_s3 + $0x78] sm:$0xff] %v1010_v39  ;;  %v845_v42 = vpop.f32.mrb[16].mxu0  ;;  %v734_v44 = vpop.f32.mrb[17].mxu1 }
 0x137   :  { %v846_v43 = vadd.f32 %v845_v42, %v732_v41  ;;  %v847_v45 = vpop.f32.mrb[17].mxu0  ;;  %v736_v47 = vpop.f32.mrb[18].mxu1 }
 0x138   :  { %v848_v46 = vadd.f32 %v847_v45, %v734_v44  ;;  %v849_v48 = vpop.f32.mrb[18].mxu0  ;;  %v738_v51 = vpop.f32.mrb[19].mxu1 }
 0x139   :  { %v1011_v49 = vadd.f32 %v1646_v37, %v846_v43  ;;  %v850_v50 = vadd.f32 %v849_v48, %v736_v47  ;;  %v851_v52 = vpop.f32.mrb[19].mxu0 }
 0x13a   :  { %v1012_v53 = vadd.f32 %v1648_v40, %v848_v46  ;;  %v852_v54 = vadd.f32 %v851_v52, %v738_v51 }
 0x13b   :  { %1043 = vst [vmem:[%s1781_s3 + $0x80] sm:$0xff] %v1011_v49  ;;  %v1013_v55 = vadd.f32 %v1646_v37, %v850_v50 }
 0x13c   :  { %1044 = vst [vmem:[%s1781_s3 + $0x88] sm:$0xff] %v1012_v53  ;;  %v1014_v56 = vadd.f32 %v1648_v40, %v852_v54 }
 0x13d   :  { %1045 = vst [vmem:[%s1781_s3 + $0x90] sm:$0xff] %v1013_v55  ;;  %v742_v57 = vpop.f32.mrb[20].mxu1 }
 0x13e   :  { %1046 = vst [vmem:[%s1781_s3 + $0x98] sm:$0xff] %v1014_v56  ;;  %v855_v58 = vpop.f32.mrb[20].mxu0  ;;  %v744_v60 = vpop.f32.mrb[21].mxu1 }
 0x13f   :  { %v856_v59 = vadd.f32 %v855_v58, %v742_v57  ;;  %v857_v61 = vpop.f32.mrb[21].mxu0  ;;  %v746_v63 = vpop.f32.mrb[22].mxu1 }
 0x140   :  { %v858_v62 = vadd.f32 %v857_v61, %v744_v60  ;;  %v859_v0 = vpop.f32.mrb[22].mxu0  ;;  %v748_v3 = vpop.f32.mrb[23].mxu1 }
 0x141   :  { %v1015_v1 = vadd.f32 %v1646_v37, %v856_v59  ;;  %v860_v2 = vadd.f32 %v859_v0, %v746_v63  ;;  %v861_v4 = vpop.f32.mrb[23].mxu0 }
 0x142   :  { %v1016_v5 = vadd.f32 %v1648_v40, %v858_v62  ;;  %v862_v6 = vadd.f32 %v861_v4, %v748_v3 }
 0x143   :  { %1047 = vst [vmem:[%s1781_s3 + $0xa0] sm:$0xff] %v1015_v1  ;;  %v1017_v7 = vadd.f32 %v1646_v37, %v860_v2 }
 0x144   :  { %1048 = vst [vmem:[%s1781_s3 + $0xa8] sm:$0xff] %v1016_v5  ;;  %v1018_v8 = vadd.f32 %v1648_v40, %v862_v6 }
 0x145   :  { %1049 = vst [vmem:[%s1781_s3 + $0xb0] sm:$0xff] %v1017_v7  ;;  %v752_v9 = vpop.f32.mrb[24].mxu1 }
 0x146   :  { %1050 = vst [vmem:[%s1781_s3 + $0xb8] sm:$0xff] %v1018_v8  ;;  %v865_v10 = vpop.f32.mrb[24].mxu0  ;;  %v754_v12 = vpop.f32.mrb[25].mxu1 }
 0x147   :  { %v866_v11 = vadd.f32 %v865_v10, %v752_v9  ;;  %v867_v13 = vpop.f32.mrb[25].mxu0  ;;  %v756_v15 = vpop.f32.mrb[26].mxu1 }
 0x148   :  { %v868_v14 = vadd.f32 %v867_v13, %v754_v12  ;;  %v869_v16 = vpop.f32.mrb[26].mxu0  ;;  %v758_v19 = vpop.f32.mrb[27].mxu1 }
 0x149   :  { %v1019_v17 = vadd.f32 %v1646_v37, %v866_v11  ;;  %v870_v18 = vadd.f32 %v869_v16, %v756_v15  ;;  %v871_v20 = vpop.f32.mrb[27].mxu0 }
 0x14a   :  { %v1020_v21 = vadd.f32 %v1648_v40, %v868_v14  ;;  %v872_v22 = vadd.f32 %v871_v20, %v758_v19 }
 0x14b   :  { %1051 = vst [vmem:[%s1781_s3 + $0xc0] sm:$0xff] %v1019_v17  ;;  %v1021_v23 = vadd.f32 %v1646_v37, %v870_v18 }
 0x14c   :  { %1052 = vst [vmem:[%s1781_s3 + $0xc8] sm:$0xff] %v1020_v21  ;;  %v1022_v24 = vadd.f32 %v1648_v40, %v872_v22 }
 0x14d   :  { %1053 = vst [vmem:[%s1781_s3 + $0xd0] sm:$0xff] %v1021_v23  ;;  %v762_v25 = vpop.f32.mrb[28].mxu1 }
 0x14e   :  { %1054 = vst [vmem:[%s1781_s3 + $0xd8] sm:$0xff] %v1022_v24  ;;  %v875_v26 = vpop.f32.mrb[28].mxu0  ;;  %v764_v28 = vpop.f32.mrb[29].mxu1 }
 0x14f   :  { %v876_v27 = vadd.f32 %v875_v26, %v762_v25  ;;  %v877_v29 = vpop.f32.mrb[29].mxu0  ;;  %v766_v31 = vpop.f32.mrb[30].mxu1 }
 0x150   :  { %v878_v30 = vadd.f32 %v877_v29, %v764_v28  ;;  %v879_v32 = vpop.f32.mrb[30].mxu0  ;;  %v768_v35 = vpop.f32.mrb[31].mxu1 }
 0x151   :  { %v1023_v33 = vadd.f32 %v1646_v37, %v876_v27  ;;  %v880_v34 = vadd.f32 %v879_v32, %v766_v31  ;;  %v881_v36 = vpop.f32.mrb[31].mxu0 }
 0x152   :  { %v1024_v38 = vadd.f32 %v1648_v40, %v878_v30  ;;  %v882_v39 = vadd.f32 %v881_v36, %v768_v35 }
 0x153   :  { %1055 = vst [vmem:[%s1781_s3 + $0xe0] sm:$0xff] %v1023_v33  ;;  %v1025_v41 = vadd.f32 %v1646_v37, %v880_v34 }
 0x154   :  { %1056 = vst [vmem:[%s1781_s3 + $0xe8] sm:$0xff] %v1024_v38  ;;  %v1026_v42 = vadd.f32 %v1648_v40, %v882_v39 }
 0x155   :  { %1057 = vst [vmem:[%s1781_s3 + $0xf0] sm:$0xff] %v1025_v41 }
 0x156   :  { %1058 = vst [vmem:[%s1781_s3 + $0xf8] sm:$0xff] %v1026_v42 }

// kernel: generator_forward.37
= control target key start
LH: loop header
LB: loop body
LE: loop exit
PB: predicated region body
PF: predicated region fallthrough
CT: control target
= control target key end

     0   :  { %s1513_s12 = smov 0   ;;  %s1515_s13 = smov 0   ;;  %s1774_s0 = inlined_call_operand.vmem [shape: bf16[512,3200], index: 0, kind: input, shape index: {}]   ;;  %s1775_s1 = inlined_call_operand.vmem [shape: bf16[3200,128], index: 1, kind: input, shape index: {}]   ;;  %s1776_s2 = inlined_call_operand.vmem [shape: f32[1,128], index: 2, kind: input, shape index: {}]   ;;  %s1777_s3 = inlined_call_operand.vmem [shape: f32[512,128], index: 3, kind: output, shape index: {}]  }
   0x1   :  { %s1517_s14 = smov 0   ;;  %s1519_s15 = smov 0  }
   0x2   :  { %s1521_s16 = smov 0   ;;  %s1523_s17 = smov 0  }
   0x3   :  { %s1525_s18 = smov 0  }
   0x4 LB: > { %s25_s19 = sadd.s32 1, %s1482_s16  ;;  %s32_s20 = sadd.s32 1, %s1486_s17  ;;  %s1490_s18 = sphi %s1525_s18, %s13_s18   ;;  %s1486_s17 = sphi %s1523_s17, %s1783_s17   ;;  %s1482_s16 = sphi %s1521_s16, %s1782_s16   ;;  %s1478_s15 = sphi %s1519_s15, %s1781_s15   ;;  %s1474_s14 = sphi %s1517_s14, %s1780_s14   ;;  %s1470_s13 = sphi %s1515_s13, %s1779_s13   ;;  %s1466_s12 = sphi %s1513_s12, %s1778_s12  }
   0x5   : > { %p26_p0 = scmp.ge.s32.totalorder %s25_s19, 25  ;;  %p48_p1 = scmp.ne.s32.totalorder %s1470_s13, %s1466_s12 }
   0x6   : > { %p49_p2 = scmp.eq.s32.totalorder %s1490_s18, 0  ;;  %s41_s24 = sadd.s32 1, %s1470_s13 }
   0x7   : > { %s1785_s19 = smov (%p26_p0, %s25_s19), 0  ;;  %s1787_s20 = smov (!%p26_p0, %s32_s20), %s1486_s17 }
   0x8   : > { %p50_p3 = por %p49_p2, %p48_p1  ;;  %p34_p4 = scmp.ge.s32.totalorder %s1787_s20, 2 }
   0x9   : > { %s37_s21 = ssub.s32 %s1482_s16, %s1785_s19  ;;  %p1162_p6 = scmp.ge.s32.totalorder %s1490_s18, 50 }
   0xa   : > { %s1789_s20 = smov (%p34_p4, %s1787_s20), 0 }
   0xb   : > { %s36_s22 = ssub.s32 %s1486_s17, %s1789_s20  ;;  %162 = sbr.rel (%p1162_p6) target bundleno = 46 (0x2e), region = 20 }
   0xc   : > { %s38_s23 = sor.u32 %s37_s21, %s36_s22 }
   0xd   : > { %p39_p5 = scmp.eq.s32.totalorder %s38_s23, 0 }
   0xf   : > { %s1564_s25 = scalar_select %p39_p5, %s1470_s13, %s41_s24  }
  0x12   : > { %165 = sbr.rel (!%p50_p3) target bundleno = 46 (0x2e), region = 24  ;;  %s167_s26 = sand.u32 (%p50_p3), 1, %s1470_s13  }
  0x13   : > { %s1290_s27 = smul.u32 (%p50_p3), 800, %s1486_s17  ;;  %s1163_s28 = sshll.u32 (%p50_p3), %s167_s26, 7 }
  0x14   : > { %s1578_s7 = scalar_lea.vmem (%p50_p3), [#allocation3], %s1163_s28 }
  0x15   : > { %s172_s29 = sadd.s32 (%p50_p3), %s1482_s16, %s1290_s27 }
  0x16   : > { %s1166_s30 = sshll.u32 (%p50_p3), %s172_s29, 2 }
  0x17   : > { %s1573_s6 = scalar_lea.vmem (%p50_p3), %s1774_s0, %s1166_s30 }
  0x18   : > { %v190_v0 = vld [vmem:[%s1573_s6] sm:$0xf] (%p50_p3)  ;;  %v192_v1 = vld [vmem:[%s1573_s6 + $0x64] sm:$0xf] (%p50_p3)  ;;  %v194_v2 = vld [vmem:[%s1573_s6 + $0xc8] sm:$0xf] (%p50_p3) }
  0x19   : > { %191 = vst [vmem:[%s1578_s7] sm:$0xf] %v190_v0  ;;  %193 = vst [vmem:[%s1578_s7 + $0x4] sm:$0xf] %v192_v1  ;;  %v196_v3 = vld [vmem:[%s1573_s6 + $0x12c] sm:$0xf] }
  0x1a   : > { %195 = vst [vmem:[%s1578_s7 + $0x8] sm:$0xf] %v194_v2  ;;  %v198_v4 = vld [vmem:[%s1573_s6 + $0x190] sm:$0xf]  ;;  %v200_v5 = vld [vmem:[%s1573_s6 + $0x1f4] sm:$0xf] }
  0x1b   : > { %197 = vst [vmem:[%s1578_s7 + $0xc] sm:$0xf] %v196_v3  ;;  %199 = vst [vmem:[%s1578_s7 + $0x10] sm:$0xf] %v198_v4  ;;  %v202_v6 = vld [vmem:[%s1573_s6 + $0x258] sm:$0xf] }
  0x1c   : > { %201 = vst [vmem:[%s1578_s7 + $0x14] sm:$0xf] %v200_v5  ;;  %v204_v7 = vld [vmem:[%s1573_s6 + $0x2bc] sm:$0xf]  ;;  %v206_v8 = vld [vmem:[%s1573_s6 + $0x320] sm:$0xf] }
  0x1d   : > { %203 = vst [vmem:[%s1578_s7 + $0x18] sm:$0xf] %v202_v6  ;;  %205 = vst [vmem:[%s1578_s7 + $0x1c] sm:$0xf] %v204_v7  ;;  %v208_v9 = vld [vmem:[%s1573_s6 + $0x384] sm:$0xf] }
  0x1e   : > { %207 = vst [vmem:[%s1578_s7 + $0x20] sm:$0xf] %v206_v8  ;;  %v210_v10 = vld [vmem:[%s1573_s6 + $0x3e8] sm:$0xf]  ;;  %v212_v11 = vld [vmem:[%s1573_s6 + $0x44c] sm:$0xf] }
  0x1f   : > { %209 = vst [vmem:[%s1578_s7 + $0x24] sm:$0xf] %v208_v9  ;;  %211 = vst [vmem:[%s1578_s7 + $0x28] sm:$0xf] %v210_v10  ;;  %v214_v12 = vld [vmem:[%s1573_s6 + $0x4b0] sm:$0xf] }
  0x20   : > { %213 = vst [vmem:[%s1578_s7 + $0x2c] sm:$0xf] %v212_v11  ;;  %v216_v13 = vld [vmem:[%s1573_s6 + $0x514] sm:$0xf]  ;;  %v218_v14 = vld [vmem:[%s1573_s6 + $0x578] sm:$0xf] }
  0x21   : > { %215 = vst [vmem:[%s1578_s7 + $0x30] sm:$0xf] %v214_v12  ;;  %217 = vst [vmem:[%s1578_s7 + $0x34] sm:$0xf] %v216_v13  ;;  %v220_v15 = vld [vmem:[%s1573_s6 + $0x5dc] sm:$0xf] }
  0x22   : > { %219 = vst [vmem:[%s1578_s7 + $0x38] sm:$0xf] %v218_v14  ;;  %v222_v16 = vld [vmem:[%s1573_s6 + $0x640] sm:$0xf]  ;;  %v224_v17 = vld [vmem:[%s1573_s6 + $0x6a4] sm:$0xf] }
  0x23   : > { %221 = vst [vmem:[%s1578_s7 + $0x3c] sm:$0xf] %v220_v15  ;;  %223 = vst [vmem:[%s1578_s7 + $0x40] sm:$0xf] %v222_v16  ;;  %v226_v18 = vld [vmem:[%s1573_s6 + $0x708] sm:$0xf] }
  0x24   : > { %225 = vst [vmem:[%s1578_s7 + $0x44] sm:$0xf] %v224_v17  ;;  %v228_v19 = vld [vmem:[%s1573_s6 + $0x76c] sm:$0xf]  ;;  %v230_v20 = vld [vmem:[%s1573_s6 + $0x7d0] sm:$0xf] }
  0x25   : > { %227 = vst [vmem:[%s1578_s7 + $0x48] sm:$0xf] %v226_v18  ;;  %229 = vst [vmem:[%s1578_s7 + $0x4c] sm:$0xf] %v228_v19  ;;  %v232_v21 = vld [vmem:[%s1573_s6 + $0x834] sm:$0xf] }
  0x26   : > { %231 = vst [vmem:[%s1578_s7 + $0x50] sm:$0xf] %v230_v20  ;;  %v234_v22 = vld [vmem:[%s1573_s6 + $0x898] sm:$0xf]  ;;  %v236_v23 = vld [vmem:[%s1573_s6 + $0x8fc] sm:$0xf] }
  0x27   : > { %233 = vst [vmem:[%s1578_s7 + $0x54] sm:$0xf] %v232_v21  ;;  %235 = vst [vmem:[%s1578_s7 + $0x58] sm:$0xf] %v234_v22  ;;  %v238_v24 = vld [vmem:[%s1573_s6 + $0x960] sm:$0xf] }
  0x28   : > { %237 = vst [vmem:[%s1578_s7 + $0x5c] sm:$0xf] %v236_v23  ;;  %v240_v25 = vld [vmem:[%s1573_s6 + $0x9c4] sm:$0xf]  ;;  %v242_v26 = vld [vmem:[%s1573_s6 + $0xa28] sm:$0xf] }
  0x29   : > { %239 = vst [vmem:[%s1578_s7 + $0x60] sm:$0xf] %v238_v24  ;;  %241 = vst [vmem:[%s1578_s7 + $0x64] sm:$0xf] %v240_v25  ;;  %v244_v27 = vld [vmem:[%s1573_s6 + $0xa8c] sm:$0xf] }
  0x2a   : > { %243 = vst [vmem:[%s1578_s7 + $0x68] sm:$0xf] %v242_v26  ;;  %v246_v28 = vld [vmem:[%s1573_s6 + $0xaf0] sm:$0xf]  ;;  %v248_v29 = vld [vmem:[%s1573_s6 + $0xb54] sm:$0xf] }
  0x2b   : > { %245 = vst [vmem:[%s1578_s7 + $0x6c] sm:$0xf] %v244_v27  ;;  %247 = vst [vmem:[%s1578_s7 + $0x70] sm:$0xf] %v246_v28  ;;  %v250_v30 = vld [vmem:[%s1573_s6 + $0xbb8] sm:$0xf] }
  0x2c   : > { %249 = vst [vmem:[%s1578_s7 + $0x74] sm:$0xf] %v248_v29  ;;  %v252_v31 = vld [vmem:[%s1573_s6 + $0xc1c] sm:$0xf]  ;;  %251 = vst [vmem:[%s1578_s7 + $0x78] sm:$0xf] %v250_v30 }
  0x2d   : > { %253 = vst [vmem:[%s1578_s7 + $0x7c] sm:$0xf] %v252_v31 }
  0x2e PF: > { %p1167_p7 = scmp.ge.s32.totalorder %s1490_s18, 1  ;;  %p351_p8 = scmp.lt.s32.totalorder %s1490_s18, 51 }
  0x30   : > { %p352_p9 = pnand %p1167_p7, %p351_p8 }
  0x31   : > { %s358_s8 = sand.u32 (!%p352_p9), 1, %s1466_s12   ;;  %s1169_s9 = sshll.u32 (!%p352_p9), %s1474_s14, 4 }
  0x32   : > { %355 = sbr.rel (%p352_p9) target bundleno = 389 (0x185), region = 69  ;;  %s1168_s10 = sshll.u32 (!%p352_p9), %s358_s8, 7 }
  0x33   : > { %p397_p10 = scmp.lt.s32.totalorder (!%p352_p9), %s1169_s9, 399  ;;  %s1171_s11 = sshll.u32 (!%p352_p9), %s1478_s15, 5 }
  0x34   : > { %p409_p11 = scmp.lt.s32.totalorder (!%p352_p9), %s1171_s11, 63  ;;  %s1656_s12 = scalar_lea.vmem (!%p352_p9), [#allocation3], %s1168_s10 }
  0x35   : > { %p1173_p12 = scmp.ne.s32.totalorder (!%p352_p9), %s1474_s14, 0 }
  0x39   : > { %s1791_s9 = smov (!%p397_p10, %s1169_s9), 399  ;;  %s1793_s11 = smov (!%p409_p11, %s1171_s11), 63 }
  0x3a   : > { %s1170_s21 = sshll.u32 %s1791_s9, 2  ;;  %s1172_s26 = sshll.u32 %s1793_s11, 3  ;;  %v1492_v32 = vmov (!%p1173_p12), 0.0  }
  0x3b   : > { %s1649_s24 = scalar_lea.vmem %s1775_s1, %s1170_s21  ;;  %s1654_s29 = scalar_lea.vmem %s1777_s3, %s1172_s26  ;;  %422 = vst [vmem:[#allocation2] sm:$0xff] (!%p1173_p12), %v1492_v32  ;;  %423 = vst [vmem:[#allocation2 + $0x8] sm:$0xff] (!%p1173_p12), %v1492_v32 }
  0x3c   : > { %421 = sbr.rel (%p1173_p12) target bundleno = 75 (0x4b), region = 77  ;;  %424 = vst [vmem:[#allocation2 + $0x10] sm:$0xff] (!%p1173_p12), %v1492_v32  ;;  %425 = vst [vmem:[#allocation2 + $0x18] sm:$0xff] (!%p1173_p12), %v1492_v32 }
  0x3d   : > { %426 = vst [vmem:[#allocation2 + $0x20] sm:$0xff] (!%p1173_p12), %v1492_v32  ;;  %427 = vst [vmem:[#allocation2 + $0x28] sm:$0xff] (!%p1173_p12), %v1492_v32 }
  0x3e   : > { %428 = vst [vmem:[#allocation2 + $0x30] sm:$0xff] (!%p1173_p12), %v1492_v32  ;;  %429 = vst [vmem:[#allocation2 + $0x38] sm:$0xff] (!%p1173_p12), %v1492_v32 }
  0x3f   : > { %430 = vst [vmem:[#allocation2 + $0x40] sm:$0xff] (!%p1173_p12), %v1492_v32  ;;  %431 = vst [vmem:[#allocation2 + $0x48] sm:$0xff] (!%p1173_p12), %v1492_v32 }
  0x40   : > { %432 = vst [vmem:[#allocation2 + $0x50] sm:$0xff] (!%p1173_p12), %v1492_v32  ;;  %433 = vst [vmem:[#allocation2 + $0x58] sm:$0xff] (!%p1173_p12), %v1492_v32 }
  0x41   : > { %434 = vst [vmem:[#allocation2 + $0x60] sm:$0xff] (!%p1173_p12), %v1492_v32  ;;  %435 = vst [vmem:[#allocation2 + $0x68] sm:$0xff] (!%p1173_p12), %v1492_v32 }
  0x42   : > { %436 = vst [vmem:[#allocation2 + $0x70] sm:$0xff] (!%p1173_p12), %v1492_v32  ;;  %437 = vst [vmem:[#allocation2 + $0x78] sm:$0xff] (!%p1173_p12), %v1492_v32 }
  0x43   : > { %438 = vst [vmem:[#allocation2 + $0x80] sm:$0xff] %v1492_v32  ;;  %439 = vst [vmem:[#allocation2 + $0x88] sm:$0xff] %v1492_v32 }
  0x44   : > { %440 = vst [vmem:[#allocation2 + $0x90] sm:$0xff] %v1492_v32  ;;  %441 = vst [vmem:[#allocation2 + $0x98] sm:$0xff] %v1492_v32 }
  0x45   : > { %442 = vst [vmem:[#allocation2 + $0xa0] sm:$0xff] %v1492_v32  ;;  %443 = vst [vmem:[#allocation2 + $0xa8] sm:$0xff] %v1492_v32 }
  0x46   : > { %444 = vst [vmem:[#allocation2 + $0xb0] sm:$0xff] %v1492_v32  ;;  %445 = vst [vmem:[#allocation2 + $0xb8] sm:$0xff] %v1492_v32 }
  0x47   : > { %446 = vst [vmem:[#allocation2 + $0xc0] sm:$0xff] %v1492_v32  ;;  %447 = vst [vmem:[#allocation2 + $0xc8] sm:$0xff] %v1492_v32 }
  0x48   : > { %448 = vst [vmem:[#allocation2 + $0xd0] sm:$0xff] %v1492_v32  ;;  %449 = vst [vmem:[#allocation2 + $0xd8] sm:$0xff] %v1492_v32 }
  0x49   : > { %450 = vst [vmem:[#allocation2 + $0xe0] sm:$0xff] %v1492_v32  ;;  %451 = vst [vmem:[#allocation2 + $0xe8] sm:$0xff] %v1492_v32 }
  0x4a   : > { %452 = vst [vmem:[#allocation2 + $0xf0] sm:$0xff] %v1492_v32  ;;  %453 = vst [vmem:[#allocation2 + $0xf8] sm:$0xff] %v1492_v32 }
  0x4b PF: > { %v1348_v33 = vld [vmem:[%s1649_s24] sm:$0xff]   ;;  %v1349_v34 = vld [vmem:[%s1649_s24 + $0x8] sm:$0xff]   ;;  %v1350_v35 = vld [vmem:[%s1649_s24 + $0x10] sm:$0xff]   ;;  %p1198_p13 = scmp.ne.s32.totalorder %s1474_s14, 24 }
  0x4c   : > { %1226 = vmatprep.subr.bf16.mxu0 %v1348_v33  ;;  %1274 = vmatprep.subr.bf16.mxu1 %v1348_v33  ;;  %v1351_v36 = vld [vmem:[%s1649_s24 + $0x18] sm:$0xff]   ;;  %v1356_v37 = vld [vmem:[%s1656_s12] sm:$0xff]   ;;  %v1353_v40 = vld [vmem:[%s1649_s24 + $0x28] sm:$0xff]  }
  0x4d   : > { %1227 = vmatpush3.bf16.msra.mxu0 %v1348_v33  ;;  %1282 = vmatpush3.bf16.msra.mxu1 %v1348_v33  ;;  %v1357_v38 = vld [vmem:[%s1656_s12 + $0x40] sm:$0xff]   ;;  %v1354_v41 = vld [vmem:[%s1649_s24 + $0x30] sm:$0xff]   ;;  %v1355_v42 = vld [vmem:[%s1649_s24 + $0x38] sm:$0xff]  }
  0x4e   : > { %1228 = vmatprep.subr.bf16.mxu0 %v1349_v34  ;;  %1275 = vmatprep.subr.bf16.mxu1 %v1349_v34  ;;  %v1352_v39 = vld [vmem:[%s1649_s24 + $0x20] sm:$0xff]   ;;  %v1358_v43 = vld [vmem:[%s1656_s12 + $0x8] sm:$0xff]   ;;  %v1360_v45 = vld [vmem:[%s1656_s12 + $0x10] sm:$0xff]  }
  0x4f   : > { %1242 = vmatprep.mubr.bf16.mxu0 %v1356_v37  ;;  %1258 = vmatprep.mubr.bf16.mxu1 %v1357_v38  ;;  %v1359_v44 = vld [vmem:[%s1656_s12 + $0x48] sm:$0xff]   ;;  %v1361_v46 = vld [vmem:[%s1656_s12 + $0x50] sm:$0xff]   ;;  %v1362_v47 = vld [vmem:[%s1656_s12 + $0x18] sm:$0xff]  }
  0x50   : > { %v1363_v48 = vld [vmem:[%s1656_s12 + $0x58] sm:$0xff]   ;;  %v1364_v49 = vld [vmem:[%s1656_s12 + $0x20] sm:$0xff]   ;;  %v1366_v51 = vld [vmem:[%s1656_s12 + $0x28] sm:$0xff]  }
  0x51   : > { %1229 = vmatpush3.bf16.msra.mxu0 %v1349_v34  ;;  %1283 = vmatpush3.bf16.msra.mxu1 %v1349_v34  ;;  %v1365_v50 = vld [vmem:[%s1656_s12 + $0x60] sm:$0xff]   ;;  %v1367_v52 = vld [vmem:[%s1656_s12 + $0x68] sm:$0xff]   ;;  %v1368_v53 = vld [vmem:[%s1656_s12 + $0x30] sm:$0xff]  }
  0x52   : > { %1230 = vmatprep.subr.bf16.mxu0 %v1350_v35  ;;  %1276 = vmatprep.subr.bf16.mxu1 %v1350_v35  ;;  %v1369_v54 = vld [vmem:[%s1656_s12 + $0x70] sm:$0xff]   ;;  %v1370_v55 = vld [vmem:[%s1656_s12 + $0x38] sm:$0xff]   ;;  %v454_v59 = vld [vmem:[#allocation2] sm:$0xff] }
  0x53   : > { %v1371_v56 = vld [vmem:[%s1656_s12 + $0x78] sm:$0xff]   ;;  %v456_v57 = vld [vmem:[#allocation2 + $0x10] sm:$0xff]  ;;  %v470_v60 = vld [vmem:[#allocation2 + $0x80] sm:$0xff] }
  0x54   : > { %v472_v58 = vld [vmem:[#allocation2 + $0x90] sm:$0xff]  ;;  %v457_v63 = vld [vmem:[#allocation2 + $0x18] sm:$0xff]  ;;  %v455_v5 = vld [vmem:[#allocation2 + $0x8] sm:$0xff] }
  0x55   : > { %1231 = vmatpush3.bf16.msra.mxu0 %v1350_v35  ;;  %1284 = vmatpush3.bf16.msra.mxu1 %v1350_v35  ;;  %v473_v0 = vld [vmem:[#allocation2 + $0x98] sm:$0xff]  ;;  %v471_v6 = vld [vmem:[#allocation2 + $0x88] sm:$0xff]  ;;  %v460_v17 = vld [vmem:[#allocation2 + $0x30] sm:$0xff] }
  0x56   : > { %1232 = vmatprep.subr.bf16.mxu0 %v1351_v36  ;;  %1277 = vmatprep.subr.bf16.mxu1 %v1351_v36  ;;  %v476_v18 = vld [vmem:[#allocation2 + $0xb0] sm:$0xff]  ;;  %v458_v19 = vld [vmem:[#allocation2 + $0x20] sm:$0xff]  ;;  %v461_v23 = vld [vmem:[#allocation2 + $0x38] sm:$0xff] }
  0x57   : > { %v474_v20 = vld [vmem:[#allocation2 + $0xa0] sm:$0xff]  ;;  %v477_v24 = vld [vmem:[#allocation2 + $0xb8] sm:$0xff]  ;;  %v459_v29 = vld [vmem:[#allocation2 + $0x28] sm:$0xff] }
  0x58   : > { %v475_v30 = vld [vmem:[#allocation2 + $0xa8] sm:$0xff] }
  0x59   : > { %1233 = vmatpush3.bf16.msra.mxu0 %v1351_v36  ;;  %1285 = vmatpush3.bf16.msra.mxu1 %v1351_v36 }
  0x5a   : > { %1234 = vmatprep.subr.bf16.mxu0 %v1352_v39  ;;  %1278 = vmatprep.subr.bf16.mxu1 %v1352_v39 }
  0x5d   : > { %1235 = vmatpush3.bf16.msra.mxu0 %v1352_v39  ;;  %1286 = vmatpush3.bf16.msra.mxu1 %v1352_v39 }
  0x5e   : > { %1236 = vmatprep.subr.bf16.mxu0 %v1353_v40  ;;  %1279 = vmatprep.subr.bf16.mxu1 %v1353_v40 }
  0x61   : > { %1237 = vmatpush3.bf16.msra.mxu0 %v1353_v40  ;;  %1287 = vmatpush3.bf16.msra.mxu1 %v1353_v40 }
  0x62   : > { %1238 = vmatprep.subr.bf16.mxu0 %v1354_v41  ;;  %1280 = vmatprep.subr.bf16.mxu1 %v1354_v41 }
  0x65   : > { %1239 = vmatpush3.bf16.msra.mxu0 %v1354_v41  ;;  %1288 = vmatpush3.bf16.msra.mxu1 %v1354_v41  ;;  %v464_v41 = vld [vmem:[#allocation2 + $0x50] sm:$0xff] }
  0x66   : > { %1240 = vmatprep.subr.bf16.mxu0 %v1355_v42  ;;  %1281 = vmatprep.subr.bf16.mxu1 %v1355_v42 }
  0x69   : > { %1241 = vmatpush3.bf16.msra.mxu0 %v1355_v42  ;;  %1289 = vmatpush3.bf16.msra.mxu1 %v1355_v42  ;;  %v480_v42 = vld [vmem:[#allocation2 + $0xd0] sm:$0xff] }
  0x6c   : > { %1243 = vmatmul.mubr.bf16.vlgmr.msra.gmra.mrb[0].mxu0 %v1358_v43  ;;  %1259 = vmatmul.mubr.bf16.vlgmr.msra.gmra.mrb[0].mxu1 %v1359_v44  ;;  %v462_v43 = vld [vmem:[#allocation2 + $0x40] sm:$0xff] }
  0x6d   : > { %1246 = vmatprep.mubr.bf16.mxu0 %v1360_v45  ;;  %1262 = vmatprep.mubr.bf16.mxu1 %v1361_v46  ;;  %v478_v44 = vld [vmem:[#allocation2 + $0xc0] sm:$0xff] }
  0x74   : > { %1247 = vmatmul.mubr.bf16.gmra.mrb[4].mxu0 %v1362_v47  ;;  %1263 = vmatmul.mubr.bf16.gmra.mrb[4].mxu1 %v1363_v48  ;;  %v465_v47 = vld [vmem:[#allocation2 + $0x58] sm:$0xff] }
  0x75   : > { %1250 = vmatprep.mubr.bf16.mxu0 %v1364_v49  ;;  %1266 = vmatprep.mubr.bf16.mxu1 %v1365_v50  ;;  %v481_v48 = vld [vmem:[#allocation2 + $0xd8] sm:$0xff] }
  0x7c   : > { %1251 = vmatmul.mubr.bf16.gmra.mrb[8].mxu0 %v1366_v51  ;;  %1267 = vmatmul.mubr.bf16.gmra.mrb[8].mxu1 %v1367_v52 }
  0x7d   : > { %1254 = vmatprep.mubr.bf16.mxu0 %v1368_v53  ;;  %1270 = vmatprep.mubr.bf16.mxu1 %v1369_v54  ;;  %v463_v53 = vld [vmem:[#allocation2 + $0x48] sm:$0xff] }
  0x7e   : > { %v479_v54 = vld [vmem:[#allocation2 + $0xc8] sm:$0xff] }
  0x84   : > { %1255 = vmatmul.mubr.bf16.gmra.mrb[12].mxu0 %v1370_v55  ;;  %1271 = vmatmul.mubr.bf16.gmra.mrb[12].mxu1 %v1371_v56 }
 0x13f   : > { %v1244_v61 = vpop.f32.mrb[0].mxu0  ;;  %v1260_v62 = vpop.f32.mrb[0].mxu1 }
 0x140   : > { %v841_v1 = vadd.f32 %v1244_v61, %v456_v57  ;;  %v857_v2 = vadd.f32 %v1260_v62, %v472_v58  ;;  %v712_v3 = vpop.f32.mrb[1].mxu0  ;;  %v776_v4 = vpop.f32.mrb[1].mxu1 }
 0x141   : > { %v839_v7 = vadd.f32 %v712_v3, %v454_v59  ;;  %v855_v8 = vadd.f32 %v776_v4, %v470_v60  ;;  %v1245_v9 = vpop.f32.mrb[2].mxu0  ;;  %v1261_v10 = vpop.f32.mrb[2].mxu1  ;;  %v466_v3 = vld [vmem:[#allocation2 + $0x60] sm:$0xff] }
 0x142   : > { %873 = vst [vmem:[#allocation2 + $0x10] sm:$0xff] %v841_v1  ;;  %889 = vst [vmem:[#allocation2 + $0x90] sm:$0xff] %v857_v2  ;;  %v842_v11 = vadd.f32 %v1245_v9, %v457_v63  ;;  %v858_v12 = vadd.f32 %v1261_v10, %v473_v0  ;;  %v715_v13 = vpop.f32.mrb[3].mxu0  ;;  %v779_v14 = vpop.f32.mrb[3].mxu1  ;;  %v468_v1 = vld [vmem:[#allocation2 + $0x70] sm:$0xff]  ;;  %v482_v4 = vld [vmem:[#allocation2 + $0xe0] sm:$0xff] }
 0x143   : > { %871 = vst [vmem:[#allocation2] sm:$0xff] %v839_v7  ;;  %887 = vst [vmem:[#allocation2 + $0x80] sm:$0xff] %v855_v8  ;;  %v840_v15 = vadd.f32 %v715_v13, %v455_v5  ;;  %v856_v16 = vadd.f32 %v779_v14, %v471_v6  ;;  %v484_v2 = vld [vmem:[#allocation2 + $0xf0] sm:$0xff]  ;;  %v469_v7 = vld [vmem:[#allocation2 + $0x78] sm:$0xff] }
 0x144   : > { %874 = vst [vmem:[#allocation2 + $0x18] sm:$0xff] %v842_v11  ;;  %890 = vst [vmem:[#allocation2 + $0x98] sm:$0xff] %v858_v12  ;;  %v485_v8 = vld [vmem:[#allocation2 + $0xf8] sm:$0xff]  ;;  %v467_v13 = vld [vmem:[#allocation2 + $0x68] sm:$0xff] }
 0x145   : > { %872 = vst [vmem:[#allocation2 + $0x8] sm:$0xff] %v840_v15  ;;  %888 = vst [vmem:[#allocation2 + $0x88] sm:$0xff] %v856_v16  ;;  %v483_v14 = vld [vmem:[#allocation2 + $0xe8] sm:$0xff] }
 0x147   : > { %v1248_v21 = vpop.f32.mrb[4].mxu0  ;;  %v1264_v22 = vpop.f32.mrb[4].mxu1 }
 0x148   : > { %v845_v25 = vadd.f32 %v1248_v21, %v460_v17  ;;  %v861_v26 = vadd.f32 %v1264_v22, %v476_v18  ;;  %v728_v27 = vpop.f32.mrb[5].mxu0  ;;  %v792_v28 = vpop.f32.mrb[5].mxu1 }
 0x149   : > { %v843_v31 = vadd.f32 %v728_v27, %v458_v19  ;;  %v859_v32 = vadd.f32 %v792_v28, %v474_v20  ;;  %v1249_v33 = vpop.f32.mrb[6].mxu0  ;;  %v1265_v34 = vpop.f32.mrb[6].mxu1 }
 0x14a   : > { %877 = vst [vmem:[#allocation2 + $0x30] sm:$0xff] %v845_v25  ;;  %893 = vst [vmem:[#allocation2 + $0xb0] sm:$0xff] %v861_v26  ;;  %v846_v35 = vadd.f32 %v1249_v33, %v461_v23  ;;  %v862_v36 = vadd.f32 %v1265_v34, %v477_v24  ;;  %v731_v37 = vpop.f32.mrb[7].mxu0  ;;  %v795_v38 = vpop.f32.mrb[7].mxu1  ;;  %v907_v25 = vld [vmem:[#allocation2] sm:$0xff] (!%p1198_p13) }
 0x14b   : > { %875 = vst [vmem:[#allocation2 + $0x20] sm:$0xff] %v843_v31  ;;  %891 = vst [vmem:[#allocation2 + $0xa0] sm:$0xff] %v859_v32  ;;  %v844_v39 = vadd.f32 %v731_v37, %v459_v29  ;;  %v860_v40 = vadd.f32 %v795_v38, %v475_v30  ;;  %v1687_v26 = vld [vmem:[%s1776_s2] ss:$0 sm:$0xff] (!%p1198_p13)  ;;  %v909_v30 = vld [vmem:[#allocation2 + $0x10] sm:$0xff] (!%p1198_p13) }
 0x14c   : > { %878 = vst [vmem:[#allocation2 + $0x38] sm:$0xff] %v846_v35  ;;  %894 = vst [vmem:[#allocation2 + $0xb8] sm:$0xff] %v862_v36  ;;  %v908_v27 = vld [vmem:[#allocation2 + $0x8] sm:$0xff] (!%p1198_p13)  ;;  %v946_v28 = vadd.f32 (!%p1198_p13), %v1687_v26, %v907_v25  ;;  %v910_v31 = vld [vmem:[#allocation2 + $0x18] sm:$0xff] (!%p1198_p13)  ;;  %v948_v33 = vadd.f32 (!%p1198_p13), %v1687_v26, %v909_v30 }
 0x14d   : > { %876 = vst [vmem:[#allocation2 + $0x28] sm:$0xff] %v844_v39  ;;  %892 = vst [vmem:[#allocation2 + $0xa8] sm:$0xff] %v860_v40  ;;  %v947_v29 = vadd.f32 (!%p1198_p13), %v1687_v26, %v908_v27  ;;  %v949_v34 = vadd.f32 (!%p1198_p13), %v1687_v26, %v910_v31 }
 0x14e   : > { %1372 = vtanh.f32 (!%p1198_p13), %v946_v28 }
 0x14f   : > { %v1252_v45 = vpop.f32.mrb[8].mxu0  ;;  %v1268_v46 = vpop.f32.mrb[8].mxu1  ;;  %1374 = vtanh.f32 (!%p1198_p13), %v947_v29 }
 0x150   : > { %v849_v49 = vadd.f32 %v1252_v45, %v464_v41  ;;  %v865_v50 = vadd.f32 %v1268_v46, %v480_v42  ;;  %v744_v51 = vpop.f32.mrb[9].mxu0  ;;  %v808_v52 = vpop.f32.mrb[9].mxu1  ;;  %1376 = vtanh.f32 (!%p1198_p13), %v948_v33 }
 0x151   : > { %v847_v55 = vadd.f32 %v744_v51, %v462_v43  ;;  %v863_v56 = vadd.f32 %v808_v52, %v478_v44  ;;  %v1253_v57 = vpop.f32.mrb[10].mxu0  ;;  %v1269_v58 = vpop.f32.mrb[10].mxu1  ;;  %v913_v36 = vld [vmem:[#allocation2 + $0x30] sm:$0xff] (!%p1198_p13)  ;;  %1378 = vtanh.f32 (!%p1198_p13), %v949_v34 }
 0x152   : > { %881 = vst [vmem:[#allocation2 + $0x50] sm:$0xff] %v849_v49  ;;  %897 = vst [vmem:[#allocation2 + $0xd0] sm:$0xff] %v865_v50  ;;  %v850_v59 = vadd.f32 %v1253_v57, %v465_v47  ;;  %v866_v60 = vadd.f32 %v1269_v58, %v481_v48  ;;  %v747_v61 = vpop.f32.mrb[11].mxu0  ;;  %v811_v62 = vpop.f32.mrb[11].mxu1  ;;  %v911_v32 = vld [vmem:[#allocation2 + $0x20] sm:$0xff] (!%p1198_p13)  ;;  %v952_v41 = vadd.f32 (!%p1198_p13), %v1687_v26, %v913_v36 }
 0x153   : > { %879 = vst [vmem:[#allocation2 + $0x40] sm:$0xff] %v847_v55  ;;  %895 = vst [vmem:[#allocation2 + $0xc0] sm:$0xff] %v863_v56  ;;  %v848_v63 = vadd.f32 %v747_v61, %v463_v53  ;;  %v864_v0 = vadd.f32 %v811_v62, %v479_v54  ;;  %v950_v37 = vadd.f32 (!%p1198_p13), %v1687_v26, %v911_v32  ;;  %v914_v38 = vld [vmem:[#allocation2 + $0x38] sm:$0xff] (!%p1198_p13)  ;;  %v923_v56 = vld [vmem:[#allocation2 + $0x80] sm:$0xff] (!%p1198_p13) }
 0x154   : > { %882 = vst [vmem:[#allocation2 + $0x58] sm:$0xff] %v850_v59  ;;  %898 = vst [vmem:[#allocation2 + $0xd8] sm:$0xff] %v866_v60  ;;  %v912_v35 = vld [vmem:[#allocation2 + $0x28] sm:$0xff] (!%p1198_p13)  ;;  %v953_v43 = vadd.f32 (!%p1198_p13), %v1687_v26, %v914_v38  ;;  %v925_v62 = vld [vmem:[#allocation2 + $0x90] sm:$0xff] (!%p1198_p13) }
 0x155   : > { %880 = vst [vmem:[#allocation2 + $0x48] sm:$0xff] %v848_v63  ;;  %896 = vst [vmem:[#allocation2 + $0xc8] sm:$0xff] %v864_v0  ;;  %v951_v39 = vadd.f32 (!%p1198_p13), %v1687_v26, %v912_v35  ;;  %1380 = vtanh.f32 (!%p1198_p13), %v950_v37  ;;  %v924_v59 = vld [vmem:[#allocation2 + $0x88] sm:$0xff] (!%p1198_p13)  ;;  %v962_v0 = vadd.f32 (!%p1198_p13), %v1687_v26, %v923_v56 }
 0x157   : > { %v1256_v5 = vpop.f32.mrb[12].mxu0  ;;  %v1272_v6 = vpop.f32.mrb[12].mxu1  ;;  %906 = sbr.rel (%p1198_p13) target bundleno = 389 (0x185), region = 81  ;;  %1382 = vtanh.f32 (!%p1198_p13), %v951_v39 }
 0x158   : > { %v853_v9 = vadd.f32 %v1256_v5, %v468_v1  ;;  %v869_v10 = vadd.f32 %v1272_v6, %v484_v2  ;;  %v760_v11 = vpop.f32.mrb[13].mxu0  ;;  %v824_v12 = vpop.f32.mrb[13].mxu1  ;;  %1384 = vtanh.f32 (!%p1198_p13), %v952_v41  ;;  %v926_v1 = vld [vmem:[#allocation2 + $0x98] sm:$0xff] (!%p1198_p13)  ;;  %v964_v6 = vadd.f32 (!%p1198_p13), %v1687_v26, %v925_v62 }
 0x159   : > { %v851_v15 = vadd.f32 %v760_v11, %v466_v3  ;;  %v867_v16 = vadd.f32 %v824_v12, %v482_v4  ;;  %v1257_v17 = vpop.f32.mrb[14].mxu0  ;;  %v1273_v18 = vpop.f32.mrb[14].mxu1  ;;  %v917_v44 = vld [vmem:[#allocation2 + $0x50] sm:$0xff] (!%p1198_p13)  ;;  %1386 = vtanh.f32 (!%p1198_p13), %v953_v43  ;;  %v963_v3 = vadd.f32 (!%p1198_p13), %v1687_v26, %v924_v59  ;;  %v927_v4 = vld [vmem:[#allocation2 + $0xa0] sm:$0xff] (!%p1198_p13) }
 0x15a   : > { %885 = vst [vmem:[#allocation2 + $0x70] sm:$0xff] %v853_v9  ;;  %901 = vst [vmem:[#allocation2 + $0xf0] sm:$0xff] %v869_v10  ;;  %v854_v19 = vadd.f32 %v1257_v17, %v469_v7  ;;  %v870_v20 = vadd.f32 %v1273_v18, %v485_v8  ;;  %v763_v21 = vpop.f32.mrb[15].mxu0  ;;  %v827_v22 = vpop.f32.mrb[15].mxu1  ;;  %v915_v40 = vld [vmem:[#allocation2 + $0x40] sm:$0xff] (!%p1198_p13)  ;;  %v956_v49 = vadd.f32 (!%p1198_p13), %v1687_v26, %v917_v44  ;;  %v928_v7 = vld [vmem:[#allocation2 + $0xa8] sm:$0xff] (!%p1198_p13) }
 0x15b   : > { %883 = vst [vmem:[#allocation2 + $0x60] sm:$0xff] %v851_v15  ;;  %899 = vst [vmem:[#allocation2 + $0xe0] sm:$0xff] %v867_v16  ;;  %v852_v23 = vadd.f32 %v763_v21, %v467_v13  ;;  %v868_v24 = vadd.f32 %v827_v22, %v483_v14  ;;  %v954_v45 = vadd.f32 (!%p1198_p13), %v1687_v26, %v915_v40  ;;  %v918_v46 = vld [vmem:[#allocation2 + $0x58] sm:$0xff] (!%p1198_p13)  ;;  %v1373_v57 = vpop.eup (!%p1198_p13), %1372  ;;  %v929_v10 = vld [vmem:[#allocation2 + $0xb0] sm:$0xff] (!%p1198_p13) }
 0x15c   : > { %886 = vst [vmem:[#allocation2 + $0x78] sm:$0xff] %v854_v19  ;;  %902 = vst [vmem:[#allocation2 + $0xf8] sm:$0xff] %v870_v20  ;;  %v916_v42 = vld [vmem:[#allocation2 + $0x48] sm:$0xff] (!%p1198_p13)  ;;  %v957_v51 = vadd.f32 (!%p1198_p13), %v1687_v26, %v918_v46  ;;  %v1375_v60 = vpop.eup (!%p1198_p13), %1374  ;;  %v965_v9 = vadd.f32 (!%p1198_p13), %v1687_v26, %v926_v1  ;;  %v966_v12 = vadd.f32 (!%p1198_p13), %v1687_v26, %v927_v4  ;;  %v930_v13 = vld [vmem:[#allocation2 + $0xb8] sm:$0xff] (!%p1198_p13) }
 0x15d   : > { %884 = vst [vmem:[#allocation2 + $0x68] sm:$0xff] %v852_v23  ;;  %900 = vst [vmem:[#allocation2 + $0xe8] sm:$0xff] %v868_v24  ;;  %v955_v47 = vadd.f32 (!%p1198_p13), %v1687_v26, %v916_v42  ;;  %1388 = vtanh.f32 (!%p1198_p13), %v954_v45  ;;  %v1377_v63 = vpop.eup (!%p1198_p13), %1376  ;;  %v967_v15 = vadd.f32 (!%p1198_p13), %v1687_v26, %v928_v7  ;;  %v931_v16 = vld [vmem:[#allocation2 + $0xc0] sm:$0xff] (!%p1198_p13)  ;;  %v968_v18 = vadd.f32 (!%p1198_p13), %v1687_v26, %v929_v10  ;;  %v932_v19 = vld [vmem:[#allocation2 + $0xc8] sm:$0xff] (!%p1198_p13) }
 0x15e   : > { %1010 = vst [vmem:[%s1654_s29] sm:$0xff] %v1373_v57  ;;  %1011 = vst [vmem:[%s1654_s29 + $0x8] sm:$0xff] %v1375_v60  ;;  %v1379_v2 = vpop.eup %1378  ;;  %v969_v21 = vadd.f32 %v1687_v26, %v930_v13  ;;  %v933_v22 = vld [vmem:[#allocation2 + $0xd0] sm:$0xff]  ;;  %v970_v24 = vadd.f32 %v1687_v26, %v931_v16  ;;  %v934_v25 = vld [vmem:[#allocation2 + $0xd8] sm:$0xff]  ;;  %v971_v28 = vadd.f32 %v1687_v26, %v932_v19 }
 0x15f   : > { %1390 = vtanh.f32 %v955_v47  ;;  %1012 = vst [vmem:[%s1654_s29 + $0x10] sm:$0xff] %v1377_v63  ;;  %v1381_v5 = vpop.eup %1380  ;;  %1013 = vst [vmem:[%s1654_s29 + $0x18] sm:$0xff] %v1379_v2  ;;  %v972_v31 = vadd.f32 %v1687_v26, %v933_v22  ;;  %v973_v34 = vadd.f32 %v1687_v26, %v934_v25 }
 0x160   : > { %1392 = vtanh.f32 %v956_v49  ;;  %1014 = vst [vmem:[%s1654_s29 + $0x20] sm:$0xff] %v1381_v5 }
 0x161   : > { %v921_v52 = vld [vmem:[#allocation2 + $0x70] sm:$0xff]  ;;  %1394 = vtanh.f32 %v957_v51  ;;  %v1383_v8 = vpop.eup %1382 }
 0x162   : > { %v919_v48 = vld [vmem:[#allocation2 + $0x60] sm:$0xff]  ;;  %v960_v58 = vadd.f32 %v1687_v26, %v921_v52  ;;  %v1385_v11 = vpop.eup %1384  ;;  %1015 = vst [vmem:[%s1654_s29 + $0x28] sm:$0xff] %v1383_v8  ;;  %v937_v35 = vld [vmem:[#allocation2 + $0xf0] sm:$0xff] }
 0x163   : > { %v958_v53 = vadd.f32 %v1687_v26, %v919_v48  ;;  %v922_v54 = vld [vmem:[#allocation2 + $0x78] sm:$0xff]  ;;  %v1387_v14 = vpop.eup %1386  ;;  %1016 = vst [vmem:[%s1654_s29 + $0x30] sm:$0xff] %v1385_v11  ;;  %v935_v29 = vld [vmem:[#allocation2 + $0xe0] sm:$0xff]  ;;  %v976_v42 = vadd.f32 %v1687_v26, %v937_v35 }
 0x164   : > { %v920_v50 = vld [vmem:[#allocation2 + $0x68] sm:$0xff]  ;;  %v961_v61 = vadd.f32 %v1687_v26, %v922_v54  ;;  %1017 = vst [vmem:[%s1654_s29 + $0x38] sm:$0xff] %v1387_v14  ;;  %v974_v37 = vadd.f32 %v1687_v26, %v935_v29  ;;  %v938_v38 = vld [vmem:[#allocation2 + $0xf8] sm:$0xff] }
 0x165   : > { %v959_v55 = vadd.f32 %v1687_v26, %v920_v50  ;;  %1396 = vtanh.f32 %v958_v53  ;;  %v936_v32 = vld [vmem:[#allocation2 + $0xe8] sm:$0xff]  ;;  %v977_v44 = vadd.f32 %v1687_v26, %v938_v38 }
 0x166   : > { %v975_v40 = vadd.f32 %v1687_v26, %v936_v32 }
 0x167   : > { %1398 = vtanh.f32 %v959_v55  ;;  %v1389_v17 = vpop.eup %1388 }
 0x168   : > { %1400 = vtanh.f32 %v960_v58  ;;  %1018 = vst [vmem:[%s1654_s29 + $0x40] sm:$0xff] %v1389_v17 }
 0x169   : > { %1402 = vtanh.f32 %v961_v61  ;;  %v1391_v20 = vpop.eup %1390 }
 0x16a   : > { %1404 = vtanh.f32 %v962_v0  ;;  %v1393_v23 = vpop.eup %1392  ;;  %1019 = vst [vmem:[%s1654_s29 + $0x48] sm:$0xff] %v1391_v20 }
 0x16b   : > { %1406 = vtanh.f32 %v963_v3  ;;  %v1395_v27 = vpop.eup %1394  ;;  %1020 = vst [vmem:[%s1654_s29 + $0x50] sm:$0xff] %v1393_v23 }
 0x16c   : > { %1408 = vtanh.f32 %v964_v6  ;;  %1021 = vst [vmem:[%s1654_s29 + $0x58] sm:$0xff] %v1395_v27 }
 0x16d   : > { %1410 = vtanh.f32 %v965_v9 }
 0x16e   : > { %1412 = vtanh.f32 %v966_v12 }
 0x16f   : > { %1414 = vtanh.f32 %v967_v15  ;;  %v1397_v30 = vpop.eup %1396 }
 0x170   : > { %1416 = vtanh.f32 %v968_v18  ;;  %1022 = vst [vmem:[%s1654_s29 + $0x60] sm:$0xff] %v1397_v30 }
 0x171   : > { %v1399_v33 = vpop.eup %1398  ;;  %1418 = vtanh.f32 %v969_v21 }
 0x172   : > { %v1401_v36 = vpop.eup %1400  ;;  %1023 = vst [vmem:[%s1654_s29 + $0x68] sm:$0xff] %v1399_v33  ;;  %1420 = vtanh.f32 %v970_v24 }
 0x173   : > { %v1403_v39 = vpop.eup %1402  ;;  %1024 = vst [vmem:[%s1654_s29 + $0x70] sm:$0xff] %v1401_v36  ;;  %1422 = vtanh.f32 %v971_v28 }
 0x174   : > { %v1405_v41 = vpop.eup %1404  ;;  %1025 = vst [vmem:[%s1654_s29 + $0x78] sm:$0xff] %v1403_v39  ;;  %1424 = vtanh.f32 %v972_v31 }
 0x175   : > { %v1407_v43 = vpop.eup %1406  ;;  %1026 = vst [vmem:[%s1654_s29 + $0x80] sm:$0xff] %v1405_v41  ;;  %1426 = vtanh.f32 %v973_v34 }
 0x176   : > { %v1409_v45 = vpop.eup %1408  ;;  %1027 = vst [vmem:[%s1654_s29 + $0x88] sm:$0xff] %v1407_v43  ;;  %1428 = vtanh.f32 %v974_v37 }
 0x177   : > { %v1411_v46 = vpop.eup %1410  ;;  %1028 = vst [vmem:[%s1654_s29 + $0x90] sm:$0xff] %v1409_v45  ;;  %1430 = vtanh.f32 %v975_v40 }
 0x178   : > { %v1413_v47 = vpop.eup %1412  ;;  %1029 = vst [vmem:[%s1654_s29 + $0x98] sm:$0xff] %v1411_v46  ;;  %1432 = vtanh.f32 %v976_v42 }
 0x179   : > { %v1415_v48 = vpop.eup %1414  ;;  %1030 = vst [vmem:[%s1654_s29 + $0xa0] sm:$0xff] %v1413_v47  ;;  %1434 = vtanh.f32 %v977_v44 }
 0x17a   : > { %v1417_v26 = vpop.eup %1416  ;;  %1031 = vst [vmem:[%s1654_s29 + $0xa8] sm:$0xff] %v1415_v48 }
 0x17b   : > { %v1419_v49 = vpop.eup %1418  ;;  %1032 = vst [vmem:[%s1654_s29 + $0xb0] sm:$0xff] %v1417_v26 }
 0x17c   : > { %v1421_v50 = vpop.eup %1420  ;;  %1033 = vst [vmem:[%s1654_s29 + $0xb8] sm:$0xff] %v1419_v49 }
 0x17d   : > { %v1423_v51 = vpop.eup %1422  ;;  %1034 = vst [vmem:[%s1654_s29 + $0xc0] sm:$0xff] %v1421_v50 }
 0x17e   : > { %v1425_v52 = vpop.eup %1424  ;;  %1035 = vst [vmem:[%s1654_s29 + $0xc8] sm:$0xff] %v1423_v51 }
 0x17f   : > { %v1427_v53 = vpop.eup %1426  ;;  %1036 = vst [vmem:[%s1654_s29 + $0xd0] sm:$0xff] %v1425_v52 }
 0x180   : > { %v1429_v54 = vpop.eup %1428  ;;  %1037 = vst [vmem:[%s1654_s29 + $0xd8] sm:$0xff] %v1427_v53 }
 0x181   : > { %v1431_v55 = vpop.eup %1430  ;;  %1038 = vst [vmem:[%s1654_s29 + $0xe0] sm:$0xff] %v1429_v54 }
 0x182   : > { %v1433_v56 = vpop.eup %1432  ;;  %1039 = vst [vmem:[%s1654_s29 + $0xe8] sm:$0xff] %v1431_v55 }
 0x183   : > { %v1435_v57 = vpop.eup %1434  ;;  %1040 = vst [vmem:[%s1654_s29 + $0xf0] sm:$0xff] %v1433_v56 }
 0x184   : > { %1041 = vst [vmem:[%s1654_s29 + $0xf8] sm:$0xff] %v1435_v57 }
 0x185 PF: > { %s13_s18 = sadd.s32 1, %s1490_s18   ;;  %s1778_s12 = smov %s1470_s13 }
 0x186   : > { %p10_p0 = scmp.ge.s32.totalorder %s13_s18, 52   ;;  %s1779_s13 = smov %s1564_s25 }
 0x187   : > { %s1780_s14 = smov %s1482_s16  ;;  %s1781_s15 = smov %s1486_s17 }
 0x188   : > { %s1782_s16 = smov %s1785_s19  ;;  %s1783_s17 = smov %s1789_s20 }
 0x189   :  { %12 = sbr.rel (!%p10_p0) target bundleno = 4 (0x4), region = 122 }

</bundles_post_ra>
